<compile_context>
chip_gen: v6e
topology: v6e:2x2x1
jax: 0.10.0
libtpu: 0.0.40
codegen_flags: <defaults>
</compile_context>

<pallas_src>
import functools

import jax
import jax.numpy as jnp
from jax.experimental import pallas as pl
from jax.experimental.pallas import tpu as pltpu


# ----------------------- cv1: 1x1 Conv (+folded BN) + SiLU --------------------

def _pw_conv_bias_silu_kernel(x_ref, w_ref, b_ref, o_ref):
    # bf16 MXU matmul, f32 accumulate; BN scale already folded into w.
    y = jnp.dot(x_ref[...], w_ref[...], preferred_element_type=jnp.float32)
    y = y + b_ref[...]
    # SiLU(y) = y * sigmoid(y); exp + approx reciprocal both go to the EUP.
    s = y * pl.reciprocal(1.0 + jnp.exp(-y), approx=True)
    o_ref[...] = s.astype(o_ref.dtype)


def pointwise_conv_bias_silu(x2d, w, bias, *, tm=2048):
    """x2d: (M, Cin) bf16 channels-last pixels, w: (Cin, Cout) bf16, bias f32."""
    M, cin = x2d.shape
    cout = w.shape[1]
    tm = min(tm, M)                    # large M-tiles amortize per-step overhead
    grid = (pl.cdiv(M, tm),)           # ragged last tile handled by Pallas
    return pl.pallas_call(
        _pw_conv_bias_silu_kernel,
        out_shape=jax.ShapeDtypeStruct((M, cout), jnp.bfloat16),
        grid=grid,
        in_specs=[
            pl.BlockSpec((tm, cin), lambda i: (i, 0)),
            # Weight / bias never change across the grid: single VMEM buffer.
            pl.BlockSpec((cin, cout), lambda i: (0, 0),
                         pipeline_mode=pl.Buffered(1)),
            pl.BlockSpec((1, cout), lambda i: (0, 0),
                         pipeline_mode=pl.Buffered(1)),
        ],
        out_specs=pl.BlockSpec((tm, cout), lambda i: (i, 0)),
        compiler_params=pltpu.CompilerParams(
            dimension_semantics=("parallel",),
            vmem_limit_bytes=32 * 1024 * 1024),
    )(x2d, w, bias.reshape(1, cout))


# ------------- fused SPPF pool-chain + concat + cv2 (1x1 conv+BN+SiLU) --------

def _sppf_cv2_kernel(y_ref, w2_ref, b2_ref, o_ref, pad_ref, acc_ref, *,
                     k0, n_pools, H, W, lpad):
    p = k0 // 2
    c_idx = pl.program_id(1)
    neg = float(jnp.finfo(jnp.bfloat16).min)   # never wins vs post-SiLU values

    @pl.when(c_idx == 0)
    def _():
        # Zero the cv2 accumulator and fill the pool-padding border once per
        # image: the interior is fully overwritten before every read and the
        # border never is, so later channel blocks reuse the same -inf border.
        acc_ref[...] = jnp.zeros_like(acc_ref)
        pad_ref[...] = jnp.full(pad_ref.shape, neg, dtype=pad_ref.dtype)

    cblk = y_ref.shape[-1]

    def contrib(v, idx):
        # One pyramid level's share of cv2: (H*W, Cblk) @ (Cblk, c2), f32 acc.
        return jnp.dot(v.reshape(H * W, cblk), w2_ref[idx],
                       preferred_element_type=jnp.float32)

    def pool_once(v):
        # Stride-1 "same" max-pool, window k0, separable (height then width).
        # Interior store starts at a sublane-aligned width offset (lpad).
        pad_ref[pl.ds(p, H), pl.ds(lpad, W), :] = v
        # Height pass: shifted row bands read straight from the ref along the
        # leading (untiled) axis -> cheap slices, one-band live ranges, bf16.
        acc = pad_ref[pl.ds(0, H), :, :]
        for i in range(1, k0):
            acc = jnp.maximum(acc, pad_ref[pl.ds(i, H), :, :])
        # Width pass: sublane-offset shifts done on the 32-bit relayout path
        # (proven lowering); cast back to bf16 is exact for a max-pool.
        accf = acc.astype(jnp.float32)
        base = lpad - p
        out = accf[:, base:base + W, :]
        for j in range(1, k0):
            out = jnp.maximum(out, accf[:, base + j:base + j + W, :])
        return out.astype(jnp.bfloat16)

    # cv2(cat[x, p5, p9, p13]) == sum over levels (and channel blocks) of
    # block matmuls -> the concat tensor is never built.
    cur = y_ref[0]                               # (H, W, Cblk) bf16
    acc_ref[...] += contrib(cur, 0)
    for t in range(n_pools):
        cur = pool_once(cur)                     # chained k0-pool == k0 + t*(k0-1)
        acc_ref[...] += contrib(cur, t + 1)

    @pl.when(c_idx == pl.num_programs(1) - 1)
    def _():
        z = acc_ref[...] + b2_ref[...]
        z = z * pl.reciprocal(1.0 + jnp.exp(-z), approx=True)
        o_ref[0] = z.astype(o_ref.dtype)         # bf16, lane-dense store


def sppf_cv2(y, w2, b2, *, k0, n_pools, c_blk=128):
    """y: (N, H, W, C) bf16; w2: (n_pools+1, C, c2) bf16; b2: (c2,) f32."""
    N, H, W, C = y.shape
    cout = w2.shape[-1]
    p = k0 // 2
    lpad = ((p + 15) // 16) * 16     # aligned left pad for the interior store
    if C % c_blk != 0:               # toy / non-128-multiple configs: 1 block
        c_blk = C
    n_cblk = C // c_blk
    # TODO(synk): add a halo'd row-split grid axis for extra TC parallelism
    # when N == 1 on multi-TensorCore chips (v7x).
    kern = functools.partial(_sppf_cv2_kernel, k0=k0, n_pools=n_pools,
                             H=H, W=W, lpad=lpad)
    z = pl.pallas_call(
        kern,
        out_shape=jax.ShapeDtypeStruct((N, H * W, cout), jnp.bfloat16),
        grid=(N, n_cblk),            # batch parallel, channel-block reduction
        in_specs=[
            pl.BlockSpec((1, H, W, c_blk), lambda n, c: (n, 0, 0, c)),
            pl.BlockSpec((n_pools + 1, c_blk, cout), lambda n, c: (0, c, 0)),
            pl.BlockSpec((1, cout), lambda n, c: (0, 0),
                         pipeline_mode=pl.Buffered(1)),
        ],
        out_specs=pl.BlockSpec((1, H * W, cout), lambda n, c: (n, 0, 0)),
        scratch_shapes=[
            pltpu.VMEM((H + 2 * p, lpad + W + p, c_blk), jnp.bfloat16),
            pltpu.VMEM((H * W, cout), jnp.float32),
        ],
        compiler_params=pltpu.CompilerParams(
            dimension_semantics=("parallel", "arbitrary"),
            vmem_limit_bytes=32 * 1024 * 1024),
    )(y, w2, b2.reshape(1, cout))
    return z.reshape(N, H, W, cout)


# ----------------------------------- SPP --------------------------------------

def init_spp_params(key, c1, c2, k=(5, 9, 13)):
    c_ = c1 // 2
    n = len(k) + 1
    c_cat = c_ * n
    ks = jax.random.split(key, 10)

    def bn_fold(kg, kb, km, kv, c, eps=1e-5):
        gamma = 1.0 + 0.1 * jax.random.normal(kg, (c,), jnp.float32)
        beta = 0.1 * jax.random.normal(kb, (c,), jnp.float32)
        mean = 0.1 * jax.random.normal(km, (c,), jnp.float32)
        var = jnp.abs(jax.random.normal(kv, (c,), jnp.float32)) + 0.5
        scale = gamma / jnp.sqrt(var + eps)
        bias = beta - mean * scale
        return scale, bias

    # Conv weights stored as (Cin, Cout) == transposed PyTorch (Cout, Cin, 1, 1).
    w1 = 0.2 * jax.random.normal(ks[0], (c1, c_), jnp.float32)
    s1, b1 = bn_fold(ks[1], ks[2], ks[3], ks[4], c_)
    w2 = 0.2 * jax.random.normal(ks[5], (c_cat, c2), jnp.float32)
    s2, b2 = bn_fold(ks[6], ks[7], ks[8], ks[9], c2)

    # Fold BN scale into weight columns; store weights bf16, biases f32.
    w1f = (w1 * s1[None, :]).astype(jnp.bfloat16)
    w2f = (w2 * s2[None, :]).reshape(n, c_, c2).astype(jnp.bfloat16)
    return (w1f, b1, w2f, b2)


def spp_forward(x_nchw, params, k=(5, 9, 13)):
    k = tuple(k)
    k0 = k[0]
    # SPPF chain identity requires k = (k0, 2k0-1, 3k0-2, ...), true for (5,9,13).
    # TODO(synk): independent-pool fallback for non-chained k tuples.
    assert all(kk == k0 + i * (k0 - 1) for i, kk in enumerate(k)), (
        "spp_forward expects a chained pyramid, e.g. k=(5, 9, 13)")
    n_pools = len(k)

    N, C1, H, W = x_nchw.shape
    w1f, b1, w2f, b2 = params
    c_ = w1f.shape[1]
    # TODO(synk): pad c_ / c2 up to multiples of 128 for production configs so
    # the lane dimension and MXU K/N are fully utilized.

    # cv1 on channels-last pixels (single boundary transpose, no internal ones).
    x2d = jnp.transpose(x_nchw, (0, 2, 3, 1)).reshape(N * H * W, C1)
    y2d = pointwise_conv_bias_silu(x2d.astype(jnp.bfloat16), w1f, b1)  # (M, c_)
    y = y2d.reshape(N, H, W, c_)

    # fused: chained max-pools + implicit concat + cv2 (+BN+SiLU), bf16 out.
    z = sppf_cv2(y, w2f, b2, k0=k0, n_pools=n_pools)    # (N, H, W, c2) bf16
    return jnp.transpose(z, (0, 3, 1, 2))               # back to NCHW (bf16)


if __name__ == "__main__":
    key = jax.random.PRNGKey(0)
    kx, kp = jax.random.split(key)

    N, C1, H, W = 2, 4, 16, 16
    C2 = 8
    x = jax.random.normal(kx, (N, C1, H, W), jnp.float32)
    params = init_spp_params(kp, C1, C2)

    out = jax.jit(spp_forward)(x, params)
    jax.block_until_ready(out)
    assert out.shape == (N, C2, H, W), out.shape
    assert bool(jnp.all(jnp.isfinite(out.astype(jnp.float32))))
    print("KERNEL_OK")
</pallas_src>

<mosaic_0001>
module attributes {stable_mosaic.version = 11 : i64} {
  func.func @_pw_conv_bias_silu_kernel(%arg0: i32, %arg1: memref<512x4xbf16, #tpu.memory_space<vmem>>, %arg2: memref<4x2xbf16, #tpu.memory_space<vmem>>, %arg3: memref<1x2xf32, #tpu.memory_space<vmem>>, %arg4: memref<512x2xbf16, #tpu.memory_space<vmem>>) attributes {dimension_semantics = [#tpu.dimension_semantics<parallel>], iteration_bounds = array<i64: 1>, scalar_prefetch = 0 : i64, scratch_operands = 0 : i64, tpu.core_type = #tpu.core_type<tc>, window_params = [{transform_indices = @transform_0, window_bounds = array<i64: 512, 4>}, {pipeline_mode = #tpu.pipeline_mode<synchronous>, transform_indices = @transform_1, window_bounds = array<i64: 4, 2>}, {pipeline_mode = #tpu.pipeline_mode<synchronous>, transform_indices = @transform_2, window_bounds = array<i64: 1, 2>}, {transform_indices = @transform_3, window_bounds = array<i64: 512, 2>}]} {
    %c0 = arith.constant 0 : index
    %c0_0 = arith.constant 0 : index
    %0 = vector.load %arg1[%c0, %c0_0] : memref<512x4xbf16, #tpu.memory_space<vmem>>, vector<512x4xbf16>
    %c0_1 = arith.constant 0 : index
    %c0_2 = arith.constant 0 : index
    %1 = vector.load %arg2[%c0_1, %c0_2] : memref<4x2xbf16, #tpu.memory_space<vmem>>, vector<4x2xbf16>
    %cst = arith.constant dense<0.000000e+00> : vector<512x2xf32>
    %2 = tpu.matmul %0, %1, %cst {dimension_numbers = #tpu.dot_dimension_numbers<[1], [0], [0], [1], [0, 0, 1, 1], [], []>} : vector<512x4xbf16>, vector<4x2xbf16>, vector<512x2xf32> -> vector<512x2xf32>
    %c0_3 = arith.constant 0 : index
    %c0_4 = arith.constant 0 : index
    %3 = vector.load %arg3[%c0_3, %c0_4] : memref<1x2xf32, #tpu.memory_space<vmem>>, vector<1x2xf32>
    %4 = vector.broadcast %3 : vector<1x2xf32> to vector<512x2xf32>
    %5 = arith.addf %2, %4 : vector<512x2xf32>
    %cst_5 = arith.constant 0.000000e+00 : f32
    %6 = vector.broadcast %cst_5 : f32 to vector<512x2xf32>
    %7 = arith.subf %6, %5 : vector<512x2xf32>
    %8 = math.exp %7 : vector<512x2xf32>
    %cst_6 = arith.constant 1.000000e+00 : f32
    %9 = vector.broadcast %cst_6 : f32 to vector<512x2xf32>
    %10 = arith.addf %9, %8 : vector<512x2xf32>
    %11 = tpu.reciprocal %10 {approx = true} : vector<512x2xf32> -> vector<512x2xf32>
    %12 = arith.mulf %5, %11 : vector<512x2xf32>
    %13 = arith.truncf %12 : vector<512x2xf32> to vector<512x2xbf16>
    %c0_7 = arith.constant 0 : index
    %c0_8 = arith.constant 0 : index
    %14 = vector.load %arg4[%c0_7, %c0_8] : memref<512x2xbf16, #tpu.memory_space<vmem>>, vector<512x2xbf16>
    tpu.vector_store %arg4[%c0_7, %c0_8], %13 {strides = array<i32>} : memref<512x2xbf16, #tpu.memory_space<vmem>>, vector<512x2xbf16>,
    return
  }
  func.func @transform_0(%arg0: i32) -> (i32, i32) {
    %c0_i32 = arith.constant 0 : i32
    %c0_i32_0 = arith.constant 0 : i32
    return %arg0, %c0_i32 : i32, i32
  }
  func.func @transform_1(%arg0: i32) -> (i32, i32) {
    %c0_i32 = arith.constant 0 : i32
    %c0_i32_0 = arith.constant 0 : i32
    %c0_i32_1 = arith.constant 0 : i32
    return %c0_i32, %c0_i32_0 : i32, i32
  }
  func.func @transform_2(%arg0: i32) -> (i32, i32) {
    %c0_i32 = arith.constant 0 : i32
    %c0_i32_0 = arith.constant 0 : i32
    %c0_i32_1 = arith.constant 0 : i32
    return %c0_i32, %c0_i32_0 : i32, i32
  }
  func.func @transform_3(%arg0: i32) -> (i32, i32) {
    %c0_i32 = arith.constant 0 : i32
    %c0_i32_0 = arith.constant 0 : i32
    return %arg0, %c0_i32 : i32, i32
  }
}

module attributes {stable_mosaic.version = 11 : i64} {
  func.func @_sppf_cv2_kernel(%arg0: i32, %arg1: i32, %arg2: memref<1x16x16x2xbf16, #tpu.memory_space<vmem>>, %arg3: memref<4x2x8xbf16, #tpu.memory_space<vmem>>, %arg4: memref<1x8xf32, #tpu.memory_space<vmem>>, %arg5: memref<1x256x8xbf16, #tpu.memory_space<vmem>>, %arg6: memref<20x34x2xbf16, #tpu.memory_space<vmem>>, %arg7: memref<256x8xf32, #tpu.memory_space<vmem>>) attributes {dimension_semantics = [#tpu.dimension_semantics<parallel>, #tpu.dimension_semantics<arbitrary>], iteration_bounds = array<i64: 2, 1>, scalar_prefetch = 0 : i64, scratch_operands = 2 : i64, tpu.core_type = #tpu.core_type<tc>, window_params = [{transform_indices = @transform_0, window_bounds = array<i64: 1, 16, 16, 2>}, {transform_indices = @transform_1, window_bounds = array<i64: 4, 2, 8>}, {pipeline_mode = #tpu.pipeline_mode<synchronous>, transform_indices = @transform_2, window_bounds = array<i64: 1, 8>}, {transform_indices = @transform_3, window_bounds = array<i64: 1, 256, 8>}]} {
    %c0_i32 = arith.constant 0 : i32
    %0 = arith.cmpi eq, %arg1, %c0_i32 : i32
    %1 = arith.extui %0 : i1 to i32
    %c0_i32_0 = arith.constant 0 : i32
    %2 = arith.cmpi ne, %1, %c0_i32_0 : i32
    scf.if %2 {
      %cst_86 = arith.constant 0.000000e+00 : f32
      %99 = vector.broadcast %cst_86 : f32 to vector<256x8xf32>
      %c0_87 = arith.constant 0 : index
      %c0_88 = arith.constant 0 : index
      %100 = vector.load %arg7[%c0_87, %c0_88] : memref<256x8xf32, #tpu.memory_space<vmem>>, vector<256x8xf32>
      tpu.vector_store %arg7[%c0_87, %c0_88], %99 {strides = array<i32>} : memref<256x8xf32, #tpu.memory_space<vmem>>, vector<256x8xf32>,
      %cst_89 = arith.constant -3.389530e+38 : bf16
      %101 = vector.broadcast %cst_89 : bf16 to vector<20x34x2xbf16>
      %c0_90 = arith.constant 0 : index
      %c0_91 = arith.constant 0 : index
      %c0_92 = arith.constant 0 : index
      %102 = vector.load %arg6[%c0_90, %c0_91, %c0_92] : memref<20x34x2xbf16, #tpu.memory_space<vmem>>, vector<20x34x2xbf16>
      tpu.vector_store %arg6[%c0_90, %c0_91, %c0_92], %101 {strides = array<i32>} : memref<20x34x2xbf16, #tpu.memory_space<vmem>>, vector<20x34x2xbf16>,
    } else {
    }
    %c0 = arith.constant 0 : index
    %c0_1 = arith.constant 0 : index
    %c0_2 = arith.constant 0 : index
    %c0_3 = arith.constant 0 : index
    %3 = vector.load %arg2[%c0, %c0_1, %c0_2, %c0_3] : memref<1x16x16x2xbf16, #tpu.memory_space<vmem>>, vector<1x16x16x2xbf16>
    %4 = vector.shape_cast %3 : vector<1x16x16x2xbf16> to vector<16x16x2xbf16>
    %c0_4 = arith.constant 0 : index
    %c0_5 = arith.constant 0 : index
    %5 = vector.load %arg7[%c0_4, %c0_5] : memref<256x8xf32, #tpu.memory_space<vmem>>, vector<256x8xf32>
    %6 = vector.shape_cast %4 : vector<16x16x2xbf16> to vector<256x2xbf16>
    %c0_6 = arith.constant 0 : index
    %c0_7 = arith.constant 0 : index
    %c0_8 = arith.constant 0 : index
    %7 = vector.load %arg3[%c0_6, %c0_7, %c0_8] : memref<4x2x8xbf16, #tpu.memory_space<vmem>>, vector<1x2x8xbf16>
    %8 = vector.shape_cast %7 : vector<1x2x8xbf16> to vector<2x8xbf16>
    %cst = arith.constant dense<0.000000e+00> : vector<256x8xf32>
    %9 = tpu.matmul %6, %8, %cst {dimension_numbers = #tpu.dot_dimension_numbers<[1], [0], [0], [1], [0, 0, 1, 1], [], []>} : vector<256x2xbf16>, vector<2x8xbf16>, vector<256x8xf32> -> vector<256x8xf32>
    %10 = arith.addf %5, %9 : vector<256x8xf32>
    %c0_9 = arith.constant 0 : index
    %c0_10 = arith.constant 0 : index
    %11 = vector.load %arg7[%c0_9, %c0_10] : memref<256x8xf32, #tpu.memory_space<vmem>>, vector<256x8xf32>
    tpu.vector_store %arg7[%c0_9, %c0_10], %10 {strides = array<i32>} : memref<256x8xf32, #tpu.memory_space<vmem>>, vector<256x8xf32>,
    %c2 = arith.constant 2 : index
    %c16 = arith.constant 16 : index
    %c0_11 = arith.constant 0 : index
    %12 = vector.load %arg6[%c2, %c16, %c0_11] : memref<20x34x2xbf16, #tpu.memory_space<vmem>>, vector<16x16x2xbf16>
    tpu.vector_store %arg6[%c2, %c16, %c0_11], %4 {strides = array<i32>} : memref<20x34x2xbf16, #tpu.memory_space<vmem>>, vector<16x16x2xbf16>,
    %c0_12 = arith.constant 0 : index
    %c0_13 = arith.constant 0 : index
    %c0_14 = arith.constant 0 : index
    %13 = vector.load %arg6[%c0_12, %c0_13, %c0_14] : memref<20x34x2xbf16, #tpu.memory_space<vmem>>, vector<16x34x2xbf16>
    %c1 = arith.constant 1 : index
    %c0_15 = arith.constant 0 : index
    %c0_16 = arith.constant 0 : index
    %14 = vector.load %arg6[%c1, %c0_15, %c0_16] : memref<20x34x2xbf16, #tpu.memory_space<vmem>>, vector<16x34x2xbf16>
    %15 = arith.maximumf %13, %14 : vector<16x34x2xbf16>
    %c2_17 = arith.constant 2 : index
    %c0_18 = arith.constant 0 : index
    %c0_19 = arith.constant 0 : index
    %16 = vector.load %arg6[%c2_17, %c0_18, %c0_19] : memref<20x34x2xbf16, #tpu.memory_space<vmem>>, vector<16x34x2xbf16>
    %17 = arith.maximumf %15, %16 : vector<16x34x2xbf16>
    %c3 = arith.constant 3 : index
    %c0_20 = arith.constant 0 : index
    %c0_21 = arith.constant 0 : index
    %18 = vector.load %arg6[%c3, %c0_20, %c0_21] : memref<20x34x2xbf16, #tpu.memory_space<vmem>>, vector<16x34x2xbf16>
    %19 = arith.maximumf %17, %18 : vector<16x34x2xbf16>
    %c4 = arith.constant 4 : index
    %c0_22 = arith.constant 0 : index
    %c0_23 = arith.constant 0 : index
    %20 = vector.load %arg6[%c4, %c0_22, %c0_23] : memref<20x34x2xbf16, #tpu.memory_space<vmem>>, vector<16x34x2xbf16>
    %21 = arith.maximumf %19, %20 : vector<16x34x2xbf16>
    %22 = arith.extf %21 : vector<16x34x2xbf16> to vector<16x34x2xf32>
    %23 = vector.extract_strided_slice %22 {offsets = [0, 14, 0], sizes = [16, 16, 2], strides = [1, 1, 1]} : vector<16x34x2xf32> to vector<16x16x2xf32>
    %24 = vector.extract_strided_slice %22 {offsets = [0, 15, 0], sizes = [16, 16, 2], strides = [1, 1, 1]} : vector<16x34x2xf32> to vector<16x16x2xf32>
    %25 = arith.maximumf %23, %24 : vector<16x16x2xf32>
    %26 = vector.extract_strided_slice %22 {offsets = [0, 16, 0], sizes = [16, 16, 2], strides = [1, 1, 1]} : vector<16x34x2xf32> to vector<16x16x2xf32>
    %27 = arith.maximumf %25, %26 : vector<16x16x2xf32>
    %28 = vector.extract_strided_slice %22 {offsets = [0, 17, 0], sizes = [16, 16, 2], strides = [1, 1, 1]} : vector<16x34x2xf32> to vector<16x16x2xf32>
    %29 = arith.maximumf %27, %28 : vector<16x16x2xf32>
    %30 = vector.extract_strided_slice %22 {offsets = [0, 18, 0], sizes = [16, 16, 2], strides = [1, 1, 1]} : vector<16x34x2xf32> to vector<16x16x2xf32>
    %31 = arith.maximumf %29, %30 : vector<16x16x2xf32>
    %32 = arith.truncf %31 : vector<16x16x2xf32> to vector<16x16x2xbf16>
    %c0_24 = arith.constant 0 : index
    %c0_25 = arith.constant 0 : index
    %33 = vector.load %arg7[%c0_24, %c0_25] : memref<256x8xf32, #tpu.memory_space<vmem>>, vector<256x8xf32>
    %34 = vector.shape_cast %32 : vector<16x16x2xbf16> to vector<256x2xbf16>
    %c1_26 = arith.constant 1 : index
    %c0_27 = arith.constant 0 : index
    %c0_28 = arith.constant 0 : index
    %35 = vector.load %arg3[%c1_26, %c0_27, %c0_28] : memref<4x2x8xbf16, #tpu.memory_space<vmem>>, vector<1x2x8xbf16>
    %36 = vector.shape_cast %35 : vector<1x2x8xbf16> to vector<2x8xbf16>
    %cst_29 = arith.constant dense<0.000000e+00> : vector<256x8xf32>
    %37 = tpu.matmul %34, %36, %cst_29 {dimension_numbers = #tpu.dot_dimension_numbers<[1], [0], [0], [1], [0, 0, 1, 1], [], []>} : vector<256x2xbf16>, vector<2x8xbf16>, vector<256x8xf32> -> vector<256x8xf32>
    %38 = arith.addf %33, %37 : vector<256x8xf32>
    %c0_30 = arith.constant 0 : index
    %c0_31 = arith.constant 0 : index
    %39 = vector.load %arg7[%c0_30, %c0_31] : memref<256x8xf32, #tpu.memory_space<vmem>>, vector<256x8xf32>
    tpu.vector_store %arg7[%c0_30, %c0_31], %38 {strides = array<i32>} : memref<256x8xf32, #tpu.memory_space<vmem>>, vector<256x8xf32>,
    %c2_32 = arith.constant 2 : index
    %c16_33 = arith.constant 16 : index
    %c0_34 = arith.constant 0 : index
    %40 = vector.load %arg6[%c2_32, %c16_33, %c0_34] : memref<20x34x2xbf16, #tpu.memory_space<vmem>>, vector<16x16x2xbf16>
    tpu.vector_store %arg6[%c2_32, %c16_33, %c0_34], %32 {strides = array<i32>} : memref<20x34x2xbf16, #tpu.memory_space<vmem>>, vector<16x16x2xbf16>,
    %c0_35 = arith.constant 0 : index
    %c0_36 = arith.constant 0 : index
    %c0_37 = arith.constant 0 : index
    %41 = vector.load %arg6[%c0_35, %c0_36, %c0_37] : memref<20x34x2xbf16, #tpu.memory_space<vmem>>, vector<16x34x2xbf16>
    %c1_38 = arith.constant 1 : index
    %c0_39 = arith.constant 0 : index
    %c0_40 = arith.constant 0 : index
    %42 = vector.load %arg6[%c1_38, %c0_39, %c0_40] : memref<20x34x2xbf16, #tpu.memory_space<vmem>>, vector<16x34x2xbf16>
    %43 = arith.maximumf %41, %42 : vector<16x34x2xbf16>
    %c2_41 = arith.constant 2 : index
    %c0_42 = arith.constant 0 : index
    %c0_43 = arith.constant 0 : index
    %44 = vector.load %arg6[%c2_41, %c0_42, %c0_43] : memref<20x34x2xbf16, #tpu.memory_space<vmem>>, vector<16x34x2xbf16>
    %45 = arith.maximumf %43, %44 : vector<16x34x2xbf16>
    %c3_44 = arith.constant 3 : index
    %c0_45 = arith.constant 0 : index
    %c0_46 = arith.constant 0 : index
    %46 = vector.load %arg6[%c3_44, %c0_45, %c0_46] : memref<20x34x2xbf16, #tpu.memory_space<vmem>>, vector<16x34x2xbf16>
    %47 = arith.maximumf %45, %46 : vector<16x34x2xbf16>
    %c4_47 = arith.constant 4 : index
    %c0_48 = arith.constant 0 : index
    %c0_49 = arith.constant 0 : index
    %48 = vector.load %arg6[%c4_47, %c0_48, %c0_49] : memref<20x34x2xbf16, #tpu.memory_space<vmem>>, vector<16x34x2xbf16>
    %49 = arith.maximumf %47, %48 : vector<16x34x2xbf16>
    %50 = arith.extf %49 : vector<16x34x2xbf16> to vector<16x34x2xf32>
    %51 = vector.extract_strided_slice %50 {offsets = [0, 14, 0], sizes = [16, 16, 2], strides = [1, 1, 1]} : vector<16x34x2xf32> to vector<16x16x2xf32>
    %52 = vector.extract_strided_slice %50 {offsets = [0, 15, 0], sizes = [16, 16, 2], strides = [1, 1, 1]} : vector<16x34x2xf32> to vector<16x16x2xf32>
    %53 = arith.maximumf %51, %52 : vector<16x16x2xf32>
    %54 = vector.extract_strided_slice %50 {offsets = [0, 16, 0], sizes = [16, 16, 2], strides = [1, 1, 1]} : vector<16x34x2xf32> to vector<16x16x2xf32>
    %55 = arith.maximumf %53, %54 : vector<16x16x2xf32>
    %56 = vector.extract_strided_slice %50 {offsets = [0, 17, 0], sizes = [16, 16, 2], strides = [1, 1, 1]} : vector<16x34x2xf32> to vector<16x16x2xf32>
    %57 = arith.maximumf %55, %56 : vector<16x16x2xf32>
    %58 = vector.extract_strided_slice %50 {offsets = [0, 18, 0], sizes = [16, 16, 2], strides = [1, 1, 1]} : vector<16x34x2xf32> to vector<16x16x2xf32>
    %59 = arith.maximumf %57, %58 : vector<16x16x2xf32>
    %60 = arith.truncf %59 : vector<16x16x2xf32> to vector<16x16x2xbf16>
    %c0_50 = arith.constant 0 : index
    %c0_51 = arith.constant 0 : index
    %61 = vector.load %arg7[%c0_50, %c0_51] : memref<256x8xf32, #tpu.memory_space<vmem>>, vector<256x8xf32>
    %62 = vector.shape_cast %60 : vector<16x16x2xbf16> to vector<256x2xbf16>
    %c2_52 = arith.constant 2 : index
    %c0_53 = arith.constant 0 : index
    %c0_54 = arith.constant 0 : index
    %63 = vector.load %arg3[%c2_52, %c0_53, %c0_54] : memref<4x2x8xbf16, #tpu.memory_space<vmem>>, vector<1x2x8xbf16>
    %64 = vector.shape_cast %63 : vector<1x2x8xbf16> to vector<2x8xbf16>
    %cst_55 = arith.constant dense<0.000000e+00> : vector<256x8xf32>
    %65 = tpu.matmul %62, %64, %cst_55 {dimension_numbers = #tpu.dot_dimension_numbers<[1], [0], [0], [1], [0, 0, 1, 1], [], []>} : vector<256x2xbf16>, vector<2x8xbf16>, vector<256x8xf32> -> vector<256x8xf32>
    %66 = arith.addf %61, %65 : vector<256x8xf32>
    %c0_56 = arith.constant 0 : index
    %c0_57 = arith.constant 0 : index
    %67 = vector.load %arg7[%c0_56, %c0_57] : memref<256x8xf32, #tpu.memory_space<vmem>>, vector<256x8xf32>
    tpu.vector_store %arg7[%c0_56, %c0_57], %66 {strides = array<i32>} : memref<256x8xf32, #tpu.memory_space<vmem>>, vector<256x8xf32>,
    %c2_58 = arith.constant 2 : index
    %c16_59 = arith.constant 16 : index
    %c0_60 = arith.constant 0 : index
    %68 = vector.load %arg6[%c2_58, %c16_59, %c0_60] : memref<20x34x2xbf16, #tpu.memory_space<vmem>>, vector<16x16x2xbf16>
    tpu.vector_store %arg6[%c2_58, %c16_59, %c0_60], %60 {strides = array<i32>} : memref<20x34x2xbf16, #tpu.memory_space<vmem>>, vector<16x16x2xbf16>,
    %c0_61 = arith.constant 0 : index
    %c0_62 = arith.constant 0 : index
    %c0_63 = arith.constant 0 : index
    %69 = vector.load %arg6[%c0_61, %c0_62, %c0_63] : memref<20x34x2xbf16, #tpu.memory_space<vmem>>, vector<16x34x2xbf16>
    %c1_64 = arith.constant 1 : index
    %c0_65 = arith.constant 0 : index
    %c0_66 = arith.constant 0 : index
    %70 = vector.load %arg6[%c1_64, %c0_65, %c0_66] : memref<20x34x2xbf16, #tpu.memory_space<vmem>>, vector<16x34x2xbf16>
    %71 = arith.maximumf %69, %70 : vector<16x34x2xbf16>
    %c2_67 = arith.constant 2 : index
    %c0_68 = arith.constant 0 : index
    %c0_69 = arith.constant 0 : index
    %72 = vector.load %arg6[%c2_67, %c0_68, %c0_69] : memref<20x34x2xbf16, #tpu.memory_space<vmem>>, vector<16x34x2xbf16>
    %73 = arith.maximumf %71, %72 : vector<16x34x2xbf16>
    %c3_70 = arith.constant 3 : index
    %c0_71 = arith.constant 0 : index
    %c0_72 = arith.constant 0 : index
    %74 = vector.load %arg6[%c3_70, %c0_71, %c0_72] : memref<20x34x2xbf16, #tpu.memory_space<vmem>>, vector<16x34x2xbf16>
    %75 = arith.maximumf %73, %74 : vector<16x34x2xbf16>
    %c4_73 = arith.constant 4 : index
    %c0_74 = arith.constant 0 : index
    %c0_75 = arith.constant 0 : index
    %76 = vector.load %arg6[%c4_73, %c0_74, %c0_75] : memref<20x34x2xbf16, #tpu.memory_space<vmem>>, vector<16x34x2xbf16>
    %77 = arith.maximumf %75, %76 : vector<16x34x2xbf16>
    %78 = arith.extf %77 : vector<16x34x2xbf16> to vector<16x34x2xf32>
    %79 = vector.extract_strided_slice %78 {offsets = [0, 14, 0], sizes = [16, 16, 2], strides = [1, 1, 1]} : vector<16x34x2xf32> to vector<16x16x2xf32>
    %80 = vector.extract_strided_slice %78 {offsets = [0, 15, 0], sizes = [16, 16, 2], strides = [1, 1, 1]} : vector<16x34x2xf32> to vector<16x16x2xf32>
    %81 = arith.maximumf %79, %80 : vector<16x16x2xf32>
    %82 = vector.extract_strided_slice %78 {offsets = [0, 16, 0], sizes = [16, 16, 2], strides = [1, 1, 1]} : vector<16x34x2xf32> to vector<16x16x2xf32>
    %83 = arith.maximumf %81, %82 : vector<16x16x2xf32>
    %84 = vector.extract_strided_slice %78 {offsets = [0, 17, 0], sizes = [16, 16, 2], strides = [1, 1, 1]} : vector<16x34x2xf32> to vector<16x16x2xf32>
    %85 = arith.maximumf %83, %84 : vector<16x16x2xf32>
    %86 = vector.extract_strided_slice %78 {offsets = [0, 18, 0], sizes = [16, 16, 2], strides = [1, 1, 1]} : vector<16x34x2xf32> to vector<16x16x2xf32>
    %87 = arith.maximumf %85, %86 : vector<16x16x2xf32>
    %88 = arith.truncf %87 : vector<16x16x2xf32> to vector<16x16x2xbf16>
    %c0_76 = arith.constant 0 : index
    %c0_77 = arith.constant 0 : index
    %89 = vector.load %arg7[%c0_76, %c0_77] : memref<256x8xf32, #tpu.memory_space<vmem>>, vector<256x8xf32>
    %90 = vector.shape_cast %88 : vector<16x16x2xbf16> to vector<256x2xbf16>
    %c3_78 = arith.constant 3 : index
    %c0_79 = arith.constant 0 : index
    %c0_80 = arith.constant 0 : index
    %91 = vector.load %arg3[%c3_78, %c0_79, %c0_80] : memref<4x2x8xbf16, #tpu.memory_space<vmem>>, vector<1x2x8xbf16>
    %92 = vector.shape_cast %91 : vector<1x2x8xbf16> to vector<2x8xbf16>
    %cst_81 = arith.constant dense<0.000000e+00> : vector<256x8xf32>
    %93 = tpu.matmul %90, %92, %cst_81 {dimension_numbers = #tpu.dot_dimension_numbers<[1], [0], [0], [1], [0, 0, 1, 1], [], []>} : vector<256x2xbf16>, vector<2x8xbf16>, vector<256x8xf32> -> vector<256x8xf32>
    %94 = arith.addf %89, %93 : vector<256x8xf32>
    %c0_82 = arith.constant 0 : index
    %c0_83 = arith.constant 0 : index
    %95 = vector.load %arg7[%c0_82, %c0_83] : memref<256x8xf32, #tpu.memory_space<vmem>>, vector<256x8xf32>
    tpu.vector_store %arg7[%c0_82, %c0_83], %94 {strides = array<i32>} : memref<256x8xf32, #tpu.memory_space<vmem>>, vector<256x8xf32>,
    %c0_i32_84 = arith.constant 0 : i32
    %96 = arith.cmpi eq, %arg1, %c0_i32_84 : i32
    %97 = arith.extui %96 : i1 to i32
    %c0_i32_85 = arith.constant 0 : i32
    %98 = arith.cmpi ne, %97, %c0_i32_85 : i32
    scf.if %98 {
      %c0_86 = arith.constant 0 : index
      %c0_87 = arith.constant 0 : index
      %99 = vector.load %arg7[%c0_86, %c0_87] : memref<256x8xf32, #tpu.memory_space<vmem>>, vector<256x8xf32>
      %c0_88 = arith.constant 0 : index
      %c0_89 = arith.constant 0 : index
      %100 = vector.load %arg4[%c0_88, %c0_89] : memref<1x8xf32, #tpu.memory_space<vmem>>, vector<1x8xf32>
      %101 = vector.broadcast %100 : vector<1x8xf32> to vector<256x8xf32>
      %102 = arith.addf %99, %101 : vector<256x8xf32>
      %cst_90 = arith.constant 0.000000e+00 : f32
      %103 = vector.broadcast %cst_90 : f32 to vector<256x8xf32>
      %104 = arith.subf %103, %102 : vector<256x8xf32>
      %105 = math.exp %104 : vector<256x8xf32>
      %cst_91 = arith.constant 1.000000e+00 : f32
      %106 = vector.broadcast %cst_91 : f32 to vector<256x8xf32>
      %107 = arith.addf %106, %105 : vector<256x8xf32>
      %108 = tpu.reciprocal %107 {approx = true} : vector<256x8xf32> -> vector<256x8xf32>
      %109 = arith.mulf %102, %108 : vector<256x8xf32>
      %110 = arith.truncf %109 : vector<256x8xf32> to vector<256x8xbf16>
      %c0_92 = arith.constant 0 : index
      %c0_93 = arith.constant 0 : index
      %c0_94 = arith.constant 0 : index
      %111 = vector.load %arg5[%c0_92, %c0_93, %c0_94] : memref<1x256x8xbf16, #tpu.memory_space<vmem>>, vector<1x256x8xbf16>
      %112 = vector.shape_cast %111 : vector<1x256x8xbf16> to vector<256x8xbf16>
      %113 = vector.shape_cast %110 : vector<256x8xbf16> to vector<1x256x8xbf16>
      tpu.vector_store %arg5[%c0_92, %c0_93, %c0_94], %113 {strides = array<i32>} : memref<1x256x8xbf16, #tpu.memory_space<vmem>>, vector<1x256x8xbf16>,
    } else {
    }
    return
  }
  func.func @transform_0(%arg0: i32, %arg1: i32) -> (i32, i32, i32, i32) {
    %c0_i32 = arith.constant 0 : i32
    %c0_i32_0 = arith.constant 0 : i32
    %c0_i32_1 = arith.constant 0 : i32
    return %arg0, %c0_i32, %c0_i32_0, %arg1 : i32, i32, i32, i32
  }
  func.func @transform_1(%arg0: i32, %arg1: i32) -> (i32, i32, i32) {
    %c0_i32 = arith.constant 0 : i32
    %c0_i32_0 = arith.constant 0 : i32
    %c0_i32_1 = arith.constant 0 : i32
    return %c0_i32, %arg1, %c0_i32_0 : i32, i32, i32
  }
  func.func @transform_2(%arg0: i32, %arg1: i32) -> (i32, i32) {
    %c0_i32 = arith.constant 0 : i32
    %c0_i32_0 = arith.constant 0 : i32
    %c0_i32_1 = arith.constant 0 : i32
    return %c0_i32, %c0_i32_0 : i32, i32
  }
  func.func @transform_3(%arg0: i32, %arg1: i32) -> (i32, i32, i32) {
    %c0_i32 = arith.constant 0 : i32
    %c0_i32_0 = arith.constant 0 : i32
    %c0_i32_1 = arith.constant 0 : i32
    return %arg0, %c0_i32, %c0_i32_0 : i32, i32, i32
  }
}

</mosaic_0001>

<bundles_post_ra>
// kernel: spp_forward.2
= control target key start
LH: loop header
LB: loop body
LE: loop exit
PB: predicated region body
PF: predicated region fallthrough
CT: control target
= control target key end

     0   :  { %vm344_vm0 = vcmask 1041408   ;;  %vm247_vm1 = vcmask 31744   ;;  %vm1277_vm2 = vcmask 11264   ;;  %s2743_s1 = inlined_call_operand.vmem [shape: bf16[4,2], index: 1, kind: input, shape index: {}]   ;;  %s2744_s0 = inlined_call_operand.vmem [shape: bf16[512,4], index: 0, kind: input, shape index: {}]   ;;  %s2745_s2 = inlined_call_operand.vmem [shape: f32[1,2], index: 2, kind: input, shape index: {}]   ;;  %s2746_s3 = inlined_call_operand.vmem [shape: bf16[512,2], index: 3, kind: output, shape index: {}]  }
   0x1   :  { %v79_v0 = vld [vmem:[%s2743_s1] sm:$0x3]  ;;  %v1644_v4 = vld [vmem:[%s2744_s0 + $0x8] sm:$0xff]   ;;  %v1646_v6 = vld [vmem:[%s2744_s0 + $0x10] sm:$0xff]  }
   0x2   :  { %1640 = vmatprep.subr.msk.bf16.mxu0 %vm344_vm0, %v79_v0  ;;  %1641 = vmatprep.subr.msk.bf16.mxu1 %vm344_vm0, %v79_v0  ;;  %v346_v1 = vsel %vm344_vm0, %v79_v0, 0  ;;  %v1642_v2 = vld [vmem:[%s2744_s0] sm:$0xff]   ;;  %v1645_v5 = vld [vmem:[%s2744_s0 + $0x88] sm:$0xff]   ;;  %v1647_v7 = vld [vmem:[%s2744_s0 + $0x90] sm:$0xff]  }
   0x3   :  { %1573 = vmatpush3.bf16.msra.mxu0 %v346_v1  ;;  %1639 = vmatpush3.bf16.msra.mxu1 %v346_v1  ;;  %v1643_v3 = vld [vmem:[%s2744_s0 + $0x80] sm:$0xff]   ;;  %v1648_v8 = vld [vmem:[%s2744_s0 + $0x18] sm:$0xff]   ;;  %v1652_v12 = vld [vmem:[%s2744_s0 + $0x28] sm:$0xff]  }
   0x4   :  { %1574 = vmatprep.mubr.msk.bf16.mxu0 %vm247_vm1, %v1642_v2  ;;  %1606 = vmatprep.mubr.msk.bf16.mxu1 %vm247_vm1, %v1643_v3  ;;  %v1649_v9 = vld [vmem:[%s2744_s0 + $0x98] sm:$0xff]   ;;  %v1650_v10 = vld [vmem:[%s2744_s0 + $0x20] sm:$0xff]   ;;  %v1653_v13 = vld [vmem:[%s2744_s0 + $0xa8] sm:$0xff]  }
   0x5   :  { %v1651_v11 = vld [vmem:[%s2744_s0 + $0xa0] sm:$0xff]   ;;  %v1654_v14 = vld [vmem:[%s2744_s0 + $0x30] sm:$0xff]   ;;  %v1656_v16 = vld [vmem:[%s2744_s0 + $0x38] sm:$0xff]  }
   0x6   :  { %1575 = vmatmul.mubr.msk.bf16.vlgmr.msra.gmra.mxu0 %vm247_vm1, %v1644_v4  ;;  %1607 = vmatmul.mubr.msk.bf16.vlgmr.msra.gmra.mxu1 %vm247_vm1, %v1645_v5  ;;  %v1655_v15 = vld [vmem:[%s2744_s0 + $0xb0] sm:$0xff]   ;;  %v1657_v17 = vld [vmem:[%s2744_s0 + $0xb8] sm:$0xff]   ;;  %v1658_v18 = vld [vmem:[%s2744_s0 + $0x40] sm:$0xff]  }
   0x7   :  { %1578 = vmatprep.mubr.msk.bf16.mxu0 %vm247_vm1, %v1646_v6  ;;  %1610 = vmatprep.mubr.msk.bf16.mxu1 %vm247_vm1, %v1647_v7  ;;  %v1659_v19 = vld [vmem:[%s2744_s0 + $0xc0] sm:$0xff]   ;;  %v1660_v20 = vld [vmem:[%s2744_s0 + $0x48] sm:$0xff]   ;;  %v1662_v22 = vld [vmem:[%s2744_s0 + $0x50] sm:$0xff]  }
   0x8   :  { %v1661_v21 = vld [vmem:[%s2744_s0 + $0xc8] sm:$0xff]   ;;  %v1663_v23 = vld [vmem:[%s2744_s0 + $0xd0] sm:$0xff]   ;;  %v1664_v24 = vld [vmem:[%s2744_s0 + $0x58] sm:$0xff]  }
   0x9   :  { %v1665_v25 = vld [vmem:[%s2744_s0 + $0xd8] sm:$0xff]   ;;  %v1666_v26 = vld [vmem:[%s2744_s0 + $0x60] sm:$0xff]   ;;  %v1668_v28 = vld [vmem:[%s2744_s0 + $0x68] sm:$0xff]  }
   0xa   :  { %v1667_v27 = vld [vmem:[%s2744_s0 + $0xe0] sm:$0xff]   ;;  %v1669_v29 = vld [vmem:[%s2744_s0 + $0xe8] sm:$0xff]   ;;  %v1670_v30 = vld [vmem:[%s2744_s0 + $0x70] sm:$0xff]  }
   0xb   :  { %v1671_v31 = vld [vmem:[%s2744_s0 + $0xf0] sm:$0xff]   ;;  %v1672_v32 = vld [vmem:[%s2744_s0 + $0x78] sm:$0xff]   ;;  %v2085_v34 = vld [vmem:[%s2745_s2] ss:$0 sm:$0xff] }
   0xc   :  { %v1673_v33 = vld [vmem:[%s2744_s0 + $0xf8] sm:$0xff]  }
   0xe   :  { %1579 = vmatmul.mubr.msk.bf16.gmra.mxu0 %vm247_vm1, %v1648_v8  ;;  %1611 = vmatmul.mubr.msk.bf16.gmra.mxu1 %vm247_vm1, %v1649_v9 }
   0xf   :  { %1582 = vmatprep.mubr.msk.bf16.mxu0 %vm247_vm1, %v1650_v10  ;;  %1614 = vmatprep.mubr.msk.bf16.mxu1 %vm247_vm1, %v1651_v11 }
  0x16   :  { %1583 = vmatmul.mubr.msk.bf16.gmra.mxu0 %vm247_vm1, %v1652_v12  ;;  %1615 = vmatmul.mubr.msk.bf16.gmra.mxu1 %vm247_vm1, %v1653_v13 }
  0x17   :  { %1586 = vmatprep.mubr.msk.bf16.mxu0 %vm247_vm1, %v1654_v14  ;;  %1618 = vmatprep.mubr.msk.bf16.mxu1 %vm247_vm1, %v1655_v15 }
  0x1e   :  { %1587 = vmatmul.mubr.msk.bf16.gmra.mxu0 %vm247_vm1, %v1656_v16  ;;  %1619 = vmatmul.mubr.msk.bf16.gmra.mxu1 %vm247_vm1, %v1657_v17 }
  0x1f   :  { %1590 = vmatprep.mubr.msk.bf16.mxu0 %vm247_vm1, %v1658_v18  ;;  %1622 = vmatprep.mubr.msk.bf16.mxu1 %vm247_vm1, %v1659_v19 }
  0x26   :  { %1591 = vmatmul.mubr.msk.bf16.gmra.mxu0 %vm247_vm1, %v1660_v20  ;;  %1623 = vmatmul.mubr.msk.bf16.gmra.mxu1 %vm247_vm1, %v1661_v21 }
  0x27   :  { %1594 = vmatprep.mubr.msk.bf16.mxu0 %vm247_vm1, %v1662_v22  ;;  %1626 = vmatprep.mubr.msk.bf16.mxu1 %vm247_vm1, %v1663_v23 }
  0x2e   :  { %1595 = vmatmul.mubr.msk.bf16.gmra.mxu0 %vm247_vm1, %v1664_v24  ;;  %1627 = vmatmul.mubr.msk.bf16.gmra.mxu1 %vm247_vm1, %v1665_v25 }
  0x2f   :  { %1598 = vmatprep.mubr.msk.bf16.mxu0 %vm247_vm1, %v1666_v26  ;;  %1630 = vmatprep.mubr.msk.bf16.mxu1 %vm247_vm1, %v1667_v27 }
  0x36   :  { %1599 = vmatmul.mubr.msk.bf16.gmra.mxu0 %vm247_vm1, %v1668_v28  ;;  %1631 = vmatmul.mubr.msk.bf16.gmra.mxu1 %vm247_vm1, %v1669_v29 }
  0x37   :  { %1602 = vmatprep.mubr.msk.bf16.mxu0 %vm247_vm1, %v1670_v30  ;;  %1634 = vmatprep.mubr.msk.bf16.mxu1 %vm247_vm1, %v1671_v31 }
  0x3e   :  { %1603 = vmatmul.mubr.msk.bf16.gmra.mxu0 %vm247_vm1, %v1672_v32  ;;  %1635 = vmatmul.mubr.msk.bf16.gmra.mxu1 %vm247_vm1, %v1673_v33 }
  0xc6   :  { %v1576_v35 = vpop.f32.mrf.mxu0  ;;  %v1608_v37 = vpop.f32.mrf.mxu1 }
  0xc7   :  { %v2088_v36 = vadd.f32 %v1576_v35, %v2085_v34  ;;  %v2091_v38 = vadd.f32 %v1608_v37, %v2085_v34 }
  0xc8   :  { %v382_v39 = vpop.f32.mrf.mxu0  ;;  %v510_v42 = vpop.f32.mrf.mxu1 }
  0xc9   :  { %v639_v40 = vsub.f32 0.0, %v2088_v36  ;;  %v2095_v41 = vadd.f32 %v2085_v34, %v382_v39  ;;  %v671_v43 = vsub.f32 0.0, %v2091_v38  ;;  %v2099_v44 = vadd.f32 %v2085_v34, %v510_v42 }
  0xca   :  { %v1577_v45 = vpop.f32.mrf.mxu0  ;;  %v1609_v49 = vpop.f32.mrf.mxu1 }
  0xcb   :  { %v705_v46 = vmul.f32 1.442695, %v639_v40  ;;  %v637_v47 = vsub.f32 0.0, %v2095_v41  ;;  %v2103_v48 = vadd.f32 %v1577_v45, %v2085_v34  ;;  %v769_v50 = vmul.f32 1.442695, %v671_v43 }
  0xcc   :  { %v669_v51 = vsub.f32 0.0, %v2099_v44  ;;  %v2107_v52 = vadd.f32 %v1609_v49, %v2085_v34  ;;  %v385_v53 = vpop.f32.mrf.mxu0  ;;  %v513_v57 = vpop.f32.mrf.mxu1 }
  0xcd   :  { %1674 = vpow2.f32 %v705_v46  ;;  %v701_v54 = vmul.f32 1.442695, %v637_v47  ;;  %v640_v55 = vsub.f32 0.0, %v2103_v48  ;;  %v2111_v56 = vadd.f32 %v2085_v34, %v385_v53 }
  0xce   :  { %1676 = vpow2.f32 %v769_v50  ;;  %v765_v58 = vmul.f32 1.442695, %v669_v51  ;;  %v672_v59 = vsub.f32 0.0, %v2107_v52  ;;  %v2115_v60 = vadd.f32 %v2085_v34, %v513_v57  ;;  %v1580_v61 = vpop.f32.mrf.mxu0  ;;  %v1612_v1 = vpop.f32.mrf.mxu1 }
  0xcf   :  { %1678 = vpow2.f32 %v701_v54  ;;  %v707_v62 = vmul.f32 1.442695, %v640_v55  ;;  %v638_v63 = vsub.f32 0.0, %v2111_v56  ;;  %v2119_v0 = vadd.f32 %v1580_v61, %v2085_v34 }
  0xd0   :  { %1680 = vpow2.f32 %v765_v58  ;;  %v771_v2 = vmul.f32 1.442695, %v672_v59  ;;  %v670_v3 = vsub.f32 0.0, %v2115_v60  ;;  %v2123_v4 = vadd.f32 %v1612_v1, %v2085_v34  ;;  %v398_v5 = vpop.f32.mrf.mxu0  ;;  %v526_v9 = vpop.f32.mrf.mxu1 }
  0xd1   :  { %1682 = vpow2.f32 %v707_v62  ;;  %v703_v6 = vmul.f32 1.442695, %v638_v63  ;;  %v643_v7 = vsub.f32 0.0, %v2119_v0  ;;  %v2127_v8 = vadd.f32 %v2085_v34, %v398_v5 }
  0xd2   :  { %1684 = vpow2.f32 %v771_v2  ;;  %v767_v10 = vmul.f32 1.442695, %v670_v3  ;;  %v675_v11 = vsub.f32 0.0, %v2123_v4  ;;  %v2131_v12 = vadd.f32 %v2085_v34, %v526_v9  ;;  %v1581_v13 = vpop.f32.mrf.mxu0  ;;  %v1613_v17 = vpop.f32.mrf.mxu1 }
  0xd3   :  { %1686 = vpow2.f32 %v703_v6  ;;  %v713_v14 = vmul.f32 1.442695, %v643_v7  ;;  %v641_v15 = vsub.f32 0.0, %v2127_v8  ;;  %v2135_v16 = vadd.f32 %v1581_v13, %v2085_v34 }
  0xd4   :  { %1688 = vpow2.f32 %v767_v10  ;;  %v777_v18 = vmul.f32 1.442695, %v675_v11  ;;  %v673_v19 = vsub.f32 0.0, %v2131_v12  ;;  %v2139_v20 = vadd.f32 %v1613_v17, %v2085_v34  ;;  %v401_v21 = vpop.f32.mrf.mxu0  ;;  %v529_v25 = vpop.f32.mrf.mxu1 }
  0xd5   :  { %1690 = vpow2.f32 %v713_v14  ;;  %v709_v22 = vmul.f32 1.442695, %v641_v15  ;;  %v644_v23 = vsub.f32 0.0, %v2135_v16  ;;  %v2143_v24 = vadd.f32 %v2085_v34, %v401_v21 }
  0xd6   :  { %1692 = vpow2.f32 %v777_v18  ;;  %v773_v26 = vmul.f32 1.442695, %v673_v19  ;;  %v676_v27 = vsub.f32 0.0, %v2139_v20  ;;  %v2147_v28 = vadd.f32 %v2085_v34, %v529_v25  ;;  %v1584_v29 = vpop.f32.mrf.mxu0  ;;  %v1616_v33 = vpop.f32.mrf.mxu1 }
  0xd7   :  { %1694 = vpow2.f32 %v709_v22  ;;  %v715_v30 = vmul.f32 1.442695, %v644_v23  ;;  %v642_v31 = vsub.f32 0.0, %v2143_v24  ;;  %v2151_v32 = vadd.f32 %v1584_v29, %v2085_v34 }
  0xd8   :  { %1696 = vpow2.f32 %v773_v26  ;;  %v779_v35 = vmul.f32 1.442695, %v676_v27  ;;  %v674_v37 = vsub.f32 0.0, %v2147_v28  ;;  %v2155_v39 = vadd.f32 %v1616_v33, %v2085_v34  ;;  %v414_v40 = vpop.f32.mrf.mxu0  ;;  %v542_v45 = vpop.f32.mrf.mxu1 }
  0xd9   :  { %1698 = vpow2.f32 %v715_v30  ;;  %v711_v42 = vmul.f32 1.442695, %v642_v31  ;;  %v2158_v43 = vadd.f32 %v2085_v34, %v414_v40  ;;  %v2161_v49 = vadd.f32 %v2085_v34, %v542_v45 }
  0xda   :  { %v1675_v46 = vpop.eup %1674  ;;  %1700 = vpow2.f32 %v779_v35  ;;  %v775_v47 = vmul.f32 1.442695, %v674_v37  ;;  %v1585_v50 = vpop.f32.mrf.mxu0  ;;  %v647_v54 = vsub.f32 0.0, %v2151_v32  ;;  %v679_v59 = vsub.f32 0.0, %v2155_v39 }
  0xdb   :  { %v1677_v51 = vpop.eup %1676  ;;  %v831_v53 = vadd.f32 1.0, %v1675_v46  ;;  %1702 = vpow2.f32 %v711_v42  ;;  %v1617_v55 = vpop.f32.mrf.mxu1  ;;  %v645_v1 = vsub.f32 0.0, %v2158_v43  ;;  %v677_v2 = vsub.f32 0.0, %v2161_v49 }
  0xdc   :  { %v1679_v57 = vpop.eup %1678  ;;  %v863_v58 = vadd.f32 1.0, %v1677_v51  ;;  %1704 = vpow2.f32 %v775_v47  ;;  %v417_v61 = vpop.f32.mrf.mxu0  ;;  %v2168_v7 = vadd.f32 %v1585_v50, %v2085_v34  ;;  %v2171_v9 = vadd.f32 %v1617_v55, %v2085_v34 }
  0xdd   :  { %v1681_v62 = vpop.eup %1680  ;;  %1706 = vrcp.f32 %v831_v53  ;;  %v829_v63 = vadd.f32 1.0, %v1679_v57  ;;  %v545_v3 = vpop.f32.mrf.mxu1  ;;  %v2173_v14 = vmul.f32 1.442695, %v647_v54  ;;  %v2176_v15 = vadd.f32 %v2085_v34, %v417_v61 }
  0xde   :  { %v1683_v5 = vpop.eup %1682  ;;  %1708 = vrcp.f32 %v863_v58  ;;  %v861_v6 = vadd.f32 1.0, %v1681_v62  ;;  %v1588_v10 = vpop.f32.mrf.mxu0  ;;  %v2178_v21 = vmul.f32 1.442695, %v679_v59  ;;  %v2181_v22 = vadd.f32 %v2085_v34, %v545_v3 }
  0xdf   :  { %v1685_v11 = vpop.eup %1684  ;;  %1710 = vrcp.f32 %v829_v63  ;;  %v832_v13 = vadd.f32 1.0, %v1683_v5  ;;  %v1620_v17 = vpop.f32.mrf.mxu1  ;;  %v2183_v26 = vmul.f32 1.442695, %v645_v1  ;;  %v2185_v27 = vmul.f32 1.442695, %v677_v2 }
  0xe0   :  { %v1687_v18 = vpop.eup %1686  ;;  %1712 = vrcp.f32 %v861_v6  ;;  %v864_v19 = vadd.f32 1.0, %v1685_v11  ;;  %v648_v31 = vsub.f32 0.0, %v2168_v7  ;;  %v680_v33 = vsub.f32 0.0, %v2171_v9  ;;  %v430_v35 = vpop.f32.mrf.mxu0 }
  0xe1   :  { %v1689_v23 = vpop.eup %1688  ;;  %1714 = vrcp.f32 %v832_v13  ;;  %v830_v25 = vadd.f32 1.0, %v1687_v18  ;;  %v646_v42 = vsub.f32 0.0, %v2176_v15  ;;  %v2191_v45 = vadd.f32 %v1588_v10, %v2085_v34  ;;  %v558_v46 = vpop.f32.mrf.mxu1 }
  0xe2   :  { %v1691_v29 = vpop.eup %1690  ;;  %1716 = vrcp.f32 %v864_v19  ;;  %v862_v30 = vadd.f32 1.0, %v1689_v23  ;;  %v678_v51 = vsub.f32 0.0, %v2181_v22  ;;  %v2195_v53 = vadd.f32 %v1620_v17, %v2085_v34  ;;  %v1589_v1 = vpop.f32.mrf.mxu0 }
  0xe3   :  { %v1693_v37 = vpop.eup %1692  ;;  %1718 = vrcp.f32 %v830_v25  ;;  %v835_v40 = vadd.f32 1.0, %v1691_v29  ;;  %v651_v57 = vsub.f32 0.0, %v2191_v45  ;;  %v2199_v58 = vadd.f32 %v2085_v34, %v430_v35  ;;  %v1621_v10 = vpop.f32.mrf.mxu1 }
  0xe4   :  { %v1695_v47 = vpop.eup %1694  ;;  %1720 = vrcp.f32 %v862_v30  ;;  %v867_v50 = vadd.f32 1.0, %v1693_v37  ;;  %v683_v62 = vsub.f32 0.0, %v2195_v53  ;;  %v2203_v63 = vadd.f32 %v2085_v34, %v558_v46 }
  0xe5   :  { %v1697_v54 = vpop.eup %1696  ;;  %1722 = vrcp.f32 %v835_v40  ;;  %v833_v55 = vadd.f32 1.0, %v1695_v47  ;;  %v723_v5 = vmul.f32 1.442695, %v648_v31  ;;  %v649_v6 = vsub.f32 0.0, %v2199_v58  ;;  %v433_v40 = vpop.f32.mrf.mxu0 }
  0xe6   :  { %v1699_v59 = vpop.eup %1698  ;;  %1724 = vrcp.f32 %v867_v50  ;;  %v865_v61 = vadd.f32 1.0, %v1697_v54  ;;  %v787_v17 = vmul.f32 1.442695, %v680_v33  ;;  %v681_v18 = vsub.f32 0.0, %v2203_v63 }
  0xe7   :  { %v1701_v2 = vpop.eup %1700  ;;  %1726 = vrcp.f32 %v833_v55  ;;  %v836_v3 = vadd.f32 1.0, %v1699_v59  ;;  %v719_v25 = vmul.f32 1.442695, %v646_v42  ;;  %v2207_v29 = vmul.f32 1.442695, %v678_v51  ;;  %v561_v42 = vpop.f32.mrf.mxu1 }
  0xe8   :  { %v1703_v11 = vpop.eup %1702  ;;  %1728 = vrcp.f32 %v865_v61  ;;  %v868_v13 = vadd.f32 1.0, %v1701_v2  ;;  %v2209_v37 = vmul.f32 1.442695, %v651_v57  ;;  %v2211_v31 = vmul.f32 1.442695, %v683_v62 }
  0xe9   :  { %v1705_v19 = vpop.eup %1704  ;;  %1730 = vrcp.f32 %v836_v3  ;;  %v834_v23 = vadd.f32 1.0, %v1703_v11  ;;  %v2214_v33 = vmul.f32 1.442695, %v649_v6  ;;  %v2217_v50 = vadd.f32 %v1589_v1, %v2085_v34  ;;  %v1592_v6 = vpop.f32.mrf.mxu0 }
  0xea   :  { %v1707_v30 = vpop.eup %1706  ;;  %1732 = vrcp.f32 %v868_v13  ;;  %v866_v35 = vadd.f32 1.0, %v1705_v19  ;;  %v2220_v55 = vmul.f32 1.442695, %v681_v18  ;;  %v2223_v57 = vadd.f32 %v1621_v10, %v2085_v34 }
  0xeb   :  { %v1709_v46 = vpop.eup %1708  ;;  %v959_v47 = vmul.f32 %v1707_v30, %v2088_v36  ;;  %1734 = vrcp.f32 %v834_v23  ;;  %v2228_v62 = vadd.f32 %v2085_v34, %v433_v40  ;;  %v652_v11 = vsub.f32 0.0, %v2217_v50 }
  0xec   :  { %v1711_v51 = vpop.eup %1710  ;;  %v991_v54 = vmul.f32 %v1709_v46, %v2091_v38  ;;  %1736 = vrcp.f32 %v866_v35  ;;  %v2233_v38 = vadd.f32 %v2085_v34, %v561_v42  ;;  %v684_v19 = vsub.f32 0.0, %v2223_v57  ;;  %v446_v46 = vpop.f32.mrf.mxu0 }
  0xed   :  { %v1713_v59 = vpop.eup %1712  ;;  %v1477_v61 = vpack.c.bf16 %v959_v47, %v959_v47  ;;  %v957_v36 = vmul.f32 %v1711_v51, %v2095_v41  ;;  %1738 = vpow2.f32 %v2173_v14  ;;  %v650_v30 = vsub.f32 0.0, %v2228_v62 }
  0xee   :  { %v1715_v1 = vpop.eup %1714  ;;  %v1509_v2 = vpack.c.bf16 %v991_v54, %v991_v54  ;;  %v989_v3 = vmul.f32 %v1713_v59, %v2099_v44  ;;  %1740 = vpow2.f32 %v2178_v21  ;;  %v1624_v44 = vpop.f32.mrf.mxu1  ;;  %v682_v40 = vsub.f32 0.0, %v2233_v38 }
  0xef   :  { %v1717_v10 = vpop.eup %1716  ;;  %1280 = vst.msk [vmem:[%s2746_s3 + $0x8] sm:$0xf] %vm1277_vm2, %v1477_v61  ;;  %v1475_v41 = vpack.c.bf16 %v957_v36, %v957_v36  ;;  %v960_v14 = vmul.f32 %v1715_v1, %v2103_v48  ;;  %1742 = vpow2.f32 %v2183_v26  ;;  %v731_v42 = vmul.f32 1.442695, %v652_v11 }
  0xf0   :  { %v1719_v13 = vpop.eup %1718  ;;  %1312 = vst.msk [vmem:[%s2746_s3 + $0x88] sm:$0xf] %vm1277_vm2, %v1509_v2  ;;  %v1507_v21 = vpack.c.bf16 %v989_v3, %v989_v3  ;;  %v992_v18 = vmul.f32 %v1717_v10, %v2107_v52  ;;  %1744 = vpow2.f32 %v2185_v27  ;;  %v574_v51 = vpop.f32.mrf.mxu1  ;;  %v795_v59 = vmul.f32 1.442695, %v684_v19 }
  0xf1   :  { %v1721_v23 = vpop.eup %1720  ;;  %1278 = vst.msk [vmem:[%s2746_s3] sm:$0xf] %vm1277_vm2, %v1475_v41  ;;  %v1478_v48 = vpack.c.bf16 %v960_v14, %v960_v14  ;;  %v958_v26 = vmul.f32 %v1719_v13, %v2111_v56  ;;  %1746 = vpow2.f32 %v723_v5  ;;  %v727_v36 = vmul.f32 1.442695, %v650_v30  ;;  %v1593_v3 = vpop.f32.mrf.mxu0 }
  0xf2   :  { %v1723_v35 = vpop.eup %1722  ;;  %1310 = vst.msk [vmem:[%s2746_s3 + $0x80] sm:$0xf] %vm1277_vm2, %v1507_v21  ;;  %v1510_v52 = vpack.c.bf16 %v992_v18, %v992_v18  ;;  %v990_v27 = vmul.f32 %v1721_v23, %v2115_v60  ;;  %1748 = vpow2.f32 %v787_v17  ;;  %v791_v2 = vmul.f32 1.442695, %v682_v40  ;;  %v1625_v14 = vpop.f32.mrf.mxu1 }
  0xf3   :  { %v1725_v47 = vpop.eup %1724  ;;  %1281 = vst.msk [vmem:[%s2746_s3 + $0xc] sm:$0xf] %vm1277_vm2, %v1478_v48  ;;  %v1476_v56 = vpack.c.bf16 %v958_v26, %v958_v26  ;;  %v963_v5 = vmul.f32 %v1723_v35, %v2119_v0  ;;  %1750 = vpow2.f32 %v719_v25  ;;  %v2291_v41 = vadd.f32 %v1592_v6, %v2085_v34  ;;  %v449_v19 = vpop.f32.mrf.mxu0 }
  0xf4   :  { %v1727_v54 = vpop.eup %1726  ;;  %1313 = vst.msk [vmem:[%s2746_s3 + $0x8c] sm:$0xf] %vm1277_vm2, %v1510_v52  ;;  %v1508_v60 = vpack.c.bf16 %v990_v27, %v990_v27  ;;  %v995_v17 = vmul.f32 %v1725_v47, %v2123_v4  ;;  %1752 = vpow2.f32 %v2207_v29  ;;  %v2300_v13 = vadd.f32 %v1624_v44, %v2085_v34  ;;  %v577_v30 = vpop.f32.mrf.mxu1 }
  0xf5   :  { %v1729_v61 = vpop.eup %1728  ;;  %1279 = vst.msk [vmem:[%s2746_s3 + $0x4] sm:$0xf] %vm1277_vm2, %v1476_v56  ;;  %v1481_v0 = vpack.c.bf16 %v963_v5, %v963_v5  ;;  %v961_v25 = vmul.f32 %v1727_v54, %v2127_v8  ;;  %1754 = vpow2.f32 %v2209_v37  ;;  %v2308_v21 = vadd.f32 %v2085_v34, %v446_v46 }
  0xf6   :  { %v1731_v1 = vpop.eup %1730  ;;  %1311 = vst.msk [vmem:[%s2746_s3 + $0x84] sm:$0xf] %vm1277_vm2, %v1508_v60  ;;  %v1513_v4 = vpack.c.bf16 %v995_v17, %v995_v17  ;;  %v993_v29 = vmul.f32 %v1729_v61, %v2131_v12  ;;  %1756 = vpow2.f32 %v2211_v31  ;;  %v2316_v44 = vadd.f32 %v2085_v34, %v574_v51  ;;  %v1596_v60 = vpop.f32.mrf.mxu0 }
  0xf7   :  { %v1733_v10 = vpop.eup %1732  ;;  %1284 = vst.msk [vmem:[%s2746_s3 + $0x18] sm:$0xf] %vm1277_vm2, %v1481_v0  ;;  %v1479_v8 = vpack.c.bf16 %v961_v25, %v961_v25  ;;  %v964_v37 = vmul.f32 %v1731_v1, %v2135_v16  ;;  %1758 = vpow2.f32 %v2214_v33  ;;  %v655_v26 = vsub.f32 0.0, %v2291_v41  ;;  %v1628_v25 = vpop.f32.mrf.mxu1 }
  0xf8   :  { %v1735_v12 = vpop.eup %1734  ;;  %1316 = vst.msk [vmem:[%s2746_s3 + $0x98] sm:$0xf] %vm1277_vm2, %v1513_v4  ;;  %v1511_v31 = vpack.c.bf16 %v993_v29, %v993_v29  ;;  %v996_v11 = vmul.f32 %v1733_v10, %v2139_v20  ;;  %1760 = vpow2.f32 %v2220_v55  ;;  %v687_v27 = vsub.f32 0.0, %v2300_v13 }
  0xf9   :  { %v1737_v16 = vpop.eup %1736  ;;  %1282 = vst.msk [vmem:[%s2746_s3 + $0x10] sm:$0xf] %vm1277_vm2, %v1479_v8  ;;  %v1482_v33 = vpack.c.bf16 %v964_v37, %v964_v37  ;;  %v962_v6 = vmul.f32 %v1735_v12, %v2143_v24  ;;  %1762 = vpow2.f32 %v731_v42  ;;  %v653_v47 = vsub.f32 0.0, %v2308_v21 }
  0xfa   :  { %v1739_v18 = vpop.eup %1738  ;;  %1314 = vst.msk [vmem:[%s2746_s3 + $0x90] sm:$0xf] %vm1277_vm2, %v1511_v31  ;;  %v1514_v20 = vpack.c.bf16 %v996_v11, %v996_v11  ;;  %v994_v55 = vmul.f32 %v1737_v16, %v2147_v28  ;;  %1764 = vpow2.f32 %v795_v59  ;;  %v685_v56 = vsub.f32 0.0, %v2316_v44  ;;  %v462_v11 = vpop.f32.mrf.mxu0 }
  0xfb   :  { %v1741_v23 = vpop.eup %1740  ;;  %1285 = vst.msk [vmem:[%s2746_s3 + $0x1c] sm:$0xf] %vm1277_vm2, %v1482_v33  ;;  %v1480_v24 = vpack.c.bf16 %v962_v6, %v962_v6  ;;  %v839_v48 = vadd.f32 1.0, %v1739_v18  ;;  %1766 = vpow2.f32 %v727_v36  ;;  %v2339_v51 = vadd.f32 %v1593_v3, %v2085_v34 }
  0xfc   :  { %v1743_v35 = vpop.eup %1742  ;;  %1317 = vst.msk [vmem:[%s2746_s3 + $0x9c] sm:$0xf] %vm1277_vm2, %v1514_v20  ;;  %v1512_v28 = vpack.c.bf16 %v994_v55, %v994_v55  ;;  %v871_v52 = vadd.f32 1.0, %v1741_v23  ;;  %1768 = vpow2.f32 %v791_v2  ;;  %v2342_v54 = vadd.f32 %v1625_v14, %v2085_v34  ;;  %v590_v20 = vpop.f32.mrf.mxu1 }
  0xfd   :  { %v1745_v40 = vpop.eup %1744  ;;  %1283 = vst.msk [vmem:[%s2746_s3 + $0x14] sm:$0xf] %vm1277_vm2, %v1480_v24  ;;  %1770 = vrcp.f32 %v839_v48  ;;  %v837_v46 = vadd.f32 1.0, %v1743_v35  ;;  %v2344_v61 = vmul.f32 1.442695, %v655_v26  ;;  %v2347_v0 = vadd.f32 %v2085_v34, %v449_v19 }
  0xfe   :  { %v1747_v5 = vpop.eup %1746  ;;  %1315 = vst.msk [vmem:[%s2746_s3 + $0x94] sm:$0xf] %vm1277_vm2, %v1512_v28  ;;  %1772 = vrcp.f32 %v871_v52  ;;  %v869_v42 = vadd.f32 1.0, %v1745_v40  ;;  %v2349_v4 = vmul.f32 1.442695, %v687_v27  ;;  %v2352_v29 = vadd.f32 %v2085_v34, %v577_v30 }
  0xff   :  { %v1749_v17 = vpop.eup %1748  ;;  %1774 = vrcp.f32 %v837_v46  ;;  %v840_v59 = vadd.f32 1.0, %v1747_v5  ;;  %v2354_v10 = vmul.f32 1.442695, %v653_v47  ;;  %v2356_v8 = vmul.f32 1.442695, %v685_v56  ;;  %v1597_v46 = vpop.f32.mrf.mxu0 }
 0x100   :  { %v1751_v36 = vpop.eup %1750  ;;  %1776 = vrcp.f32 %v869_v42  ;;  %v872_v1 = vadd.f32 1.0, %v1749_v17  ;;  %v656_v12 = vsub.f32 0.0, %v2339_v51  ;;  %v688_v31 = vsub.f32 0.0, %v2342_v54 }
 0x101   :  { %v1753_v2 = vpop.eup %1752  ;;  %1778 = vrcp.f32 %v840_v59  ;;  %v838_v3 = vadd.f32 1.0, %v1751_v36  ;;  %v654_v6 = vsub.f32 0.0, %v2347_v0  ;;  %v2362_v18 = vadd.f32 %v1596_v60, %v2085_v34  ;;  %v1629_v60 = vpop.f32.mrf.mxu1 }
 0x102   :  { %v1755_v37 = vpop.eup %1754  ;;  %1780 = vrcp.f32 %v872_v1  ;;  %v870_v14 = vadd.f32 1.0, %v1753_v2  ;;  %v686_v23 = vsub.f32 0.0, %v2352_v29  ;;  %v2366_v24 = vadd.f32 %v1628_v25, %v2085_v34 }
 0x103   :  { %v1757_v16 = vpop.eup %1756  ;;  %1782 = vrcp.f32 %v838_v3  ;;  %v843_v33 = vadd.f32 1.0, %v1755_v37  ;;  %v659_v30 = vsub.f32 0.0, %v2362_v18  ;;  %v2370_v35 = vadd.f32 %v2085_v34, %v462_v11 }
 0x104   :  { %v1759_v55 = vpop.eup %1758  ;;  %1784 = vrcp.f32 %v870_v14  ;;  %v875_v19 = vadd.f32 1.0, %v1757_v16  ;;  %v691_v27 = vsub.f32 0.0, %v2366_v24  ;;  %v2374_v40 = vadd.f32 %v2085_v34, %v590_v20 }
 0x105   :  { %v1761_v48 = vpop.eup %1760  ;;  %1786 = vrcp.f32 %v843_v33  ;;  %v841_v26 = vadd.f32 1.0, %v1759_v55  ;;  %v739_v5 = vmul.f32 1.442695, %v656_v12  ;;  %v657_v42 = vsub.f32 0.0, %v2370_v35  ;;  %v465_v33 = vpop.f32.mrf.mxu0 }
 0x106   :  { %v1763_v28 = vpop.eup %1762  ;;  %1788 = vrcp.f32 %v875_v19  ;;  %v873_v52 = vadd.f32 1.0, %v1761_v48  ;;  %v803_v25 = vmul.f32 1.442695, %v688_v31  ;;  %v689_v36 = vsub.f32 0.0, %v2374_v40 }
 0x107   :  { %v1765_v47 = vpop.eup %1764  ;;  %1790 = vrcp.f32 %v841_v26  ;;  %v844_v56 = vadd.f32 1.0, %v1763_v28  ;;  %v735_v3 = vmul.f32 1.442695, %v654_v6  ;;  %v2378_v37 = vmul.f32 1.442695, %v686_v23  ;;  %v593_v6 = vpop.f32.mrf.mxu1 }
 0x108   :  { %v1767_v17 = vpop.eup %1766  ;;  %1792 = vrcp.f32 %v873_v52  ;;  %v876_v59 = vadd.f32 1.0, %v1765_v47  ;;  %v2380_v16 = vmul.f32 1.442695, %v659_v30  ;;  %v2382_v12 = vmul.f32 1.442695, %v691_v27 }
 0x109   :  { %v1769_v1 = vpop.eup %1768  ;;  %1794 = vrcp.f32 %v844_v56  ;;  %v842_v2 = vadd.f32 1.0, %v1767_v17  ;;  %v2385_v31 = vmul.f32 1.442695, %v657_v42  ;;  %v2388_v19 = vadd.f32 %v1597_v46, %v2085_v34  ;;  %v1600_v42 = vpop.f32.mrf.mxu0 }
 0x10a   :  { %v1771_v14 = vpop.eup %1770  ;;  %1796 = vrcp.f32 %v876_v59  ;;  %v874_v11 = vadd.f32 1.0, %v1769_v1  ;;  %v2391_v26 = vmul.f32 1.442695, %v689_v36  ;;  %v2394_v30 = vadd.f32 %v1629_v60, %v2085_v34 }
 0x10b   :  { %v1773_v20 = vpop.eup %1772  ;;  %v967_v55 = vmul.f32 %v1771_v14, %v2151_v32  ;;  %1798 = vrcp.f32 %v842_v2  ;;  %v2399_v27 = vadd.f32 %v2085_v34, %v465_v33  ;;  %v660_v17 = vsub.f32 0.0, %v2388_v19 }
 0x10c   :  { %v1775_v23 = vpop.eup %1774  ;;  %v999_v48 = vmul.f32 %v1773_v20, %v2155_v39  ;;  %1800 = vrcp.f32 %v874_v11  ;;  %v2404_v39 = vadd.f32 %v2085_v34, %v593_v6  ;;  %v692_v1 = vsub.f32 0.0, %v2394_v30  ;;  %v478_v20 = vpop.f32.mrf.mxu0 }
 0x10d   :  { %v1777_v28 = vpop.eup %1776  ;;  %v1485_v52 = vpack.c.bf16 %v967_v55, %v967_v55  ;;  %v965_v32 = vmul.f32 %v1775_v23, %v2158_v43  ;;  %1802 = vpow2.f32 %v2344_v61  ;;  %v658_v14 = vsub.f32 0.0, %v2399_v27 }
 0x10e   :  { %v1779_v46 = vpop.eup %1778  ;;  %v1517_v47 = vpack.c.bf16 %v999_v48, %v999_v48  ;;  %v997_v56 = vmul.f32 %v1777_v28, %v2161_v49  ;;  %1804 = vpow2.f32 %v2349_v4  ;;  %v1632_v49 = vpop.f32.mrf.mxu1  ;;  %v690_v33 = vsub.f32 0.0, %v2404_v39 }
 0x10f   :  { %v1781_v60 = vpop.eup %1780  ;;  %1288 = vst.msk [vmem:[%s2746_s3 + $0x28] sm:$0xf] %vm1277_vm2, %v1485_v52  ;;  %v1483_v43 = vpack.c.bf16 %v965_v32, %v965_v32  ;;  %v968_v61 = vmul.f32 %v1779_v46, %v2168_v7  ;;  %1806 = vpow2.f32 %v2354_v10  ;;  %v747_v6 = vmul.f32 1.442695, %v660_v17 }
 0x110   :  { %v1783_v59 = vpop.eup %1782  ;;  %1320 = vst.msk [vmem:[%s2746_s3 + $0xa8] sm:$0xf] %vm1277_vm2, %v1517_v47  ;;  %v1515_v4 = vpack.c.bf16 %v997_v56, %v997_v56  ;;  %v1000_v36 = vmul.f32 %v1781_v60, %v2171_v9  ;;  %1808 = vpow2.f32 %v2356_v8  ;;  %v606_v23 = vpop.f32.mrf.mxu1  ;;  %v811_v28 = vmul.f32 1.442695, %v692_v1 }
 0x111   :  { %v1785_v2 = vpop.eup %1784  ;;  %1286 = vst.msk [vmem:[%s2746_s3 + $0x20] sm:$0xf] %vm1277_vm2, %v1483_v43  ;;  %v1486_v7 = vpack.c.bf16 %v968_v61, %v968_v61  ;;  %v966_v10 = vmul.f32 %v1783_v59, %v2176_v15  ;;  %1810 = vpow2.f32 %v739_v5  ;;  %v743_v32 = vmul.f32 1.442695, %v658_v14  ;;  %v1601_v56 = vpop.f32.mrf.mxu0 }
 0x112   :  { %v1787_v11 = vpop.eup %1786  ;;  %1318 = vst.msk [vmem:[%s2746_s3 + $0xa0] sm:$0xf] %vm1277_vm2, %v1515_v4  ;;  %v1518_v9 = vpack.c.bf16 %v1000_v36, %v1000_v36  ;;  %v998_v8 = vmul.f32 %v1785_v2, %v2181_v22  ;;  %1812 = vpow2.f32 %v803_v25  ;;  %v807_v47 = vmul.f32 1.442695, %v690_v33  ;;  %v1633_v61 = vpop.f32.mrf.mxu1 }
 0x113   :  { %v1789_v55 = vpop.eup %1788  ;;  %1289 = vst.msk [vmem:[%s2746_s3 + $0x2c] sm:$0xf] %vm1277_vm2, %v1486_v7  ;;  %v1484_v15 = vpack.c.bf16 %v966_v10, %v966_v10  ;;  %v971_v5 = vmul.f32 %v1787_v11, %v2191_v45  ;;  %1814 = vpow2.f32 %v735_v3  ;;  %v2462_v43 = vadd.f32 %v1600_v42, %v2085_v34  ;;  %v481_v1 = vpop.f32.mrf.mxu0 }
 0x114   :  { %v1791_v48 = vpop.eup %1790  ;;  %1321 = vst.msk [vmem:[%s2746_s3 + $0xac] sm:$0xf] %vm1277_vm2, %v1518_v9  ;;  %v1516_v22 = vpack.c.bf16 %v998_v8, %v998_v8  ;;  %v1003_v25 = vmul.f32 %v1789_v55, %v2195_v53  ;;  %1816 = vpow2.f32 %v2378_v37  ;;  %v2471_v59 = vadd.f32 %v1632_v49, %v2085_v34  ;;  %v609_v14 = vpop.f32.mrf.mxu1 }
 0x115   :  { %v1793_v52 = vpop.eup %1792  ;;  %1287 = vst.msk [vmem:[%s2746_s3 + $0x24] sm:$0xf] %vm1277_vm2, %v1484_v15  ;;  %v1489_v45 = vpack.c.bf16 %v971_v5, %v971_v5  ;;  %v969_v3 = vmul.f32 %v1791_v48, %v2199_v58  ;;  %1818 = vpow2.f32 %v2380_v16  ;;  %v2479_v4 = vadd.f32 %v2085_v34, %v478_v20 }
 0x116   :  { %v1795_v46 = vpop.eup %1794  ;;  %1319 = vst.msk [vmem:[%s2746_s3 + $0xa4] sm:$0xf] %vm1277_vm2, %v1516_v22  ;;  %v1521_v53 = vpack.c.bf16 %v1003_v25, %v1003_v25  ;;  %v1001_v37 = vmul.f32 %v1793_v52, %v2203_v63  ;;  %1820 = vpow2.f32 %v2382_v12  ;;  %v2487_v49 = vadd.f32 %v2085_v34, %v606_v23  ;;  %v1604_v23 = vpop.f32.mrf.mxu0 }
 0x117   :  { %v1797_v60 = vpop.eup %1796  ;;  %1292 = vst.msk [vmem:[%s2746_s3 + $0x38] sm:$0xf] %vm1277_vm2, %v1489_v45  ;;  %v1487_v58 = vpack.c.bf16 %v969_v3, %v969_v3  ;;  %v972_v16 = vmul.f32 %v1795_v46, %v2217_v50  ;;  %1822 = vpow2.f32 %v2385_v31  ;;  %v663_v10 = vsub.f32 0.0, %v2462_v43  ;;  %v1636_v52 = vpop.f32.mrf.mxu1 }
 0x118   :  { %v1799_v63 = vpop.eup %1798  ;;  %1324 = vst.msk [vmem:[%s2746_s3 + $0xb8] sm:$0xf] %vm1277_vm2, %v1521_v53  ;;  %v1519_v12 = vpack.c.bf16 %v1001_v37, %v1001_v37  ;;  %v1004_v17 = vmul.f32 %v1797_v60, %v2223_v57  ;;  %1824 = vpow2.f32 %v2391_v26  ;;  %v695_v8 = vsub.f32 0.0, %v2471_v59 }
 0x119   :  { %v1801_v50 = vpop.eup %1800  ;;  %1290 = vst.msk [vmem:[%s2746_s3 + $0x30] sm:$0xf] %vm1277_vm2, %v1487_v58  ;;  %v1490_v31 = vpack.c.bf16 %v972_v16, %v972_v16  ;;  %v970_v42 = vmul.f32 %v1799_v63, %v2228_v62  ;;  %1826 = vpow2.f32 %v747_v6  ;;  %v661_v55 = vsub.f32 0.0, %v2479_v4  ;;  %v2529_v63 = vld [vmem:[%s2745_s2] ss:$0 sm:$0xff] }
 0x11a   :  { %v1803_v36 = vpop.eup %1802  ;;  %1322 = vst.msk [vmem:[%s2746_s3 + $0xb0] sm:$0xf] %vm1277_vm2, %v1519_v12  ;;  %v1522_v57 = vpack.c.bf16 %v1004_v17, %v1004_v17  ;;  %v1002_v26 = vmul.f32 %v1801_v50, %v2233_v38  ;;  %1828 = vpow2.f32 %v811_v28  ;;  %v693_v6 = vsub.f32 0.0, %v2487_v49  ;;  %v494_v12 = vpop.f32.mrf.mxu0 }
 0x11b   :  { %v1805_v2 = vpop.eup %1804  ;;  %1293 = vst.msk [vmem:[%s2746_s3 + $0x3c] sm:$0xf] %vm1277_vm2, %v1490_v31  ;;  %v1488_v62 = vpack.c.bf16 %v970_v42, %v970_v42  ;;  %v847_v7 = vadd.f32 1.0, %v1803_v36  ;;  %1830 = vpow2.f32 %v743_v32  ;;  %v2509_v25 = vmul.f32 1.442695, %v663_v10  ;;  %v622_v42 = vpop.f32.mrf.mxu1 }
 0x11c   :  { %v1807_v11 = vpop.eup %1806  ;;  %1325 = vst.msk [vmem:[%s2746_s3 + $0xbc] sm:$0xf] %vm1277_vm2, %v1522_v57  ;;  %v1520_v38 = vpack.c.bf16 %v1002_v26, %v1002_v26  ;;  %v879_v9 = vadd.f32 1.0, %v1805_v2  ;;  %1832 = vpow2.f32 %v807_v47  ;;  %v2512_v28 = vadd.f32 %v1601_v56, %v2085_v34 }
 0x11d   :  { %v1809_v33 = vpop.eup %1808  ;;  %1291 = vst.msk [vmem:[%s2746_s3 + $0x34] sm:$0xf] %vm1277_vm2, %v1488_v62  ;;  %1834 = vrcp.f32 %v847_v7  ;;  %v845_v20 = vadd.f32 1.0, %v1807_v11  ;;  %v2514_v32 = vmul.f32 1.442695, %v695_v8  ;;  %v2517_v46 = vadd.f32 %v1633_v61, %v2085_v34 }
 0x11e   :  { %v1811_v15 = vpop.eup %1810  ;;  %1323 = vst.msk [vmem:[%s2746_s3 + $0xb4] sm:$0xf] %vm1277_vm2, %v1520_v38  ;;  %1836 = vrcp.f32 %v879_v9  ;;  %v877_v5 = vadd.f32 1.0, %v1809_v33  ;;  %v2519_v47 = vmul.f32 1.442695, %v661_v55  ;;  %v2522_v60 = vadd.f32 %v2085_v34, %v481_v1 }
 0x11f   :  { %v1813_v48 = vpop.eup %1812  ;;  %1838 = vrcp.f32 %v845_v20  ;;  %v848_v22 = vadd.f32 1.0, %v1811_v15  ;;  %v2524_v16 = vmul.f32 1.442695, %v693_v6  ;;  %v2532_v61 = vadd.f32 %v2529_v63, %v609_v14 }
 0x120   :  { %v1815_v45 = vpop.eup %1814  ;;  %1840 = vrcp.f32 %v877_v5  ;;  %v880_v3 = vadd.f32 1.0, %v1813_v48  ;;  %v664_v34 = vsub.f32 0.0, %v2512_v28  ;;  %v2536_v31 = vadd.f32 %v2529_v63, %v1604_v23  ;;  %v1605_v48 = vpop.f32.mrf.mxu0 }
 0x121   :  { %v1817_v53 = vpop.eup %1816  ;;  %1842 = vrcp.f32 %v848_v22  ;;  %v846_v37 = vadd.f32 1.0, %v1815_v45  ;;  %v696_v26 = vsub.f32 0.0, %v2517_v46  ;;  %v2540_v1 = vadd.f32 %v2529_v63, %v1636_v52 }
 0x122   :  { %v1819_v58 = vpop.eup %1818  ;;  %1844 = vrcp.f32 %v880_v3  ;;  %v878_v56 = vadd.f32 1.0, %v1817_v53  ;;  %v662_v7 = vsub.f32 0.0, %v2522_v60  ;;  %v2544_v10 = vadd.f32 %v2529_v63, %v494_v12  ;;  %v1637_v53 = vpop.f32.mrf.mxu1 }
 0x123   :  { %v1821_v17 = vpop.eup %1820  ;;  %1846 = vrcp.f32 %v846_v37  ;;  %v851_v50 = vadd.f32 1.0, %v1819_v58  ;;  %v694_v38 = vsub.f32 0.0, %v2532_v61  ;;  %v2548_v9 = vadd.f32 %v2529_v63, %v622_v42 }
 0x124   :  { %v1823_v36 = vpop.eup %1822  ;;  %1848 = vrcp.f32 %v878_v56  ;;  %v883_v57 = vadd.f32 1.0, %v1821_v17  ;;  %v667_v20 = vsub.f32 0.0, %v2536_v31  ;;  %v699_v55 = vsub.f32 0.0, %v2540_v1 }
 0x125   :  { %v1825_v2 = vpop.eup %1824  ;;  %1850 = vrcp.f32 %v851_v50  ;;  %v849_v62 = vadd.f32 1.0, %v1823_v36  ;;  %v755_v6 = vmul.f32 1.442695, %v664_v34  ;;  %v665_v23 = vsub.f32 0.0, %v2544_v10 }
 0x126   :  { %v1827_v14 = vpop.eup %1826  ;;  %1852 = vrcp.f32 %v883_v57  ;;  %v881_v11 = vadd.f32 1.0, %v1825_v2  ;;  %v819_v45 = vmul.f32 1.442695, %v696_v26  ;;  %v697_v3 = vsub.f32 0.0, %v2548_v9 }
 0x127   :  { %v1829_v8 = vpop.eup %1828  ;;  %1854 = vrcp.f32 %v849_v62  ;;  %v852_v33 = vadd.f32 1.0, %v1827_v14  ;;  %v751_v56 = vmul.f32 1.442695, %v662_v7  ;;  %v815_v12 = vmul.f32 1.442695, %v694_v38  ;;  %v497_v62 = vpop.f32.mrf.mxu0 }
 0x128   :  { %v1831_v15 = vpop.eup %1830  ;;  %1856 = vrcp.f32 %v881_v11  ;;  %v884_v5 = vadd.f32 1.0, %v1829_v8  ;;  %v761_v34 = vmul.f32 1.442695, %v667_v20  ;;  %v2555_v42 = vmul.f32 1.442695, %v699_v55  ;;  %v625_v38 = vpop.f32.mrf.mxu1 }
 0x129   :  { %v1833_v22 = vpop.eup %1832  ;;  %1858 = vrcp.f32 %v852_v33  ;;  %v850_v52 = vadd.f32 1.0, %v1831_v15  ;;  %v2558_v26 = vmul.f32 1.442695, %v665_v23  ;;  %v2561_v2 = vadd.f32 %v2529_v63, %v1605_v48 }
 0x12a   :  { %v1835_v37 = vpop.eup %1834  ;;  %1860 = vrcp.f32 %v884_v5  ;;  %v882_v58 = vadd.f32 1.0, %v1833_v22  ;;  %v2570_v20 = vadd.f32 %v2529_v63, %v1637_v53  ;;  %v2579_v15 = vadd.f32 %v2529_v63, %v497_v62 }
 0x12b   :  { %v1837_v17 = vpop.eup %1836  ;;  %v975_v50 = vmul.f32 %v1835_v37, %v2291_v41  ;;  %1862 = vrcp.f32 %v850_v52  ;;  %v2565_v41 = vmul.f32 1.442695, %v697_v3  ;;  %v2588_v23 = vadd.f32 %v2529_v63, %v625_v38 }
 0x12c   :  { %v1839_v36 = vpop.eup %1838  ;;  %v1007_v57 = vmul.f32 %v1837_v17, %v2300_v13  ;;  %1864 = vrcp.f32 %v882_v58  ;;  %v668_v22 = vsub.f32 0.0, %v2561_v2  ;;  %v700_v63 = vsub.f32 0.0, %v2570_v20 }
 0x12d   :  { %v1841_v14 = vpop.eup %1840  ;;  %v1493_v7 = vpack.c.bf16 %v975_v50, %v975_v50  ;;  %v973_v11 = vmul.f32 %v1839_v36, %v2308_v21  ;;  %1866 = vpow2.f32 %v2509_v25  ;;  %v666_v53 = vsub.f32 0.0, %v2579_v15 }
 0x12e   :  { %v1843_v8 = vpop.eup %1842  ;;  %v1525_v33 = vpack.c.bf16 %v1007_v57, %v1007_v57  ;;  %v1005_v13 = vmul.f32 %v1841_v14, %v2316_v44  ;;  %1868 = vpow2.f32 %v2514_v32  ;;  %v698_v58 = vsub.f32 0.0, %v2588_v23 }
 0x12f   :  { %v1845_v55 = vpop.eup %1844  ;;  %1296 = vst.msk [vmem:[%s2746_s3 + $0x48] sm:$0xf] %vm1277_vm2, %v1493_v7  ;;  %v1491_v21 = vpack.c.bf16 %v973_v11, %v973_v11  ;;  %v976_v25 = vmul.f32 %v1843_v8, %v2339_v51  ;;  %1870 = vpow2.f32 %v2519_v47  ;;  %v763_v50 = vmul.f32 1.442695, %v668_v22 }
 0x130   :  { %v1847_v44 = vpop.eup %1846  ;;  %1328 = vst.msk [vmem:[%s2746_s3 + $0xc8] sm:$0xf] %vm1277_vm2, %v1525_v33  ;;  %v1523_v32 = vpack.c.bf16 %v1005_v13, %v1005_v13  ;;  %v1008_v5 = vmul.f32 %v1845_v55, %v2342_v54  ;;  %1872 = vpow2.f32 %v2524_v16  ;;  %v827_v57 = vmul.f32 1.442695, %v700_v63 }
 0x131   :  { %v1849_v51 = vpop.eup %1848  ;;  %1294 = vst.msk [vmem:[%s2746_s3 + $0x40] sm:$0xf] %vm1277_vm2, %v1491_v21  ;;  %v1494_v47 = vpack.c.bf16 %v976_v25, %v976_v25  ;;  %v974_v48 = vmul.f32 %v1847_v44, %v2347_v0  ;;  %1874 = vpow2.f32 %v755_v6  ;;  %v759_v14 = vmul.f32 1.442695, %v666_v53 }
 0x132   :  { %v1851_v52 = vpop.eup %1850  ;;  %1326 = vst.msk [vmem:[%s2746_s3 + $0xc0] sm:$0xf] %vm1277_vm2, %v1523_v32  ;;  %v1526_v54 = vpack.c.bf16 %v1008_v5, %v1008_v5  ;;  %v1006_v16 = vmul.f32 %v1849_v51, %v2352_v29  ;;  %1876 = vpow2.f32 %v819_v45  ;;  %v823_v11 = vmul.f32 1.442695, %v698_v58 }
 0x133   :  { %v1853_v3 = vpop.eup %1852  ;;  %1297 = vst.msk [vmem:[%s2746_s3 + $0x4c] sm:$0xf] %vm1277_vm2, %v1494_v47  ;;  %v1492_v0 = vpack.c.bf16 %v974_v48, %v974_v48  ;;  %v979_v6 = vmul.f32 %v1851_v52, %v2362_v18  ;;  %1878 = vpow2.f32 %v751_v56 }
 0x134   :  { %v1855_v37 = vpop.eup %1854  ;;  %1329 = vst.msk [vmem:[%s2746_s3 + $0xcc] sm:$0xf] %vm1277_vm2, %v1526_v54  ;;  %v1524_v29 = vpack.c.bf16 %v1006_v16, %v1006_v16  ;;  %v1011_v45 = vmul.f32 %v1853_v3, %v2366_v24  ;;  %1880 = vpow2.f32 %v815_v12 }
 0x135   :  { %v1857_v17 = vpop.eup %1856  ;;  %1295 = vst.msk [vmem:[%s2746_s3 + $0x44] sm:$0xf] %vm1277_vm2, %v1492_v0  ;;  %v1497_v18 = vpack.c.bf16 %v979_v6, %v979_v6  ;;  %v977_v56 = vmul.f32 %v1855_v37, %v2370_v35  ;;  %1882 = vpow2.f32 %v761_v34 }
 0x136   :  { %v1859_v36 = vpop.eup %1858  ;;  %1327 = vst.msk [vmem:[%s2746_s3 + $0xc4] sm:$0xf] %vm1277_vm2, %v1524_v29  ;;  %v1529_v24 = vpack.c.bf16 %v1011_v45, %v1011_v45  ;;  %v1009_v12 = vmul.f32 %v1857_v17, %v2374_v40  ;;  %1884 = vpow2.f32 %v2555_v42 }
 0x137   :  { %v1861_v62 = vpop.eup %1860  ;;  %1300 = vst.msk [vmem:[%s2746_s3 + $0x58] sm:$0xf] %vm1277_vm2, %v1497_v18  ;;  %v1495_v35 = vpack.c.bf16 %v977_v56, %v977_v56  ;;  %v980_v34 = vmul.f32 %v1859_v36, %v2388_v19  ;;  %1886 = vpow2.f32 %v2558_v26 }
 0x138   :  { %v1863_v7 = vpop.eup %1862  ;;  %1332 = vst.msk [vmem:[%s2746_s3 + $0xd8] sm:$0xf] %vm1277_vm2, %v1529_v24  ;;  %v1527_v40 = vpack.c.bf16 %v1009_v12, %v1009_v12  ;;  %v1012_v42 = vmul.f32 %v1861_v62, %v2394_v30  ;;  %1888 = vpow2.f32 %v2565_v41 }
 0x139   :  { %v1865_v38 = vpop.eup %1864  ;;  %1298 = vst.msk [vmem:[%s2746_s3 + $0x50] sm:$0xf] %vm1277_vm2, %v1495_v35  ;;  %v1498_v19 = vpack.c.bf16 %v980_v34, %v980_v34  ;;  %v978_v26 = vmul.f32 %v1863_v7, %v2399_v27  ;;  %1890 = vpow2.f32 %v763_v50 }
 0x13a   :  { %v1867_v8 = vpop.eup %1866  ;;  %1330 = vst.msk [vmem:[%s2746_s3 + $0xd0] sm:$0xf] %vm1277_vm2, %v1527_v40  ;;  %v1530_v30 = vpack.c.bf16 %v1012_v42, %v1012_v42  ;;  %v1010_v41 = vmul.f32 %v1865_v38, %v2404_v39  ;;  %1892 = vpow2.f32 %v827_v57 }
 0x13b   :  { %v1869_v33 = vpop.eup %1868  ;;  %1301 = vst.msk [vmem:[%s2746_s3 + $0x5c] sm:$0xf] %vm1277_vm2, %v1498_v19  ;;  %v1496_v13 = vpack.c.bf16 %v978_v26, %v978_v26  ;;  %v855_v55 = vadd.f32 1.0, %v1867_v8  ;;  %1894 = vpow2.f32 %v759_v14 }
 0x13c   :  { %v1871_v27 = vpop.eup %1870  ;;  %1333 = vst.msk [vmem:[%s2746_s3 + $0xdc] sm:$0xf] %vm1277_vm2, %v1530_v30  ;;  %v1528_v21 = vpack.c.bf16 %v1010_v41, %v1010_v41  ;;  %v887_v25 = vadd.f32 1.0, %v1869_v33  ;;  %1896 = vpow2.f32 %v823_v11 }
 0x13d   :  { %v1873_v39 = vpop.eup %1872  ;;  %1299 = vst.msk [vmem:[%s2746_s3 + $0x54] sm:$0xf] %vm1277_vm2, %v1496_v13  ;;  %1898 = vrcp.f32 %v855_v55  ;;  %v853_v44 = vadd.f32 1.0, %v1871_v27 }
 0x13e   :  { %v1875_v32 = vpop.eup %1874  ;;  %1331 = vst.msk [vmem:[%s2746_s3 + $0xd4] sm:$0xf] %vm1277_vm2, %v1528_v21  ;;  %1900 = vrcp.f32 %v887_v25  ;;  %v885_v5 = vadd.f32 1.0, %v1873_v39 }
 0x13f   :  { %v1877_v51 = vpop.eup %1876  ;;  %1902 = vrcp.f32 %v853_v44  ;;  %v856_v47 = vadd.f32 1.0, %v1875_v32 }
 0x140   :  { %v1879_v48 = vpop.eup %1878  ;;  %1904 = vrcp.f32 %v885_v5  ;;  %v888_v22 = vadd.f32 1.0, %v1877_v51 }
 0x141   :  { %v1881_v52 = vpop.eup %1880  ;;  %1906 = vrcp.f32 %v856_v47  ;;  %v854_v54 = vadd.f32 1.0, %v1879_v48 }
 0x142   :  { %v1883_v16 = vpop.eup %1882  ;;  %1908 = vrcp.f32 %v888_v22  ;;  %v886_v63 = vadd.f32 1.0, %v1881_v52 }
 0x143   :  { %v1885_v3 = vpop.eup %1884  ;;  %1910 = vrcp.f32 %v854_v54  ;;  %v859_v0 = vadd.f32 1.0, %v1883_v16 }
 0x144   :  { %v1887_v6 = vpop.eup %1886  ;;  %1912 = vrcp.f32 %v886_v63  ;;  %v891_v53 = vadd.f32 1.0, %v1885_v3 }
 0x145   :  { %v1889_v37 = vpop.eup %1888  ;;  %1914 = vrcp.f32 %v859_v0  ;;  %v857_v29 = vadd.f32 1.0, %v1887_v6 }
 0x146   :  { %v1891_v45 = vpop.eup %1890  ;;  %1916 = vrcp.f32 %v891_v53  ;;  %v889_v58 = vadd.f32 1.0, %v1889_v37 }
 0x147   :  { %v1893_v17 = vpop.eup %1892  ;;  %1918 = vrcp.f32 %v857_v29  ;;  %v860_v18 = vadd.f32 1.0, %v1891_v45 }
 0x148   :  { %v1895_v56 = vpop.eup %1894  ;;  %1920 = vrcp.f32 %v889_v58  ;;  %v892_v50 = vadd.f32 1.0, %v1893_v17 }
 0x149   :  { %v1897_v36 = vpop.eup %1896  ;;  %1922 = vrcp.f32 %v860_v18  ;;  %v858_v24 = vadd.f32 1.0, %v1895_v56 }
 0x14a   :  { %v1899_v12 = vpop.eup %1898  ;;  %1924 = vrcp.f32 %v892_v50  ;;  %v890_v57 = vadd.f32 1.0, %v1897_v36 }
 0x14b   :  { %v1901_v62 = vpop.eup %1900  ;;  %v983_v35 = vmul.f32 %v1899_v12, %v2462_v43  ;;  %1926 = vrcp.f32 %v858_v24 }
 0x14c   :  { %v1903_v34 = vpop.eup %1902  ;;  %v1015_v14 = vmul.f32 %v1901_v62, %v2471_v59  ;;  %1928 = vrcp.f32 %v890_v57 }
 0x14d   :  { %v1905_v7 = vpop.eup %1904  ;;  %v1501_v40 = vpack.c.bf16 %v983_v35, %v983_v35  ;;  %v981_v42 = vmul.f32 %v1903_v34, %v2479_v4 }
 0x14e   :  { %v1907_v11 = vpop.eup %1906  ;;  %v1533_v38 = vpack.c.bf16 %v1015_v14, %v1015_v14  ;;  %v1013_v19 = vmul.f32 %v1905_v7, %v2487_v49 }
 0x14f   :  { %v1909_v26 = vpop.eup %1908  ;;  %1304 = vst.msk [vmem:[%s2746_s3 + $0x68] sm:$0xf] %vm1277_vm2, %v1501_v40  ;;  %v1499_v43 = vpack.c.bf16 %v981_v42, %v981_v42  ;;  %v984_v8 = vmul.f32 %v1907_v11, %v2512_v28 }
 0x150   :  { %v1911_v30 = vpop.eup %1910  ;;  %1336 = vst.msk [vmem:[%s2746_s3 + $0xe8] sm:$0xf] %vm1277_vm2, %v1533_v38  ;;  %v1531_v59 = vpack.c.bf16 %v1013_v19, %v1013_v19  ;;  %v1016_v4 = vmul.f32 %v1909_v26, %v2517_v46 }
 0x151   :  { %v1913_v41 = vpop.eup %1912  ;;  %1302 = vst.msk [vmem:[%s2746_s3 + $0x60] sm:$0xf] %vm1277_vm2, %v1499_v43  ;;  %v1502_v49 = vpack.c.bf16 %v984_v8, %v984_v8  ;;  %v982_v33 = vmul.f32 %v1911_v30, %v2522_v60 }
 0x152   :  { %v1915_v13 = vpop.eup %1914  ;;  %1334 = vst.msk [vmem:[%s2746_s3 + $0xe0] sm:$0xf] %vm1277_vm2, %v1531_v59  ;;  %v1534_v28 = vpack.c.bf16 %v1016_v4, %v1016_v4  ;;  %v1014_v55 = vmul.f32 %v1913_v41, %v2532_v61 }
 0x153   :  { %v1917_v27 = vpop.eup %1916  ;;  %1305 = vst.msk [vmem:[%s2746_s3 + $0x6c] sm:$0xf] %vm1277_vm2, %v1502_v49  ;;  %v1500_v46 = vpack.c.bf16 %v982_v33, %v982_v33  ;;  %v987_v21 = vmul.f32 %v1915_v13, %v2536_v31 }
 0x154   :  { %v1919_v25 = vpop.eup %1918  ;;  %1337 = vst.msk [vmem:[%s2746_s3 + $0xec] sm:$0xf] %vm1277_vm2, %v1534_v28  ;;  %v1532_v60 = vpack.c.bf16 %v1014_v55, %v1014_v55  ;;  %v1019_v39 = vmul.f32 %v1917_v27, %v2540_v1 }
 0x155   :  { %v1921_v44 = vpop.eup %1920  ;;  %1303 = vst.msk [vmem:[%s2746_s3 + $0x64] sm:$0xf] %vm1277_vm2, %v1500_v46  ;;  %v1505_v61 = vpack.c.bf16 %v987_v21, %v987_v21  ;;  %v985_v32 = vmul.f32 %v1919_v25, %v2544_v10 }
 0x156   :  { %v1923_v5 = vpop.eup %1922  ;;  %1335 = vst.msk [vmem:[%s2746_s3 + $0xe4] sm:$0xf] %vm1277_vm2, %v1532_v60  ;;  %v1537_v31 = vpack.c.bf16 %v1019_v39, %v1019_v39  ;;  %v1017_v51 = vmul.f32 %v1921_v44, %v2548_v9 }
 0x157   :  { %v1925_v47 = vpop.eup %1924  ;;  %1308 = vst.msk [vmem:[%s2746_s3 + $0x78] sm:$0xf] %vm1277_vm2, %v1505_v61  ;;  %v1503_v1 = vpack.c.bf16 %v985_v32, %v985_v32  ;;  %v988_v48 = vmul.f32 %v1923_v5, %v2561_v2 }
 0x158   :  { %v1927_v22 = vpop.eup %1926  ;;  %1340 = vst.msk [vmem:[%s2746_s3 + $0xf8] sm:$0xf] %vm1277_vm2, %v1537_v31  ;;  %v1535_v10 = vpack.c.bf16 %v1017_v51, %v1017_v51  ;;  %v1020_v52 = vmul.f32 %v1925_v47, %v2570_v20 }
 0x159   :  { %v1929_v54 = vpop.eup %1928  ;;  %1306 = vst.msk [vmem:[%s2746_s3 + $0x70] sm:$0xf] %vm1277_vm2, %v1503_v1  ;;  %v1506_v9 = vpack.c.bf16 %v988_v48, %v988_v48  ;;  %v986_v16 = vmul.f32 %v1927_v22, %v2579_v15 }
 0x15a   :  { %1338 = vst.msk [vmem:[%s2746_s3 + $0xf0] sm:$0xf] %vm1277_vm2, %v1535_v10  ;;  %v1538_v2 = vpack.c.bf16 %v1020_v52, %v1020_v52  ;;  %v1018_v63 = vmul.f32 %v1929_v54, %v2588_v23 }
 0x15b   :  { %1309 = vst.msk [vmem:[%s2746_s3 + $0x7c] sm:$0xf] %vm1277_vm2, %v1506_v9  ;;  %v1504_v20 = vpack.c.bf16 %v986_v16, %v986_v16 }
 0x15c   :  { %1341 = vst.msk [vmem:[%s2746_s3 + $0xfc] sm:$0xf] %vm1277_vm2, %v1538_v2  ;;  %v1536_v15 = vpack.c.bf16 %v1018_v63, %v1018_v63 }
 0x15d   :  { %1307 = vst.msk [vmem:[%s2746_s3 + $0x74] sm:$0xf] %vm1277_vm2, %v1504_v20 }
 0x15e   :  { %1339 = vst.msk [vmem:[%s2746_s3 + $0xf4] sm:$0xf] %vm1277_vm2, %v1536_v15 }

// kernel: spp_forward.3
= control target key start
LH: loop header
LB: loop body
LE: loop exit
PB: predicated region body
PF: predicated region fallthrough
CT: control target
= control target key end

     0   :  { %s8075_s12 = smov 0   ;;  %s8077_s13 = smov 0   ;;  %s10830_s0 = inlined_call_operand.vmem [shape: bf16[2,16,16,2], index: 0, kind: input, shape index: {}]   ;;  %s10831_s1 = inlined_call_operand.vmem [shape: bf16[4,2,8], index: 1, kind: input, shape index: {}]   ;;  %s10832_s2 = inlined_call_operand.vmem [shape: f32[1,8], index: 2, kind: input, shape index: {}]   ;;  %s10833_s3 = inlined_call_operand.vmem [shape: bf16[2,256,8], index: 3, kind: output, shape index: {}]  }
   0x1   :  { %s8079_s14 = smov 0  }
   0x2 LB: > { %s25_s15 = sadd.s32 1, %s8047_s13  ;;  %p7270_p0 = scmp.ge.s32.totalorder %s8051_s14, 1  ;;  %s8051_s14 = sphi %s8079_s14, %s13_s14   ;;  %s8047_s13 = sphi %s8077_s13, %s10963_s13   ;;  %s8043_s12 = sphi %s8075_s12, %s10962_s12  }
   0x3   : > { %p27_p1 = scmp.ge.s32.totalorder %s25_s15, 2  ;;  %p162_p2 = scmp.lt.s32.totalorder %s8051_s14, 3 }
   0x5   : > { %s10965_s15 = smov (%p27_p1, %s25_s15), 0  ;;  %p163_p3 = pnand %p7270_p0, %p162_p2 }
   0x7   : > { %166 = sbr.rel (%p163_p3) target bundleno = 1071 (0x42f), region = 32 }
   0xc   : > { %v413_v0 = vld [vmem:[%s10831_s1] sm:$0x1]  ;;  %vm543_vm0 = vcmask 1040384   ;;  %p192_p4 = scmp.lt.s32.totalorder %s8043_s12, 1  ;;  %vm247_vm1 = vcmask 11264   ;;  %vm252_vm2 = vcmask 8192  }
   0xd   : > { %7855 = vmatprep.subr.msk.bf16.mxu0 %vm543_vm0, %v413_v0  ;;  %v545_v1 = vsel %vm543_vm0, %v413_v0, 0  ;;  %v8101_v2 = vld [vmem:[%s10831_s1 + $0x2] sm:$0x1]  ;;  %v8053_v3 = vmov 4286578559   ;;  %vm494_vm3 = vcmask 15360  }
   0xe   : > { %7720 = vmatpush3.bf16.msra.mxu0 %v545_v1  ;;  %s10967_s12 = smov (!%p192_p4, %s8043_s12), 1  ;;  %261 = vst.msk [vmem:[#allocation2 + $0x30] sm:$0xf] %vm247_vm1, %v8053_v3  ;;  %262 = vst.msk [vmem:[#allocation2 + $0x34] sm:$0xf] %vm247_vm1, %v8053_v3  ;;  %v4459_v7 = vsel %vm543_vm0, %v8101_v2, 0 }
   0xf   : > { %249 = vst.msk [vmem:[#allocation2 + $0x4] sm:$0xf] %vm247_vm1, %v8053_v3  ;;  %250 = vst.msk [vmem:[#allocation2 + $0x8] sm:$0xf] %vm247_vm1, %v8053_v3  ;;  %v7307_v4 = vld [vmem:[%s10831_s1 + $0x1] sm:$0x1]  ;;  %7857 = vmatprep.subr.msk.bf16.mxu0 %vm543_vm0, %v8101_v2 }
  0x10   : > { %251 = vst.msk [vmem:[#allocation2 + $0xc] sm:$0xf] %vm247_vm1, %v8053_v3  ;;  %255 = vst.msk [vmem:[#allocation2 + $0x18] sm:$0xf] %vm247_vm1, %v8053_v3  ;;  %7856 = vmatprep.subr.msk.bf16.mxu1 %vm543_vm0, %v7307_v4  ;;  %v2386_v5 = vsel %vm543_vm0, %v7307_v4, 0  ;;  %s7521_s24 = sshll.u32 %s10967_s12, 7 }
  0x11   : > { %256 = vst.msk [vmem:[#allocation2 + $0x1c] sm:$0xf] %vm247_vm1, %v8053_v3  ;;  %257 = vst.msk [vmem:[#allocation2 + $0x20] sm:$0xf] %vm247_vm1, %v8053_v3  ;;  %v7469_v6 = vld [vmem:[%s10831_s1 + $0x3] sm:$0x1]  ;;  %7754 = vmatpush3.bf16.msra.mxu1 %v2386_v5  ;;  %s8281_s27 = scalar_lea.vmem %s10830_s0, %s7521_s24  ;;  %s10644_s5 = scalar_lea.vmem %s10833_s3, %s7521_s24 }
  0x12   : > { %260 = vst.msk [vmem:[#allocation2 + $0x2c] sm:$0xf] %vm247_vm1, %v8053_v3  ;;  %265 = vst.msk [vmem:[#allocation2 + $0x40] sm:$0xf] %vm247_vm1, %v8053_v3  ;;  %7858 = vmatprep.subr.msk.bf16.mxu1 %vm543_vm0, %v7469_v6  ;;  %v349_v8 = vld [vmem:[%s8281_s27] sm:$0xf] }
  0x13   : > { %266 = vst.msk [vmem:[#allocation2 + $0x44] sm:$0xf] %vm247_vm1, %v8053_v3  ;;  %267 = vst.msk [vmem:[#allocation2 + $0x48] sm:$0xf] %vm247_vm1, %v8053_v3  ;;  %v350_v9 = vld [vmem:[%s8281_s27 + $0x4] sm:$0xf] }
  0x14   : > { %270 = vst.msk [vmem:[#allocation2 + $0x54] sm:$0xf] %vm247_vm1, %v8053_v3  ;;  %271 = vst.msk [vmem:[#allocation2 + $0x58] sm:$0xf] %vm247_vm1, %v8053_v3  ;;  %v351_v10 = vld [vmem:[%s8281_s27 + $0x8] sm:$0xf]  ;;  %v7275_v11 = vcombine.low %v349_v8, %v350_v9 }
  0x15   : > { %272 = vst.msk [vmem:[#allocation2 + $0x5c] sm:$0xf] %vm247_vm1, %v8053_v3  ;;  %275 = vst.msk [vmem:[#allocation2 + $0x68] sm:$0xf] %vm247_vm1, %v8053_v3  ;;  %v352_v12 = vld [vmem:[%s8281_s27 + $0xc] sm:$0xf] }
  0x16   : > { %276 = vst.msk [vmem:[#allocation2 + $0x6c] sm:$0xf] %vm247_vm1, %v8053_v3  ;;  %277 = vst.msk [vmem:[#allocation2 + $0x70] sm:$0xf] %vm247_vm1, %v8053_v3  ;;  %v353_v13 = vld [vmem:[%s8281_s27 + $0x10] sm:$0xf]  ;;  %v7276_v15 = vcombine.low %v351_v10, %v352_v12  ;;  %7721 = vmatprep.mubr.msk.bf16.mxu0 %vm494_vm3, %v7275_v11 }
  0x17   : > { %280 = vst.msk [vmem:[#allocation2 + $0x7c] sm:$0xf] %vm247_vm1, %v8053_v3  ;;  %281 = vst.msk [vmem:[#allocation2 + $0x80] sm:$0xf] %vm247_vm1, %v8053_v3  ;;  %v354_v14 = vld [vmem:[%s8281_s27 + $0x14] sm:$0xf] }
  0x18   : > { %282 = vst.msk [vmem:[#allocation2 + $0x84] sm:$0xf] %vm247_vm1, %v8053_v3  ;;  %285 = vst.msk [vmem:[#allocation2 + $0x90] sm:$0xf] %vm247_vm1, %v8053_v3  ;;  %v7277_v16 = vcombine.low %v353_v13, %v354_v14  ;;  %v355_v17 = vld [vmem:[%s8281_s27 + $0x18] sm:$0xf]  ;;  %7722 = vmatmul.mubr.msk.bf16.vlgmr.msra.gmra.mxu0 %vm494_vm3, %v7276_v15 }
  0x19   : > { %286 = vst.msk [vmem:[#allocation2 + $0x94] sm:$0xf] %vm247_vm1, %v8053_v3  ;;  %287 = vst.msk [vmem:[#allocation2 + $0x98] sm:$0xf] %vm247_vm1, %v8053_v3  ;;  %v356_v18 = vld [vmem:[%s8281_s27 + $0x1c] sm:$0xf]  ;;  %7788 = vmatpush3.bf16.msra.mxu0 %v4459_v7 }
  0x1a   : > { %290 = vst.msk [vmem:[#allocation2 + $0xa4] sm:$0xf] %vm247_vm1, %v8053_v3  ;;  %291 = vst.msk [vmem:[#allocation2 + $0xa8] sm:$0xf] %vm247_vm1, %v8053_v3  ;;  %v357_v19 = vld [vmem:[%s8281_s27 + $0x20] sm:$0xf]  ;;  %7725 = vmatprep.mubr.msk.bf16.mxu0 %vm494_vm3, %v7277_v16  ;;  %v7278_v27 = vcombine.low %v355_v17, %v356_v18 }
  0x1b   : > { %292 = vst.msk [vmem:[#allocation2 + $0xac] sm:$0xf] %vm247_vm1, %v8053_v3  ;;  %295 = vst.msk [vmem:[#allocation2 + $0xb8] sm:$0xf] %vm247_vm1, %v8053_v3  ;;  %v358_v20 = vld [vmem:[%s8281_s27 + $0x24] sm:$0xf] }
  0x1c   : > { %296 = vst.msk [vmem:[#allocation2 + $0xbc] sm:$0xf] %vm247_vm1, %v8053_v3  ;;  %297 = vst.msk [vmem:[#allocation2 + $0xc0] sm:$0xf] %vm247_vm1, %v8053_v3  ;;  %v8307_v21 = vld [vmem:[%s8281_s27 + $0x28] sm:$0xf]  ;;  %v7279_v28 = vcombine.low %v357_v19, %v358_v20 }
  0x1d   : > { %300 = vst.msk [vmem:[#allocation2 + $0xcc] sm:$0xf] %vm247_vm1, %v8053_v3  ;;  %301 = vst.msk [vmem:[#allocation2 + $0xd0] sm:$0xf] %vm247_vm1, %v8053_v3  ;;  %v8310_v22 = vld [vmem:[%s8281_s27 + $0x2c] sm:$0xf] }
  0x1e   : > { %302 = vst.msk [vmem:[#allocation2 + $0xd4] sm:$0xf] %vm247_vm1, %v8053_v3  ;;  %305 = vst.msk [vmem:[#allocation2 + $0xe0] sm:$0xf] %vm247_vm1, %v8053_v3  ;;  %v8319_v23 = vld [vmem:[%s8281_s27 + $0x30] sm:$0xf]  ;;  %v7280_v55 = vcombine.low %v8307_v21, %v8310_v22 }
  0x1f   : > { %306 = vst.msk [vmem:[#allocation2 + $0xe4] sm:$0xf] %vm247_vm1, %v8053_v3  ;;  %307 = vst.msk [vmem:[#allocation2 + $0xe8] sm:$0xf] %vm247_vm1, %v8053_v3  ;;  %v8322_v24 = vld [vmem:[%s8281_s27 + $0x34] sm:$0xf] }
  0x20   : > { %310 = vst.msk [vmem:[#allocation2 + $0xf4] sm:$0xf] %vm247_vm1, %v8053_v3  ;;  %311 = vst.msk [vmem:[#allocation2 + $0xf8] sm:$0xf] %vm247_vm1, %v8053_v3  ;;  %v8325_v25 = vld [vmem:[%s8281_s27 + $0x38] sm:$0xf]  ;;  %7726 = vmatmul.mubr.msk.bf16.gmra.mxu0 %vm494_vm3, %v7278_v27  ;;  %v7281_v61 = vcombine.low %v8319_v23, %v8322_v24 }
  0x21   : > { %312 = vst.msk [vmem:[#allocation2 + $0xfc] sm:$0xf] %vm247_vm1, %v8053_v3  ;;  %315 = vst.msk [vmem:[#allocation2 + $0x108] sm:$0xf] %vm247_vm1, %v8053_v3  ;;  %v8333_v26 = vld [vmem:[%s8281_s27 + $0x3c] sm:$0xf]  ;;  %7729 = vmatprep.mubr.msk.bf16.mxu0 %vm494_vm3, %v7279_v28 }
  0x22   : > { %316 = vst.msk [vmem:[#allocation2 + $0x10c] sm:$0xf] %vm247_vm1, %v8053_v3  ;;  %317 = vst.msk [vmem:[#allocation2 + $0x110] sm:$0xf] %vm247_vm1, %v8053_v3  ;;  %v807_v29 = vld [vmem:[#allocation2 + $0x4] sm:$0xf]  ;;  %v7282_v63 = vcombine.low %v8325_v25, %v8333_v26 }
  0x23   : > { %320 = vst.msk [vmem:[#allocation2 + $0x11c] sm:$0xf] %vm247_vm1, %v8053_v3  ;;  %321 = vst.msk [vmem:[#allocation2 + $0x120] sm:$0xf] %vm247_vm1, %v8053_v3  ;;  %v808_v30 = vld [vmem:[#allocation2 + $0x8] sm:$0xf] }
  0x24   : > { %322 = vst.msk [vmem:[#allocation2 + $0x124] sm:$0xf] %vm247_vm1, %v8053_v3  ;;  %325 = vst.msk [vmem:[#allocation2 + $0x130] sm:$0xf] %vm247_vm1, %v8053_v3  ;;  %v8340_v31 = vsel %vm543_vm0, %v7469_v6, 0  ;;  %vm1498_vm4 = vcmask 1046528  }
  0x25   : > { %326 = vst.msk [vmem:[#allocation2 + $0x134] sm:$0xf] %vm247_vm1, %v8053_v3  ;;  %327 = vst.msk [vmem:[#allocation2 + $0x138] sm:$0xf] %vm247_vm1, %v8053_v3  ;;  %v809_v32 = vld [vmem:[#allocation2 + $0xc] sm:$0xf] }
  0x26   : > { %330 = vst.msk [vmem:[#allocation2 + $0x144] sm:$0xf] %vm247_vm1, %v8053_v3  ;;  %331 = vst.msk [vmem:[#allocation2 + $0x148] sm:$0xf] %vm247_vm1, %v8053_v3  ;;  %v872_v34 = vld [vmem:[#allocation2 + $0x18] sm:$0xf] }
  0x27   : > { %332 = vst.msk [vmem:[#allocation2 + $0x14c] sm:$0xf] %vm247_vm1, %v8053_v3  ;;  %335 = vst.msk [vmem:[#allocation2 + $0x158] sm:$0xf] %vm247_vm1, %v8053_v3  ;;  %v873_v35 = vld [vmem:[#allocation2 + $0x1c] sm:$0xf]  ;;  %v936_v52 = vmax.bf16 %v872_v34, %v807_v29 }
  0x28   : > { %336 = vst.msk [vmem:[#allocation2 + $0x15c] sm:$0xf] %vm247_vm1, %v8053_v3  ;;  %337 = vst.msk [vmem:[#allocation2 + $0x160] sm:$0xf] %vm247_vm1, %v8053_v3  ;;  %v874_v36 = vld [vmem:[#allocation2 + $0x20] sm:$0xf]  ;;  %v937_v53 = vmax.bf16 %v873_v35, %v808_v30  ;;  %7730 = vmatmul.mubr.msk.bf16.gmra.mxu0 %vm494_vm3, %v7280_v55 }
  0x29   : > { %340 = vst.msk [vmem:[#allocation2 + $0x16c] sm:$0xf] %vm247_vm1, %v8053_v3  ;;  %341 = vst.msk [vmem:[#allocation2 + $0x170] sm:$0xf] %vm247_vm1, %v8053_v3  ;;  %v938_v54 = vmax.bf16 %v874_v36, %v809_v32  ;;  %v8390_v1 = vld [vmem:[#allocation2 + $0x20] sm:$0xf]  ;;  %7733 = vmatprep.mubr.msk.bf16.mxu0 %vm494_vm3, %v7281_v61 }
  0x2a   : > { %342 = vst.msk [vmem:[#allocation2 + $0x174] sm:$0xf] %vm247_vm1, %v8053_v3  ;;  %345 = vst.msk [vmem:[#allocation2 + $0x180] sm:$0xf] %vm247_vm1, %v8053_v3  ;;  %v1000_v6 = vld [vmem:[#allocation2 + $0x2c] sm:$0xf] }
  0x2b   : > { %346 = vst.msk [vmem:[#allocation2 + $0x184] sm:$0xf] %vm247_vm1, %v8053_v3  ;;  %347 = vst.msk [vmem:[#allocation2 + $0x188] sm:$0xf] %vm247_vm1, %v8053_v3  ;;  %v1064_v16 = vmax.bf16 %v1000_v6, %v936_v52  ;;  %vm1675_vm5 = vcmask 1045504   ;;  %vm1836_vm6 = vcmask 1044480  }
  0x2c   : > { %253 = vst.msk [vmem:[#allocation2 + $0x10] sm:$0x1] %vm252_vm2, %v8053_v3  ;;  %258 = vst.msk [vmem:[#allocation2 + $0x24] sm:$0x1] %vm252_vm2, %v8053_v3  ;;  %v1258_v27 = vld [vmem:[#allocation2 + $0x54] sm:$0xf] }
  0x2d   : > { %263 = vst.msk [vmem:[#allocation2 + $0x38] sm:$0x1] %vm252_vm2, %v8053_v3  ;;  %268 = vst.msk [vmem:[#allocation2 + $0x4c] sm:$0x1] %vm252_vm2, %v8053_v3  ;;  %vm2013_vm7 = vcmask 1043456   ;;  %vm2710_vm8 = vcmask 1044484  }
  0x2e   : > { %273 = vst.msk [vmem:[#allocation2 + $0x60] sm:$0x1] %vm252_vm2, %v8053_v3  ;;  %278 = vst.msk [vmem:[#allocation2 + $0x74] sm:$0x1] %vm252_vm2, %v8053_v3  ;;  %v812_v6 = vld [vmem:[#allocation2 + $0x1c] sm:$0xf] }
  0x2f   : > { %283 = vst.msk [vmem:[#allocation2 + $0x88] sm:$0x1] %vm252_vm2, %v8053_v3  ;;  %288 = vst.msk [vmem:[#allocation2 + $0x9c] sm:$0x1] %vm252_vm2, %v8053_v3  ;;  %vm214_vm10 = vcmask 64512   ;;  %vm7150_vm11 = vcmask 60416  }
  0x30   : > { %293 = vst.msk [vmem:[#allocation2 + $0xb0] sm:$0x1] %vm252_vm2, %v8053_v3  ;;  %298 = vst.msk [vmem:[#allocation2 + $0xc4] sm:$0x1] %vm252_vm2, %v8053_v3  ;;  %7734 = vmatmul.mubr.msk.bf16.gmra.mxu0 %vm494_vm3, %v7282_v63 }
  0x31   : > { %303 = vst.msk [vmem:[#allocation2 + $0xd8] sm:$0x1] %vm252_vm2, %v8053_v3  ;;  %308 = vst.msk [vmem:[#allocation2 + $0xec] sm:$0x1] %vm252_vm2, %v8053_v3 }
  0x32   : > { %313 = vst.msk [vmem:[#allocation2 + $0x100] sm:$0x1] %vm252_vm2, %v8053_v3  ;;  %318 = vst.msk [vmem:[#allocation2 + $0x114] sm:$0x1] %vm252_vm2, %v8053_v3 }
  0x33   : > { %323 = vst.msk [vmem:[#allocation2 + $0x128] sm:$0x1] %vm252_vm2, %v8053_v3  ;;  %328 = vst.msk [vmem:[#allocation2 + $0x13c] sm:$0x1] %vm252_vm2, %v8053_v3  ;;  %v810_v33 = vld [vmem:[#allocation2 + $0x10] sm:$0x1] }
  0x34   : > { %333 = vst.msk [vmem:[#allocation2 + $0x150] sm:$0x1] %vm252_vm2, %v8053_v3  ;;  %338 = vst.msk [vmem:[#allocation2 + $0x164] sm:$0x1] %vm252_vm2, %v8053_v3  ;;  %v875_v37 = vld [vmem:[#allocation2 + $0x24] sm:$0x1] }
  0x35   : > { %343 = vst.msk [vmem:[#allocation2 + $0x178] sm:$0x1] %vm252_vm2, %v8053_v3  ;;  %348 = vst.msk [vmem:[#allocation2 + $0x18c] sm:$0x1] %vm252_vm2, %v8053_v3  ;;  %v939_v60 = vmax.bf16 %v875_v37, %v810_v33  ;;  %v1003_v15 = vld [vmem:[#allocation2 + $0x38] sm:$0x1] }
  0x36   : > { %775 = vst.msk [vmem:[#allocation2 + $0x30] sm:$0xf] %vm247_vm1, %v349_v8  ;;  %776 = vst.msk [vmem:[#allocation2 + $0x34] sm:$0xf] %vm247_vm1, %v350_v9  ;;  %v1261_v37 = vld [vmem:[#allocation2 + $0x60] sm:$0x1] }
  0x37   : > { %777 = vst.msk [vmem:[#allocation2 + $0x44] sm:$0xf] %vm247_vm1, %v351_v10  ;;  %778 = vst.msk [vmem:[#allocation2 + $0x48] sm:$0xf] %vm247_vm1, %v352_v12  ;;  %v814_v61 = vld [vmem:[#allocation2 + $0x24] sm:$0x1] }
  0x38   : > { %779 = vst.msk [vmem:[#allocation2 + $0x58] sm:$0xf] %vm247_vm1, %v353_v13  ;;  %780 = vst.msk [vmem:[#allocation2 + $0x5c] sm:$0xf] %vm247_vm1, %v354_v14  ;;  %v1007_v29 = vld [vmem:[#allocation2 + $0x4c] sm:$0x1] }
  0x39   : > { %781 = vst.msk [vmem:[#allocation2 + $0x6c] sm:$0xf] %vm247_vm1, %v355_v17  ;;  %782 = vst.msk [vmem:[#allocation2 + $0x70] sm:$0xf] %vm247_vm1, %v356_v18  ;;  %v1136_v28 = vld [vmem:[#allocation2 + $0x60] sm:$0x1] }
  0x3a   : > { %783 = vst.msk [vmem:[#allocation2 + $0x80] sm:$0xf] %vm247_vm1, %v357_v19  ;;  %784 = vst.msk [vmem:[#allocation2 + $0x84] sm:$0xf] %vm247_vm1, %v358_v20  ;;  %v1129_v19 = vld [vmem:[#allocation2 + $0x40] sm:$0xf] }
  0x3b   : > { %785 = vst.msk [vmem:[#allocation2 + $0x94] sm:$0xf] %vm247_vm1, %v8307_v21  ;;  %786 = vst.msk [vmem:[#allocation2 + $0x98] sm:$0xf] %vm247_vm1, %v8310_v22  ;;  %v1067_v22 = vmax.bf16 %v1003_v15, %v939_v60  ;;  %v1193_v32 = vmax.bf16 %v1129_v19, %v1064_v16  ;;  %v811_v60 = vld [vmem:[#allocation2 + $0x18] sm:$0xf] }
  0x3c   : > { %787 = vst.msk [vmem:[#allocation2 + $0xa8] sm:$0xf] %vm247_vm1, %v8319_v23  ;;  %788 = vst.msk [vmem:[#allocation2 + $0xac] sm:$0xf] %vm247_vm1, %v8322_v24  ;;  %v1132_v24 = vld [vmem:[#allocation2 + $0x4c] sm:$0x1] }
  0x3d   : > { %789 = vst.msk [vmem:[#allocation2 + $0xbc] sm:$0xf] %vm247_vm1, %v8325_v25  ;;  %790 = vst.msk [vmem:[#allocation2 + $0xc0] sm:$0xf] %vm247_vm1, %v8333_v26  ;;  %v8392_v2 = vld [vmem:[#allocation2 + $0x34] sm:$0xf]  ;;  %v1196_v55 = vmax.bf16 %v1132_v24, %v1067_v22 }
  0x3e   : > { %v8394_v3 = vld [vmem:[#allocation2 + $0x34] sm:$0xf]  ;;  %v8396_v4 = vld [vmem:[#allocation2 + $0x48] sm:$0xf]  ;;  %v8398_v5 = vld [vmem:[#allocation2 + $0x30] sm:$0xf] }
  0x3f   : > { %v8343_v38 = vld [vmem:[#allocation2 + $0x58] sm:$0xf]  ;;  %v8345_v39 = vld [vmem:[#allocation2 + $0x5c] sm:$0xf]  ;;  %v1001_v7 = vld [vmem:[#allocation2 + $0x30] sm:$0xf] }
  0x40   : > { %v8347_v40 = vld [vmem:[#allocation2 + $0x6c] sm:$0xf]  ;;  %v8349_v41 = vld [vmem:[#allocation2 + $0x70] sm:$0xf]  ;;  %v1002_v8 = vld [vmem:[#allocation2 + $0x34] sm:$0xf]  ;;  %v1065_v17 = vmax.bf16 %v1001_v7, %v937_v53  ;;  %v942_v53 = vmax.bf16 %v8394_v3, %v8390_v1  ;;  %v941_v1 = vmax.bf16 %v8398_v5, %v812_v6  ;;  %v1325_v3 = vmax.bf16 %v1261_v37, %v1196_v55 }
  0x41   : > { %v8351_v42 = vld [vmem:[#allocation2 + $0x6c] sm:$0xf]  ;;  %v8353_v43 = vld [vmem:[#allocation2 + $0x70] sm:$0xf]  ;;  %v8356_v44 = vld [vmem:[#allocation2 + $0x80] sm:$0xf]  ;;  %v1066_v18 = vmax.bf16 %v1002_v8, %v938_v54  ;;  %v1322_v8 = vmax.bf16 %v1258_v27, %v1193_v32 }
  0x42   : > { %v8358_v45 = vld [vmem:[#allocation2 + $0x80] sm:$0xf]  ;;  %v8360_v46 = vld [vmem:[#allocation2 + $0x84] sm:$0xf]  ;;  %v8364_v48 = vld [vmem:[#allocation2 + $0x94] sm:$0xf]  ;;  %v1389_v52 = vunpack.c.l.bf16 %v1325_v3 }
  0x43   : > { %v8362_v47 = vld [vmem:[#allocation2 + $0x84] sm:$0xf]  ;;  %v8366_v49 = vld [vmem:[#allocation2 + $0x98] sm:$0xf]  ;;  %v8368_v50 = vld [vmem:[#allocation2 + $0x94] sm:$0xf]  ;;  %v1386_v27 = vunpack.c.l.bf16 %v1322_v8 }
  0x44   : > { %v8370_v51 = vld [vmem:[#allocation2 + $0x98] sm:$0xf]  ;;  %v8374_v56 = vld [vmem:[#allocation2 + $0xa8] sm:$0xf]  ;;  %v8378_v58 = vld [vmem:[#allocation2 + $0xac] sm:$0xf] }
  0x45   : > { %10838 = vst [vmem:[#allocation4_spill] sm:$0xff] %v8374_v56  ;;  %v8376_v57 = vld [vmem:[#allocation2 + $0xa8] sm:$0xf]  ;;  %v8380_v59 = vld [vmem:[#allocation2 + $0xbc] sm:$0xf]  ;;  %v1499_v55 = vrot.slane %v1386_v27, 1  ;;  %vm8470_vm9 = vmor %vm543_vm0, %vm2710_vm8 }
  0x46   : > { %10839 = vst [vmem:[#allocation5_spill] sm:$0xff] %v8380_v59  ;;  %v8384_v62 = vld [vmem:[#allocation2 + $0xac] sm:$0xf]  ;;  %v8388_v0 = vld [vmem:[#allocation2 + $0xc0] sm:$0xf]  ;;  %v2017_v11 = vrot.slane %v1389_v52, 4 }
  0x47   : > { %10840 = vst [vmem:[#allocation6_spill] sm:$0xff] %v8384_v62  ;;  %10841 = vst [vmem:[#allocation7_spill] sm:$0xff] %v8388_v0  ;;  %v8408_v13 = vld [vmem:[#allocation2 + $0x58] sm:$0xf]  ;;  %v8410_v14 = vld [vmem:[#allocation2 + $0x5c] sm:$0xf] }
  0x48   : > { %v1130_v20 = vld [vmem:[#allocation2 + $0x44] sm:$0xf]  ;;  %v1131_v23 = vld [vmem:[#allocation2 + $0x48] sm:$0xf]  ;;  %v1259_v35 = vld [vmem:[#allocation2 + $0x58] sm:$0xf] }
  0x49   : > { %v1194_v33 = vmax.bf16 %v1130_v20, %v1065_v17  ;;  %v1195_v34 = vmax.bf16 %v1131_v23, %v1066_v18  ;;  %v1260_v36 = vld [vmem:[#allocation2 + $0x5c] sm:$0xf]  ;;  %v8430_v17 = vld [vmem:[#allocation2 + $0x44] sm:$0xf]  ;;  %v8432_v18 = vld [vmem:[#allocation2 + $0x48] sm:$0xf] }
  0x4a   : > { %v876_v19 = vld [vmem:[#allocation2 + $0x2c] sm:$0xf]  ;;  %v879_v20 = vld [vmem:[#allocation2 + $0x38] sm:$0x1]  ;;  %v1004_v23 = vld [vmem:[#allocation2 + $0x40] sm:$0xf] }
  0x4b   : > { %v1323_v15 = vmax.bf16 %v1259_v35, %v1194_v33  ;;  %v1324_v16 = vmax.bf16 %v1260_v36, %v1195_v34  ;;  %v940_v22 = vmax.bf16 %v876_v19, %v811_v60  ;;  %v943_v34 = vmax.bf16 %v879_v20, %v814_v61  ;;  %v1005_v35 = vld [vmem:[#allocation2 + $0x44] sm:$0xf]  ;;  %v1006_v36 = vld [vmem:[#allocation2 + $0x48] sm:$0xf]  ;;  %v1135_v25 = vld [vmem:[#allocation2 + $0x5c] sm:$0xf] }
  0x4c   : > { %v1069_v5 = vmax.bf16 %v1005_v35, %v941_v1  ;;  %v1070_v37 = vmax.bf16 %v1006_v36, %v942_v53  ;;  %v1840_v53 = vrot.slane %v1389_v52, 3  ;;  %v365_v21 = vld [vmem:[%s8281_s27 + $0x40] sm:$0xf]  ;;  %v366_v12 = vld [vmem:[%s8281_s27 + $0x44] sm:$0xf] }
  0x4d   : > { %v8439_v32 = vunpack.c.l.bf16 %v1323_v15  ;;  %v1388_v33 = vunpack.c.l.bf16 %v1324_v16  ;;  %v1068_v30 = vmax.bf16 %v1004_v23, %v940_v22  ;;  %v1133_v16 = vld [vmem:[#allocation2 + $0x54] sm:$0xf]  ;;  %v1134_v23 = vld [vmem:[#allocation2 + $0x58] sm:$0xf]  ;;  %791 = vst.msk [vmem:[#allocation2 + $0xd0] sm:$0xf] %vm247_vm1, %v365_v21 }
  0x4e   : > { %792 = vst.msk [vmem:[#allocation2 + $0xd4] sm:$0xf] %vm247_vm1, %v366_v12  ;;  %v367_v10 = vld [vmem:[%s8281_s27 + $0x48] sm:$0xf]  ;;  %v1263_v24 = vld [vmem:[#allocation2 + $0x6c] sm:$0xf] }
  0x4f   : > { %v1500_v60 = vrot.slane %v8439_v32, 1  ;;  %v1502_v6 = vrot.slane %v1388_v33, 1  ;;  %v1676_v19 = vrot.slane %v8439_v32, 2  ;;  %v1677_v61 = vrot.slane %v1388_v33, 2  ;;  %v1262_v7 = vld [vmem:[#allocation2 + $0x68] sm:$0xf] }
  0x50   : > { %v1837_v8 = vrot.slane %v8439_v32, 3  ;;  %v1838_v15 = vrot.slane %v1388_v33, 3  ;;  %v2014_v22 = vrot.slane %v8439_v32, 4  ;;  %v1197_v9 = vmax.bf16 %v1133_v16, %v1068_v30  ;;  %793 = vst.msk [vmem:[#allocation2 + $0xe4] sm:$0xf] %vm247_vm1, %v367_v10 }
  0x51   : > { %v1501_v1 = vsel %vm1498_vm4, %v1499_v55, %v1500_v60  ;;  %v1503_v3 = vsel %vm1498_vm4, %v1500_v60, %v1502_v6  ;;  %v1629_v20 = vmax.f32 %v1388_v33, %v1502_v6  ;;  %v1678_v35 = vsel %vm1675_vm5, %v1676_v19, %v1677_v61 }
  0x52   : > { %v1627_v26 = vmax.f32 %v1386_v27, %v1501_v1  ;;  %v1628_v63 = vmax.f32 %v8439_v32, %v1503_v3  ;;  %v1839_v36 = vsel %vm1836_vm6, %v1837_v8, %v1838_v15  ;;  %v1841_v60 = vsel %vm1836_vm6, %v1838_v15, %v1840_v53  ;;  %v368_v27 = vld [vmem:[%s8281_s27 + $0x4c] sm:$0xf]  ;;  %v1264_v53 = vld [vmem:[#allocation2 + $0x70] sm:$0xf] }
  0x53   : > { %v1774_v55 = vmax.f32 %v1629_v20, %v1677_v61  ;;  %v2015_v6 = vrot.slane %v1388_v33, 4  ;;  %v1071_v3 = vmax.bf16 %v1007_v29, %v943_v34  ;;  %794 = vst.msk [vmem:[#allocation2 + $0xe8] sm:$0xf] %vm247_vm1, %v368_v27  ;;  %v1198_v15 = vmax.bf16 %v1134_v23, %v1069_v5  ;;  %v1265_v20 = vld [vmem:[#allocation2 + $0x74] sm:$0x1] }
  0x54   : > { %v1772_v1 = vmax.f32 %v1627_v26, %v1676_v19  ;;  %v1773_v32 = vmax.f32 %v1628_v63, %v1678_v35  ;;  %v1199_v19 = vmax.bf16 %v1135_v25, %v1070_v37  ;;  %v1326_v30 = vmax.bf16 %v1262_v7, %v1197_v9 }
  0x55   : > { %v1967_v61 = vmax.f32 %v1774_v55, %v1841_v60  ;;  %v2016_v33 = vsel %vm2013_vm7, %v2014_v22, %v2015_v6  ;;  %v2018_v52 = vsel %vm2013_vm7, %v2015_v6, %v2017_v11  ;;  %v1200_v26 = vmax.bf16 %v1136_v28, %v1071_v3  ;;  %v816_v6 = vld [vmem:[#allocation2 + $0x30] sm:$0xf]  ;;  %v881_v3 = vld [vmem:[#allocation2 + $0x44] sm:$0xf] }
  0x56   : > { %v1965_v54 = vmax.f32 %v1772_v1, %v1837_v8  ;;  %v1966_v62 = vmax.f32 %v1773_v32, %v1839_v36  ;;  %v1327_v34 = vmax.bf16 %v1263_v24, %v1198_v15  ;;  %v7283_v16 = vcombine.low %v365_v21, %v366_v12 }
  0x57   : > { %v2144_v29 = vmax.f32 %v1967_v61, %v2018_v52  ;;  %v1328_v0 = vmax.bf16 %v1264_v53, %v1199_v19  ;;  %v1329_v56 = vmax.bf16 %v1265_v20, %v1200_v26  ;;  %v1390_v60 = vunpack.c.l.bf16 %v1326_v30  ;;  %v815_v53 = vld [vmem:[#allocation2 + $0x2c] sm:$0xf]  ;;  %v818_v20 = vld [vmem:[#allocation2 + $0x38] sm:$0x1]  ;;  %v880_v19 = vld [vmem:[#allocation2 + $0x40] sm:$0xf] }
  0x58   : > { %v2142_v63 = vmax.f32 %v1965_v54, %v2014_v22  ;;  %v2143_v35 = vmax.f32 %v1966_v62, %v2016_v33  ;;  %v8465_v59 = vunpack.c.l.bf16 %v1327_v34  ;;  %7737 = vmatprep.mubr.msk.bf16.mxu0 %vm494_vm3, %v7283_v16  ;;  %v7284_v11 = vcombine.low %v367_v10, %v368_v27  ;;  %v883_v16 = vld [vmem:[#allocation2 + $0x4c] sm:$0x1] }
  0x59   : > { %v2191_v55 = vpack.c.bf16 %v2144_v29, %v2144_v29  ;;  %v1392_v37 = vunpack.c.l.bf16 %v1328_v0  ;;  %v1393_v21 = vunpack.c.l.bf16 %v1329_v56  ;;  %v1504_v28 = vrot.slane %v1390_v60, 1 }
  0x5a   : > { %v2190_v5 = vpack.c.bf16 %v2143_v35, %v2142_v63  ;;  %v7523_v8 = vpack.c.bf16 %v2142_v63, %v2142_v63  ;;  %v7524_v23 = vpack.c.bf16 %v2143_v35, %v2143_v35  ;;  %7738 = vmatmul.mubr.msk.bf16.gmra.mxu0 %vm494_vm3, %v7284_v11  ;;  %v1505_v10 = vrot.slane %v8465_v59, 1  ;;  %v1008_v63 = vld [vmem:[#allocation2 + $0x54] sm:$0xf] }
  0x5b   : > { %v2288_v62 = vrot.slane %v2191_v55, 3  ;;  %v2717_v12 = vrot.slane %v2191_v55, 7  ;;  %v1507_v22 = vrot.slane %v1392_v37, 1  ;;  %v1679_v0 = vrot.slane %v8465_v59, 2 }
  0x5c   : > { %v2287_v54 = vrot.slane %v2190_v5, 3  ;;  %v7372_v7 = vrot.slane %v7523_v8, 11  ;;  %v2714_v24 = vrot.slane %v7524_v23, 7  ;;  %v1680_v25 = vrot.slane %v1392_v37, 2  ;;  %v1009_v5 = vld [vmem:[#allocation2 + $0x58] sm:$0xf] }
  0x5d   : > { %v1842_v36 = vrot.slane %v8465_v59, 3  ;;  %v1506_v32 = vsel %vm1498_vm4, %v1504_v28, %v1505_v10  ;;  %v1508_v61 = vsel %vm1498_vm4, %v1505_v10, %v1507_v22  ;;  %v1632_v52 = vmax.f32 %v1392_v37, %v1507_v22  ;;  %v1010_v8 = vld [vmem:[#allocation2 + $0x5c] sm:$0xf] }
  0x5e   : > { %v2289_v27 = vsel %vm1836_vm6, %v2287_v54, %v2288_v62  ;;  %v2715_v56 = vsel %vm8470_vm9, %v7372_v7, %v2714_v24  ;;  %v2716_v1 = vrot.slane %v2714_v24, 4  ;;  %v1630_v33 = vmax.f32 %v1390_v60, %v1506_v32  ;;  %v1011_v54 = vld [vmem:[#allocation2 + $0x60] sm:$0x1]  ;;  %v1137_v7 = vld [vmem:[#allocation2 + $0x68] sm:$0xf] }
  0x5f   : > { %7755 = vmatprep.mubr.msk.bf16.mxu1 %vm494_vm3, %v2289_v27  ;;  %2856 = vst.msk [vmem:[#allocation2 + $0x30] sm:$0xf] %vm247_vm1, %v2715_v56  ;;  %v1681_v15 = vsel %vm1675_vm5, %v1679_v0, %v1680_v25  ;;  %v1631_v29 = vmax.f32 %v8465_v59, %v1508_v61  ;;  %v1843_v30 = vrot.slane %v1392_v37, 3  ;;  %v1845_v34 = vrot.slane %v1393_v21, 3  ;;  %v1140_v61 = vld [vmem:[#allocation2 + $0x74] sm:$0x1] }
  0x60   : > { %v2718_v26 = vsel %vm8470_vm9, %v2716_v1, %v2717_v12  ;;  %v1775_v35 = vmax.f32 %v1630_v33, %v1679_v0  ;;  %v1777_v55 = vmax.f32 %v1632_v52, %v1680_v25  ;;  %v2019_v60 = vrot.slane %v8465_v59, 4  ;;  %v1138_v25 = vld [vmem:[#allocation2 + $0x6c] sm:$0xf]  ;;  %v819_v59 = vld [vmem:[#allocation2 + $0x40] sm:$0xf] }
  0x61   : > { %2857 = vst.msk [vmem:[#allocation2 + $0x34] sm:$0xf] %vm247_vm1, %v2718_v26  ;;  %v2020_v11 = vrot.slane %v1392_v37, 4  ;;  %v1776_v23 = vmax.f32 %v1631_v29, %v1681_v15  ;;  %v1844_v62 = vsel %vm1836_vm6, %v1842_v36, %v1843_v30  ;;  %v1846_v12 = vsel %vm1836_vm6, %v1843_v30, %v1845_v34  ;;  %v884_v37 = vld [vmem:[#allocation2 + $0x54] sm:$0xf] }
  0x62   : > { %v2022_v28 = vrot.slane %v1393_v21, 4  ;;  %v1968_v24 = vmax.f32 %v1775_v35, %v1842_v36  ;;  %v1970_v10 = vmax.f32 %v1777_v55, %v1846_v12  ;;  %v944_v0 = vmax.bf16 %v880_v19, %v815_v53  ;;  %v1139_v21 = vld [vmem:[#allocation2 + $0x70] sm:$0xf]  ;;  %v8502_v26 = vld [vmem:[%s8281_s27 + $0x54] sm:$0xf] }
  0x63   : > { %v2021_v22 = vsel %vm2013_vm7, %v2019_v60, %v2020_v11  ;;  %v1969_v27 = vmax.f32 %v1776_v23, %v1844_v62  ;;  %v945_v1 = vmax.bf16 %v881_v3, %v816_v6  ;;  %v947_v32 = vmax.bf16 %v883_v16, %v818_v20  ;;  %v8496_v33 = vld [vmem:[%s8281_s27 + $0x50] sm:$0xf]  ;;  %v8507_v29 = vld [vmem:[%s8281_s27 + $0x58] sm:$0xf]  ;;  %v8510_v6 = vld [vmem:[%s8281_s27 + $0x5c] sm:$0xf] }
  0x64   : > { %v2023_v56 = vsel %vm2013_vm7, %v2020_v11, %v2022_v28  ;;  %v2145_v36 = vmax.f32 %v1968_v24, %v2019_v60  ;;  %v1072_v15 = vmax.bf16 %v1008_v63, %v944_v0  ;;  %v10844_v53 = vmax.bf16 %v8396_v4, %v8392_v2  ;;  %795 = vst.msk [vmem:[#allocation2 + $0xf8] sm:$0xf] %vm247_vm1, %v8496_v33  ;;  %v1266_v34 = vld [vmem:[#allocation2 + $0x7c] sm:$0xf]  ;;  %v1267_v55 = vld [vmem:[#allocation2 + $0x80] sm:$0xf] }
  0x65   : > { %v2147_v52 = vmax.f32 %v1970_v10, %v2023_v56  ;;  %v2146_v3 = vmax.f32 %v1969_v27, %v2021_v22  ;;  %v1073_v20 = vmax.bf16 %v1009_v5, %v945_v1  ;;  %v1075_v30 = vmax.bf16 %v1011_v54, %v947_v32  ;;  %796 = vst.msk [vmem:[#allocation2 + $0xfc] sm:$0xf] %vm247_vm1, %v8502_v26  ;;  %v1268_v60 = vld [vmem:[#allocation2 + $0x84] sm:$0xf]  ;;  %v1269_v11 = vld [vmem:[#allocation2 + $0x88] sm:$0x1] }
  0x66   : > { %v1074_v19 = vmax.bf16 %v1010_v8, %v10844_v53  ;;  %v948_v16 = vmax.bf16 %v884_v37, %v819_v59  ;;  %797 = vst.msk [vmem:[#allocation2 + $0x10c] sm:$0xf] %vm247_vm1, %v8507_v29  ;;  %798 = vst.msk [vmem:[#allocation2 + $0x110] sm:$0xf] %vm247_vm1, %v8510_v6  ;;  %v7526_v4 = vpack.c.bf16 %v2145_v36, %v2145_v36  ;;  %v822_v12 = vld [vmem:[#allocation2 + $0x4c] sm:$0x1] }
  0x67   : > { %v2193_v2 = vpack.c.bf16 %v2147_v52, %v2147_v52  ;;  %v1201_v63 = vmax.bf16 %v1137_v7, %v1072_v15  ;;  %v2192_v5 = vpack.c.bf16 %v2146_v3, %v2145_v36  ;;  %v7527_v8 = vpack.c.bf16 %v2146_v3, %v2146_v3  ;;  %v887_v28 = vld [vmem:[#allocation2 + $0x60] sm:$0x1]  ;;  %v1012_v54 = vld [vmem:[#allocation2 + $0x68] sm:$0xf]  ;;  %v1013_v7 = vld [vmem:[#allocation2 + $0x6c] sm:$0xf] }
  0x68   : > { %v1203_v35 = vmax.bf16 %v1139_v21, %v1074_v19  ;;  %v1202_v23 = vmax.bf16 %v1138_v25, %v1073_v20  ;;  %v1204_v62 = vmax.bf16 %v1140_v61, %v1075_v30  ;;  %v7373_v10 = vrot.slane %v7526_v4, 11 }
  0x69   : > { %v2291_v24 = vrot.slane %v2193_v2, 3  ;;  %v2724_v22 = vrot.slane %v2193_v2, 7  ;;  %v1330_v0 = vmax.bf16 %v1266_v34, %v1201_v63  ;;  %v2290_v59 = vrot.slane %v2192_v5, 3 }
  0x6a   : > { %v2721_v37 = vrot.slane %v7527_v8, 7  ;;  %v1331_v27 = vmax.bf16 %v1267_v55, %v1202_v23  ;;  %v1332_v56 = vmax.bf16 %v1268_v60, %v1203_v35  ;;  %v1333_v1 = vmax.bf16 %v1269_v11, %v1204_v62 }
  0x6b   : > { %v1394_v32 = vunpack.c.l.bf16 %v1330_v0  ;;  %v951_v21 = vmax.bf16 %v887_v28, %v822_v12  ;;  %v1076_v52 = vmax.bf16 %v1012_v54, %v948_v16  ;;  %v2292_v36 = vsel %vm1836_vm6, %v2290_v59, %v2291_v24  ;;  %v1015_v28 = vld [vmem:[#allocation2 + $0x74] sm:$0x1]  ;;  %v1141_v54 = vld [vmem:[#allocation2 + $0x7c] sm:$0xf]  ;;  %v1142_v24 = vld [vmem:[#allocation2 + $0x80] sm:$0xf] }
  0x6c   : > { %v2722_v25 = vsel %vm8470_vm9, %v7373_v10, %v2721_v37  ;;  %v2723_v61 = vrot.slane %v2721_v37, 4  ;;  %v1395_v15 = vunpack.c.l.bf16 %v1331_v27  ;;  %7756 = vmatmul.mubr.msk.bf16.vlgmr.msra.gmra.mxu1 %vm494_vm3, %v2292_v36  ;;  %v1396_v53 = vunpack.c.l.bf16 %v1332_v56  ;;  %v1143_v37 = vld [vmem:[#allocation2 + $0x84] sm:$0xf]  ;;  %v1144_v36 = vld [vmem:[#allocation2 + $0x88] sm:$0x1] }
  0x6d   : > { %2858 = vst.msk [vmem:[#allocation2 + $0x44] sm:$0xf] %vm247_vm1, %v2722_v25  ;;  %v1397_v19 = vunpack.c.l.bf16 %v1333_v1  ;;  %v1509_v3 = vrot.slane %v1394_v32, 1  ;;  %v10845_v20 = vmax.bf16 %v8408_v13, %v8430_v17  ;;  %7822 = vmatpush3.bf16.msra.mxu1 %v8340_v31  ;;  %v1014_v17 = vld [vmem:[#allocation2 + $0x70] sm:$0xf]  ;;  %v10846_v1 = vmax.bf16 %v8410_v14, %v8432_v18 }
  0x6e   : > { %v2725_v34 = vsel %vm8470_vm9, %v2723_v61, %v2724_v22  ;;  %v1510_v16 = vrot.slane %v1395_v15, 1  ;;  %v1682_v2 = vrot.slane %v1395_v15, 2  ;;  %v1847_v4 = vrot.slane %v1395_v15, 3  ;;  %v1270_v25 = vld [vmem:[#allocation2 + $0x90] sm:$0xf] }
  0x6f   : > { %v1077_v30 = vmax.bf16 %v1013_v7, %v10845_v20  ;;  %2859 = vst.msk [vmem:[#allocation2 + $0x48] sm:$0xf] %vm247_vm1, %v2725_v34  ;;  %v1512_v63 = vrot.slane %v1396_v53, 1  ;;  %v1683_v35 = vrot.slane %v1396_v53, 2  ;;  %v1848_v55 = vrot.slane %v1396_v53, 3 }
  0x70   : > { %v1850_v60 = vrot.slane %v1397_v19, 3  ;;  %v1511_v11 = vsel %vm1498_vm4, %v1509_v3, %v1510_v16  ;;  %v2024_v5 = vrot.slane %v1395_v15, 4  ;;  %v2025_v8 = vrot.slane %v1396_v53, 4  ;;  %v1271_v61 = vld [vmem:[#allocation2 + $0x94] sm:$0xf] }
  0x71   : > { %v2027_v13 = vrot.slane %v1397_v19, 4  ;;  %v1513_v23 = vsel %vm1498_vm4, %v1510_v16, %v1512_v63  ;;  %v1633_v62 = vmax.f32 %v1394_v32, %v1511_v11  ;;  %v1635_v12 = vmax.f32 %v1396_v53, %v1512_v63  ;;  %v1272_v20 = vld [vmem:[#allocation2 + $0x98] sm:$0xf]  ;;  %v8542_v11 = vld [vmem:[#allocation2 + $0x54] sm:$0xf] }
  0x72   : > { %v1684_v31 = vsel %vm1675_vm5, %v1682_v2, %v1683_v35  ;;  %v1634_v10 = vmax.f32 %v1395_v15, %v1513_v23  ;;  %v1849_v22 = vsel %vm1836_vm6, %v1847_v4, %v1848_v55  ;;  %v1851_v0 = vsel %vm1836_vm6, %v1848_v55, %v1850_v60 }
  0x73   : > { %v2026_v59 = vsel %vm2013_vm7, %v2024_v5, %v2025_v8  ;;  %v1778_v27 = vmax.f32 %v1633_v62, %v1682_v2  ;;  %v1780_v56 = vmax.f32 %v1635_v12, %v1683_v35  ;;  %v2028_v7 = vsel %vm2013_vm7, %v2025_v8, %v2027_v13  ;;  %v1273_v2 = vld [vmem:[#allocation2 + $0x9c] sm:$0x1]  ;;  %v8555_v62 = vld [vmem:[%s8281_s27 + $0x64] sm:$0xf]  ;;  %v8563_v12 = vld [vmem:[%s8281_s27 + $0x6c] sm:$0xf] }
  0x74   : > { %v1078_v32 = vmax.bf16 %v1014_v17, %v10846_v1  ;;  %v1779_v53 = vmax.f32 %v1634_v10, %v1684_v31  ;;  %v1079_v15 = vmax.bf16 %v1015_v28, %v951_v21  ;;  %v1205_v19 = vmax.bf16 %v1141_v54, %v1076_v52  ;;  %v8544_v21 = vld [vmem:[#allocation2 + $0x68] sm:$0xf]  ;;  %800 = vst.msk [vmem:[#allocation2 + $0x124] sm:$0xf] %vm247_vm1, %v8555_v62 }
  0x75   : > { %v1206_v3 = vmax.bf16 %v1142_v24, %v1077_v30  ;;  %v1971_v34 = vmax.f32 %v1778_v27, %v1847_v4  ;;  %v1973_v16 = vmax.f32 %v1780_v56, %v1851_v0  ;;  %v7285_v35 = vcombine.low %v8496_v33, %v8502_v26  ;;  %v8550_v33 = vld [vmem:[%s8281_s27 + $0x60] sm:$0xf]  ;;  %802 = vst.msk [vmem:[#allocation2 + $0x138] sm:$0xf] %vm247_vm1, %v8563_v12 }
  0x76   : > { %v1207_v63 = vmax.bf16 %v1143_v37, %v1078_v32  ;;  %v1972_v55 = vmax.f32 %v1779_v53, %v1849_v22  ;;  %v1208_v14 = vmax.bf16 %v1144_v36, %v1079_v15  ;;  %v1334_v18 = vmax.bf16 %v1270_v25, %v1205_v19  ;;  %799 = vst.msk [vmem:[#allocation2 + $0x120] sm:$0xf] %vm247_vm1, %v8550_v33 }
  0x77   : > { %v1335_v60 = vmax.bf16 %v1271_v61, %v1206_v3  ;;  %v2148_v52 = vmax.f32 %v1971_v34, %v2024_v5  ;;  %v2150_v30 = vmax.f32 %v1973_v16, %v2028_v7  ;;  %7741 = vmatprep.mubr.msk.bf16.mxu0 %vm494_vm3, %v7285_v35  ;;  %v7286_v8 = vcombine.low %v8507_v29, %v8510_v6  ;;  %v8560_v5 = vld [vmem:[%s8281_s27 + $0x68] sm:$0xf]  ;;  %v826_v35 = vld [vmem:[#allocation2 + $0x60] sm:$0x1] }
  0x78   : > { %v1336_v4 = vmax.bf16 %v1272_v20, %v1207_v63  ;;  %v2149_v26 = vmax.f32 %v1972_v55, %v2026_v59  ;;  %v1337_v13 = vmax.bf16 %v1273_v2, %v1208_v14  ;;  %v1398_v17 = vunpack.c.l.bf16 %v1334_v18  ;;  %801 = vst.msk [vmem:[#allocation2 + $0x134] sm:$0xf] %vm247_vm1, %v8560_v5  ;;  %v891_v55 = vld [vmem:[#allocation2 + $0x74] sm:$0x1]  ;;  %v1016_v14 = vld [vmem:[#allocation2 + $0x7c] sm:$0xf] }
  0x79   : > { %v8552_v23 = vunpack.c.l.bf16 %v1335_v60  ;;  %v2195_v31 = vpack.c.bf16 %v2150_v30, %v2150_v30  ;;  %v7529_v28 = vpack.c.bf16 %v2148_v52, %v2148_v52  ;;  %7742 = vmatmul.mubr.msk.bf16.gmra.mxu0 %vm494_vm3, %v7286_v8  ;;  %v952_v29 = vmax.bf16 %v8544_v21, %v8542_v11  ;;  %v1018_v30 = vld [vmem:[#allocation2 + $0x84] sm:$0xf] }
  0x7a   : > { %v8565_v54 = vunpack.c.l.bf16 %v1336_v4  ;;  %v2194_v6 = vpack.c.bf16 %v2149_v26, %v2148_v52  ;;  %v7530_v24 = vpack.c.bf16 %v2149_v26, %v2149_v26  ;;  %v1401_v10 = vunpack.c.l.bf16 %v1337_v13  ;;  %v1017_v52 = vld [vmem:[#allocation2 + $0x80] sm:$0xf] }
  0x7b   : > { %v1514_v22 = vrot.slane %v1398_v17, 1  ;;  %v2294_v0 = vrot.slane %v2195_v31, 3  ;;  %v7374_v59 = vrot.slane %v7529_v28, 11  ;;  %v2731_v37 = vrot.slane %v2195_v31, 7  ;;  %v1145_v31 = vld [vmem:[#allocation2 + $0x90] sm:$0xf] }
  0x7c   : > { %v1515_v27 = vrot.slane %v8552_v23, 1  ;;  %v2293_v56 = vrot.slane %v2194_v6, 3  ;;  %v2728_v7 = vrot.slane %v7530_v24, 7  ;;  %v1517_v1 = vrot.slane %v8565_v54, 1 }
  0x7d   : > { %v1685_v32 = vrot.slane %v8552_v23, 2  ;;  %v1686_v25 = vrot.slane %v8565_v54, 2  ;;  %v1852_v61 = vrot.slane %v8552_v23, 3  ;;  %v1853_v53 = vrot.slane %v8565_v54, 3 }
  0x7e   : > { %v1516_v36 = vsel %vm1498_vm4, %v1514_v22, %v1515_v27  ;;  %v2295_v15 = vsel %vm1836_vm6, %v2293_v56, %v2294_v0  ;;  %v2729_v19 = vsel %vm8470_vm9, %v7374_v59, %v2728_v7  ;;  %v2730_v3 = vrot.slane %v2728_v7, 4  ;;  %v1146_v0 = vld [vmem:[#allocation2 + $0x94] sm:$0xf]  ;;  %v1147_v59 = vld [vmem:[#allocation2 + $0x98] sm:$0xf] }
  0x7f   : > { %v1518_v20 = vsel %vm1498_vm4, %v1515_v27, %v1517_v1  ;;  %7759 = vmatprep.mubr.msk.bf16.mxu1 %vm494_vm3, %v2295_v15  ;;  %2860 = vst.msk [vmem:[#allocation2 + $0x58] sm:$0xf] %vm247_vm1, %v2729_v19  ;;  %v1636_v34 = vmax.f32 %v1398_v17, %v1516_v36  ;;  %v1638_v63 = vmax.f32 %v8565_v54, %v1517_v1  ;;  %v1855_v11 = vrot.slane %v1401_v10, 3  ;;  %v1019_v17 = vld [vmem:[#allocation2 + $0x88] sm:$0x1] }
  0x80   : > { %v1637_v16 = vmax.f32 %v8552_v23, %v1518_v20  ;;  %v1687_v2 = vsel %vm1675_vm5, %v1685_v32, %v1686_v25  ;;  %v2732_v18 = vsel %vm8470_vm9, %v2730_v3, %v2731_v37  ;;  %v1854_v60 = vsel %vm1836_vm6, %v1852_v61, %v1853_v53  ;;  %v1148_v7 = vld [vmem:[#allocation2 + $0x9c] sm:$0x1]  ;;  %v8600_v1 = vld [vmem:[#allocation2 + $0x68] sm:$0xf] }
  0x81   : > { %v2029_v21 = vrot.slane %v8552_v23, 4  ;;  %2861 = vst.msk [vmem:[#allocation2 + $0x5c] sm:$0xf] %vm247_vm1, %v2732_v18  ;;  %v1781_v4 = vmax.f32 %v1636_v34, %v1685_v32  ;;  %v1783_v26 = vmax.f32 %v1638_v63, %v1686_v25  ;;  %v2030_v13 = vrot.slane %v8565_v54, 4  ;;  %v8602_v32 = vld [vmem:[#allocation2 + $0x7c] sm:$0xf] }
  0x82   : > { %v1782_v8 = vmax.f32 %v1637_v16, %v1687_v2  ;;  %v1856_v28 = vsel %vm1836_vm6, %v1853_v53, %v1855_v11  ;;  %v2032_v6 = vrot.slane %v1401_v10, 4  ;;  %v955_v24 = vmax.bf16 %v891_v55, %v826_v35  ;;  %v1274_v53 = vld [vmem:[#allocation2 + $0xa4] sm:$0xf]  ;;  %v1275_v34 = vld [vmem:[#allocation2 + $0xa8] sm:$0xf] }
  0x83   : > { %v1080_v22 = vmax.bf16 %v1016_v14, %v952_v29  ;;  %v1974_v37 = vmax.f32 %v1781_v4, %v1852_v61  ;;  %v1976_v27 = vmax.f32 %v1783_v26, %v1856_v28  ;;  %v2031_v56 = vsel %vm2013_vm7, %v2029_v21, %v2030_v13  ;;  %v1276_v16 = vld [vmem:[#allocation2 + $0xac] sm:$0xf]  ;;  %v1277_v63 = vld [vmem:[#allocation2 + $0xb0] sm:$0x1] }
  0x84   : > { %v1975_v23 = vmax.f32 %v1782_v8, %v1854_v60  ;;  %v2033_v54 = vsel %vm2013_vm7, %v2030_v13, %v2032_v6  ;;  %v10847_v36 = vmax.bf16 %v8351_v42, %v8343_v38  ;;  %v10848_v29 = vmax.bf16 %v8353_v43, %v8345_v39 }
  0x85   : > { %v1083_v61 = vmax.bf16 %v1019_v17, %v955_v24  ;;  %v2151_v15 = vmax.f32 %v1974_v37, %v2029_v21  ;;  %v2153_v3 = vmax.f32 %v1976_v27, %v2033_v54  ;;  %v1209_v20 = vmax.bf16 %v1145_v31, %v1080_v22 }
  0x86   : > { %v1081_v10 = vmax.bf16 %v1017_v52, %v10847_v36  ;;  %v1082_v25 = vmax.bf16 %v1018_v30, %v10848_v29  ;;  %v2152_v19 = vmax.f32 %v1975_v23, %v2031_v56  ;;  %v956_v38 = vmax.bf16 %v8602_v32, %v8600_v1 }
  0x87   : > { %v1212_v55 = vmax.bf16 %v1148_v7, %v1083_v61  ;;  %v2197_v14 = vpack.c.bf16 %v2153_v3, %v2153_v3  ;;  %v7532_v18 = vpack.c.bf16 %v2151_v15, %v2151_v15  ;;  %v1338_v43 = vmax.bf16 %v1274_v53, %v1209_v20  ;;  %v8633_v7 = vld [vmem:[%s8281_s27 + $0x78] sm:$0xf]  ;;  %v830_v3 = vld [vmem:[#allocation2 + $0x74] sm:$0x1]  ;;  %v895_v20 = vld [vmem:[#allocation2 + $0x88] sm:$0x1] }
  0x88   : > { %v1210_v2 = vmax.bf16 %v1146_v0, %v1081_v10  ;;  %v1211_v35 = vmax.bf16 %v1147_v59, %v1082_v25  ;;  %v2196_v42 = vpack.c.bf16 %v2152_v19, %v2151_v15  ;;  %v7533_v39 = vpack.c.bf16 %v2152_v19, %v2152_v19  ;;  %v8619_v0 = vld [vmem:[%s8281_s27 + $0x70] sm:$0xf]  ;;  %v8622_v59 = vld [vmem:[%s8281_s27 + $0x74] sm:$0xf]  ;;  %v8639_v25 = vld [vmem:[%s8281_s27 + $0x7c] sm:$0xf] }
  0x89   : > { %v1341_v21 = vmax.bf16 %v1277_v63, %v1212_v55  ;;  %v2297_v30 = vrot.slane %v2197_v14, 3  ;;  %v7375_v4 = vrot.slane %v7532_v18, 11  ;;  %v2738_v26 = vrot.slane %v2197_v14, 7  ;;  %803 = vst.msk [vmem:[#allocation2 + $0x148] sm:$0xf] %vm247_vm1, %v8619_v0 }
  0x8a   : > { %v1339_v60 = vmax.bf16 %v1275_v34, %v1210_v2  ;;  %v1340_v11 = vmax.bf16 %v1276_v16, %v1211_v35  ;;  %v2296_v52 = vrot.slane %v2196_v42, 3  ;;  %v2735_v8 = vrot.slane %v7533_v39, 7  ;;  %804 = vst.msk [vmem:[#allocation2 + $0x14c] sm:$0xf] %vm247_vm1, %v8622_v59  ;;  %805 = vst.msk [vmem:[#allocation2 + $0x15c] sm:$0xf] %vm247_vm1, %v8633_v7 }
  0x8b   : > { %v1402_v13 = vunpack.c.l.bf16 %v1338_v43  ;;  %v1405_v22 = vunpack.c.l.bf16 %v1341_v21  ;;  %806 = vst.msk [vmem:[#allocation2 + $0x160] sm:$0xf] %vm247_vm1, %v8639_v25  ;;  %v1020_v35 = vld [vmem:[#allocation2 + $0x90] sm:$0xf]  ;;  %v1021_v55 = vld [vmem:[#allocation2 + $0x94] sm:$0xf] }
  0x8c   : > { %v8613_v17 = vunpack.c.l.bf16 %v1339_v60  ;;  %v1404_v31 = vunpack.c.l.bf16 %v1340_v11  ;;  %v2298_v28 = vsel %vm1836_vm6, %v2296_v52, %v2297_v30  ;;  %v2736_v6 = vsel %vm8470_vm9, %v7375_v4, %v2735_v8  ;;  %v1022_v43 = vld [vmem:[#allocation2 + $0x98] sm:$0xf]  ;;  %v1023_v60 = vld [vmem:[#allocation2 + $0x9c] sm:$0x1]  ;;  %v1149_v4 = vld [vmem:[#allocation2 + $0xa4] sm:$0xf] }
  0x8d   : > { %v2737_v24 = vrot.slane %v2735_v8, 4  ;;  %7760 = vmatmul.mubr.msk.bf16.gmra.mxu1 %vm494_vm3, %v2298_v28  ;;  %2862 = vst.msk [vmem:[#allocation2 + $0x6c] sm:$0xf] %vm247_vm1, %v2736_v6  ;;  %v1519_v37 = vrot.slane %v1402_v13, 1  ;;  %v1860_v19 = vrot.slane %v1405_v22, 3  ;;  %v2037_v52 = vrot.slane %v1405_v22, 4 }
  0x8e   : > { %v1520_v23 = vrot.slane %v8613_v17, 1  ;;  %v1522_v27 = vrot.slane %v1404_v31, 1  ;;  %v1688_v56 = vrot.slane %v8613_v17, 2  ;;  %v1689_v36 = vrot.slane %v1404_v31, 2  ;;  %v1150_v8 = vld [vmem:[#allocation2 + $0xa8] sm:$0xf] }
  0x8f   : > { %v2739_v54 = vsel %vm8470_vm9, %v2737_v24, %v2738_v26  ;;  %v1857_v10 = vrot.slane %v8613_v17, 3  ;;  %v1858_v29 = vrot.slane %v1404_v31, 3  ;;  %v2034_v18 = vrot.slane %v8613_v17, 4 }
  0x90   : > { %2863 = vst.msk [vmem:[#allocation2 + $0x70] sm:$0xf] %vm247_vm1, %v2739_v54  ;;  %v1521_v61 = vsel %vm1498_vm4, %v1519_v37, %v1520_v23  ;;  %v1523_v53 = vsel %vm1498_vm4, %v1520_v23, %v1522_v27  ;;  %v1641_v15 = vmax.f32 %v1404_v31, %v1522_v27  ;;  %v1690_v63 = vsel %vm1675_vm5, %v1688_v56, %v1689_v36  ;;  %v1278_v54 = vld [vmem:[#allocation2 + $0xb8] sm:$0xf] }
  0x91   : > { %v1639_v34 = vmax.f32 %v1402_v13, %v1521_v61  ;;  %v1640_v16 = vmax.f32 %v8613_v17, %v1523_v53  ;;  %v1859_v2 = vsel %vm1836_vm6, %v1857_v10, %v1858_v29  ;;  %v1861_v14 = vsel %vm1836_vm6, %v1858_v29, %v1860_v19 }
  0x92   : > { %v1786_v42 = vmax.f32 %v1641_v15, %v1689_v36  ;;  %v2035_v39 = vrot.slane %v1404_v31, 4  ;;  %v959_v30 = vmax.bf16 %v895_v20, %v830_v3  ;;  %v1084_v28 = vmax.bf16 %v1020_v35, %v956_v38  ;;  %v1151_v31 = vld [vmem:[#allocation2 + $0xac] sm:$0xf]  ;;  %v1279_v36 = vld [vmem:[#allocation2 + $0xbc] sm:$0xf] }
  0x93   : > { %v1784_v11 = vmax.f32 %v1639_v34, %v1688_v56  ;;  %v1785_v21 = vmax.f32 %v1640_v16, %v1690_v63  ;;  %v10849_v6 = vmax.bf16 %v8358_v45, %v8347_v40  ;;  %v10850_v22 = vmax.bf16 %v8360_v46, %v8349_v41  ;;  %v1152_v56 = vld [vmem:[#allocation2 + $0xb0] sm:$0x1]  ;;  %v1280_v38 = vld [vmem:[#allocation2 + $0xc0] sm:$0xf]  ;;  %v1281_v15 = vld [vmem:[#allocation2 + $0xc4] sm:$0x1] }
  0x94   : > { %v1979_v26 = vmax.f32 %v1786_v42, %v1861_v14  ;;  %v2036_v13 = vsel %vm2013_vm7, %v2034_v18, %v2035_v39  ;;  %v2038_v23 = vsel %vm2013_vm7, %v2035_v39, %v2037_v52  ;;  %v1087_v61 = vmax.bf16 %v1023_v60, %v959_v30 }
  0x95   : > { %v1085_v17 = vmax.bf16 %v1021_v55, %v10849_v6  ;;  %v1977_v24 = vmax.f32 %v1784_v11, %v1857_v10  ;;  %v1978_v37 = vmax.f32 %v1785_v21, %v1859_v2  ;;  %v1086_v27 = vmax.bf16 %v1022_v43, %v10850_v22 }
  0x96   : > { %v2156_v29 = vmax.f32 %v1979_v26, %v2038_v23  ;;  %v1213_v1 = vmax.bf16 %v1149_v4, %v1084_v28  ;;  %v7287_v10 = vcombine.low %v8550_v33, %v8555_v62  ;;  %v1216_v3 = vmax.bf16 %v1152_v56, %v1087_v61  ;;  %v896_v56 = vld [vmem:[#allocation2 + $0x90] sm:$0xf] }
  0x97   : > { %v1214_v32 = vmax.bf16 %v1150_v8, %v1085_v17  ;;  %v2154_v53 = vmax.f32 %v1977_v24, %v2034_v18  ;;  %v2155_v40 = vmax.f32 %v1978_v37, %v2036_v13  ;;  %v1215_v45 = vmax.bf16 %v1151_v31, %v1086_v27  ;;  %v831_v31 = vld [vmem:[#allocation2 + $0x7c] sm:$0xf]  ;;  %v834_v24 = vld [vmem:[#allocation2 + $0x88] sm:$0x1] }
  0x98   : > { %v2199_v19 = vpack.c.bf16 %v2156_v29, %v2156_v29  ;;  %v1342_v20 = vmax.bf16 %v1278_v54, %v1213_v1  ;;  %7745 = vmatprep.mubr.msk.bf16.mxu0 %vm494_vm3, %v7287_v10  ;;  %v1345_v55 = vmax.bf16 %v1281_v15, %v1216_v3  ;;  %v7288_v11 = vcombine.low %v8560_v5, %v8563_v12  ;;  %v899_v54 = vld [vmem:[#allocation2 + $0x9c] sm:$0x1]  ;;  %v1026_v10 = vld [vmem:[#allocation2 + $0xac] sm:$0xf] }
  0x99   : > { %v1343_v41 = vmax.bf16 %v1279_v36, %v1214_v32  ;;  %v2198_v46 = vpack.c.bf16 %v2155_v40, %v2154_v53  ;;  %v7535_v34 = vpack.c.bf16 %v2154_v53, %v2154_v53  ;;  %v7536_v16 = vpack.c.bf16 %v2155_v40, %v2155_v40  ;;  %v1025_v36 = vld [vmem:[#allocation2 + $0xa8] sm:$0xf] }
  0x9a   : > { %v1344_v63 = vmax.bf16 %v1280_v38, %v1215_v45  ;;  %v2300_v2 = vrot.slane %v2199_v19, 3  ;;  %v2745_v35 = vrot.slane %v2199_v19, 7  ;;  %v1406_v42 = vunpack.c.l.bf16 %v1342_v20  ;;  %7746 = vmatmul.mubr.msk.bf16.gmra.mxu0 %vm494_vm3, %v7288_v11  ;;  %v1024_v38 = vld [vmem:[#allocation2 + $0xa4] sm:$0xf]  ;;  %v1027_v19 = vld [vmem:[#allocation2 + $0xb0] sm:$0x1] }
  0x9b   : > { %v2299_v14 = vrot.slane %v2198_v46, 3  ;;  %v7376_v18 = vrot.slane %v7535_v34, 11  ;;  %v2742_v39 = vrot.slane %v7536_v16, 7  ;;  %v8667_v43 = vunpack.c.l.bf16 %v1343_v41  ;;  %v1154_v16 = vld [vmem:[#allocation2 + $0xbc] sm:$0xf] }
  0x9c   : > { %v1408_v33 = vunpack.c.l.bf16 %v1344_v63  ;;  %v1409_v62 = vunpack.c.l.bf16 %v1345_v55  ;;  %v1524_v60 = vrot.slane %v1406_v42, 1  ;;  %v960_v20 = vmax.bf16 %v896_v56, %v831_v31  ;;  %v835_v63 = vld [vmem:[#allocation2 + $0x90] sm:$0xf]  ;;  %v1285_v31 = vld [vmem:[#allocation2 + $0xd8] sm:$0x1] }
  0x9d   : > { %v2301_v21 = vsel %vm1836_vm6, %v2299_v14, %v2300_v2  ;;  %v2743_v52 = vsel %vm8470_vm9, %v7376_v18, %v2742_v39  ;;  %v2744_v30 = vrot.slane %v2742_v39, 4  ;;  %v1525_v4 = vrot.slane %v8667_v43, 1  ;;  %v900_v2 = vld [vmem:[#allocation2 + $0xa4] sm:$0xf]  ;;  %v1153_v18 = vld [vmem:[#allocation2 + $0xb8] sm:$0xf] }
  0x9e   : > { %7763 = vmatprep.mubr.msk.bf16.mxu1 %vm494_vm3, %v2301_v21  ;;  %2864 = vst.msk [vmem:[#allocation2 + $0x80] sm:$0xf] %vm247_vm1, %v2743_v52  ;;  %v1527_v8 = vrot.slane %v1408_v33, 1  ;;  %v1691_v26 = vrot.slane %v8667_v43, 2  ;;  %v1692_v13 = vrot.slane %v1408_v33, 2  ;;  %v1862_v28 = vrot.slane %v8667_v43, 3 }
  0x9f   : > { %v2746_v5 = vsel %vm8470_vm9, %v2744_v30, %v2745_v35  ;;  %v1526_v12 = vsel %vm1498_vm4, %v1524_v60, %v1525_v4  ;;  %v1863_v6 = vrot.slane %v1408_v33, 3  ;;  %v1865_v17 = vrot.slane %v1409_v62, 3  ;;  %v1155_v39 = vld [vmem:[#allocation2 + $0xc0] sm:$0xf]  ;;  %v8698_v21 = vld [vmem:[#allocation2 + $0x9c] sm:$0x1] }
  0xa0   : > { %2865 = vst.msk [vmem:[#allocation2 + $0x84] sm:$0xf] %vm247_vm1, %v2746_v5  ;;  %v1528_v37 = vsel %vm1498_vm4, %v1525_v4, %v1527_v8  ;;  %v1642_v23 = vmax.f32 %v1406_v42, %v1526_v12  ;;  %v1644_v22 = vmax.f32 %v1408_v33, %v1527_v8  ;;  %v1693_v27 = vsel %vm1675_vm5, %v1691_v26, %v1692_v13  ;;  %v8700_v52 = vld [vmem:[#allocation2 + $0xb0] sm:$0x1] }
  0xa1   : > { %v1643_v29 = vmax.f32 %v8667_v43, %v1528_v37  ;;  %v1864_v61 = vsel %vm1836_vm6, %v1862_v28, %v1863_v6  ;;  %v1866_v1 = vsel %vm1836_vm6, %v1863_v6, %v1865_v17  ;;  %v2039_v32 = vrot.slane %v8667_v43, 4  ;;  %v1156_v43 = vld [vmem:[#allocation2 + $0xc4] sm:$0x1] }
  0xa2   : > { %v1787_v53 = vmax.f32 %v1642_v23, %v1691_v26  ;;  %v1789_v40 = vmax.f32 %v1644_v22, %v1692_v13  ;;  %v2040_v45 = vrot.slane %v1408_v33, 4  ;;  %v2042_v15 = vrot.slane %v1409_v62, 4  ;;  %v1282_v26 = vld [vmem:[#allocation2 + $0xcc] sm:$0xf]  ;;  %v1284_v13 = vld [vmem:[#allocation2 + $0xd4] sm:$0xf] }
  0xa3   : > { %v1788_v3 = vmax.f32 %v1643_v29, %v1693_v27  ;;  %v963_v41 = vmax.bf16 %v899_v54, %v834_v24  ;;  %v10851_v46 = vmax.bf16 %v8368_v50, %v8356_v44  ;;  %v1088_v62 = vmax.bf16 %v1024_v38, %v960_v20  ;;  %v1283_v50 = vld [vmem:[#allocation2 + $0xd0] sm:$0xf]  ;;  %v1028_v54 = vld [vmem:[#allocation2 + $0xb8] sm:$0xf] }
  0xa4   : > { %v1980_v35 = vmax.f32 %v1787_v53, %v1862_v28  ;;  %v1982_v55 = vmax.f32 %v1789_v40, %v1866_v1  ;;  %v2041_v42 = vsel %vm2013_vm7, %v2039_v32, %v2040_v45  ;;  %v2043_v14 = vsel %vm2013_vm7, %v2040_v45, %v2042_v15 }
  0xa5   : > { %v1089_v34 = vmax.bf16 %v1025_v36, %v10851_v46  ;;  %v1981_v33 = vmax.f32 %v1788_v3, %v1864_v61  ;;  %v10852_v60 = vmax.bf16 %v8370_v51, %v8362_v47  ;;  %v1091_v44 = vmax.bf16 %v1027_v19, %v963_v41  ;;  %v1029_v36 = vld [vmem:[#allocation2 + $0xbc] sm:$0xf] }
  0xa6   : > { %v2157_v30 = vmax.f32 %v1980_v35, %v2039_v32  ;;  %v2159_v4 = vmax.f32 %v1982_v55, %v2043_v14  ;;  %v964_v28 = vmax.bf16 %v900_v2, %v835_v63  ;;  %v1217_v12 = vmax.bf16 %v1153_v18, %v1088_v62  ;;  %v1030_v62 = vld [vmem:[#allocation2 + $0xc0] sm:$0xf] }
  0xa7   : > { %v1090_v11 = vmax.bf16 %v1026_v10, %v10852_v60  ;;  %v1218_v8 = vmax.bf16 %v1154_v16, %v1089_v34  ;;  %v2158_v5 = vmax.f32 %v1981_v33, %v2041_v42  ;;  %v1220_v17 = vmax.bf16 %v1156_v43, %v1091_v44  ;;  %v1031_v60 = vld [vmem:[#allocation2 + $0xc4] sm:$0x1] }
  0xa8   : > { %v2201_v24 = vpack.c.bf16 %v2159_v4, %v2159_v4  ;;  %v7538_v47 = vpack.c.bf16 %v2157_v30, %v2157_v30  ;;  %v967_v37 = vmax.bf16 %v8700_v52, %v8698_v21  ;;  %v1346_v27 = vmax.bf16 %v1282_v26, %v1217_v12  ;;  %v1157_v52 = vld [vmem:[#allocation2 + $0xcc] sm:$0xf] }
  0xa9   : > { %v1219_v6 = vmax.bf16 %v1155_v39, %v1090_v11  ;;  %v1347_v51 = vmax.bf16 %v1283_v50, %v1218_v8  ;;  %v2200_v23 = vpack.c.bf16 %v2158_v5, %v2157_v30  ;;  %v7539_v22 = vpack.c.bf16 %v2158_v5, %v2158_v5  ;;  %v1158_v30 = vld [vmem:[#allocation2 + $0xd0] sm:$0xf] }
  0xaa   : > { %v2303_v29 = vrot.slane %v2201_v24, 3  ;;  %v7377_v61 = vrot.slane %v7538_v47, 11  ;;  %v2752_v1 = vrot.slane %v2201_v24, 7  ;;  %v1349_v32 = vmax.bf16 %v1285_v31, %v1220_v17  ;;  %v1160_v24 = vld [vmem:[#allocation2 + $0xd8] sm:$0x1] }
  0xab   : > { %v1348_v56 = vmax.bf16 %v1284_v13, %v1219_v6  ;;  %v2302_v38 = vrot.slane %v2200_v23, 3  ;;  %v2749_v53 = vrot.slane %v7539_v22, 7  ;;  %v1410_v40 = vunpack.c.l.bf16 %v1346_v27  ;;  %v1286_v47 = vld [vmem:[#allocation2 + $0xe0] sm:$0xf] }
  0xac   : > { %v1411_v45 = vunpack.c.l.bf16 %v1347_v51  ;;  %v1413_v10 = vunpack.c.l.bf16 %v1349_v32  ;;  %v1092_v19 = vmax.bf16 %v1028_v54, %v964_v28  ;;  %v10853_v3 = vmax.bf16 %v8376_v57, %v8364_v48  ;;  %v1159_v28 = vld [vmem:[#allocation2 + $0xd4] sm:$0xf]  ;;  %v1288_v54 = vld [vmem:[#allocation2 + $0xe8] sm:$0xf]  ;;  %v1289_v32 = vld [vmem:[#allocation2 + $0xec] sm:$0x1] }
  0xad   : > { %v1412_v15 = vunpack.c.l.bf16 %v1348_v56  ;;  %v2304_v41 = vsel %vm1836_vm6, %v2302_v38, %v2303_v29  ;;  %v2750_v46 = vsel %vm8470_vm9, %v7377_v61, %v2749_v53  ;;  %v2751_v34 = vrot.slane %v2749_v53, 4  ;;  %v1287_v56 = vld [vmem:[#allocation2 + $0xe4] sm:$0xf] }
  0xae   : > { %v1093_v20 = vmax.bf16 %v1029_v36, %v10853_v3  ;;  %v1529_v16 = vrot.slane %v1410_v40, 1  ;;  %7764 = vmatmul.mubr.msk.bf16.gmra.mxu1 %vm494_vm3, %v2304_v41  ;;  %2866 = vst.msk [vmem:[#allocation2 + $0x94] sm:$0xf] %vm247_vm1, %v2750_v46  ;;  %v1530_v63 = vrot.slane %v1411_v45, 1  ;;  %v1694_v35 = vrot.slane %v1411_v45, 2 }
  0xaf   : > { %v1532_v2 = vrot.slane %v1412_v15, 1  ;;  %v1695_v55 = vrot.slane %v1412_v15, 2  ;;  %v2753_v42 = vsel %vm8470_vm9, %v2751_v34, %v2752_v1  ;;  %v1867_v48 = vrot.slane %v1411_v45, 3 }
  0xb0   : > { %v1868_v57 = vrot.slane %v1412_v15, 3  ;;  %v1870_v14 = vrot.slane %v1413_v10, 3  ;;  %2867 = vst.msk [vmem:[#allocation2 + $0x98] sm:$0xf] %vm247_vm1, %v2753_v42  ;;  %v1531_v18 = vsel %vm1498_vm4, %v1529_v16, %v1530_v63  ;;  %v2044_v8 = vrot.slane %v1411_v45, 4 }
  0xb1   : > { %v1533_v39 = vsel %vm1498_vm4, %v1530_v63, %v1532_v2  ;;  %v1647_v43 = vmax.f32 %v1412_v15, %v1532_v2  ;;  %v1696_v33 = vsel %vm1675_vm5, %v1694_v35, %v1695_v55  ;;  %v1645_v11 = vmax.f32 %v1410_v40, %v1531_v18 }
  0xb2   : > { %v1646_v44 = vmax.f32 %v1411_v45, %v1533_v39  ;;  %v1869_v50 = vsel %vm1836_vm6, %v1867_v48, %v1868_v57  ;;  %v1871_v21 = vsel %vm1836_vm6, %v1868_v57, %v1870_v14  ;;  %v2045_v26 = vrot.slane %v1412_v15, 4 }
  0xb3   : > { %v1792_v4 = vmax.f32 %v1647_v43, %v1695_v55  ;;  %v2047_v13 = vrot.slane %v1413_v10, 4  ;;  %v1790_v5 = vmax.f32 %v1645_v11, %v1694_v35  ;;  %v10854_v6 = vmax.bf16 %v8378_v58, %v8366_v49 }
  0xb4   : > { %v1791_v12 = vmax.f32 %v1646_v44, %v1696_v33  ;;  %v1095_v31 = vmax.bf16 %v1031_v60, %v967_v37  ;;  %v2046_v23 = vsel %vm2013_vm7, %v2044_v8, %v2045_v26  ;;  %v1221_v27 = vmax.bf16 %v1157_v52, %v1092_v19  ;;  %v904_v52 = vld [vmem:[#allocation2 + $0xb8] sm:$0xf] }
  0xb5   : > { %v1094_v17 = vmax.bf16 %v1030_v62, %v10854_v6  ;;  %v1985_v51 = vmax.f32 %v1792_v4, %v1871_v21  ;;  %v2048_v22 = vsel %vm2013_vm7, %v2045_v26, %v2047_v13  ;;  %v1983_v36 = vmax.f32 %v1790_v5, %v1867_v48  ;;  %v842_v21 = vld [vmem:[#allocation2 + $0xb0] sm:$0x1]  ;;  %v907_v13 = vld [vmem:[#allocation2 + $0xc4] sm:$0x1] }
  0xb6   : > { %v1984_v29 = vmax.f32 %v1791_v12, %v1869_v50  ;;  %v1222_v61 = vmax.bf16 %v1158_v30, %v1093_v20  ;;  %v1224_v53 = vmax.bf16 %v1160_v24, %v1095_v31  ;;  %v1350_v49 = vmax.bf16 %v1286_v47, %v1221_v27  ;;  %v839_v50 = vld [vmem:[#allocation2 + $0xa4] sm:$0xf]  ;;  %v1033_v31 = vld [vmem:[#allocation2 + $0xd0] sm:$0xf]  ;;  %v1035_v27 = vld [vmem:[#allocation2 + $0xd8] sm:$0x1] }
  0xb7   : > { %v1223_v1 = vmax.bf16 %v1159_v28, %v1094_v17  ;;  %v2162_v38 = vmax.f32 %v1985_v51, %v2048_v22  ;;  %v7289_v58 = vcombine.low %v8619_v0, %v8622_v59  ;;  %v2160_v37 = vmax.f32 %v1983_v36, %v2044_v8  ;;  %v1032_v28 = vld [vmem:[#allocation2 + $0xcc] sm:$0xf]  ;;  %v1034_v22 = vld [vmem:[#allocation2 + $0xd4] sm:$0xf] }
  0xb8   : > { %v2161_v40 = vmax.f32 %v1984_v29, %v2046_v23  ;;  %v1351_v45 = vmax.bf16 %v1287_v56, %v1222_v61  ;;  %v1353_v3 = vmax.bf16 %v1289_v32, %v1224_v53  ;;  %v1414_v19 = vunpack.c.l.bf16 %v1350_v49  ;;  %v1161_v61 = vld [vmem:[#allocation2 + $0xe0] sm:$0xf]  ;;  %v8754_v32 = vld [vmem:[#allocation2 + $0xcc] sm:$0xf] }
  0xb9   : > { %v1352_v15 = vmax.bf16 %v1288_v54, %v1223_v1  ;;  %v2203_v10 = vpack.c.bf16 %v2162_v38, %v2162_v38  ;;  %7749 = vmatprep.mubr.msk.bf16.mxu0 %vm494_vm3, %v7289_v58  ;;  %v7290_v20 = vcombine.low %v8633_v7, %v8639_v25  ;;  %v7541_v46 = vpack.c.bf16 %v2160_v37, %v2160_v37  ;;  %v8752_v1 = vld [vmem:[#allocation2 + $0xb8] sm:$0xf] }
  0xba   : > { %v2202_v41 = vpack.c.bf16 %v2161_v40, %v2160_v37  ;;  %v7542_v34 = vpack.c.bf16 %v2161_v40, %v2161_v40  ;;  %v8730_v16 = vunpack.c.l.bf16 %v1351_v45  ;;  %v1417_v59 = vunpack.c.l.bf16 %v1353_v3  ;;  %v1162_v37 = vld [vmem:[#allocation2 + $0xe4] sm:$0xf]  ;;  %v1163_v40 = vld [vmem:[#allocation2 + $0xe8] sm:$0xf]  ;;  %v1164_v45 = vld [vmem:[#allocation2 + $0xec] sm:$0x1] }
  0xbb   : > { %v2306_v63 = vrot.slane %v2203_v10, 3  ;;  %v2759_v2 = vrot.slane %v2203_v10, 7  ;;  %v1416_v0 = vunpack.c.l.bf16 %v1352_v15  ;;  %7750 = vmatmul.mubr.msk.bf16.gmra.mxu0 %vm494_vm3, %v7290_v20  ;;  %v7378_v55 = vrot.slane %v7541_v46, 11  ;;  %v10855_v10 = vld [vmem:[#allocation5_spill] sm:$0xff]  ;;  %v10856_v3 = vld [vmem:[#allocation4_spill] sm:$0xff]  ;;  %v10859_v46 = vld [vmem:[#allocation6_spill] sm:$0xff] }
  0xbc   : > { %v2305_v35 = vrot.slane %v2202_v41, 3  ;;  %v2756_v42 = vrot.slane %v7542_v34, 7  ;;  %v1534_v48 = vrot.slane %v1414_v19, 1  ;;  %v1535_v57 = vrot.slane %v8730_v16, 1  ;;  %v10858_v41 = vld [vmem:[#allocation7_spill] sm:$0xff] }
  0xbd   : > { %v1537_v14 = vrot.slane %v1416_v0, 1  ;;  %v1697_v7 = vrot.slane %v8730_v16, 2  ;;  %v1698_v25 = vrot.slane %v1416_v0, 2  ;;  %v1872_v33 = vrot.slane %v8730_v16, 3 }
  0xbe   : > { %v2307_v18 = vsel %vm1836_vm6, %v2305_v35, %v2306_v63  ;;  %v2757_v39 = vsel %vm8470_vm9, %v7378_v55, %v2756_v42  ;;  %v2758_v43 = vrot.slane %v2756_v42, 4  ;;  %v1536_v62 = vsel %vm1498_vm4, %v1534_v48, %v1535_v57  ;;  %v1291_v55 = vld [vmem:[#allocation2 + $0xf8] sm:$0xf]  ;;  %v1292_v42 = vld [vmem:[#allocation2 + $0xfc] sm:$0xf] }
  0xbf   : > { %7767 = vmatprep.mubr.msk.bf16.mxu1 %vm494_vm3, %v2307_v18  ;;  %2868 = vst.msk [vmem:[#allocation2 + $0xa8] sm:$0xf] %vm247_vm1, %v2757_v39  ;;  %v1538_v60 = vsel %vm1498_vm4, %v1535_v57, %v1537_v14  ;;  %v1650_v11 = vmax.f32 %v1416_v0, %v1537_v14  ;;  %v1699_v44 = vsel %vm1675_vm5, %v1697_v7, %v1698_v25  ;;  %v1873_v26 = vrot.slane %v1416_v0, 3  ;;  %v1293_v48 = vld [vmem:[#allocation2 + $0x100] sm:$0x1] }
  0xc0   : > { %v2760_v30 = vsel %vm8470_vm9, %v2758_v43, %v2759_v2  ;;  %v1648_v4 = vmax.f32 %v1414_v19, %v1536_v62  ;;  %v1649_v8 = vmax.f32 %v8730_v16, %v1538_v60  ;;  %v1875_v12 = vrot.slane %v1417_v59, 3  ;;  %v1290_v2 = vld [vmem:[#allocation2 + $0xf4] sm:$0xf] }
  0xc1   : > { %2869 = vst.msk [vmem:[#allocation2 + $0xac] sm:$0xf] %vm247_vm1, %v2760_v30  ;;  %v1795_v5 = vmax.f32 %v1650_v11, %v1698_v25  ;;  %v2049_v6 = vrot.slane %v8730_v16, 4  ;;  %v2050_v17 = vrot.slane %v1416_v0, 4  ;;  %v1874_v51 = vsel %vm1836_vm6, %v1872_v33, %v1873_v26 }
  0xc2   : > { %v1793_v24 = vmax.f32 %v1648_v4, %v1697_v7  ;;  %v1794_v47 = vmax.f32 %v1649_v8, %v1699_v44  ;;  %v2052_v23 = vrot.slane %v1417_v59, 4  ;;  %v1876_v56 = vsel %vm1836_vm6, %v1873_v26, %v1875_v12 }
  0xc3   : > { %v2051_v54 = vsel %vm2013_vm7, %v2049_v6, %v2050_v17  ;;  %v968_v36 = vmax.bf16 %v904_v52, %v839_v50  ;;  %v971_v29 = vmax.bf16 %v907_v13, %v842_v21  ;;  %v1988_v49 = vmax.f32 %v1795_v5, %v1876_v56  ;;  %v844_v5 = vld [vmem:[#allocation2 + $0xbc] sm:$0xf] }
  0xc4   : > { %v1986_v38 = vmax.f32 %v1793_v24, %v1872_v33  ;;  %v1987_v53 = vmax.f32 %v1794_v47, %v1874_v51  ;;  %v2053_v58 = vsel %vm2013_vm7, %v2050_v17, %v2052_v23  ;;  %v10857_v19 = vmax.bf16 %v10855_v10, %v10856_v3  ;;  %v846_v10 = vld [vmem:[#allocation2 + $0xc4] sm:$0x1]  ;;  %v911_v3 = vld [vmem:[#allocation2 + $0xd8] sm:$0x1] }
  0xc5   : > { %v1096_v15 = vmax.bf16 %v1032_v28, %v968_v36  ;;  %v10860_v34 = vmax.bf16 %v10858_v41, %v10859_v46  ;;  %v1099_v63 = vmax.bf16 %v1035_v27, %v971_v29  ;;  %v2165_v35 = vmax.f32 %v1988_v49, %v2053_v58  ;;  %v909_v29 = vld [vmem:[#allocation2 + $0xd0] sm:$0xf]  ;;  %v910_v58 = vld [vmem:[#allocation2 + $0xd4] sm:$0xf] }
  0xc6   : > { %v1097_v20 = vmax.bf16 %v1033_v31, %v10857_v19  ;;  %v2163_v0 = vmax.f32 %v1986_v38, %v2049_v6  ;;  %v2164_v59 = vmax.f32 %v1987_v53, %v2051_v54  ;;  %v972_v57 = vmax.bf16 %v8754_v32, %v8752_v1 }
  0xc7   : > { %v1098_v16 = vmax.bf16 %v1034_v22, %v10860_v34  ;;  %v1225_v14 = vmax.bf16 %v1161_v61, %v1096_v15  ;;  %v1228_v18 = vmax.bf16 %v1164_v45, %v1099_v63  ;;  %v2205_v43 = vpack.c.bf16 %v2165_v35, %v2165_v35  ;;  %v845_v22 = vld [vmem:[#allocation2 + $0xc0] sm:$0xf]  ;;  %v1038_v35 = vld [vmem:[#allocation2 + $0xe8] sm:$0xf] }
  0xc8   : > { %v1226_v7 = vmax.bf16 %v1162_v37, %v1097_v20  ;;  %v2204_v39 = vpack.c.bf16 %v2164_v59, %v2163_v0  ;;  %v7544_v33 = vpack.c.bf16 %v2163_v0, %v2163_v0  ;;  %v7545_v62 = vpack.c.bf16 %v2164_v59, %v2164_v59  ;;  %v1036_v34 = vld [vmem:[#allocation2 + $0xe0] sm:$0xf] }
  0xc9   : > { %v1227_v25 = vmax.bf16 %v1163_v40, %v1098_v16  ;;  %v1354_v60 = vmax.bf16 %v1290_v2, %v1225_v14  ;;  %v1357_v50 = vmax.bf16 %v1293_v48, %v1228_v18  ;;  %v2309_v52 = vrot.slane %v2205_v43, 3  ;;  %v1037_v16 = vld [vmem:[#allocation2 + $0xe4] sm:$0xf] }
  0xca   : > { %v1355_v11 = vmax.bf16 %v1291_v55, %v1226_v7  ;;  %v2308_v21 = vrot.slane %v2204_v39, 3  ;;  %v7379_v30 = vrot.slane %v7544_v33, 11  ;;  %v2763_v4 = vrot.slane %v7545_v62, 7  ;;  %v1039_v55 = vld [vmem:[#allocation2 + $0xec] sm:$0x1] }
  0xcb   : > { %v1356_v44 = vmax.bf16 %v1292_v42, %v1227_v25  ;;  %v2766_v8 = vrot.slane %v2205_v43, 7  ;;  %v1418_v26 = vunpack.c.l.bf16 %v1354_v60  ;;  %v1421_v31 = vunpack.c.l.bf16 %v1357_v50  ;;  %v1165_v25 = vld [vmem:[#allocation2 + $0xf4] sm:$0xf]  ;;  %v8786_v18 = vld [vmem:[#allocation2 + $0x4] sm:$0xf] }
  0xcc   : > { %v8765_v13 = vunpack.c.l.bf16 %v1355_v11  ;;  %v2310_v12 = vsel %vm1836_vm6, %v2308_v21, %v2309_v52  ;;  %v2764_v6 = vsel %vm8470_vm9, %v7379_v30, %v2763_v4  ;;  %v2765_v17 = vrot.slane %v2763_v4, 4  ;;  %v8788_v39 = vld [vmem:[#allocation2 + $0x18] sm:$0xf]  ;;  %v1168_v50 = vld [vmem:[#allocation2 + $0x100] sm:$0x1] }
  0xcd   : > { %v1420_v28 = vunpack.c.l.bf16 %v1356_v44  ;;  %7768 = vmatmul.mubr.msk.bf16.gmra.mxu1 %vm494_vm3, %v2310_v12  ;;  %2870 = vst.msk [vmem:[#allocation2 + $0xbc] sm:$0xf] %vm247_vm1, %v2764_v6  ;;  %v1539_v24 = vrot.slane %v1418_v26, 1  ;;  %v1880_v49 = vrot.slane %v1421_v31, 3  ;;  %v2057_v0 = vrot.slane %v1421_v31, 4 }
  0xce   : > { %v1540_v47 = vrot.slane %v8765_v13, 1  ;;  %v1700_v23 = vrot.slane %v8765_v13, 2  ;;  %v2767_v27 = vsel %vm8470_vm9, %v2765_v17, %v2766_v8  ;;  %v1877_v54 = vrot.slane %v8765_v13, 3  ;;  %v1166_v11 = vld [vmem:[#allocation2 + $0xf8] sm:$0xf] }
  0xcf   : > { %v1542_v51 = vrot.slane %v1420_v28, 1  ;;  %v1701_v56 = vrot.slane %v1420_v28, 2  ;;  %v1878_v36 = vrot.slane %v1420_v28, 3  ;;  %2871 = vst.msk [vmem:[#allocation2 + $0xc0] sm:$0xf] %vm247_vm1, %v2767_v27  ;;  %v2054_v41 = vrot.slane %v8765_v13, 4 }
  0xd0   : > { %v1541_v61 = vsel %vm1498_vm4, %v1539_v24, %v1540_v47  ;;  %v2055_v46 = vrot.slane %v1420_v28, 4  ;;  %v973_v59 = vmax.bf16 %v909_v29, %v844_v5  ;;  %v974_v14 = vmax.bf16 %v910_v58, %v845_v22  ;;  %v1167_v44 = vld [vmem:[#allocation2 + $0xfc] sm:$0xf]  ;;  %v1294_v8 = vld [vmem:[#allocation2 + $0x108] sm:$0xf] }
  0xd1   : > { %v1543_v38 = vsel %vm1498_vm4, %v1540_v47, %v1542_v51  ;;  %v1653_v53 = vmax.f32 %v1420_v28, %v1542_v51  ;;  %v1651_v37 = vmax.f32 %v1418_v26, %v1541_v61  ;;  %v1702_v45 = vsel %vm1675_vm5, %v1700_v23, %v1701_v56  ;;  %v1295_v5 = vld [vmem:[#allocation2 + $0x10c] sm:$0xf]  ;;  %v1296_v12 = vld [vmem:[#allocation2 + $0x110] sm:$0xf]  ;;  %v8796_v22 = vld [vmem:[#allocation2 + $0x8] sm:$0xf] }
  0xd2   : > { %v1652_v40 = vmax.f32 %v8765_v13, %v1543_v38  ;;  %v1879_v15 = vsel %vm1836_vm6, %v1877_v54, %v1878_v36  ;;  %v1881_v20 = vsel %vm1836_vm6, %v1878_v36, %v1880_v49  ;;  %v2056_v48 = vsel %vm2013_vm7, %v2054_v41, %v2055_v46  ;;  %v8798_v27 = vld [vmem:[#allocation2 + $0x1c] sm:$0xf] }
  0xd3   : > { %v1798_v19 = vmax.f32 %v1653_v53, %v1701_v56  ;;  %v1796_v63 = vmax.f32 %v1651_v37, %v1700_v23  ;;  %v975_v7 = vmax.bf16 %v911_v3, %v846_v10  ;;  %v2058_v62 = vsel %vm2013_vm7, %v2055_v46, %v2057_v0 }
  0xd4   : > { %v1797_v2 = vmax.f32 %v1652_v40, %v1702_v45  ;;  %v1100_v60 = vmax.bf16 %v1036_v34, %v972_v57  ;;  %v1101_v52 = vmax.bf16 %v1037_v16, %v973_v59  ;;  %v1102_v30 = vmax.bf16 %v1038_v35, %v974_v14  ;;  %v1297_v57 = vld [vmem:[#allocation2 + $0x114] sm:$0x1] }
  0xd5   : > { %v1991_v42 = vmax.f32 %v1798_v19, %v1881_v20  ;;  %v1989_v43 = vmax.f32 %v1796_v63, %v1877_v54  ;;  %v1103_v4 = vmax.bf16 %v1039_v55, %v975_v7  ;;  %v3016_v6 = vmax.bf16 %v8788_v39, %v8786_v18  ;;  %v8813_v63 = vld [vmem:[#allocation2 + $0xd4] sm:$0xf]  ;;  %v2890_v7 = vld [vmem:[#allocation2 + $0xc] sm:$0xf] }
  0xd6   : > { %v1990_v33 = vmax.f32 %v1797_v2, %v1879_v15  ;;  %v1229_v28 = vmax.bf16 %v1165_v25, %v1100_v60  ;;  %v1230_v31 = vmax.bf16 %v1166_v11, %v1101_v52  ;;  %v1231_v1 = vmax.bf16 %v1167_v44, %v1102_v30  ;;  %v8804_v15 = vld [vmem:[#allocation2 + $0xd0] sm:$0xf]  ;;  %v2954_v25 = vld [vmem:[#allocation2 + $0x20] sm:$0xf]  ;;  %v2955_v44 = vld [vmem:[#allocation2 + $0x24] sm:$0x1] }
  0xd7   : > { %v2168_v21 = vmax.f32 %v1991_v42, %v2058_v62  ;;  %v2166_v26 = vmax.f32 %v1989_v43, %v2054_v41  ;;  %v1232_v32 = vmax.bf16 %v1168_v50, %v1103_v4  ;;  %v3017_v45 = vmax.bf16 %v8798_v27, %v8796_v22  ;;  %v2891_v11 = vld [vmem:[#allocation2 + $0x10] sm:$0x1]  ;;  %v3080_v50 = vld [vmem:[#allocation2 + $0x2c] sm:$0xf] }
  0xd8   : > { %v2167_v13 = vmax.f32 %v1990_v33, %v2056_v48  ;;  %v1358_v23 = vmax.bf16 %v1294_v8, %v1229_v28  ;;  %v1359_v36 = vmax.bf16 %v1295_v5, %v1230_v31  ;;  %v1360_v29 = vmax.bf16 %v1296_v12, %v1231_v1  ;;  %v3081_v8 = vld [vmem:[#allocation2 + $0x30] sm:$0xf]  ;;  %v3208_v31 = vld [vmem:[#allocation2 + $0x40] sm:$0xf] }
  0xd9   : > { %v2207_v17 = vpack.c.bf16 %v2168_v21, %v2168_v21  ;;  %v7547_v47 = vpack.c.bf16 %v2166_v26, %v2166_v26  ;;  %v1361_v49 = vmax.bf16 %v1297_v57, %v1232_v32  ;;  %v3018_v12 = vmax.bf16 %v2954_v25, %v2890_v7 }
  0xda   : > { %v2206_v24 = vpack.c.bf16 %v2167_v13, %v2166_v26  ;;  %v7548_v51 = vpack.c.bf16 %v2167_v13, %v2167_v13  ;;  %v1422_v58 = vunpack.c.l.bf16 %v1358_v23  ;;  %v8800_v37 = vunpack.c.l.bf16 %v1359_v36  ;;  %v3082_v26 = vld [vmem:[#allocation2 + $0x34] sm:$0xf]  ;;  %v8832_v23 = vld [vmem:[#allocation2 + $0x2c] sm:$0xf]  ;;  %v3210_v36 = vld [vmem:[#allocation2 + $0x48] sm:$0xf] }
  0xdb   : > { %v2312_v56 = vrot.slane %v2207_v17, 3  ;;  %v2773_v54 = vrot.slane %v2207_v17, 7  ;;  %v7380_v38 = vrot.slane %v7547_v47, 11  ;;  %v1424_v40 = vunpack.c.l.bf16 %v1360_v29  ;;  %v3083_v17 = vld [vmem:[#allocation2 + $0x38] sm:$0x1] }
  0xdc   : > { %v2311_v61 = vrot.slane %v2206_v24, 3  ;;  %v2770_v53 = vrot.slane %v7548_v51, 7  ;;  %v1425_v20 = vunpack.c.l.bf16 %v1361_v49  ;;  %v1544_v41 = vrot.slane %v1422_v58, 1  ;;  %v3209_v47 = vld [vmem:[#allocation2 + $0x44] sm:$0xf] }
  0xdd   : > { %v1545_v46 = vrot.slane %v8800_v37, 1  ;;  %v1547_v34 = vrot.slane %v1424_v40, 1  ;;  %v1703_v16 = vrot.slane %v8800_v37, 2  ;;  %v1704_v0 = vrot.slane %v1424_v40, 2  ;;  %v8830_v51 = vld [vmem:[#allocation2 + $0x18] sm:$0xf] }
  0xde   : > { %v2313_v10 = vsel %vm1836_vm6, %v2311_v61, %v2312_v56  ;;  %v2771_v3 = vsel %vm8470_vm9, %v7380_v38, %v2770_v53  ;;  %v2772_v19 = vrot.slane %v2770_v53, 4  ;;  %v1882_v59 = vrot.slane %v8800_v37, 3  ;;  %v3211_v29 = vld [vmem:[#allocation2 + $0x4c] sm:$0x1]  ;;  %v3336_v61 = vld [vmem:[#allocation2 + $0x54] sm:$0xf] }
  0xdf   : > { %7771 = vmatprep.mubr.msk.bf16.mxu1 %vm494_vm3, %v2313_v10  ;;  %2872 = vst.msk [vmem:[#allocation2 + $0xd0] sm:$0xf] %vm247_vm1, %v2771_v3  ;;  %v1883_v35 = vrot.slane %v1424_v40, 3  ;;  %v1546_v55 = vsel %vm1498_vm4, %v1544_v41, %v1545_v46  ;;  %v1548_v42 = vsel %vm1498_vm4, %v1545_v46, %v1547_v34  ;;  %v1656_v48 = vmax.f32 %v1424_v40, %v1547_v34  ;;  %v3339_v10 = vld [vmem:[#allocation2 + $0x60] sm:$0x1] }
  0xe0   : > { %v2774_v2 = vsel %vm8470_vm9, %v2772_v19, %v2773_v54  ;;  %v1885_v14 = vrot.slane %v1425_v20, 3  ;;  %v1654_v43 = vmax.f32 %v1422_v58, %v1546_v55  ;;  %v1655_v33 = vmax.f32 %v8800_v37, %v1548_v42 }
  0xe1   : > { %2873 = vst.msk [vmem:[#allocation2 + $0xd4] sm:$0xf] %vm247_vm1, %v2774_v2  ;;  %v1705_v62 = vsel %vm1675_vm5, %v1703_v16, %v1704_v0  ;;  %v1884_v60 = vsel %vm1836_vm6, %v1882_v59, %v1883_v35  ;;  %v1801_v21 = vmax.f32 %v1656_v48, %v1704_v0  ;;  %v2059_v30 = vrot.slane %v8800_v37, 4  ;;  %v3337_v37 = vld [vmem:[#allocation2 + $0x58] sm:$0xf] }
  0xe2   : > { %v1886_v52 = vsel %vm1836_vm6, %v1883_v35, %v1885_v14  ;;  %v2060_v4 = vrot.slane %v1424_v40, 4  ;;  %v1799_v13 = vmax.f32 %v1654_v43, %v1703_v16  ;;  %v1800_v28 = vmax.f32 %v1655_v33, %v1705_v62  ;;  %v3338_v40 = vld [vmem:[#allocation2 + $0x5c] sm:$0xf]  ;;  %v8841_v33 = vld [vmem:[#allocation2 + $0xe4] sm:$0xf] }
  0xe3   : > { %v2062_v5 = vrot.slane %v1425_v20, 4  ;;  %v1994_v1 = vmax.f32 %v1801_v21, %v1886_v52  ;;  %v3019_v57 = vmax.bf16 %v2955_v44, %v2891_v11  ;;  %v3144_v24 = vmax.bf16 %v3080_v50, %v3016_v6  ;;  %v8837_v0 = vld [vmem:[#allocation2 + $0x1c] sm:$0xf]  ;;  %v8847_v50 = vld [vmem:[#allocation2 + $0xe8] sm:$0xf] }
  0xe4   : > { %v2061_v32 = vsel %vm2013_vm7, %v2059_v30, %v2060_v4  ;;  %v1992_v22 = vmax.f32 %v1799_v13, %v1882_v59  ;;  %v1993_v27 = vmax.f32 %v1800_v28, %v1884_v60  ;;  %v3145_v54 = vmax.bf16 %v3081_v8, %v3017_v45  ;;  %v8839_v59 = vld [vmem:[#allocation2 + $0x30] sm:$0xf]  ;;  %v8849_v21 = vld [vmem:[#allocation2 + $0xe4] sm:$0xf] }
  0xe5   : > { %v2063_v56 = vsel %vm2013_vm7, %v2060_v4, %v2062_v5  ;;  %v3146_v53 = vmax.bf16 %v3082_v26, %v3018_v12  ;;  %v3147_v49 = vmax.bf16 %v3083_v17, %v3019_v57  ;;  %v3272_v58 = vmax.bf16 %v3208_v31, %v3144_v24  ;;  %v8854_v26 = vld [vmem:[#allocation2 + $0xe8] sm:$0xf]  ;;  %v2958_v17 = vld [vmem:[#allocation2 + $0x34] sm:$0xf] }
  0xe6   : > { %v2171_v38 = vmax.f32 %v1994_v1, %v2063_v56  ;;  %v2169_v18 = vmax.f32 %v1992_v22, %v2059_v30  ;;  %v2170_v39 = vmax.f32 %v1993_v27, %v2061_v32  ;;  %v3273_v6 = vmax.bf16 %v3209_v47, %v3145_v54  ;;  %v2894_v56 = vld [vmem:[#allocation2 + $0x20] sm:$0xf]  ;;  %v2895_v54 = vld [vmem:[#allocation2 + $0x24] sm:$0x1] }
  0xe7   : > { %v3020_v3 = vmax.bf16 %v8832_v23, %v8830_v51  ;;  %v3274_v20 = vmax.bf16 %v3210_v36, %v3146_v53  ;;  %v3275_v41 = vmax.bf16 %v3211_v29, %v3147_v49  ;;  %v3400_v45 = vmax.bf16 %v3336_v61, %v3272_v58  ;;  %v2959_v36 = vld [vmem:[#allocation2 + $0x38] sm:$0x1]  ;;  %v3084_v49 = vld [vmem:[#allocation2 + $0x40] sm:$0xf]  ;;  %v3085_v58 = vld [vmem:[#allocation2 + $0x44] sm:$0xf] }
  0xe8   : > { %v2209_v19 = vpack.c.bf16 %v2171_v38, %v2171_v38  ;;  %v2208_v46 = vpack.c.bf16 %v2170_v39, %v2169_v18  ;;  %v7550_v34 = vpack.c.bf16 %v2169_v18, %v2169_v18  ;;  %v7551_v16 = vpack.c.bf16 %v2170_v39, %v2170_v39  ;;  %v3342_v23 = vld [vmem:[#allocation2 + $0x70] sm:$0xf] }
  0xe9   : > { %v3401_v2 = vmax.bf16 %v3337_v37, %v3273_v6  ;;  %v3402_v42 = vmax.bf16 %v3338_v40, %v3274_v20  ;;  %v3403_v48 = vmax.bf16 %v3339_v10, %v3275_v41  ;;  %v3464_v43 = vunpack.c.l.bf16 %v3400_v45  ;;  %v3086_v37 = vld [vmem:[#allocation2 + $0x48] sm:$0xf]  ;;  %v3087_v10 = vld [vmem:[#allocation2 + $0x4c] sm:$0x1] }
  0xea   : > { %v2315_v35 = vrot.slane %v2209_v19, 3  ;;  %v2780_v55 = vrot.slane %v2209_v19, 7  ;;  %v2314_v14 = vrot.slane %v2208_v46, 3  ;;  %v7381_v7 = vrot.slane %v7550_v34, 11  ;;  %v3212_v46 = vld [vmem:[#allocation2 + $0x54] sm:$0xf] }
  0xeb   : > { %v2777_v25 = vrot.slane %v7551_v16, 7  ;;  %v8843_v62 = vunpack.c.l.bf16 %v3401_v2  ;;  %v3466_v60 = vunpack.c.l.bf16 %v3402_v42  ;;  %v3467_v11 = vunpack.c.l.bf16 %v3403_v48  ;;  %v8871_v34 = vld [vmem:[#allocation2 + $0xcc] sm:$0xf]  ;;  %v8873_v16 = vld [vmem:[#allocation2 + $0xe0] sm:$0xf] }
  0xec   : > { %v3021_v44 = vmax.bf16 %v8839_v59, %v8837_v0  ;;  %v2316_v52 = vsel %vm1836_vm6, %v2314_v14, %v2315_v35  ;;  %v3576_v8 = vrot.slane %v3464_v43, 1  ;;  %v3022_v41 = vmax.bf16 %v2958_v17, %v2894_v56  ;;  %v3214_v42 = vld [vmem:[#allocation2 + $0x5c] sm:$0xf] }
  0xed   : > { %v2778_v30 = vsel %vm8470_vm9, %v7381_v7, %v2777_v25  ;;  %v2779_v4 = vrot.slane %v2777_v25, 4  ;;  %7772 = vmatmul.mubr.msk.bf16.gmra.mxu1 %vm494_vm3, %v2316_v52  ;;  %v3577_v13 = vrot.slane %v8843_v62, 1  ;;  %v3579_v28 = vrot.slane %v3466_v60, 1 }
  0xee   : > { %2874 = vst.msk [vmem:[#allocation2 + $0xe4] sm:$0xf] %vm247_vm1, %v2778_v30  ;;  %v3752_v5 = vrot.slane %v8843_v62, 2  ;;  %v3753_v12 = vrot.slane %v3466_v60, 2  ;;  %v3912_v1 = vrot.slane %v8843_v62, 3  ;;  %v3913_v32 = vrot.slane %v3466_v60, 3 }
  0xef   : > { %v2781_v31 = vsel %vm8470_vm9, %v2779_v4, %v2780_v55  ;;  %v3915_v57 = vrot.slane %v3467_v11, 3  ;;  %v3578_v24 = vsel %vm1498_vm4, %v3576_v8, %v3577_v13  ;;  %v3580_v47 = vsel %vm1498_vm4, %v3577_v13, %v3579_v28  ;;  %v3213_v55 = vld [vmem:[#allocation2 + $0x58] sm:$0xf]  ;;  %v3341_v30 = vld [vmem:[#allocation2 + $0x6c] sm:$0xf] }
  0xf0   : > { %2875 = vst.msk [vmem:[#allocation2 + $0xe8] sm:$0xf] %vm247_vm1, %v2781_v31  ;;  %v3706_v22 = vmax.f32 %v3466_v60, %v3579_v28  ;;  %v3754_v27 = vsel %vm1675_vm5, %v3752_v5, %v3753_v12  ;;  %v3704_v29 = vmax.f32 %v3464_v43, %v3578_v24  ;;  %v3705_v61 = vmax.f32 %v8843_v62, %v3580_v47  ;;  %v3215_v43 = vld [vmem:[#allocation2 + $0x60] sm:$0x1] }
  0xf1   : > { %v3914_v38 = vsel %vm1836_vm6, %v3912_v1, %v3913_v32  ;;  %v3916_v53 = vsel %vm1836_vm6, %v3913_v32, %v3915_v57  ;;  %v4088_v39 = vrot.slane %v8843_v62, 4  ;;  %v4089_v6 = vrot.slane %v3466_v60, 4  ;;  %v3340_v62 = vld [vmem:[#allocation2 + $0x68] sm:$0xf] }
  0xf2   : > { %v3850_v18 = vmax.f32 %v3706_v22, %v3753_v12  ;;  %v4091_v40 = vrot.slane %v3467_v11, 4  ;;  %v3848_v19 = vmax.f32 %v3704_v29, %v3752_v5  ;;  %v3849_v20 = vmax.f32 %v3705_v61, %v3754_v27 }
  0xf3   : > { %v3023_v45 = vmax.bf16 %v2959_v36, %v2895_v54  ;;  %v4090_v0 = vsel %vm2013_vm7, %v4088_v39, %v4089_v6  ;;  %v3148_v35 = vmax.bf16 %v3084_v49, %v3020_v3  ;;  %v3149_v7 = vmax.bf16 %v3085_v58, %v3021_v44  ;;  %v3343_v3 = vld [vmem:[#allocation2 + $0x74] sm:$0x1] }
  0xf4   : > { %v4042_v2 = vmax.f32 %v3850_v18, %v3916_v53  ;;  %v4092_v59 = vsel %vm2013_vm7, %v4089_v6, %v4091_v40  ;;  %v4040_v48 = vmax.f32 %v3848_v19, %v3912_v1  ;;  %v4041_v14 = vmax.f32 %v3849_v20, %v3914_v38  ;;  %v8891_v6 = vld [vmem:[#allocation2 + $0x30] sm:$0xf] }
  0xf5   : > { %v3150_v25 = vmax.bf16 %v3086_v37, %v3022_v41  ;;  %v3151_v11 = vmax.bf16 %v3087_v10, %v3023_v45  ;;  %v3276_v52 = vmax.bf16 %v3212_v46, %v3148_v35  ;;  %v976_v4 = vmax.bf16 %v8873_v16, %v8871_v34 }
  0xf6   : > { %v4218_v60 = vmax.f32 %v4042_v2, %v4092_v59  ;;  %v4216_v8 = vmax.f32 %v4040_v48, %v4088_v39  ;;  %v4217_v13 = vmax.f32 %v4041_v14, %v4090_v0  ;;  %v3277_v28 = vmax.bf16 %v3213_v55, %v3149_v7  ;;  %v850_v55 = vld [vmem:[#allocation2 + $0xd8] sm:$0x1]  ;;  %v1040_v48 = vld [vmem:[#allocation2 + $0xf4] sm:$0xf] }
  0xf7   : > { %v3278_v51 = vmax.bf16 %v3214_v42, %v3150_v25  ;;  %v3279_v12 = vmax.bf16 %v3215_v43, %v3151_v11  ;;  %v3404_v17 = vmax.bf16 %v3340_v62, %v3276_v52  ;;  %v977_v44 = vmax.bf16 %v8849_v21, %v8804_v15  ;;  %v915_v42 = vld [vmem:[#allocation2 + $0xec] sm:$0x1]  ;;  %v1041_v62 = vld [vmem:[#allocation2 + $0xf8] sm:$0xf]  ;;  %v1043_v11 = vld [vmem:[#allocation2 + $0x100] sm:$0x1] }
  0xf8   : > { %v4265_v5 = vpack.c.bf16 %v4218_v60, %v4218_v60  ;;  %v4264_v31 = vpack.c.bf16 %v4217_v13, %v4216_v8  ;;  %v7571_v1 = vpack.c.bf16 %v4216_v8, %v4216_v8  ;;  %v7572_v32 = vpack.c.bf16 %v4217_v13, %v4217_v13  ;;  %v1042_v60 = vld [vmem:[#allocation2 + $0xfc] sm:$0xf] }
  0xf9   : > { %v3405_v57 = vmax.bf16 %v3341_v30, %v3277_v28  ;;  %v3406_v22 = vmax.bf16 %v3342_v23, %v3278_v51  ;;  %v3407_v27 = vmax.bf16 %v3343_v3, %v3279_v12  ;;  %v3468_v29 = vunpack.c.l.bf16 %v3404_v17  ;;  %v1169_v28 = vld [vmem:[#allocation2 + $0x108] sm:$0xf]  ;;  %v1170_v12 = vld [vmem:[#allocation2 + $0x10c] sm:$0xf]  ;;  %v8913_v17 = vld [vmem:[#allocation2 + $0xe0] sm:$0xf] }
  0xfa   : > { %v4361_v24 = vrot.slane %v4265_v5, 3  ;;  %v4787_v47 = vrot.slane %v4265_v5, 7  ;;  %v4360_v56 = vrot.slane %v4264_v31, 3  ;;  %v7453_v54 = vrot.slane %v7571_v1, 11  ;;  %v8915_v31 = vld [vmem:[#allocation2 + $0xf4] sm:$0xf] }
  0xfb   : > { %v4784_v36 = vrot.slane %v7572_v32, 7  ;;  %v8884_v61 = vunpack.c.l.bf16 %v3405_v57  ;;  %v3470_v38 = vunpack.c.l.bf16 %v3406_v22  ;;  %v3471_v53 = vunpack.c.l.bf16 %v3407_v27  ;;  %v1172_v22 = vld [vmem:[#allocation2 + $0x114] sm:$0x1]  ;;  %v8922_v27 = vld [vmem:[#allocation2 + $0xf8] sm:$0xf] }
  0xfc   : > { %v978_v49 = vmax.bf16 %v8854_v26, %v8813_v63  ;;  %v4362_v58 = vsel %vm1836_vm6, %v4360_v56, %v4361_v24  ;;  %v3581_v39 = vrot.slane %v3468_v29, 1  ;;  %v8897_v63 = vld [vmem:[#allocation2 + $0x34] sm:$0xf]  ;;  %v979_v3 = vmax.bf16 %v915_v42, %v850_v55 }
  0xfd   : > { %v4785_v37 = vsel %vm8470_vm9, %v7453_v54, %v4784_v36  ;;  %v4786_v18 = vrot.slane %v4784_v36, 4  ;;  %7789 = vmatprep.mubr.msk.bf16.mxu0 %vm494_vm3, %v4362_v58  ;;  %v3582_v40 = vrot.slane %v8884_v61, 1  ;;  %v3584_v10 = vrot.slane %v3470_v38, 1  ;;  %v1298_v54 = vld [vmem:[#allocation2 + $0x11c] sm:$0xf] }
  0xfe   : > { %v3755_v19 = vrot.slane %v8884_v61, 2  ;;  %v3756_v20 = vrot.slane %v3470_v38, 2  ;;  %4926 = vst.msk [vmem:[#allocation2 + $0x30] sm:$0xf] %vm247_vm1, %v4785_v37  ;;  %v3917_v41 = vrot.slane %v8884_v61, 3  ;;  %v3918_v45 = vrot.slane %v3470_v38, 3 }
  0xff   : > { %v4788_v26 = vsel %vm8470_vm9, %v4786_v18, %v4787_v47  ;;  %v3920_v46 = vrot.slane %v3471_v53, 3  ;;  %v3583_v2 = vsel %vm1498_vm4, %v3581_v39, %v3582_v40  ;;  %v3585_v0 = vsel %vm1498_vm4, %v3582_v40, %v3584_v10  ;;  %v1171_v47 = vld [vmem:[#allocation2 + $0x110] sm:$0xf]  ;;  %v1299_v36 = vld [vmem:[#allocation2 + $0x120] sm:$0xf] }
 0x100   : > { %4927 = vst.msk [vmem:[#allocation2 + $0x34] sm:$0xf] %vm247_vm1, %v4788_v26  ;;  %v3709_v59 = vmax.f32 %v3470_v38, %v3584_v10  ;;  %v3757_v35 = vsel %vm1675_vm5, %v3755_v19, %v3756_v20  ;;  %v3707_v14 = vmax.f32 %v3468_v29, %v3583_v2  ;;  %v3708_v7 = vmax.f32 %v8884_v61, %v3585_v0  ;;  %v1301_v18 = vld [vmem:[#allocation2 + $0x128] sm:$0x1] }
 0x101   : > { %v3919_v25 = vsel %vm1836_vm6, %v3917_v41, %v3918_v45  ;;  %v3921_v43 = vsel %vm1836_vm6, %v3918_v45, %v3920_v46  ;;  %v4093_v30 = vrot.slane %v8884_v61, 4  ;;  %v4094_v8 = vrot.slane %v3470_v38, 4 }
 0x102   : > { %v3853_v52 = vmax.f32 %v3709_v59, %v3756_v20  ;;  %v4096_v13 = vrot.slane %v3471_v53, 4  ;;  %v3851_v51 = vmax.f32 %v3707_v14, %v3755_v19  ;;  %v3852_v23 = vmax.f32 %v3708_v7, %v3757_v35  ;;  %v1300_v53 = vld [vmem:[#allocation2 + $0x124] sm:$0xf]  ;;  %v8928_v19 = vld [vmem:[#allocation2 + $0xfc] sm:$0xf] }
 0x103   : > { %v1104_v5 = vmax.bf16 %v1040_v48, %v976_v4  ;;  %v4095_v32 = vsel %vm2013_vm7, %v4093_v30, %v4094_v8  ;;  %v1105_v24 = vmax.bf16 %v1041_v62, %v977_v44  ;;  %v1106_v4 = vmax.bf16 %v1042_v60, %v978_v49 }
 0x104   : > { %v4045_v1 = vmax.f32 %v3853_v52, %v3921_v43  ;;  %v4097_v57 = vsel %vm2013_vm7, %v4094_v8, %v4096_v13  ;;  %v4043_v34 = vmax.f32 %v3851_v51, %v3917_v41  ;;  %v4044_v16 = vmax.f32 %v3852_v23, %v3919_v25  ;;  %v8938_v52 = vld [vmem:[#allocation2 + $0x44] sm:$0xf]  ;;  %v854_v51 = vld [vmem:[#allocation2 + $0xec] sm:$0x1] }
 0x105   : > { %v1107_v56 = vmax.bf16 %v1043_v11, %v979_v3  ;;  %v1233_v61 = vmax.bf16 %v1169_v28, %v1104_v5  ;;  %v1234_v38 = vmax.bf16 %v1170_v12, %v1105_v24  ;;  %v980_v58 = vmax.bf16 %v8915_v31, %v8913_v17  ;;  %v1303_v31 = vld [vmem:[#allocation2 + $0x134] sm:$0xf] }
 0x106   : > { %v4221_v29 = vmax.f32 %v4045_v1, %v4097_v57  ;;  %v4219_v37 = vmax.f32 %v4043_v34, %v4093_v30  ;;  %v4220_v15 = vmax.f32 %v4044_v16, %v4095_v32  ;;  %v1235_v21 = vmax.bf16 %v1171_v47, %v1106_v4  ;;  %v8940_v30 = vld [vmem:[#allocation2 + $0x44] sm:$0xf]  ;;  %v8949_v1 = vld [vmem:[#allocation2 + $0x48] sm:$0xf]  ;;  %v1045_v16 = vld [vmem:[#allocation2 + $0x10c] sm:$0xf] }
 0x107   : > { %v1236_v44 = vmax.bf16 %v1172_v22, %v1107_v56  ;;  %v1362_v40 = vmax.bf16 %v1298_v54, %v1233_v61  ;;  %v1363_v10 = vmax.bf16 %v1299_v36, %v1234_v38  ;;  %v981_v49 = vmax.bf16 %v8922_v27, %v8841_v33  ;;  %v8951_v32 = vld [vmem:[#allocation2 + $0x48] sm:$0xf]  ;;  %v919_v27 = vld [vmem:[#allocation2 + $0x100] sm:$0x1] }
 0x108   : > { %v4267_v39 = vpack.c.bf16 %v4221_v29, %v4221_v29  ;;  %v4266_v20 = vpack.c.bf16 %v4220_v15, %v4219_v37  ;;  %v7574_v26 = vpack.c.bf16 %v4219_v37, %v4219_v37  ;;  %v7575_v41 = vpack.c.bf16 %v4220_v15, %v4220_v15  ;;  %v1044_v34 = vld [vmem:[#allocation2 + $0x108] sm:$0xf]  ;;  %v1046_v29 = vld [vmem:[#allocation2 + $0x110] sm:$0xf]  ;;  %v1047_v15 = vld [vmem:[#allocation2 + $0x114] sm:$0x1] }
 0x109   : > { %v1364_v45 = vmax.bf16 %v1300_v53, %v1235_v21  ;;  %v1365_v0 = vmax.bf16 %v1301_v18, %v1236_v44  ;;  %v1426_v59 = vunpack.c.l.bf16 %v1362_v40  ;;  %v8930_v48 = vunpack.c.l.bf16 %v1363_v10  ;;  %v1173_v21 = vld [vmem:[#allocation2 + $0x11c] sm:$0xf]  ;;  %v1174_v10 = vld [vmem:[#allocation2 + $0x120] sm:$0xf] }
 0x10a   : > { %v4364_v46 = vrot.slane %v4267_v39, 3  ;;  %v4794_v2 = vrot.slane %v4267_v39, 7  ;;  %v4363_v35 = vrot.slane %v4266_v20, 3  ;;  %v7454_v55 = vrot.slane %v7574_v26, 11  ;;  %v8965_v20 = vld [vmem:[#allocation2 + $0x40] sm:$0xf] }
 0x10b   : > { %v4791_v42 = vrot.slane %v7575_v41, 7  ;;  %v1428_v14 = vunpack.c.l.bf16 %v1364_v45  ;;  %v1429_v7 = vunpack.c.l.bf16 %v1365_v0  ;;  %v1549_v25 = vrot.slane %v1426_v59, 1  ;;  %v1176_v0 = vld [vmem:[#allocation2 + $0x128] sm:$0x1] }
 0x10c   : > { %v982_v33 = vmax.bf16 %v8928_v19, %v8847_v50  ;;  %v4365_v43 = vsel %vm1836_vm6, %v4363_v35, %v4364_v46  ;;  %v1550_v11 = vrot.slane %v8930_v48, 1  ;;  %v1706_v13 = vrot.slane %v8930_v48, 2  ;;  %v8963_v19 = vld [vmem:[#allocation2 + $0x2c] sm:$0xf] }
 0x10d   : > { %v4792_v62 = vsel %vm8470_vm9, %v7454_v55, %v4791_v42  ;;  %v4793_v60 = vrot.slane %v4791_v42, 4  ;;  %7790 = vmatmul.mubr.msk.bf16.vlgmr.msra.gmra.mxu0 %vm494_vm3, %v4365_v43  ;;  %v1552_v8 = vrot.slane %v1428_v14, 1  ;;  %v1707_v28 = vrot.slane %v1428_v14, 2 }
 0x10e   : > { %v1887_v50 = vrot.slane %v8930_v48, 3  ;;  %4928 = vst.msk [vmem:[#allocation2 + $0x44] sm:$0xf] %vm247_vm1, %v4792_v62  ;;  %v1551_v3 = vsel %vm1498_vm4, %v1549_v25, %v1550_v11  ;;  %v1888_v5 = vrot.slane %v1428_v14, 3  ;;  %v1890_v12 = vrot.slane %v1429_v7, 3 }
 0x10f   : > { %v4795_v23 = vsel %vm8470_vm9, %v4793_v60, %v4794_v2  ;;  %v1553_v57 = vsel %vm1498_vm4, %v1550_v11, %v1552_v8  ;;  %v1657_v24 = vmax.f32 %v1426_v59, %v1551_v3  ;;  %v1659_v47 = vmax.f32 %v1428_v14, %v1552_v8  ;;  %v1175_v2 = vld [vmem:[#allocation2 + $0x124] sm:$0xf]  ;;  %v1302_v59 = vld [vmem:[#allocation2 + $0x130] sm:$0xf] }
 0x110   : > { %v1708_v22 = vsel %vm1675_vm5, %v1706_v13, %v1707_v28  ;;  %4929 = vst.msk [vmem:[#allocation2 + $0x48] sm:$0xf] %vm247_vm1, %v4795_v23  ;;  %v1658_v4 = vmax.f32 %v8930_v48, %v1553_v57  ;;  %v1889_v56 = vsel %vm1836_vm6, %v1887_v50, %v1888_v5  ;;  %v1891_v54 = vsel %vm1836_vm6, %v1888_v5, %v1890_v12  ;;  %v8973_v5 = vld [vmem:[#allocation2 + $0x38] sm:$0x1]  ;;  %v8975_v12 = vld [vmem:[#allocation2 + $0x4c] sm:$0x1] }
 0x111   : > { %v2064_v36 = vrot.slane %v8930_v48, 4  ;;  %v1802_v61 = vmax.f32 %v1657_v24, %v1706_v13  ;;  %v1804_v38 = vmax.f32 %v1659_v47, %v1707_v28  ;;  %v2065_v53 = vrot.slane %v1428_v14, 4  ;;  %v1304_v14 = vld [vmem:[#allocation2 + $0x138] sm:$0xf] }
 0x112   : > { %v2067_v37 = vrot.slane %v1429_v7, 4  ;;  %v1803_v44 = vmax.f32 %v1658_v4, %v1708_v22  ;;  %v983_v18 = vmax.bf16 %v919_v27, %v854_v51  ;;  %v1108_v39 = vmax.bf16 %v1044_v34, %v980_v58  ;;  %v1305_v7 = vld [vmem:[#allocation2 + $0x13c] sm:$0x1] }
 0x113   : > { %v1109_v40 = vmax.bf16 %v1045_v16, %v981_v49  ;;  %v1995_v26 = vmax.f32 %v1802_v61, %v1887_v50  ;;  %v1997_v41 = vmax.f32 %v1804_v38, %v1891_v54  ;;  %v2066_v45 = vsel %vm2013_vm7, %v2064_v36, %v2065_v53 }
 0x114   : > { %v2068_v46 = vsel %vm2013_vm7, %v2065_v53, %v2067_v37  ;;  %v1996_v35 = vmax.f32 %v1803_v44, %v1889_v56  ;;  %v1110_v55 = vmax.bf16 %v1046_v29, %v982_v33  ;;  %v1111_v42 = vmax.bf16 %v1047_v15, %v983_v18 }
 0x115   : > { %v1237_v17 = vmax.bf16 %v1173_v21, %v1108_v39  ;;  %v2172_v58 = vmax.f32 %v1995_v26, %v2064_v36  ;;  %v2174_v49 = vmax.f32 %v1997_v41, %v2068_v46  ;;  %v1238_v48 = vmax.bf16 %v1174_v10, %v1109_v40  ;;  %v8981_v36 = vld [vmem:[#allocation2 + $0xf8] sm:$0xf]  ;;  %v3088_v46 = vld [vmem:[#allocation2 + $0x54] sm:$0xf] }
 0x116   : > { %v3024_v25 = vmax.bf16 %v8965_v20, %v8963_v19  ;;  %v2173_v43 = vmax.f32 %v1996_v35, %v2066_v45  ;;  %v1239_v62 = vmax.bf16 %v1175_v2, %v1110_v55  ;;  %v1240_v60 = vmax.bf16 %v1176_v0, %v1111_v42  ;;  %v3089_v2 = vld [vmem:[#allocation2 + $0x58] sm:$0xf]  ;;  %v3090_v0 = vld [vmem:[#allocation2 + $0x5c] sm:$0xf] }
 0x117   : > { %v1366_v11 = vmax.bf16 %v1302_v59, %v1237_v17  ;;  %v2211_v8 = vpack.c.bf16 %v2174_v49, %v2174_v49  ;;  %v7553_v13 = vpack.c.bf16 %v2172_v58, %v2172_v58  ;;  %v1367_v28 = vmax.bf16 %v1303_v31, %v1238_v48  ;;  %v3091_v17 = vld [vmem:[#allocation2 + $0x60] sm:$0x1] }
 0x118   : > { %v3025_v33 = vmax.bf16 %v8938_v52, %v8891_v6  ;;  %v2210_v50 = vpack.c.bf16 %v2173_v43, %v2172_v58  ;;  %v7554_v51 = vpack.c.bf16 %v2173_v43, %v2173_v43  ;;  %v1368_v23 = vmax.bf16 %v1304_v14, %v1239_v62  ;;  %v3216_v14 = vld [vmem:[#allocation2 + $0x68] sm:$0xf] }
 0x119   : > { %v1369_v3 = vmax.bf16 %v1305_v7, %v1240_v60  ;;  %v2318_v57 = vrot.slane %v2211_v8, 3  ;;  %v7382_v24 = vrot.slane %v7553_v13, 11  ;;  %v2787_v47 = vrot.slane %v2211_v8, 7  ;;  %v3217_v7 = vld [vmem:[#allocation2 + $0x6c] sm:$0xf] }
 0x11a   : > { %v1430_v22 = vunpack.c.l.bf16 %v1366_v11  ;;  %v2317_v27 = vrot.slane %v2210_v50, 3  ;;  %v2784_v34 = vrot.slane %v7554_v51, 7  ;;  %v1431_v16 = vunpack.c.l.bf16 %v1367_v28  ;;  %v3218_v8 = vld [vmem:[#allocation2 + $0x70] sm:$0xf]  ;;  %v9001_v13 = vld [vmem:[#allocation2 + $0x40] sm:$0xf] }
 0x11b   : > { %v1432_v4 = vunpack.c.l.bf16 %v1368_v23  ;;  %v1433_v56 = vunpack.c.l.bf16 %v1369_v3  ;;  %v3026_v6 = vmax.bf16 %v8949_v1, %v8897_v63  ;;  %v3027_v52 = vmax.bf16 %v8975_v12, %v8973_v5  ;;  %v8988_v1 = vld [vmem:[#allocation2 + $0xfc] sm:$0xf]  ;;  %v9003_v28 = vld [vmem:[#allocation2 + $0x54] sm:$0xf] }
 0x11c   : > { %v1554_v54 = vrot.slane %v1430_v22, 1  ;;  %v2319_v29 = vsel %vm1836_vm6, %v2317_v27, %v2318_v57  ;;  %v2785_v61 = vsel %vm8470_vm9, %v7382_v24, %v2784_v34  ;;  %v2786_v38 = vrot.slane %v2784_v34, 4  ;;  %v3219_v5 = vld [vmem:[#allocation2 + $0x74] sm:$0x1]  ;;  %v3344_v12 = vld [vmem:[#allocation2 + $0x7c] sm:$0xf] }
 0x11d   : > { %v1555_v53 = vrot.slane %v1431_v16, 1  ;;  %7775 = vmatprep.mubr.msk.bf16.mxu1 %vm494_vm3, %v2319_v29  ;;  %2876 = vst.msk [vmem:[#allocation2 + $0xf8] sm:$0xf] %vm247_vm1, %v2785_v61  ;;  %v1557_v37 = vrot.slane %v1432_v4, 1  ;;  %v1709_v15 = vrot.slane %v1431_v16, 2  ;;  %v1710_v21 = vrot.slane %v1432_v4, 2 }
 0x11e   : > { %v1892_v63 = vrot.slane %v1431_v16, 3  ;;  %v2788_v44 = vsel %vm8470_vm9, %v2786_v38, %v2787_v47  ;;  %v1893_v39 = vrot.slane %v1432_v4, 3  ;;  %v1895_v40 = vrot.slane %v1433_v56, 3  ;;  %v3345_v57 = vld [vmem:[#allocation2 + $0x80] sm:$0xf] }
 0x11f   : > { %v1556_v18 = vsel %vm1498_vm4, %v1554_v54, %v1555_v53  ;;  %2877 = vst.msk [vmem:[#allocation2 + $0xfc] sm:$0xf] %vm247_vm1, %v2788_v44  ;;  %v1558_v10 = vsel %vm1498_vm4, %v1555_v53, %v1557_v37  ;;  %v1662_v41 = vmax.f32 %v1432_v4, %v1557_v37  ;;  %v1711_v45 = vsel %vm1675_vm5, %v1709_v15, %v1710_v21 }
 0x120   : > { %v1660_v26 = vmax.f32 %v1430_v22, %v1556_v18  ;;  %v1661_v59 = vmax.f32 %v1431_v16, %v1558_v10  ;;  %v1894_v35 = vsel %vm1836_vm6, %v1892_v63, %v1893_v39  ;;  %v1896_v55 = vsel %vm1836_vm6, %v1893_v39, %v1895_v40 }
 0x121   : > { %v2069_v42 = vrot.slane %v1431_v16, 4  ;;  %v1807_v58 = vmax.f32 %v1662_v41, %v1710_v21  ;;  %v2070_v49 = vrot.slane %v1432_v4, 4  ;;  %v2072_v48 = vrot.slane %v1433_v56, 4  ;;  %v3347_v16 = vld [vmem:[#allocation2 + $0x88] sm:$0x1] }
 0x122   : > { %v1805_v31 = vmax.f32 %v1660_v26, %v1709_v15  ;;  %v1806_v43 = vmax.f32 %v1661_v59, %v1711_v45  ;;  %v3152_v62 = vmax.bf16 %v3088_v46, %v3024_v25  ;;  %v3153_v60 = vmax.bf16 %v3089_v2, %v3025_v33  ;;  %v3346_v25 = vld [vmem:[#allocation2 + $0x84] sm:$0xf]  ;;  %v9007_v33 = vld [vmem:[#allocation2 + $0x58] sm:$0xf]  ;;  %v9015_v46 = vld [vmem:[#allocation2 + $0x10c] sm:$0xf] }
 0x123   : > { %v3154_v11 = vmax.bf16 %v3090_v0, %v3026_v6  ;;  %v2000_v51 = vmax.f32 %v1807_v58, %v1896_v55  ;;  %v2071_v23 = vsel %vm2013_vm7, %v2069_v42, %v2070_v49  ;;  %v2073_v3 = vsel %vm2013_vm7, %v2070_v49, %v2072_v48  ;;  %v9020_v55 = vld [vmem:[#allocation2 + $0x110] sm:$0xf] }
 0x124   : > { %v1998_v50 = vmax.f32 %v1805_v31, %v1892_v63  ;;  %v1999_v24 = vmax.f32 %v1806_v43, %v1894_v35  ;;  %v3155_v47 = vmax.bf16 %v3091_v17, %v3027_v52  ;;  %v3280_v19 = vmax.bf16 %v3216_v14, %v3152_v62  ;;  %v9027_v48 = vld [vmem:[#allocation2 + $0x110] sm:$0xf] }
 0x125   : > { %v3281_v20 = vmax.bf16 %v3217_v7, %v3153_v60  ;;  %v2177_v27 = vmax.f32 %v2000_v51, %v2073_v3  ;;  %v3282_v34 = vmax.bf16 %v3218_v8, %v3154_v11  ;;  %v3028_v4 = vmax.bf16 %v9003_v28, %v9001_v13  ;;  %v2903_v51 = vld [vmem:[#allocation2 + $0x4c] sm:$0x1]  ;;  %v2967_v3 = vld [vmem:[#allocation2 + $0x60] sm:$0x1]  ;;  %v3349_v28 = vld [vmem:[#allocation2 + $0x94] sm:$0xf] }
 0x126   : > { %v2175_v22 = vmax.f32 %v1998_v50, %v2069_v42  ;;  %v2176_v56 = vmax.f32 %v1999_v24, %v2071_v23  ;;  %v3283_v54 = vmax.bf16 %v3219_v5, %v3155_v47  ;;  %v3408_v6 = vmax.bf16 %v3344_v12, %v3280_v19  ;;  %v9022_v42 = vld [vmem:[#allocation2 + $0x10c] sm:$0xf]  ;;  %v2966_v23 = vld [vmem:[#allocation2 + $0x5c] sm:$0xf]  ;;  %v3092_v47 = vld [vmem:[#allocation2 + $0x68] sm:$0xf] }
 0x127   : > { %v3409_v29 = vmax.bf16 %v3345_v57, %v3281_v20  ;;  %v2213_v61 = vpack.c.bf16 %v2177_v27, %v2177_v27  ;;  %v3410_v53 = vmax.bf16 %v3346_v25, %v3282_v34  ;;  %v3029_v52 = vmax.bf16 %v9007_v33, %v8940_v30  ;;  %v3093_v19 = vld [vmem:[#allocation2 + $0x6c] sm:$0xf]  ;;  %v3094_v34 = vld [vmem:[#allocation2 + $0x70] sm:$0xf] }
 0x128   : > { %v7556_v38 = vpack.c.bf16 %v2175_v22, %v2175_v22  ;;  %v2212_v37 = vpack.c.bf16 %v2176_v56, %v2175_v22  ;;  %v7557_v15 = vpack.c.bf16 %v2176_v56, %v2176_v56  ;;  %v3411_v21 = vmax.bf16 %v3347_v16, %v3283_v54  ;;  %v3095_v16 = vld [vmem:[#allocation2 + $0x74] sm:$0x1] }
 0x129   : > { %v3472_v63 = vunpack.c.l.bf16 %v3408_v6  ;;  %v2321_v44 = vrot.slane %v2213_v61, 3  ;;  %v2794_v39 = vrot.slane %v2213_v61, 7  ;;  %v9013_v40 = vunpack.c.l.bf16 %v3409_v29  ;;  %v3220_v61 = vld [vmem:[#allocation2 + $0x7c] sm:$0xf] }
 0x12a   : > { %v7383_v18 = vrot.slane %v7556_v38, 11  ;;  %v2320_v10 = vrot.slane %v2212_v37, 3  ;;  %v2791_v26 = vrot.slane %v7557_v15, 7  ;;  %v3474_v41 = vunpack.c.l.bf16 %v3410_v53  ;;  %v3221_v38 = vld [vmem:[#allocation2 + $0x80] sm:$0xf] }
 0x12b   : > { %v3475_v45 = vunpack.c.l.bf16 %v3411_v21  ;;  %v3586_v2 = vrot.slane %v3472_v63, 1  ;;  %v3587_v0 = vrot.slane %v9013_v40, 1  ;;  %v3758_v59 = vrot.slane %v9013_v40, 2 }
 0x12c   : > { %v3922_v35 = vrot.slane %v9013_v40, 3  ;;  %v2322_v17 = vsel %vm1836_vm6, %v2320_v10, %v2321_v44  ;;  %v2792_v31 = vsel %vm8470_vm9, %v7383_v18, %v2791_v26  ;;  %v2793_v58 = vrot.slane %v2791_v26, 4  ;;  %v9046_v44 = vld [vmem:[#allocation2 + $0xf4] sm:$0xf]  ;;  %v9048_v18 = vld [vmem:[#allocation2 + $0x108] sm:$0xf] }
 0x12d   : > { %v3589_v49 = vrot.slane %v3474_v41, 1  ;;  %7776 = vmatmul.mubr.msk.bf16.gmra.mxu1 %vm494_vm3, %v2322_v17  ;;  %2878 = vst.msk [vmem:[#allocation2 + $0x10c] sm:$0xf] %vm247_vm1, %v2792_v31  ;;  %v3588_v14 = vsel %vm1498_vm4, %v3586_v2, %v3587_v0  ;;  %v3759_v7 = vrot.slane %v3474_v41, 2  ;;  %v3923_v43 = vrot.slane %v3474_v41, 3 }
 0x12e   : > { %v3925_v62 = vrot.slane %v3475_v45, 3  ;;  %v2795_v60 = vsel %vm8470_vm9, %v2793_v58, %v2794_v39  ;;  %v3710_v8 = vmax.f32 %v3472_v63, %v3588_v14  ;;  %v4098_v22 = vrot.slane %v9013_v40, 4  ;;  %v3222_v63 = vld [vmem:[#allocation2 + $0x84] sm:$0xf]  ;;  %v3223_v26 = vld [vmem:[#allocation2 + $0x88] sm:$0x1] }
 0x12f   : > { %v3590_v11 = vsel %vm1498_vm4, %v3587_v0, %v3589_v49  ;;  %v3712_v50 = vmax.f32 %v3474_v41, %v3589_v49  ;;  %2879 = vst.msk [vmem:[#allocation2 + $0x110] sm:$0xf] %vm247_vm1, %v2795_v60  ;;  %v3760_v12 = vsel %vm1675_vm5, %v3758_v59, %v3759_v7  ;;  %v3924_v57 = vsel %vm1836_vm6, %v3922_v35, %v3923_v43  ;;  %v3351_v31 = vld [vmem:[#allocation2 + $0x9c] sm:$0x1] }
 0x130   : > { %v3711_v5 = vmax.f32 %v9013_v40, %v3590_v11  ;;  %v3926_v24 = vsel %vm1836_vm6, %v3923_v43, %v3925_v62  ;;  %v3854_v20 = vmax.f32 %v3710_v8, %v3758_v59  ;;  %v4099_v27 = vrot.slane %v3474_v41, 4  ;;  %v3348_v41 = vld [vmem:[#allocation2 + $0x90] sm:$0xf] }
 0x131   : > { %v3856_v25 = vmax.f32 %v3712_v50, %v3759_v7  ;;  %v4101_v54 = vrot.slane %v3475_v45, 4  ;;  %v3030_v6 = vmax.bf16 %v2966_v23, %v8951_v32  ;;  %v3031_v29 = vmax.bf16 %v2967_v3, %v2903_v51 }
 0x132   : > { %v3855_v56 = vmax.f32 %v3711_v5, %v3760_v12  ;;  %v4046_v53 = vmax.f32 %v3854_v20, %v3922_v35  ;;  %v4100_v15 = vsel %vm2013_vm7, %v4098_v22, %v4099_v27  ;;  %v3156_v21 = vmax.bf16 %v3092_v47, %v3028_v4  ;;  %v3350_v4 = vld [vmem:[#allocation2 + $0x98] sm:$0xf] }
 0x133   : > { %v4048_v37 = vmax.f32 %v3856_v25, %v3926_v24  ;;  %v4102_v40 = vsel %vm2013_vm7, %v4099_v27, %v4101_v54  ;;  %v3157_v32 = vmax.bf16 %v3093_v19, %v3029_v52  ;;  %v3158_v10 = vmax.bf16 %v3094_v34, %v3030_v6  ;;  %v9065_v27 = vld [vmem:[#allocation2 + $0x58] sm:$0xf]  ;;  %v9074_v6 = vld [vmem:[#allocation2 + $0x5c] sm:$0xf] }
 0x134   : > { %v4047_v39 = vmax.f32 %v3855_v56, %v3924_v57  ;;  %v4222_v45 = vmax.f32 %v4046_v53, %v4098_v22  ;;  %v3159_v0 = vmax.bf16 %v3095_v16, %v3031_v29  ;;  %v3284_v13 = vmax.bf16 %v3220_v61, %v3156_v21  ;;  %v1048_v21 = vld [vmem:[#allocation2 + $0x11c] sm:$0xf] }
 0x135   : > { %v4224_v2 = vmax.f32 %v4048_v37, %v4102_v40  ;;  %v3285_v35 = vmax.bf16 %v3221_v38, %v3157_v32  ;;  %v3286_v17 = vmax.bf16 %v3222_v63, %v3158_v10  ;;  %v984_v58 = vmax.bf16 %v9048_v18, %v9046_v44  ;;  %v858_v37 = vld [vmem:[#allocation2 + $0x100] sm:$0x1]  ;;  %v1050_v32 = vld [vmem:[#allocation2 + $0x124] sm:$0xf]  ;;  %v1051_v10 = vld [vmem:[#allocation2 + $0x128] sm:$0x1] }
 0x136   : > { %v4223_v59 = vmax.f32 %v4047_v39, %v4100_v15  ;;  %v7577_v14 = vpack.c.bf16 %v4222_v45, %v4222_v45  ;;  %v3287_v30 = vmax.bf16 %v3223_v26, %v3159_v0  ;;  %v3412_v33 = vmax.bf16 %v3348_v41, %v3284_v13  ;;  %v923_v15 = vld [vmem:[#allocation2 + $0x114] sm:$0x1]  ;;  %v1049_v40 = vld [vmem:[#allocation2 + $0x120] sm:$0xf]  ;;  %v1177_v0 = vld [vmem:[#allocation2 + $0x130] sm:$0xf] }
 0x137   : > { %v4269_v49 = vpack.c.bf16 %v4224_v2, %v4224_v2  ;;  %v3413_v43 = vmax.bf16 %v3349_v28, %v3285_v35  ;;  %v3414_v62 = vmax.bf16 %v3350_v4, %v3286_v17  ;;  %v985_v24 = vmax.bf16 %v9022_v42, %v8981_v36  ;;  %v1178_v35 = vld [vmem:[#allocation2 + $0x134] sm:$0xf]  ;;  %v9084_v17 = vld [vmem:[#allocation2 + $0x108] sm:$0xf] }
 0x138   : > { %v4268_v52 = vpack.c.bf16 %v4223_v59, %v4222_v45  ;;  %v7578_v7 = vpack.c.bf16 %v4223_v59, %v4223_v59  ;;  %v7455_v11 = vrot.slane %v7577_v14, 11  ;;  %v3415_v50 = vmax.bf16 %v3351_v31, %v3287_v30  ;;  %v9086_v31 = vld [vmem:[#allocation2 + $0x11c] sm:$0xf] }
 0x139   : > { %v4367_v60 = vrot.slane %v4269_v49, 3  ;;  %v4801_v8 = vrot.slane %v4269_v49, 7  ;;  %v3476_v3 = vunpack.c.l.bf16 %v3412_v33  ;;  %v9056_v5 = vunpack.c.l.bf16 %v3413_v43  ;;  %v9090_v43 = vld [vmem:[#allocation2 + $0x120] sm:$0xf] }
 0x13a   : > { %v4366_v51 = vrot.slane %v4268_v52, 3  ;;  %v4798_v23 = vrot.slane %v7578_v7, 7  ;;  %v3478_v12 = vunpack.c.l.bf16 %v3414_v62  ;;  %v3479_v57 = vunpack.c.l.bf16 %v3415_v50  ;;  %v1179_v52 = vld [vmem:[#allocation2 + $0x138] sm:$0xf]  ;;  %v1180_v7 = vld [vmem:[#allocation2 + $0x13c] sm:$0x1] }
 0x13b   : > { %v986_v47 = vmax.bf16 %v9027_v48, %v8988_v1  ;;  %v3591_v22 = vrot.slane %v3476_v3, 1  ;;  %v3592_v34 = vrot.slane %v9056_v5, 1  ;;  %v3761_v56 = vrot.slane %v9056_v5, 2  ;;  %v1307_v50 = vld [vmem:[#allocation2 + $0x148] sm:$0xf] }
 0x13c   : > { %v4368_v19 = vsel %vm1836_vm6, %v4366_v51, %v4367_v60  ;;  %v4799_v20 = vsel %vm8470_vm9, %v7455_v11, %v4798_v23  ;;  %v4800_v25 = vrot.slane %v4798_v23, 4  ;;  %v3594_v16 = vrot.slane %v3478_v12, 1 }
 0x13d   : > { %7793 = vmatprep.mubr.msk.bf16.mxu0 %vm494_vm3, %v4368_v19  ;;  %v3762_v36 = vrot.slane %v3478_v12, 2  ;;  %4930 = vst.msk [vmem:[#allocation2 + $0x58] sm:$0xf] %vm247_vm1, %v4799_v20  ;;  %v3927_v42 = vrot.slane %v9056_v5, 3  ;;  %v3928_v48 = vrot.slane %v3478_v12, 3  ;;  %v3930_v54 = vrot.slane %v3479_v57, 3 }
 0x13e   : > { %v4802_v1 = vsel %vm8470_vm9, %v4800_v25, %v4801_v8  ;;  %v3593_v29 = vsel %vm1498_vm4, %v3591_v22, %v3592_v34  ;;  %v3595_v61 = vsel %vm1498_vm4, %v3592_v34, %v3594_v16  ;;  %v3715_v38 = vmax.f32 %v3478_v12, %v3594_v16  ;;  %v1309_v25 = vld [vmem:[#allocation2 + $0x150] sm:$0x1] }
 0x13f   : > { %v3763_v53 = vsel %vm1675_vm5, %v3761_v56, %v3762_v36  ;;  %4931 = vst.msk [vmem:[#allocation2 + $0x5c] sm:$0xf] %vm247_vm1, %v4802_v1  ;;  %v3713_v63 = vmax.f32 %v3476_v3, %v3593_v29  ;;  %v3714_v44 = vmax.f32 %v9056_v5, %v3595_v61  ;;  %v3929_v18 = vsel %vm1836_vm6, %v3927_v42, %v3928_v48 }
 0x140   : > { %v3931_v39 = vsel %vm1836_vm6, %v3928_v48, %v3930_v54  ;;  %v3859_v26 = vmax.f32 %v3715_v38, %v3762_v36  ;;  %v4103_v41 = vrot.slane %v9056_v5, 4  ;;  %v4104_v45 = vrot.slane %v3478_v12, 4  ;;  %v1308_v5 = vld [vmem:[#allocation2 + $0x14c] sm:$0xf] }
 0x141   : > { %v4106_v2 = vrot.slane %v3479_v57, 4  ;;  %v3857_v13 = vmax.f32 %v3713_v63, %v3761_v56  ;;  %v3858_v28 = vmax.f32 %v3714_v44, %v3763_v53  ;;  %v987_v4 = vmax.bf16 %v923_v15, %v858_v37  ;;  %v9096_v56 = vld [vmem:[#allocation2 + $0x124] sm:$0xf] }
 0x142   : > { %v1112_v59 = vmax.bf16 %v1048_v21, %v984_v58  ;;  %v4051_v49 = vmax.f32 %v3859_v26, %v3931_v39  ;;  %v4105_v14 = vsel %vm2013_vm7, %v4103_v41, %v4104_v45  ;;  %v1113_v33 = vmax.bf16 %v1049_v40, %v985_v24  ;;  %v1306_v58 = vld [vmem:[#allocation2 + $0x144] sm:$0xf]  ;;  %v9106_v26 = vld [vmem:[#allocation2 + $0x6c] sm:$0xf] }
 0x143   : > { %v4107_v30 = vsel %vm2013_vm7, %v4104_v45, %v4106_v2  ;;  %v4049_v62 = vmax.f32 %v3857_v13, %v3927_v42  ;;  %v4050_v60 = vmax.f32 %v3858_v28, %v3929_v18  ;;  %v1114_v11 = vmax.bf16 %v1050_v32, %v986_v47  ;;  %v862_v13 = vld [vmem:[#allocation2 + $0x114] sm:$0x1] }
 0x144   : > { %v1115_v8 = vmax.bf16 %v1051_v10, %v987_v4  ;;  %v4227_v51 = vmax.f32 %v4051_v49, %v4107_v30  ;;  %v1241_v23 = vmax.bf16 %v1177_v0, %v1112_v59  ;;  %v1242_v3 = vmax.bf16 %v1178_v35, %v1113_v33  ;;  %v9117_v49 = vld [vmem:[#allocation2 + $0x70] sm:$0xf] }
 0x145   : > { %v988_v12 = vmax.bf16 %v9086_v31, %v9084_v17  ;;  %v4225_v57 = vmax.f32 %v4049_v62, %v4103_v41  ;;  %v4226_v19 = vmax.f32 %v4050_v60, %v4105_v14  ;;  %v1243_v24 = vmax.bf16 %v1179_v52, %v1114_v11  ;;  %v9108_v41 = vld [vmem:[#allocation2 + $0x6c] sm:$0xf]  ;;  %v9119_v14 = vld [vmem:[#allocation2 + $0x70] sm:$0xf]  ;;  %v1053_v60 = vld [vmem:[#allocation2 + $0x134] sm:$0xf] }
 0x146   : > { %v1244_v20 = vmax.bf16 %v1180_v7, %v1115_v8  ;;  %v4271_v22 = vpack.c.bf16 %v4227_v51, %v4227_v51  ;;  %v1370_v34 = vmax.bf16 %v1306_v58, %v1241_v23  ;;  %v1371_v16 = vmax.bf16 %v1307_v50, %v1242_v3  ;;  %v1052_v62 = vld [vmem:[#allocation2 + $0x130] sm:$0xf]  ;;  %v1054_v51 = vld [vmem:[#allocation2 + $0x138] sm:$0xf]  ;;  %v1311_v31 = vld [vmem:[#allocation2 + $0x15c] sm:$0xf] }
 0x147   : > { %v989_v47 = vmax.bf16 %v9090_v43, %v9015_v46  ;;  %v4270_v36 = vpack.c.bf16 %v4226_v19, %v4225_v57  ;;  %v7580_v1 = vpack.c.bf16 %v4225_v57, %v4225_v57  ;;  %v7581_v42 = vpack.c.bf16 %v4226_v19, %v4226_v19  ;;  %v927_v43 = vld [vmem:[#allocation2 + $0x128] sm:$0x1]  ;;  %v1055_v19 = vld [vmem:[#allocation2 + $0x13c] sm:$0x1] }
 0x148   : > { %v1372_v48 = vmax.bf16 %v1308_v5, %v1243_v24  ;;  %v4370_v54 = vrot.slane %v4271_v22, 3  ;;  %v4808_v29 = vrot.slane %v4271_v22, 7  ;;  %v1373_v61 = vmax.bf16 %v1309_v25, %v1244_v20  ;;  %v1181_v24 = vld [vmem:[#allocation2 + $0x144] sm:$0xf] }
 0x149   : > { %v1434_v38 = vunpack.c.l.bf16 %v1370_v34  ;;  %v4369_v53 = vrot.slane %v4270_v36, 3  ;;  %v7456_v37 = vrot.slane %v7580_v1, 11  ;;  %v4805_v15 = vrot.slane %v7581_v42, 7  ;;  %v9133_v36 = vld [vmem:[#allocation2 + $0x68] sm:$0xf] }
 0x14a   : > { %v9098_v21 = vunpack.c.l.bf16 %v1371_v16  ;;  %v1436_v63 = vunpack.c.l.bf16 %v1372_v48  ;;  %v1437_v44 = vunpack.c.l.bf16 %v1373_v61  ;;  %v990_v46 = vmax.bf16 %v9096_v56, %v9020_v55  ;;  %v1182_v16 = vld [vmem:[#allocation2 + $0x148] sm:$0xf]  ;;  %v9131_v56 = vld [vmem:[#allocation2 + $0x54] sm:$0xf]  ;;  %v1184_v61 = vld [vmem:[#allocation2 + $0x150] sm:$0x1] }
 0x14b   : > { %v1559_v18 = vrot.slane %v1434_v38, 1  ;;  %v4371_v39 = vsel %vm1836_vm6, %v4369_v53, %v4370_v54  ;;  %v4806_v40 = vsel %vm8470_vm9, %v7456_v37, %v4805_v15  ;;  %v4807_v32 = vrot.slane %v4805_v15, 4 }
 0x14c   : > { %v1560_v10 = vrot.slane %v9098_v21, 1  ;;  %7794 = vmatmul.mubr.msk.bf16.gmra.mxu0 %vm494_vm3, %v4371_v39  ;;  %v1562_v45 = vrot.slane %v1436_v63, 1  ;;  %v1712_v2 = vrot.slane %v9098_v21, 2  ;;  %v1713_v0 = vrot.slane %v1436_v63, 2  ;;  %4932 = vst.msk [vmem:[#allocation2 + $0x6c] sm:$0xf] %vm247_vm1, %v4806_v40 }
 0x14d   : > { %v1897_v55 = vrot.slane %v9098_v21, 3  ;;  %v4809_v28 = vsel %vm8470_vm9, %v4807_v32, %v4808_v29  ;;  %v1898_v59 = vrot.slane %v1436_v63, 3  ;;  %v1900_v35 = vrot.slane %v1437_v44, 3  ;;  %v1183_v29 = vld [vmem:[#allocation2 + $0x14c] sm:$0xf] }
 0x14e   : > { %v1561_v4 = vsel %vm1498_vm4, %v1559_v18, %v1560_v10  ;;  %v1563_v30 = vsel %vm1498_vm4, %v1560_v10, %v1562_v45  ;;  %v1665_v52 = vmax.f32 %v1436_v63, %v1562_v45  ;;  %v1714_v7 = vsel %vm1675_vm5, %v1712_v2, %v1713_v0  ;;  %4933 = vst.msk [vmem:[#allocation2 + $0x70] sm:$0xf] %vm247_vm1, %v4809_v28 }
 0x14f   : > { %v1663_v33 = vmax.f32 %v1434_v38, %v1561_v4  ;;  %v1664_v11 = vmax.f32 %v9098_v21, %v1563_v30  ;;  %v1899_v8 = vsel %vm1836_vm6, %v1897_v55, %v1898_v59  ;;  %v1901_v58 = vsel %vm1836_vm6, %v1898_v59, %v1900_v35  ;;  %v1310_v38 = vld [vmem:[#allocation2 + $0x158] sm:$0xf]  ;;  %v9141_v59 = vld [vmem:[#allocation2 + $0x60] sm:$0x1]  ;;  %v9143_v35 = vld [vmem:[#allocation2 + $0x74] sm:$0x1] }
 0x150   : > { %v2074_v50 = vrot.slane %v9098_v21, 4  ;;  %v1810_v3 = vmax.f32 %v1665_v52, %v1713_v0  ;;  %v2075_v5 = vrot.slane %v1436_v63, 4  ;;  %v2077_v57 = vrot.slane %v1437_v44, 4  ;;  %v1312_v63 = vld [vmem:[#allocation2 + $0x160] sm:$0xf] }
 0x151   : > { %v1808_v23 = vmax.f32 %v1663_v33, %v1712_v2  ;;  %v1809_v20 = vmax.f32 %v1664_v11, %v1714_v7  ;;  %v991_v25 = vmax.bf16 %v927_v43, %v862_v13  ;;  %v1116_v22 = vmax.bf16 %v1052_v62, %v988_v12  ;;  %v1313_v44 = vld [vmem:[#allocation2 + $0x164] sm:$0x1] }
 0x152   : > { %v1117_v34 = vmax.bf16 %v1053_v60, %v989_v47  ;;  %v2003_v42 = vmax.f32 %v1810_v3, %v1901_v58  ;;  %v2076_v48 = vsel %vm2013_vm7, %v2074_v50, %v2075_v5  ;;  %v2078_v54 = vsel %vm2013_vm7, %v2075_v5, %v2077_v57 }
 0x153   : > { %v2001_v1 = vmax.f32 %v1808_v23, %v1897_v55  ;;  %v2002_v53 = vmax.f32 %v1809_v20, %v1899_v8  ;;  %v1118_v37 = vmax.bf16 %v1054_v51, %v990_v46  ;;  %v1119_v15 = vmax.bf16 %v1055_v19, %v991_v25 }
 0x154   : > { %v1245_v17 = vmax.bf16 %v1181_v24, %v1116_v22  ;;  %v2180_v47 = vmax.f32 %v2003_v42, %v2078_v54  ;;  %v1246_v21 = vmax.bf16 %v1182_v16, %v1117_v34  ;;  %v3032_v18 = vmax.bf16 %v9133_v36, %v9131_v56  ;;  %v3096_v54 = vld [vmem:[#allocation2 + $0x7c] sm:$0xf] }
 0x155   : > { %v2178_v12 = vmax.f32 %v2001_v1, %v2074_v50  ;;  %v2179_v39 = vmax.f32 %v2002_v53, %v2076_v48  ;;  %v1247_v40 = vmax.bf16 %v1183_v29, %v1118_v37  ;;  %v1248_v32 = vmax.bf16 %v1184_v61, %v1119_v15  ;;  %v9149_v50 = vld [vmem:[#allocation2 + $0x120] sm:$0xf]  ;;  %v3098_v61 = vld [vmem:[#allocation2 + $0x84] sm:$0xf] }
 0x156   : > { %v1374_v10 = vmax.bf16 %v1310_v38, %v1245_v17  ;;  %v2215_v45 = vpack.c.bf16 %v2180_v47, %v2180_v47  ;;  %v1375_v0 = vmax.bf16 %v1311_v31, %v1246_v21  ;;  %v3033_v46 = vmax.bf16 %v9106_v26, %v9065_v27  ;;  %v3097_v29 = vld [vmem:[#allocation2 + $0x80] sm:$0xf]  ;;  %v3099_v17 = vld [vmem:[#allocation2 + $0x88] sm:$0x1] }
 0x157   : > { %v7559_v2 = vpack.c.bf16 %v2178_v12, %v2178_v12  ;;  %v2214_v55 = vpack.c.bf16 %v2179_v39, %v2178_v12  ;;  %v7560_v13 = vpack.c.bf16 %v2179_v39, %v2179_v39  ;;  %v1376_v28 = vmax.bf16 %v1312_v63, %v1247_v40  ;;  %v3224_v63 = vld [vmem:[#allocation2 + $0x90] sm:$0xf] }
 0x158   : > { %v1377_v4 = vmax.bf16 %v1313_v44, %v1248_v32  ;;  %v2324_v30 = vrot.slane %v2215_v45, 3  ;;  %v2801_v52 = vrot.slane %v2215_v45, 7  ;;  %v1438_v7 = vunpack.c.l.bf16 %v1374_v10  ;;  %v3225_v44 = vld [vmem:[#allocation2 + $0x94] sm:$0xf]  ;;  %v3226_v45 = vld [vmem:[#allocation2 + $0x98] sm:$0xf] }
 0x159   : > { %v7384_v33 = vrot.slane %v7559_v2, 11  ;;  %v2323_v43 = vrot.slane %v2214_v55, 3  ;;  %v2798_v62 = vrot.slane %v7560_v13, 7  ;;  %v1439_v60 = vunpack.c.l.bf16 %v1375_v0  ;;  %v9169_v2 = vld [vmem:[#allocation2 + $0x68] sm:$0xf] }
 0x15a   : > { %v1440_v11 = vunpack.c.l.bf16 %v1376_v28  ;;  %v1441_v8 = vunpack.c.l.bf16 %v1377_v4  ;;  %v1564_v58 = vrot.slane %v1438_v7, 1  ;;  %v3034_v27 = vmax.bf16 %v9117_v49, %v9074_v6  ;;  %v9156_v49 = vld [vmem:[#allocation2 + $0x124] sm:$0xf]  ;;  %v9171_v0 = vld [vmem:[#allocation2 + $0x7c] sm:$0xf] }
 0x15b   : > { %v3035_v26 = vmax.bf16 %v9143_v35, %v9141_v59  ;;  %v2325_v51 = vsel %vm1836_vm6, %v2323_v43, %v2324_v30  ;;  %v2799_v23 = vsel %vm8470_vm9, %v7384_v33, %v2798_v62  ;;  %v2800_v3 = vrot.slane %v2798_v62, 4  ;;  %v3227_v59 = vld [vmem:[#allocation2 + $0x9c] sm:$0x1]  ;;  %v3352_v35 = vld [vmem:[#allocation2 + $0xa4] sm:$0xf] }
 0x15c   : > { %v1565_v5 = vrot.slane %v1439_v60, 1  ;;  %7779 = vmatprep.mubr.msk.bf16.mxu1 %vm494_vm3, %v2325_v51  ;;  %2880 = vst.msk [vmem:[#allocation2 + $0x120] sm:$0xf] %vm247_vm1, %v2799_v23  ;;  %v1567_v57 = vrot.slane %v1440_v11, 1  ;;  %v1715_v19 = vrot.slane %v1439_v60, 2  ;;  %v1716_v24 = vrot.slane %v1440_v11, 2 }
 0x15d   : > { %v1902_v6 = vrot.slane %v1439_v60, 3  ;;  %v2802_v20 = vsel %vm8470_vm9, %v2800_v3, %v2801_v52  ;;  %v1903_v22 = vrot.slane %v1440_v11, 3  ;;  %v1905_v34 = vrot.slane %v1441_v8, 3  ;;  %v3353_v30 = vld [vmem:[#allocation2 + $0xa8] sm:$0xf] }
 0x15e   : > { %v1566_v25 = vsel %vm1498_vm4, %v1564_v58, %v1565_v5  ;;  %2881 = vst.msk [vmem:[#allocation2 + $0x124] sm:$0xf] %vm247_vm1, %v2802_v20  ;;  %v1568_v16 = vsel %vm1498_vm4, %v1565_v5, %v1567_v57  ;;  %v1668_v42 = vmax.f32 %v1440_v11, %v1567_v57  ;;  %v1717_v48 = vsel %vm1675_vm5, %v1715_v19, %v1716_v24 }
 0x15f   : > { %v1666_v1 = vmax.f32 %v1438_v7, %v1566_v25  ;;  %v1667_v38 = vmax.f32 %v1439_v60, %v1568_v16  ;;  %v1904_v53 = vsel %vm1836_vm6, %v1902_v6, %v1903_v22  ;;  %v1906_v37 = vsel %vm1836_vm6, %v1903_v22, %v1905_v34 }
 0x160   : > { %v2079_v15 = vrot.slane %v1439_v60, 4  ;;  %v1813_v12 = vmax.f32 %v1668_v42, %v1716_v24  ;;  %v2080_v47 = vrot.slane %v1440_v11, 4  ;;  %v2082_v21 = vrot.slane %v1441_v8, 4  ;;  %v3355_v60 = vld [vmem:[#allocation2 + $0xb0] sm:$0x1] }
 0x161   : > { %v1811_v31 = vmax.f32 %v1666_v1, %v1715_v19  ;;  %v1812_v39 = vmax.f32 %v1667_v38, %v1717_v48  ;;  %v3160_v40 = vmax.bf16 %v3096_v54, %v3032_v18  ;;  %v3161_v32 = vmax.bf16 %v3097_v29, %v3033_v46  ;;  %v3354_v18 = vld [vmem:[#allocation2 + $0xac] sm:$0xf]  ;;  %v9175_v46 = vld [vmem:[#allocation2 + $0x80] sm:$0xf]  ;;  %v9183_v54 = vld [vmem:[#allocation2 + $0x134] sm:$0xf] }
 0x162   : > { %v3162_v10 = vmax.bf16 %v3098_v61, %v3034_v27  ;;  %v2006_v13 = vmax.f32 %v1813_v12, %v1906_v37  ;;  %v2081_v28 = vsel %vm2013_vm7, %v2079_v15, %v2080_v47  ;;  %v2083_v4 = vsel %vm2013_vm7, %v2080_v47, %v2082_v21  ;;  %v9188_v37 = vld [vmem:[#allocation2 + $0x138] sm:$0xf] }
 0x163   : > { %v2004_v55 = vmax.f32 %v1811_v31, %v1902_v6  ;;  %v2005_v33 = vmax.f32 %v1812_v39, %v1904_v53  ;;  %v3163_v52 = vmax.bf16 %v3099_v17, %v3035_v26  ;;  %v3288_v56 = vmax.bf16 %v3224_v63, %v3160_v40  ;;  %v9195_v21 = vld [vmem:[#allocation2 + $0x138] sm:$0xf] }
 0x164   : > { %v3289_v36 = vmax.bf16 %v3225_v44, %v3161_v32  ;;  %v2183_v43 = vmax.f32 %v2006_v13, %v2083_v4  ;;  %v3290_v62 = vmax.bf16 %v3226_v45, %v3162_v10  ;;  %v3036_v11 = vmax.bf16 %v9171_v0, %v9169_v2  ;;  %v2911_v13 = vld [vmem:[#allocation2 + $0x74] sm:$0x1]  ;;  %v2975_v4 = vld [vmem:[#allocation2 + $0x88] sm:$0x1]  ;;  %v3357_v2 = vld [vmem:[#allocation2 + $0xbc] sm:$0xf] }
 0x165   : > { %v2181_v7 = vmax.f32 %v2004_v55, %v2079_v15  ;;  %v2182_v8 = vmax.f32 %v2005_v33, %v2081_v28  ;;  %v3291_v58 = vmax.bf16 %v3227_v59, %v3163_v52  ;;  %v3416_v27 = vmax.bf16 %v3352_v35, %v3288_v56  ;;  %v9190_v15 = vld [vmem:[#allocation2 + $0x134] sm:$0xf]  ;;  %v2974_v28 = vld [vmem:[#allocation2 + $0x84] sm:$0xf]  ;;  %v3100_v52 = vld [vmem:[#allocation2 + $0x90] sm:$0xf] }
 0x166   : > { %v3417_v51 = vmax.bf16 %v3353_v30, %v3289_v36  ;;  %v2217_v23 = vpack.c.bf16 %v2183_v43, %v2183_v43  ;;  %v3418_v5 = vmax.bf16 %v3354_v18, %v3290_v62  ;;  %v3037_v26 = vmax.bf16 %v9175_v46, %v9108_v41  ;;  %v3101_v56 = vld [vmem:[#allocation2 + $0x94] sm:$0xf]  ;;  %v3102_v62 = vld [vmem:[#allocation2 + $0x98] sm:$0xf]  ;;  %v3358_v0 = vld [vmem:[#allocation2 + $0xc0] sm:$0xf] }
 0x167   : > { %v7562_v3 = vpack.c.bf16 %v2181_v7, %v2181_v7  ;;  %v2216_v57 = vpack.c.bf16 %v2182_v8, %v2181_v7  ;;  %v7563_v19 = vpack.c.bf16 %v2182_v8, %v2182_v8  ;;  %v3419_v24 = vmax.bf16 %v3355_v60, %v3291_v58  ;;  %v9209_v60 = vld [vmem:[#allocation2 + $0x11c] sm:$0xf] }
 0x168   : > { %v3480_v6 = vunpack.c.l.bf16 %v3416_v27  ;;  %v2327_v20 = vrot.slane %v2217_v23, 3  ;;  %v2808_v22 = vrot.slane %v2217_v23, 7  ;;  %v9181_v34 = vunpack.c.l.bf16 %v3417_v51  ;;  %v3103_v23 = vld [vmem:[#allocation2 + $0x9c] sm:$0x1] }
 0x169   : > { %v7385_v25 = vrot.slane %v7562_v3, 11  ;;  %v2326_v16 = vrot.slane %v2216_v57, 3  ;;  %v2805_v1 = vrot.slane %v7563_v19, 7  ;;  %v3482_v42 = vunpack.c.l.bf16 %v3418_v5  ;;  %v3228_v3 = vld [vmem:[#allocation2 + $0xa4] sm:$0xf] }
 0x16a   : > { %v3483_v48 = vunpack.c.l.bf16 %v3419_v24  ;;  %v3596_v29 = vrot.slane %v3480_v6, 1  ;;  %v3597_v61 = vrot.slane %v9181_v34, 1  ;;  %v3764_v38 = vrot.slane %v9181_v34, 2 }
 0x16b   : > { %v3932_v53 = vrot.slane %v9181_v34, 3  ;;  %v2328_v17 = vsel %vm1836_vm6, %v2326_v16, %v2327_v20  ;;  %v2806_v31 = vsel %vm8470_vm9, %v7385_v25, %v2805_v1  ;;  %v2807_v12 = vrot.slane %v2805_v1, 4  ;;  %v3230_v20 = vld [vmem:[#allocation2 + $0xac] sm:$0xf]  ;;  %v9216_v25 = vld [vmem:[#allocation2 + $0x130] sm:$0xf] }
 0x16c   : > { %v3599_v47 = vrot.slane %v3482_v42, 1  ;;  %7780 = vmatmul.mubr.msk.bf16.gmra.mxu1 %vm494_vm3, %v2328_v17  ;;  %2882 = vst.msk [vmem:[#allocation2 + $0x134] sm:$0xf] %vm247_vm1, %v2806_v31  ;;  %v3598_v63 = vsel %vm1498_vm4, %v3596_v29, %v3597_v61  ;;  %v3765_v44 = vrot.slane %v3482_v42, 2  ;;  %v3933_v39 = vrot.slane %v3482_v42, 3 }
 0x16d   : > { %v3935_v40 = vrot.slane %v3483_v48, 3  ;;  %v2809_v32 = vsel %vm8470_vm9, %v2807_v12, %v2808_v22  ;;  %v3716_v45 = vmax.f32 %v3480_v6, %v3598_v63  ;;  %v4108_v7 = vrot.slane %v9181_v34, 4  ;;  %v3229_v6 = vld [vmem:[#allocation2 + $0xa8] sm:$0xf]  ;;  %v3231_v1 = vld [vmem:[#allocation2 + $0xb0] sm:$0x1] }
 0x16e   : > { %v3600_v10 = vsel %vm1498_vm4, %v3597_v61, %v3599_v47  ;;  %v3718_v55 = vmax.f32 %v3482_v42, %v3599_v47  ;;  %2883 = vst.msk [vmem:[#allocation2 + $0x138] sm:$0xf] %vm247_vm1, %v2809_v32  ;;  %v3766_v35 = vsel %vm1675_vm5, %v3764_v38, %v3765_v44  ;;  %v3934_v30 = vsel %vm1836_vm6, %v3932_v53, %v3933_v39  ;;  %v3359_v31 = vld [vmem:[#allocation2 + $0xc4] sm:$0x1] }
 0x16f   : > { %v3717_v59 = vmax.f32 %v9181_v34, %v3600_v10  ;;  %v3936_v33 = vsel %vm1836_vm6, %v3933_v39, %v3935_v40  ;;  %v3860_v36 = vmax.f32 %v3716_v45, %v3764_v38  ;;  %v4109_v43 = vrot.slane %v3482_v42, 4  ;;  %v3356_v42 = vld [vmem:[#allocation2 + $0xb8] sm:$0xf] }
 0x170   : > { %v3862_v18 = vmax.f32 %v3718_v55, %v3765_v44  ;;  %v4111_v58 = vrot.slane %v3483_v48, 4  ;;  %v3038_v27 = vmax.bf16 %v2974_v28, %v9119_v14  ;;  %v3039_v51 = vmax.bf16 %v2975_v4, %v2911_v13 }
 0x171   : > { %v3861_v8 = vmax.f32 %v3717_v59, %v3766_v35  ;;  %v4052_v5 = vmax.f32 %v3860_v36, %v3932_v53  ;;  %v4110_v19 = vsel %vm2013_vm7, %v4108_v7, %v4109_v43  ;;  %v3164_v24 = vmax.bf16 %v3100_v52, %v3036_v11 }
 0x172   : > { %v4054_v57 = vmax.f32 %v3862_v18, %v3936_v33  ;;  %v4112_v34 = vsel %vm2013_vm7, %v4109_v43, %v4111_v58  ;;  %v3165_v14 = vmax.bf16 %v3101_v56, %v3037_v26  ;;  %v3166_v16 = vmax.bf16 %v3102_v62, %v3038_v27  ;;  %v9233_v43 = vld [vmem:[#allocation2 + $0x80] sm:$0xf]  ;;  %v9242_v27 = vld [vmem:[#allocation2 + $0x84] sm:$0xf] }
 0x173   : > { %v4053_v22 = vmax.f32 %v3861_v8, %v3934_v30  ;;  %v4228_v48 = vmax.f32 %v4052_v5, %v4108_v7  ;;  %v3167_v61 = vmax.bf16 %v3103_v23, %v3039_v51  ;;  %v3292_v38 = vmax.bf16 %v3228_v3, %v3164_v24  ;;  %v1056_v24 = vld [vmem:[#allocation2 + $0x144] sm:$0xf] }
 0x174   : > { %v4230_v29 = vmax.f32 %v4054_v57, %v4112_v34  ;;  %v3293_v53 = vmax.bf16 %v3229_v6, %v3165_v14  ;;  %v3294_v17 = vmax.bf16 %v3230_v20, %v3166_v16  ;;  %v992_v12 = vmax.bf16 %v9216_v25, %v9209_v60  ;;  %v866_v57 = vld [vmem:[#allocation2 + $0x128] sm:$0x1]  ;;  %v1058_v14 = vld [vmem:[#allocation2 + $0x14c] sm:$0xf]  ;;  %v1059_v16 = vld [vmem:[#allocation2 + $0x150] sm:$0x1] }
 0x175   : > { %v4229_v11 = vmax.f32 %v4053_v22, %v4110_v19  ;;  %v7583_v63 = vpack.c.bf16 %v4228_v48, %v4228_v48  ;;  %v3295_v41 = vmax.bf16 %v3231_v1, %v3167_v61  ;;  %v3420_v46 = vmax.bf16 %v3356_v42, %v3292_v38  ;;  %v931_v19 = vld [vmem:[#allocation2 + $0x13c] sm:$0x1]  ;;  %v1057_v34 = vld [vmem:[#allocation2 + $0x148] sm:$0xf] }
 0x176   : > { %v4273_v47 = vpack.c.bf16 %v4230_v29, %v4230_v29  ;;  %v3421_v39 = vmax.bf16 %v3357_v2, %v3293_v53  ;;  %v3422_v40 = vmax.bf16 %v3358_v0, %v3294_v17  ;;  %v993_v33 = vmax.bf16 %v9190_v15, %v9149_v50  ;;  %v1186_v61 = vld [vmem:[#allocation2 + $0x15c] sm:$0xf]  ;;  %v1185_v53 = vld [vmem:[#allocation2 + $0x158] sm:$0xf]  ;;  %v9252_v17 = vld [vmem:[#allocation2 + $0x130] sm:$0xf] }
 0x177   : > { %v4272_v26 = vpack.c.bf16 %v4229_v11, %v4228_v48  ;;  %v7584_v44 = vpack.c.bf16 %v4229_v11, %v4229_v11  ;;  %v7457_v10 = vrot.slane %v7583_v63, 11  ;;  %v3423_v55 = vmax.bf16 %v3359_v31, %v3295_v41  ;;  %v9254_v31 = vld [vmem:[#allocation2 + $0x144] sm:$0xf] }
 0x178   : > { %v4373_v32 = vrot.slane %v4273_v47, 3  ;;  %v4815_v45 = vrot.slane %v4273_v47, 7  ;;  %v3484_v4 = vunpack.c.l.bf16 %v3420_v46  ;;  %v9224_v59 = vunpack.c.l.bf16 %v3421_v39 }
 0x179   : > { %v4372_v13 = vrot.slane %v4272_v26, 3  ;;  %v4812_v28 = vrot.slane %v7584_v44, 7  ;;  %v3486_v35 = vunpack.c.l.bf16 %v3422_v40  ;;  %v3487_v30 = vunpack.c.l.bf16 %v3423_v55  ;;  %v1187_v26 = vld [vmem:[#allocation2 + $0x160] sm:$0xf]  ;;  %v1188_v44 = vld [vmem:[#allocation2 + $0x164] sm:$0x1] }
 0x17a   : > { %v994_v52 = vmax.bf16 %v9195_v21, %v9156_v49  ;;  %v3601_v7 = vrot.slane %v3484_v4, 1  ;;  %v3602_v62 = vrot.slane %v9224_v59, 1  ;;  %v3767_v8 = vrot.slane %v9224_v59, 2  ;;  %v1315_v55 = vld [vmem:[#allocation2 + $0x170] sm:$0xf] }
 0x17b   : > { %v4374_v56 = vsel %vm1836_vm6, %v4372_v13, %v4373_v32  ;;  %v4813_v36 = vsel %vm8470_vm9, %v7457_v10, %v4812_v28  ;;  %v4814_v18 = vrot.slane %v4812_v28, 4  ;;  %v3604_v60 = vrot.slane %v3486_v35, 1  ;;  %v9258_v32 = vld [vmem:[#allocation2 + $0x148] sm:$0xf] }
 0x17c   : > { %7797 = vmatprep.mubr.msk.bf16.mxu0 %vm494_vm3, %v4374_v56  ;;  %v3768_v50 = vrot.slane %v3486_v35, 2  ;;  %4934 = vst.msk [vmem:[#allocation2 + $0x80] sm:$0xf] %vm247_vm1, %v4813_v36  ;;  %v3937_v15 = vrot.slane %v9224_v59, 3  ;;  %v3938_v21 = vrot.slane %v3486_v35, 3  ;;  %v3940_v58 = vrot.slane %v3487_v30, 3 }
 0x17d   : > { %v4816_v49 = vsel %vm8470_vm9, %v4814_v18, %v4815_v45  ;;  %v3603_v51 = vsel %vm1498_vm4, %v3601_v7, %v3602_v62  ;;  %v3605_v23 = vsel %vm1498_vm4, %v3602_v62, %v3604_v60  ;;  %v3721_v3 = vmax.f32 %v3486_v35, %v3604_v60  ;;  %v1317_v18 = vld [vmem:[#allocation2 + $0x178] sm:$0x1] }
 0x17e   : > { %v3769_v5 = vsel %vm1675_vm5, %v3767_v8, %v3768_v50  ;;  %4935 = vst.msk [vmem:[#allocation2 + $0x84] sm:$0xf] %vm247_vm1, %v4816_v49  ;;  %v3719_v6 = vmax.f32 %v3484_v4, %v3603_v51  ;;  %v3720_v20 = vmax.f32 %v9224_v59, %v3605_v23  ;;  %v3939_v25 = vsel %vm1836_vm6, %v3937_v15, %v3938_v21 }
 0x17f   : > { %v3941_v22 = vsel %vm1836_vm6, %v3938_v21, %v3940_v58  ;;  %v3865_v1 = vmax.f32 %v3721_v3, %v3768_v50  ;;  %v4113_v42 = vrot.slane %v9224_v59, 4  ;;  %v4114_v48 = vrot.slane %v3486_v35, 4  ;;  %v1316_v59 = vld [vmem:[#allocation2 + $0x174] sm:$0xf] }
 0x180   : > { %v4116_v29 = vrot.slane %v3487_v30, 4  ;;  %v3863_v38 = vmax.f32 %v3719_v6, %v3767_v8  ;;  %v3864_v2 = vmax.f32 %v3720_v20, %v3769_v5  ;;  %v995_v0 = vmax.bf16 %v931_v19, %v866_v57 }
 0x181   : > { %v1120_v11 = vmax.bf16 %v1056_v24, %v992_v12  ;;  %v4057_v47 = vmax.f32 %v3865_v1, %v3941_v22  ;;  %v4115_v63 = vsel %vm2013_vm7, %v4113_v42, %v4114_v48  ;;  %v1121_v46 = vmax.bf16 %v1057_v34, %v993_v33  ;;  %v1314_v12 = vld [vmem:[#allocation2 + $0x16c] sm:$0xf]  ;;  %v9274_v1 = vld [vmem:[#allocation2 + $0x94] sm:$0xf] }
 0x182   : > { %v4117_v41 = vsel %vm2013_vm7, %v4114_v48, %v4116_v29  ;;  %v4055_v39 = vmax.f32 %v3863_v38, %v3937_v15  ;;  %v4056_v40 = vmax.f32 %v3864_v2, %v3939_v25  ;;  %v1122_v10 = vmax.bf16 %v1058_v14, %v994_v52  ;;  %v9264_v15 = vld [vmem:[#allocation2 + $0x14c] sm:$0xf]  ;;  %v870_v38 = vld [vmem:[#allocation2 + $0x13c] sm:$0x1] }
 0x183   : > { %v1123_v45 = vmax.bf16 %v1059_v16, %v995_v0  ;;  %v4233_v13 = vmax.f32 %v4057_v47, %v4117_v41  ;;  %v1249_v28 = vmax.bf16 %v1185_v53, %v1120_v11  ;;  %v1250_v4 = vmax.bf16 %v1186_v61, %v1121_v46  ;;  %v9285_v47 = vld [vmem:[#allocation2 + $0x98] sm:$0xf] }
 0x184   : > { %v996_v35 = vmax.bf16 %v9254_v31, %v9252_v17  ;;  %v4231_v30 = vmax.f32 %v4055_v39, %v4113_v42  ;;  %v4232_v56 = vmax.f32 %v4056_v40, %v4115_v63  ;;  %v1251_v33 = vmax.bf16 %v1187_v26, %v1122_v10  ;;  %v9276_v42 = vld [vmem:[#allocation2 + $0x94] sm:$0xf]  ;;  %v9287_v63 = vld [vmem:[#allocation2 + $0x98] sm:$0xf]  ;;  %v935_v39 = vld [vmem:[#allocation2 + $0x150] sm:$0x1] }
 0x185   : > { %v1252_v36 = vmax.bf16 %v1188_v44, %v1123_v45  ;;  %v4275_v7 = vpack.c.bf16 %v4233_v13, %v4233_v13  ;;  %v1378_v62 = vmax.bf16 %v1314_v12, %v1249_v28  ;;  %v1379_v60 = vmax.bf16 %v1315_v55, %v1250_v4  ;;  %v1060_v40 = vld [vmem:[#allocation2 + $0x158] sm:$0xf]  ;;  %v1062_v13 = vld [vmem:[#allocation2 + $0x160] sm:$0xf]  ;;  %v1319_v31 = vld [vmem:[#allocation2 + $0x184] sm:$0xf] }
 0x186   : > { %v997_v52 = vmax.bf16 %v9258_v32, %v9183_v54  ;;  %v4274_v8 = vpack.c.bf16 %v4232_v56, %v4231_v30  ;;  %v7586_v50 = vpack.c.bf16 %v4231_v30, %v4231_v30  ;;  %v7587_v49 = vpack.c.bf16 %v4232_v56, %v4232_v56  ;;  %v1061_v32 = vld [vmem:[#allocation2 + $0x15c] sm:$0xf]  ;;  %v1063_v56 = vld [vmem:[#allocation2 + $0x164] sm:$0x1] }
 0x187   : > { %v1380_v21 = vmax.bf16 %v1316_v59, %v1251_v33  ;;  %v4376_v58 = vrot.slane %v4275_v7, 3  ;;  %v4822_v51 = vrot.slane %v4275_v7, 7  ;;  %v1381_v23 = vmax.bf16 %v1317_v18, %v1252_v36  ;;  %v1189_v33 = vld [vmem:[#allocation2 + $0x16c] sm:$0xf] }
 0x188   : > { %v1442_v3 = vunpack.c.l.bf16 %v1378_v62  ;;  %v4375_v5 = vrot.slane %v4274_v8, 3  ;;  %v7458_v57 = vrot.slane %v7586_v50, 11  ;;  %v4819_v19 = vrot.slane %v7587_v49, 7  ;;  %v9299_v8 = vld [vmem:[#allocation2 + $0x7c] sm:$0xf] }
 0x189   : > { %v9266_v24 = vunpack.c.l.bf16 %v1379_v60  ;;  %v1444_v6 = vunpack.c.l.bf16 %v1380_v21  ;;  %v1445_v20 = vunpack.c.l.bf16 %v1381_v23  ;;  %v998_v54 = vmax.bf16 %v9264_v15, %v9188_v37  ;;  %v1190_v60 = vld [vmem:[#allocation2 + $0x170] sm:$0xf]  ;;  %v1192_v23 = vld [vmem:[#allocation2 + $0x178] sm:$0x1] }
 0x18a   : > { %v1569_v25 = vrot.slane %v1442_v3, 1  ;;  %v4377_v22 = vsel %vm1836_vm6, %v4375_v5, %v4376_v58  ;;  %v4820_v34 = vsel %vm8470_vm9, %v7458_v57, %v4819_v19  ;;  %v4821_v14 = vrot.slane %v4819_v19, 4  ;;  %v9301_v50 = vld [vmem:[#allocation2 + $0x90] sm:$0xf] }
 0x18b   : > { %v1570_v16 = vrot.slane %v9266_v24, 1  ;;  %7798 = vmatmul.mubr.msk.bf16.gmra.mxu0 %vm494_vm3, %v4377_v22  ;;  %v1572_v48 = vrot.slane %v1444_v6, 1  ;;  %v1718_v29 = vrot.slane %v9266_v24, 2  ;;  %v1719_v61 = vrot.slane %v1444_v6, 2  ;;  %4936 = vst.msk [vmem:[#allocation2 + $0x94] sm:$0xf] %vm247_vm1, %v4820_v34 }
 0x18c   : > { %v1907_v37 = vrot.slane %v9266_v24, 3  ;;  %v4823_v2 = vsel %vm8470_vm9, %v4821_v14, %v4822_v51  ;;  %v1908_v11 = vrot.slane %v1444_v6, 3  ;;  %v1910_v53 = vrot.slane %v1445_v20, 3  ;;  %v1191_v51 = vld [vmem:[#allocation2 + $0x174] sm:$0xf] }
 0x18d   : > { %v1571_v0 = vsel %vm1498_vm4, %v1569_v25, %v1570_v16  ;;  %v1573_v41 = vsel %vm1498_vm4, %v1570_v16, %v1572_v48  ;;  %v1671_v26 = vmax.f32 %v1444_v6, %v1572_v48  ;;  %v1720_v44 = vsel %vm1675_vm5, %v1718_v29, %v1719_v61  ;;  %4937 = vst.msk [vmem:[#allocation2 + $0x98] sm:$0xf] %vm247_vm1, %v4823_v2 }
 0x18e   : > { %v1669_v46 = vmax.f32 %v1442_v3, %v1571_v0  ;;  %v1670_v10 = vmax.f32 %v9266_v24, %v1573_v41  ;;  %v1909_v45 = vsel %vm1836_vm6, %v1907_v37, %v1908_v11  ;;  %v1911_v12 = vsel %vm1836_vm6, %v1908_v11, %v1910_v53  ;;  %v1318_v3 = vld [vmem:[#allocation2 + $0x180] sm:$0xf]  ;;  %v9309_v11 = vld [vmem:[#allocation2 + $0x88] sm:$0x1]  ;;  %v2979_v53 = vld [vmem:[#allocation2 + $0x9c] sm:$0x1] }
 0x18f   : > { %v2084_v55 = vrot.slane %v9266_v24, 4  ;;  %v1816_v4 = vmax.f32 %v1671_v26, %v1719_v61  ;;  %v2085_v59 = vrot.slane %v1444_v6, 4  ;;  %v2087_v30 = vrot.slane %v1445_v20, 4  ;;  %v1320_v6 = vld [vmem:[#allocation2 + $0x188] sm:$0xf] }
 0x190   : > { %v1814_v28 = vmax.f32 %v1669_v46, %v1718_v29  ;;  %v1815_v36 = vmax.f32 %v1670_v10, %v1720_v44  ;;  %v999_v18 = vmax.bf16 %v935_v39, %v870_v38  ;;  %v1124_v7 = vmax.bf16 %v1060_v40, %v996_v35  ;;  %v1321_v20 = vld [vmem:[#allocation2 + $0x18c] sm:$0x1] }
 0x191   : > { %v1125_v62 = vmax.bf16 %v1061_v32, %v997_v52  ;;  %v2009_v15 = vmax.f32 %v1816_v4, %v1911_v12  ;;  %v2086_v21 = vsel %vm2013_vm7, %v2084_v55, %v2085_v59  ;;  %v2088_v58 = vsel %vm2013_vm7, %v2085_v59, %v2087_v30 }
 0x192   : > { %v2007_v49 = vmax.f32 %v1814_v28, %v1907_v37  ;;  %v2008_v5 = vmax.f32 %v1815_v36, %v1909_v45  ;;  %v1126_v57 = vmax.bf16 %v1062_v13, %v998_v54  ;;  %v1127_v19 = vmax.bf16 %v1063_v56, %v999_v18 }
 0x193   : > { %v1253_v17 = vmax.bf16 %v1189_v33, %v1124_v7  ;;  %v2186_v52 = vmax.f32 %v2009_v15, %v2088_v58  ;;  %v1254_v24 = vmax.bf16 %v1190_v60, %v1125_v62  ;;  %v3040_v25 = vmax.bf16 %v9301_v50, %v9299_v8  ;;  %v3104_v50 = vld [vmem:[#allocation2 + $0xa4] sm:$0xf]  ;;  %v3106_v15 = vld [vmem:[#allocation2 + $0xac] sm:$0xf] }
 0x194   : > { %v2184_v35 = vmax.f32 %v2007_v49, %v2084_v55  ;;  %v2185_v22 = vmax.f32 %v2008_v5, %v2086_v21  ;;  %v1255_v34 = vmax.bf16 %v1191_v51, %v1126_v57  ;;  %v1256_v14 = vmax.bf16 %v1192_v23, %v1127_v19  ;;  %v3105_v49 = vld [vmem:[#allocation2 + $0xa8] sm:$0xf] }
 0x195   : > { %v1382_v16 = vmax.bf16 %v1318_v3, %v1253_v17  ;;  %v2219_v48 = vpack.c.bf16 %v2186_v52, %v2186_v52  ;;  %v1383_v61 = vmax.bf16 %v1319_v31, %v1254_v24  ;;  %v3041_v54 = vmax.bf16 %v9274_v1, %v9233_v43  ;;  %v3107_v3 = vld [vmem:[#allocation2 + $0xb0] sm:$0x1]  ;;  %v3232_v31 = vld [vmem:[#allocation2 + $0xb8] sm:$0xf] }
 0x196   : > { %v7565_v29 = vpack.c.bf16 %v2184_v35, %v2184_v35  ;;  %v2218_v37 = vpack.c.bf16 %v2185_v22, %v2184_v35  ;;  %v7566_v38 = vpack.c.bf16 %v2185_v22, %v2185_v22  ;;  %v1384_v2 = vmax.bf16 %v1320_v6, %v1255_v34  ;;  %v3233_v35 = vld [vmem:[#allocation2 + $0xbc] sm:$0xf]  ;;  %v3234_v22 = vld [vmem:[#allocation2 + $0xc0] sm:$0xf]  ;;  %v9327_v34 = vld [vmem:[#allocation2 + $0x90] sm:$0xf] }
 0x197   : > { %v1385_v0 = vmax.bf16 %v1321_v20, %v1256_v14  ;;  %v2330_v41 = vrot.slane %v2219_v48, 3  ;;  %v2815_v26 = vrot.slane %v2219_v48, 7  ;;  %v1446_v44 = vunpack.c.l.bf16 %v1382_v16  ;;  %v9329_v14 = vld [vmem:[#allocation2 + $0xa4] sm:$0xf] }
 0x198   : > { %v7386_v46 = vrot.slane %v7565_v29, 11  ;;  %v2329_v39 = vrot.slane %v2218_v37, 3  ;;  %v2812_v40 = vrot.slane %v7566_v38, 7  ;;  %v1447_v32 = vunpack.c.l.bf16 %v1383_v61  ;;  %v3235_v37 = vld [vmem:[#allocation2 + $0xc4] sm:$0x1] }
 0x199   : > { %v1448_v10 = vunpack.c.l.bf16 %v1384_v2  ;;  %v1449_v45 = vunpack.c.l.bf16 %v1385_v0  ;;  %v1574_v12 = vrot.slane %v1446_v44, 1  ;;  %v3042_v43 = vmax.bf16 %v9285_v47, %v9242_v27  ;;  %v3360_v38 = vld [vmem:[#allocation2 + $0xcc] sm:$0xf]  ;;  %v3361_v2 = vld [vmem:[#allocation2 + $0xd0] sm:$0xf] }
 0x19a   : > { %v3043_v1 = vmax.bf16 %v2979_v53, %v9309_v11  ;;  %v2331_v55 = vsel %vm1836_vm6, %v2329_v39, %v2330_v41  ;;  %v2813_v13 = vsel %vm8470_vm9, %v7386_v46, %v2812_v40  ;;  %v2814_v28 = vrot.slane %v2812_v40, 4  ;;  %v9333_v41 = vld [vmem:[#allocation2 + $0xa8] sm:$0xf]  ;;  %v3363_v39 = vld [vmem:[#allocation2 + $0xd8] sm:$0x1] }
 0x19b   : > { %v1575_v4 = vrot.slane %v1447_v32, 1  ;;  %7783 = vmatprep.mubr.msk.bf16.mxu1 %vm494_vm3, %v2331_v55  ;;  %2884 = vst.msk [vmem:[#allocation2 + $0x148] sm:$0xf] %vm247_vm1, %v2813_v13  ;;  %v1577_v59 = vrot.slane %v1448_v10, 1  ;;  %v1721_v30 = vrot.slane %v1447_v32, 2  ;;  %v1722_v56 = vrot.slane %v1448_v10, 2 }
 0x19c   : > { %v1912_v33 = vrot.slane %v1447_v32, 3  ;;  %v2816_v27 = vsel %vm8470_vm9, %v2814_v28, %v2815_v26  ;;  %v1913_v36 = vrot.slane %v1448_v10, 3  ;;  %v1915_v18 = vrot.slane %v1449_v45, 3 }
 0x19d   : > { %v1576_v47 = vsel %vm1498_vm4, %v1574_v12, %v1575_v4  ;;  %2885 = vst.msk [vmem:[#allocation2 + $0x14c] sm:$0xf] %vm247_vm1, %v2816_v27  ;;  %v1578_v7 = vsel %vm1498_vm4, %v1575_v4, %v1577_v59  ;;  %v1674_v60 = vmax.f32 %v1448_v10, %v1577_v59  ;;  %v1723_v8 = vsel %vm1675_vm5, %v1721_v30, %v1722_v56 }
 0x19e   : > { %v1672_v62 = vmax.f32 %v1446_v44, %v1576_v47  ;;  %v1673_v21 = vmax.f32 %v1447_v32, %v1578_v7  ;;  %v1914_v58 = vsel %vm1836_vm6, %v1912_v33, %v1913_v36  ;;  %v1916_v51 = vsel %vm1836_vm6, %v1913_v36, %v1915_v18 }
 0x19f   : > { %v2089_v23 = vrot.slane %v1447_v32, 4  ;;  %v1819_v57 = vmax.f32 %v1674_v60, %v1722_v56  ;;  %v2090_v19 = vrot.slane %v1448_v10, 4  ;;  %v2092_v17 = vrot.slane %v1449_v45, 4 }
 0x1a0   : > { %v1817_v5 = vmax.f32 %v1672_v62, %v1721_v30  ;;  %v1818_v52 = vmax.f32 %v1673_v21, %v1723_v8  ;;  %v3168_v24 = vmax.bf16 %v3104_v50, %v3040_v25  ;;  %v3169_v6 = vmax.bf16 %v3105_v49, %v3041_v54  ;;  %v3362_v54 = vld [vmem:[#allocation2 + $0xd4] sm:$0xf] }
 0x1a1   : > { %v3170_v20 = vmax.bf16 %v3106_v15, %v3042_v43  ;;  %v2012_v48 = vmax.f32 %v1819_v57, %v1916_v51  ;;  %v2091_v29 = vsel %vm2013_vm7, %v2089_v23, %v2090_v19  ;;  %v2093_v61 = vsel %vm2013_vm7, %v2090_v19, %v2092_v17 }
 0x1a2   : > { %v2010_v16 = vmax.f32 %v1817_v5, %v1912_v33  ;;  %v2011_v0 = vmax.f32 %v1818_v52, %v1914_v58  ;;  %v3171_v11 = vmax.bf16 %v3107_v3, %v3043_v1  ;;  %v3296_v53 = vmax.bf16 %v3232_v31, %v3168_v24  ;;  %v2919_v52 = vld [vmem:[#allocation2 + $0x9c] sm:$0x1]  ;;  %v2982_v24 = vld [vmem:[#allocation2 + $0xac] sm:$0xf] }
 0x1a3   : > { %v3297_v25 = vmax.bf16 %v3233_v35, %v3169_v6  ;;  %v2189_v26 = vmax.f32 %v2012_v48, %v2093_v61  ;;  %v3298_v44 = vmax.bf16 %v3234_v22, %v3170_v20  ;;  %v3044_v40 = vmax.bf16 %v9329_v14, %v9327_v34  ;;  %v2983_v6 = vld [vmem:[#allocation2 + $0xb0] sm:$0x1]  ;;  %v3109_v61 = vld [vmem:[#allocation2 + $0xbc] sm:$0xf]  ;;  %v3365_v14 = vld [vmem:[#allocation2 + $0xe4] sm:$0xf] }
 0x1a4   : > { %v2187_v46 = vmax.f32 %v2010_v16, %v2089_v23  ;;  %v2188_v32 = vmax.f32 %v2011_v0, %v2091_v29  ;;  %v3299_v10 = vmax.bf16 %v3235_v37, %v3171_v11  ;;  %v3424_v45 = vmax.bf16 %v3360_v38, %v3296_v53  ;;  %v3108_v29 = vld [vmem:[#allocation2 + $0xb8] sm:$0xf]  ;;  %v3110_v11 = vld [vmem:[#allocation2 + $0xc0] sm:$0xf]  ;;  %v3237_v53 = vld [vmem:[#allocation2 + $0xd0] sm:$0xf] }
 0x1a5   : > { %v3425_v12 = vmax.bf16 %v3361_v2, %v3297_v25  ;;  %v2221_v43 = vpack.c.bf16 %v2189_v26, %v2189_v26  ;;  %v3426_v13 = vmax.bf16 %v3362_v54, %v3298_v44  ;;  %v3045_v1 = vmax.bf16 %v9333_v41, %v9276_v42  ;;  %v3111_v44 = vld [vmem:[#allocation2 + $0xc4] sm:$0x1] }
 0x1a6   : > { %v7568_v55 = vpack.c.bf16 %v2187_v46, %v2187_v46  ;;  %v2220_v28 = vpack.c.bf16 %v2188_v32, %v2187_v46  ;;  %v7569_v4 = vpack.c.bf16 %v2188_v32, %v2188_v32  ;;  %v3427_v59 = vmax.bf16 %v3363_v39, %v3299_v10  ;;  %v3236_v39 = vld [vmem:[#allocation2 + $0xcc] sm:$0xf] }
 0x1a7   : > { %v3488_v30 = vunpack.c.l.bf16 %v3424_v45  ;;  %v2333_v56 = vrot.slane %v2221_v43, 3  ;;  %v2822_v27 = vrot.slane %v2221_v43, 7  ;;  %v3489_v47 = vunpack.c.l.bf16 %v3425_v12  ;;  %v3238_v43 = vld [vmem:[#allocation2 + $0xd4] sm:$0xf] }
 0x1a8   : > { %v7387_v33 = vrot.slane %v7568_v55, 11  ;;  %v2332_v36 = vrot.slane %v2220_v28, 3  ;;  %v2819_v18 = vrot.slane %v7569_v4, 7  ;;  %v3490_v7 = vunpack.c.l.bf16 %v3426_v13  ;;  %v9357_v55 = vld [vmem:[#allocation2 + $0xa4] sm:$0xf] }
 0x1a9   : > { %v3491_v62 = vunpack.c.l.bf16 %v3427_v59  ;;  %v3606_v60 = vrot.slane %v3488_v30, 1  ;;  %v3607_v8 = vrot.slane %v3489_v47, 1  ;;  %v3770_v50 = vrot.slane %v3489_v47, 2  ;;  %v9359_v13 = vld [vmem:[#allocation2 + $0xb8] sm:$0xf] }
 0x1aa   : > { %v3942_v49 = vrot.slane %v3489_v47, 3  ;;  %v2334_v15 = vsel %vm1836_vm6, %v2332_v36, %v2333_v56  ;;  %v2820_v21 = vsel %vm8470_vm9, %v7387_v33, %v2819_v18  ;;  %v2821_v58 = vrot.slane %v2819_v18, 4  ;;  %v3364_v56 = vld [vmem:[#allocation2 + $0xe0] sm:$0xf] }
 0x1ab   : > { %v3609_v51 = vrot.slane %v3490_v7, 1  ;;  %7784 = vmatmul.mubr.msk.bf16.gmra.mxu1 %vm494_vm3, %v2334_v15  ;;  %2886 = vst.msk [vmem:[#allocation2 + $0x15c] sm:$0xf] %vm247_vm1, %v2820_v21  ;;  %v3608_v23 = vsel %vm1498_vm4, %v3606_v60, %v3607_v8  ;;  %v3771_v3 = vrot.slane %v3490_v7, 2  ;;  %v3943_v5 = vrot.slane %v3490_v7, 3 }
 0x1ac   : > { %v3945_v57 = vrot.slane %v3491_v62, 3  ;;  %v2823_v19 = vsel %vm8470_vm9, %v2821_v58, %v2822_v27  ;;  %v3722_v31 = vmax.f32 %v3488_v30, %v3608_v23  ;;  %v4118_v2 = vrot.slane %v3489_v47, 4  ;;  %v3239_v30 = vld [vmem:[#allocation2 + $0xd8] sm:$0x1]  ;;  %v2985_v23 = vld [vmem:[#allocation2 + $0xbc] sm:$0xf] }
 0x1ad   : > { %v3610_v17 = vsel %vm1498_vm4, %v3607_v8, %v3609_v51  ;;  %v3724_v35 = vmax.f32 %v3490_v7, %v3609_v51  ;;  %2887 = vst.msk [vmem:[#allocation2 + $0x160] sm:$0xf] %vm247_vm1, %v2823_v19  ;;  %v3772_v22 = vsel %vm1675_vm5, %v3770_v50, %v3771_v3  ;;  %v3944_v16 = vsel %vm1836_vm6, %v3942_v49, %v3943_v5  ;;  %v9369_v51 = vld [vmem:[#allocation2 + $0xac] sm:$0xf] }
 0x1ae   : > { %v3723_v20 = vmax.f32 %v3489_v47, %v3610_v17  ;;  %v3946_v48 = vsel %vm1836_vm6, %v3943_v5, %v3945_v57  ;;  %v3866_v37 = vmax.f32 %v3722_v31, %v3770_v50  ;;  %v4119_v0 = vrot.slane %v3490_v7, 4 }
 0x1af   : > { %v3868_v38 = vmax.f32 %v3724_v35, %v3771_v3  ;;  %v4121_v54 = vrot.slane %v3491_v62, 4  ;;  %v3046_v46 = vmax.bf16 %v2982_v24, %v9287_v63  ;;  %v3047_v26 = vmax.bf16 %v2983_v6, %v2919_v52  ;;  %v3367_v62 = vld [vmem:[#allocation2 + $0xec] sm:$0x1]  ;;  %v9371_v3 = vld [vmem:[#allocation2 + $0xc0] sm:$0xf] }
 0x1b0   : > { %v3867_v25 = vmax.f32 %v3723_v20, %v3772_v22  ;;  %v4058_v32 = vmax.f32 %v3866_v37, %v3942_v49  ;;  %v4120_v45 = vsel %vm2013_vm7, %v4118_v2, %v4119_v0  ;;  %v3172_v12 = vmax.bf16 %v3108_v29, %v3044_v40  ;;  %v3366_v40 = vld [vmem:[#allocation2 + $0xe8] sm:$0xf] }
 0x1b1   : > { %v4060_v10 = vmax.f32 %v3868_v38, %v3946_v48  ;;  %v4122_v4 = vsel %vm2013_vm7, %v4119_v0, %v4121_v54  ;;  %v3173_v63 = vmax.bf16 %v3109_v61, %v3045_v1  ;;  %v3174_v59 = vmax.bf16 %v3110_v11, %v3046_v46  ;;  %v9367_v1 = vld [vmem:[#allocation2 + $0xa8] sm:$0xf] }
 0x1b2   : > { %v4059_v28 = vmax.f32 %v3867_v25, %v3944_v16  ;;  %v4234_v33 = vmax.f32 %v4058_v32, %v4118_v2  ;;  %v3175_v47 = vmax.bf16 %v3111_v44, %v3047_v26  ;;  %v3300_v34 = vmax.bf16 %v3236_v39, %v3172_v12  ;;  %v3112_v12 = vld [vmem:[#allocation2 + $0xcc] sm:$0xf] }
 0x1b3   : > { %v4236_v27 = vmax.f32 %v4060_v10, %v4122_v4  ;;  %v3301_v18 = vmax.bf16 %v3237_v53, %v3173_v63  ;;  %v3302_v7 = vmax.bf16 %v3238_v43, %v3174_v59  ;;  %v3048_v60 = vmax.bf16 %v9359_v13, %v9357_v55  ;;  %v2923_v10 = vld [vmem:[#allocation2 + $0xb0] sm:$0x1]  ;;  %v3114_v63 = vld [vmem:[#allocation2 + $0xd4] sm:$0xf]  ;;  %v3115_v59 = vld [vmem:[#allocation2 + $0xd8] sm:$0x1] }
 0x1b4   : > { %v4235_v36 = vmax.f32 %v4059_v28, %v4120_v45  ;;  %v7589_v50 = vpack.c.bf16 %v4234_v33, %v4234_v33  ;;  %v3303_v42 = vmax.bf16 %v3239_v30, %v3175_v47  ;;  %v3428_v41 = vmax.bf16 %v3364_v56, %v3300_v34  ;;  %v2987_v45 = vld [vmem:[#allocation2 + $0xc4] sm:$0x1]  ;;  %v3113_v4 = vld [vmem:[#allocation2 + $0xd0] sm:$0xf] }
 0x1b5   : > { %v4277_v8 = vpack.c.bf16 %v4236_v27, %v4236_v27  ;;  %v3429_v21 = vmax.bf16 %v3365_v14, %v3301_v18  ;;  %v3430_v58 = vmax.bf16 %v3366_v40, %v3302_v7  ;;  %v3049_v22 = vmax.bf16 %v2985_v23, %v9367_v1  ;;  %v3241_v47 = vld [vmem:[#allocation2 + $0xe4] sm:$0xf]  ;;  %v3240_v18 = vld [vmem:[#allocation2 + $0xe0] sm:$0xf]  ;;  %v9396_v7 = vld [vmem:[#allocation2 + $0xb8] sm:$0xf] }
 0x1b6   : > { %v4276_v49 = vpack.c.bf16 %v4235_v36, %v4234_v33  ;;  %v7590_v15 = vpack.c.bf16 %v4235_v36, %v4235_v36  ;;  %v7459_v57 = vrot.slane %v7589_v50, 11  ;;  %v3431_v17 = vmax.bf16 %v3367_v62, %v3303_v42  ;;  %v9398_v62 = vld [vmem:[#allocation2 + $0xcc] sm:$0xf]  ;;  %v3242_v1 = vld [vmem:[#allocation2 + $0xe8] sm:$0xf] }
 0x1b7   : > { %v4379_v5 = vrot.slane %v4277_v8, 3  ;;  %v4829_v19 = vrot.slane %v4277_v8, 7  ;;  %v3492_v52 = vunpack.c.l.bf16 %v3428_v41  ;;  %v9373_v24 = vunpack.c.l.bf16 %v3429_v21 }
 0x1b8   : > { %v4378_v31 = vrot.slane %v4276_v49, 3  ;;  %v4826_v35 = vrot.slane %v7590_v15, 7  ;;  %v3494_v6 = vunpack.c.l.bf16 %v3430_v58  ;;  %v3495_v20 = vunpack.c.l.bf16 %v3431_v17  ;;  %v3243_v49 = vld [vmem:[#allocation2 + $0xec] sm:$0x1]  ;;  %v9402_v15 = vld [vmem:[#allocation2 + $0xbc] sm:$0xf] }
 0x1b9   : > { %v3050_v16 = vmax.bf16 %v9371_v3, %v9369_v51  ;;  %v3611_v37 = vrot.slane %v3492_v52, 1  ;;  %v3612_v38 = vrot.slane %v9373_v24, 1  ;;  %v3773_v0 = vrot.slane %v9373_v24, 2  ;;  %v3369_v3 = vld [vmem:[#allocation2 + $0xf8] sm:$0xf] }
 0x1ba   : > { %v4380_v48 = vsel %vm1836_vm6, %v4378_v31, %v4379_v5  ;;  %v4827_v29 = vsel %vm8470_vm9, %v7459_v57, %v4826_v35  ;;  %v4828_v61 = vrot.slane %v4826_v35, 4  ;;  %v3614_v2 = vrot.slane %v3494_v6, 1  ;;  %v9404_v5 = vld [vmem:[#allocation2 + $0xd0] sm:$0xf]  ;;  %v3370_v31 = vld [vmem:[#allocation2 + $0xfc] sm:$0xf] }
 0x1bb   : > { %7801 = vmatprep.mubr.msk.bf16.mxu0 %vm494_vm3, %v4380_v48  ;;  %v3774_v11 = vrot.slane %v3494_v6, 2  ;;  %4938 = vst.msk [vmem:[#allocation2 + $0xa8] sm:$0xf] %vm247_vm1, %v4827_v29  ;;  %v3947_v25 = vrot.slane %v9373_v24, 3  ;;  %v3948_v54 = vrot.slane %v3494_v6, 3  ;;  %v3950_v46 = vrot.slane %v3495_v20, 3 }
 0x1bc   : > { %v4830_v53 = vsel %vm8470_vm9, %v4828_v61, %v4829_v19  ;;  %v3613_v26 = vsel %vm1498_vm4, %v3611_v37, %v3612_v38  ;;  %v3615_v44 = vsel %vm1498_vm4, %v3612_v38, %v3614_v2  ;;  %v3727_v39 = vmax.f32 %v3494_v6, %v3614_v2 }
 0x1bd   : > { %v3775_v32 = vsel %vm1675_vm5, %v3773_v0, %v3774_v11  ;;  %4939 = vst.msk [vmem:[#allocation2 + $0xac] sm:$0xf] %vm247_vm1, %v4830_v53  ;;  %v3725_v43 = vmax.f32 %v3492_v52, %v3613_v26  ;;  %v3726_v55 = vmax.f32 %v9373_v24, %v3615_v44  ;;  %v3949_v13 = vsel %vm1836_vm6, %v3947_v25, %v3948_v54  ;;  %v9412_v53 = vld [vmem:[#allocation2 + $0xd4] sm:$0xf] }
 0x1be   : > { %v3951_v28 = vsel %vm1836_vm6, %v3948_v54, %v3950_v46  ;;  %v3871_v30 = vmax.f32 %v3727_v39, %v3774_v11  ;;  %v4123_v56 = vrot.slane %v9373_v24, 4  ;;  %v4124_v33 = vrot.slane %v3494_v6, 4  ;;  %v9410_v11 = vld [vmem:[#allocation2 + $0xc0] sm:$0xf] }
 0x1bf   : > { %v4126_v27 = vrot.slane %v3495_v20, 4  ;;  %v3869_v34 = vmax.f32 %v3725_v43, %v3773_v0  ;;  %v3870_v14 = vmax.f32 %v3726_v55, %v3775_v32  ;;  %v3051_v40 = vmax.bf16 %v2987_v45, %v2923_v10 }
 0x1c0   : > { %v3176_v36 = vmax.bf16 %v3112_v12, %v3048_v60  ;;  %v4063_v8 = vmax.f32 %v3871_v30, %v3951_v28  ;;  %v4125_v50 = vsel %vm2013_vm7, %v4123_v56, %v4124_v33  ;;  %v3177_v41 = vmax.bf16 %v3113_v4, %v3049_v22  ;;  %v3368_v60 = vld [vmem:[#allocation2 + $0xf4] sm:$0xf]  ;;  %v3371_v22 = vld [vmem:[#allocation2 + $0x100] sm:$0x1] }
 0x1c1   : > { %v4127_v42 = vsel %vm2013_vm7, %v4124_v33, %v4126_v27  ;;  %v4061_v21 = vmax.f32 %v3869_v34, %v3947_v25  ;;  %v4062_v58 = vmax.f32 %v3870_v14, %v3949_v13  ;;  %v3178_v51 = vmax.bf16 %v3114_v63, %v3050_v16 }
 0x1c2   : > { %v3179_v23 = vmax.bf16 %v3115_v59, %v3051_v40  ;;  %v4239_v57 = vmax.f32 %v4063_v8, %v4127_v42  ;;  %v3304_v19 = vmax.bf16 %v3240_v18, %v3176_v36  ;;  %v3305_v17 = vmax.bf16 %v3241_v47, %v3177_v41  ;;  %v2927_v40 = vld [vmem:[#allocation2 + $0xc4] sm:$0x1]  ;;  %v2991_v42 = vld [vmem:[#allocation2 + $0xd8] sm:$0x1]  ;;  %v3116_v41 = vld [vmem:[#allocation2 + $0xe0] sm:$0xf] }
 0x1c3   : > { %v3052_v35 = vmax.bf16 %v9398_v62, %v9396_v7  ;;  %v4237_v52 = vmax.f32 %v4061_v21, %v4123_v56  ;;  %v4238_v24 = vmax.f32 %v4062_v58, %v4125_v50  ;;  %v3306_v6 = vmax.bf16 %v3242_v1, %v3178_v51  ;;  %v3117_v1 = vld [vmem:[#allocation2 + $0xe4] sm:$0xf]  ;;  %v3118_v51 = vld [vmem:[#allocation2 + $0xe8] sm:$0xf]  ;;  %v3373_v62 = vld [vmem:[#allocation2 + $0x10c] sm:$0xf] }
 0x1c4   : > { %v3307_v20 = vmax.bf16 %v3243_v49, %v3179_v23  ;;  %v4279_v48 = vpack.c.bf16 %v4239_v57, %v4239_v57  ;;  %v3432_v29 = vmax.bf16 %v3368_v60, %v3304_v19  ;;  %v3433_v16 = vmax.bf16 %v3369_v3, %v3305_v17  ;;  %v3119_v57 = vld [vmem:[#allocation2 + $0xec] sm:$0x1]  ;;  %v3244_v19 = vld [vmem:[#allocation2 + $0xf4] sm:$0xf] }
 0x1c5   : > { %v3053_v61 = vmax.bf16 %v9404_v5, %v9402_v15  ;;  %v4278_v37 = vpack.c.bf16 %v4238_v24, %v4237_v52  ;;  %v7592_v38 = vpack.c.bf16 %v4237_v52, %v4237_v52  ;;  %v7593_v2 = vpack.c.bf16 %v4238_v24, %v4238_v24 }
 0x1c6   : > { %v3434_v0 = vmax.bf16 %v3370_v31, %v3306_v6  ;;  %v4382_v25 = vrot.slane %v4279_v48, 3  ;;  %v4836_v54 = vrot.slane %v4279_v48, 7  ;;  %v3435_v46 = vmax.bf16 %v3371_v22, %v3307_v20  ;;  %v3245_v6 = vld [vmem:[#allocation2 + $0xf8] sm:$0xf]  ;;  %v9432_v20 = vld [vmem:[#allocation2 + $0x4] sm:$0xf] }
 0x1c7   : > { %v3496_v26 = vunpack.c.l.bf16 %v3432_v29  ;;  %v4381_v44 = vrot.slane %v4278_v37, 3  ;;  %v7460_v39 = vrot.slane %v7592_v38, 11  ;;  %v4833_v32 = vrot.slane %v7593_v2, 7  ;;  %v9434_v22 = vld [vmem:[#allocation2 + $0x18] sm:$0xf] }
 0x1c8   : > { %v3497_v10 = vunpack.c.l.bf16 %v3433_v16  ;;  %v3498_v45 = vunpack.c.l.bf16 %v3434_v0  ;;  %v3499_v12 = vunpack.c.l.bf16 %v3435_v46  ;;  %v3054_v55 = vmax.bf16 %v9412_v53, %v9410_v11  ;;  %v3246_v38 = vld [vmem:[#allocation2 + $0xfc] sm:$0xf]  ;;  %v3247_v2 = vld [vmem:[#allocation2 + $0x100] sm:$0x1]  ;;  %v3372_v0 = vld [vmem:[#allocation2 + $0x108] sm:$0xf] }
 0x1c9   : > { %v3616_v43 = vrot.slane %v3496_v26, 1  ;;  %v4383_v13 = vsel %vm1836_vm6, %v4381_v44, %v4382_v25  ;;  %v4834_v28 = vsel %vm8470_vm9, %v7460_v39, %v4833_v32  ;;  %v4835_v4 = vrot.slane %v4833_v32, 4  ;;  %v3374_v44 = vld [vmem:[#allocation2 + $0x110] sm:$0xf]  ;;  %v3375_v39 = vld [vmem:[#allocation2 + $0x114] sm:$0x1] }
 0x1ca   : > { %v3617_v63 = vrot.slane %v3497_v10, 1  ;;  %7802 = vmatmul.mubr.msk.bf16.gmra.mxu0 %vm494_vm3, %v4383_v13  ;;  %v3619_v59 = vrot.slane %v3498_v45, 1  ;;  %v3776_v30 = vrot.slane %v3497_v10, 2  ;;  %v3777_v56 = vrot.slane %v3498_v45, 2  ;;  %4940 = vst.msk [vmem:[#allocation2 + $0xbc] sm:$0xf] %vm247_vm1, %v4834_v28 }
 0x1cb   : > { %v3952_v33 = vrot.slane %v3497_v10, 3  ;;  %v4837_v27 = vsel %vm8470_vm9, %v4835_v4, %v4836_v54  ;;  %v3953_v34 = vrot.slane %v3498_v45, 3  ;;  %v3955_v14 = vrot.slane %v3499_v12, 3  ;;  %v4960_v4 = vld [vmem:[#allocation2 + $0xc] sm:$0xf] }
 0x1cc   : > { %v3618_v47 = vsel %vm1498_vm4, %v3616_v43, %v3617_v63  ;;  %v3620_v36 = vsel %vm1498_vm4, %v3617_v63, %v3619_v59  ;;  %v3730_v8 = vmax.f32 %v3498_v45, %v3619_v59  ;;  %v3778_v50 = vsel %vm1675_vm5, %v3776_v30, %v3777_v56  ;;  %4941 = vst.msk [vmem:[#allocation2 + $0xc0] sm:$0xf] %vm247_vm1, %v4837_v27  ;;  %v9446_v27 = vld [vmem:[#allocation2 + $0x10] sm:$0x1] }
 0x1cd   : > { %v3728_v18 = vmax.f32 %v3496_v26, %v3618_v47  ;;  %v3729_v49 = vmax.f32 %v3497_v10, %v3620_v36  ;;  %v3954_v15 = vsel %vm1836_vm6, %v3952_v33, %v3953_v34  ;;  %v3956_v21 = vsel %vm1836_vm6, %v3953_v34, %v3955_v14  ;;  %v5024_v47 = vld [vmem:[#allocation2 + $0x20] sm:$0xf]  ;;  %v9448_v34 = vld [vmem:[#allocation2 + $0x24] sm:$0x1] }
 0x1ce   : > { %v4128_v58 = vrot.slane %v3497_v10, 4  ;;  %v3874_v60 = vmax.f32 %v3730_v8, %v3777_v56  ;;  %v4129_v3 = vrot.slane %v3498_v45, 4  ;;  %v4131_v5 = vrot.slane %v3499_v12, 4 }
 0x1cf   : > { %v3872_v23 = vmax.f32 %v3728_v18, %v3776_v30  ;;  %v3873_v17 = vmax.f32 %v3729_v49, %v3778_v50  ;;  %v3055_v31 = vmax.bf16 %v2991_v42, %v2927_v40  ;;  %v3180_v52 = vmax.bf16 %v3116_v41, %v3052_v35  ;;  %v9438_v35 = vld [vmem:[#allocation2 + $0x8] sm:$0xf] }
 0x1d0   : > { %v3181_v24 = vmax.bf16 %v3117_v1, %v3053_v61  ;;  %v4066_v29 = vmax.f32 %v3874_v60, %v3956_v21  ;;  %v4130_v16 = vsel %vm2013_vm7, %v4128_v58, %v4129_v3  ;;  %v4132_v37 = vsel %vm2013_vm7, %v4129_v3, %v4131_v5  ;;  %v9440_v61 = vld [vmem:[#allocation2 + $0x1c] sm:$0xf]  ;;  %v9458_v3 = vld [vmem:[#allocation2 + $0xd0] sm:$0xf] }
 0x1d1   : > { %v4064_v48 = vmax.f32 %v3872_v23, %v3952_v33  ;;  %v4065_v11 = vmax.f32 %v3873_v17, %v3954_v15  ;;  %v3182_v53 = vmax.bf16 %v3118_v51, %v3054_v55  ;;  %v3183_v25 = vmax.bf16 %v3119_v57, %v3055_v31 }
 0x1d2   : > { %v3308_v7 = vmax.bf16 %v3244_v19, %v3180_v52  ;;  %v4242_v46 = vmax.f32 %v4066_v29, %v4132_v37  ;;  %v3309_v26 = vmax.bf16 %v3245_v6, %v3181_v24  ;;  %v5086_v32 = vmax.bf16 %v9434_v22, %v9432_v20 }
 0x1d3   : > { %v4240_v54 = vmax.f32 %v4064_v48, %v4128_v58  ;;  %v4241_v10 = vmax.f32 %v4065_v11, %v4130_v16  ;;  %v3310_v45 = vmax.bf16 %v3246_v38, %v3182_v53  ;;  %v3311_v12 = vmax.bf16 %v3247_v2, %v3183_v25  ;;  %v9467_v48 = vld [vmem:[#allocation2 + $0xd4] sm:$0xf]  ;;  %v5150_v2 = vld [vmem:[#allocation2 + $0x2c] sm:$0xf]  ;;  %v5180_v9 = vld [vmem:[#allocation2 + $0xc0] sm:$0xf] }
 0x1d4   : > { %v3436_v43 = vmax.bf16 %v3372_v0, %v3308_v7  ;;  %v4281_v55 = vpack.c.bf16 %v4242_v46, %v4242_v46  ;;  %v3437_v28 = vmax.bf16 %v3373_v62, %v3309_v26  ;;  %v5087_v63 = vmax.bf16 %v9440_v61, %v9438_v35  ;;  %v5151_v0 = vld [vmem:[#allocation2 + $0x30] sm:$0xf]  ;;  %v5152_v11 = vld [vmem:[#allocation2 + $0x34] sm:$0xf]  ;;  %v5153_v35 = vld [vmem:[#allocation2 + $0x38] sm:$0x1] }
 0x1d5   : > { %v7595_v13 = vpack.c.bf16 %v4240_v54, %v4240_v54  ;;  %v4280_v59 = vpack.c.bf16 %v4241_v10, %v4240_v54  ;;  %v7596_v30 = vpack.c.bf16 %v4241_v10, %v4241_v10  ;;  %v3438_v56 = vmax.bf16 %v3374_v44, %v3310_v45  ;;  %v5278_v44 = vld [vmem:[#allocation2 + $0x40] sm:$0xf] }
 0x1d6   : > { %v3439_v33 = vmax.bf16 %v3375_v39, %v3311_v12  ;;  %v4385_v14 = vrot.slane %v4281_v55, 3  ;;  %v4843_v36 = vrot.slane %v4281_v55, 7  ;;  %v3500_v18 = vunpack.c.l.bf16 %v3436_v43  ;;  %v5279_v39 = vld [vmem:[#allocation2 + $0x44] sm:$0xf]  ;;  %v5280_v55 = vld [vmem:[#allocation2 + $0x48] sm:$0xf] }
 0x1d7   : > { %v7461_v40 = vrot.slane %v7595_v13, 11  ;;  %v4384_v8 = vrot.slane %v4280_v59, 3  ;;  %v4840_v50 = vrot.slane %v7596_v30, 7  ;;  %v9450_v42 = vunpack.c.l.bf16 %v3437_v28  ;;  %v9479_v13 = vld [vmem:[#allocation2 + $0x18] sm:$0xf] }
 0x1d8   : > { %v3502_v41 = vunpack.c.l.bf16 %v3438_v56  ;;  %v3503_v1 = vunpack.c.l.bf16 %v3439_v33  ;;  %v3621_v49 = vrot.slane %v3500_v18, 1  ;;  %v5088_v15 = vmax.bf16 %v5024_v47, %v4960_v4  ;;  %v9481_v28 = vld [vmem:[#allocation2 + $0x2c] sm:$0xf]  ;;  %v5407_v47 = vld [vmem:[#allocation2 + $0x58] sm:$0xf] }
 0x1d9   : > { %v5089_v21 = vmax.bf16 %v9448_v34, %v9446_v27  ;;  %v4386_v58 = vsel %vm1836_vm6, %v4384_v8, %v4385_v14  ;;  %v4841_v51 = vsel %vm8470_vm9, %v7461_v40, %v4840_v50  ;;  %v4842_v23 = vrot.slane %v4840_v50, 4  ;;  %v5281_v33 = vld [vmem:[#allocation2 + $0x4c] sm:$0x1]  ;;  %v5406_v27 = vld [vmem:[#allocation2 + $0x54] sm:$0xf] }
 0x1da   : > { %v3622_v60 = vrot.slane %v9450_v42, 1  ;;  %7805 = vmatprep.mubr.msk.bf16.mxu0 %vm494_vm3, %v4386_v58  ;;  %v3624_v5 = vrot.slane %v3502_v41, 1  ;;  %v3779_v57 = vrot.slane %v9450_v42, 2  ;;  %v3780_v19 = vrot.slane %v3502_v41, 2  ;;  %4942 = vst.msk [vmem:[#allocation2 + $0xd0] sm:$0xf] %vm247_vm1, %v4841_v51 }
 0x1db   : > { %v3957_v17 = vrot.slane %v9450_v42, 3  ;;  %v4844_v31 = vsel %vm8470_vm9, %v4842_v23, %v4843_v36  ;;  %v3958_v24 = vrot.slane %v3502_v41, 3  ;;  %v3960_v6 = vrot.slane %v3503_v1, 3  ;;  %v9487_v40 = vld [vmem:[#allocation2 + $0x30] sm:$0xf] }
 0x1dc   : > { %v3623_v52 = vsel %vm1498_vm4, %v3621_v49, %v3622_v60  ;;  %v3625_v29 = vsel %vm1498_vm4, %v3622_v60, %v3624_v5  ;;  %v3733_v37 = vmax.f32 %v3502_v41, %v3624_v5  ;;  %v3781_v38 = vsel %vm1675_vm5, %v3779_v57, %v3780_v19  ;;  %4943 = vst.msk [vmem:[#allocation2 + $0xd4] sm:$0xf] %vm247_vm1, %v4844_v31  ;;  %v5409_v50 = vld [vmem:[#allocation2 + $0x60] sm:$0x1] }
 0x1dd   : > { %v3731_v16 = vmax.f32 %v3500_v18, %v3623_v52  ;;  %v3732_v53 = vmax.f32 %v9450_v42, %v3625_v29  ;;  %v3959_v25 = vsel %vm1836_vm6, %v3957_v17, %v3958_v24  ;;  %v3961_v7 = vsel %vm1836_vm6, %v3958_v24, %v3960_v6 }
 0x1de   : > { %v4133_v62 = vrot.slane %v9450_v42, 4  ;;  %v3877_v54 = vmax.f32 %v3733_v37, %v3780_v19  ;;  %v4134_v46 = vrot.slane %v3502_v41, 4  ;;  %v4136_v26 = vrot.slane %v3503_v1, 4 }
 0x1df   : > { %v3875_v61 = vmax.f32 %v3731_v16, %v3779_v57  ;;  %v3876_v10 = vmax.f32 %v3732_v53, %v3781_v38  ;;  %v5214_v45 = vmax.bf16 %v5150_v2, %v5086_v32  ;;  %v5215_v12 = vmax.bf16 %v5151_v0, %v5087_v63  ;;  %v5408_v32 = vld [vmem:[#allocation2 + $0x5c] sm:$0xf] }
 0x1e0   : > { %v5216_v43 = vmax.bf16 %v5152_v11, %v5088_v15  ;;  %v4069_v59 = vmax.f32 %v3877_v54, %v3961_v7  ;;  %v4135_v30 = vsel %vm2013_vm7, %v4133_v62, %v4134_v46  ;;  %v4137_v56 = vsel %vm2013_vm7, %v4134_v46, %v4136_v26  ;;  %v9485_v63 = vld [vmem:[#allocation2 + $0x1c] sm:$0xf]  ;;  %v9501_v54 = vld [vmem:[#allocation2 + $0xe4] sm:$0xf] }
 0x1e1   : > { %v4067_v4 = vmax.f32 %v3875_v61, %v3957_v17  ;;  %v4068_v34 = vmax.f32 %v3876_v10, %v3959_v25  ;;  %v5217_v14 = vmax.bf16 %v5153_v35, %v5089_v21  ;;  %v5342_v20 = vmax.bf16 %v5278_v44, %v5214_v45  ;;  %v4964_v35 = vld [vmem:[#allocation2 + $0x20] sm:$0xf]  ;;  %v5028_v61 = vld [vmem:[#allocation2 + $0x34] sm:$0xf]  ;;  %v9503_v46 = vld [vmem:[#allocation2 + $0xe4] sm:$0xf] }
 0x1e2   : > { %v5343_v22 = vmax.bf16 %v5279_v39, %v5215_v12  ;;  %v4245_v18 = vmax.f32 %v4069_v59, %v4137_v56  ;;  %v5344_v8 = vmax.bf16 %v5280_v55, %v5216_v43  ;;  %v5090_v42 = vmax.bf16 %v9481_v28, %v9479_v13  ;;  %v4965_v45 = vld [vmem:[#allocation2 + $0x24] sm:$0x1]  ;;  %v5029_v59 = vld [vmem:[#allocation2 + $0x38] sm:$0x1]  ;;  %v9513_v56 = vld [vmem:[#allocation2 + $0xe8] sm:$0xf] }
 0x1e3   : > { %v4243_v36 = vmax.f32 %v4067_v4, %v4133_v62  ;;  %v4244_v41 = vmax.f32 %v4068_v34, %v4135_v30  ;;  %v5345_v1 = vmax.bf16 %v5281_v33, %v5217_v14  ;;  %v5470_v49 = vmax.bf16 %v5406_v27, %v5342_v20  ;;  %v9511_v30 = vld [vmem:[#allocation2 + $0xe8] sm:$0xf]  ;;  %v5154_v14 = vld [vmem:[#allocation2 + $0x40] sm:$0xf]  ;;  %v5155_v20 = vld [vmem:[#allocation2 + $0x44] sm:$0xf] }
 0x1e4   : > { %v5471_v15 = vmax.bf16 %v5407_v47, %v5343_v22  ;;  %v4283_v58 = vpack.c.bf16 %v4245_v18, %v4245_v18  ;;  %v5472_v51 = vmax.bf16 %v5408_v32, %v5344_v8  ;;  %v5091_v23 = vmax.bf16 %v9487_v40, %v9485_v63  ;;  %v5156_v8 = vld [vmem:[#allocation2 + $0x48] sm:$0xf]  ;;  %v5412_v13 = vld [vmem:[#allocation2 + $0x70] sm:$0xf] }
 0x1e5   : > { %v7598_v21 = vpack.c.bf16 %v4243_v36, %v4243_v36  ;;  %v4282_v60 = vpack.c.bf16 %v4244_v41, %v4243_v36  ;;  %v7599_v5 = vpack.c.bf16 %v4244_v41, %v4244_v41  ;;  %v5473_v57 = vmax.bf16 %v5409_v50, %v5345_v1  ;;  %v2928_v50 = vld [vmem:[#allocation2 + $0xcc] sm:$0xf] }
 0x1e6   : > { %v5534_v19 = vunpack.c.l.bf16 %v5470_v49  ;;  %v4388_v17 = vrot.slane %v4283_v58, 3  ;;  %v4850_v52 = vrot.slane %v4283_v58, 7  ;;  %v9493_v24 = vunpack.c.l.bf16 %v5471_v15  ;;  %v5157_v58 = vld [vmem:[#allocation2 + $0x4c] sm:$0x1] }
 0x1e7   : > { %v7462_v31 = vrot.slane %v7598_v21, 11  ;;  %v4387_v6 = vrot.slane %v4282_v60, 3  ;;  %v4847_v29 = vrot.slane %v7599_v5, 7  ;;  %v5536_v16 = vunpack.c.l.bf16 %v5472_v51  ;;  %v5282_v21 = vld [vmem:[#allocation2 + $0x54] sm:$0xf] }
 0x1e8   : > { %v5537_v37 = vunpack.c.l.bf16 %v5473_v57  ;;  %v5646_v38 = vrot.slane %v5534_v19, 1  ;;  %v5647_v2 = vrot.slane %v9493_v24, 1  ;;  %v5822_v0 = vrot.slane %v9493_v24, 2 }
 0x1e9   : > { %v5982_v11 = vrot.slane %v9493_v24, 3  ;;  %v4389_v53 = vsel %vm1836_vm6, %v4387_v6, %v4388_v17  ;;  %v4848_v25 = vsel %vm8470_vm9, %v7462_v31, %v4847_v29  ;;  %v4849_v7 = vrot.slane %v4847_v29, 4  ;;  %v5284_v17 = vld [vmem:[#allocation2 + $0x5c] sm:$0xf]  ;;  %v2992_v31 = vld [vmem:[#allocation2 + $0xe0] sm:$0xf] }
 0x1ea   : > { %v5649_v62 = vrot.slane %v5536_v16, 1  ;;  %7806 = vmatmul.mubr.msk.bf16.gmra.mxu0 %vm494_vm3, %v4389_v53  ;;  %v5648_v26 = vsel %vm1498_vm4, %v5646_v38, %v5647_v2  ;;  %v5823_v44 = vrot.slane %v5536_v16, 2  ;;  %v5983_v39 = vrot.slane %v5536_v16, 3  ;;  %4944 = vst.msk [vmem:[#allocation2 + $0xe4] sm:$0xf] %vm247_vm1, %v4848_v25 }
 0x1eb   : > { %v5985_v10 = vrot.slane %v5537_v37, 3  ;;  %v4851_v12 = vsel %vm8470_vm9, %v4849_v7, %v4850_v52  ;;  %v5774_v55 = vmax.f32 %v5534_v19, %v5648_v26  ;;  %v6158_v36 = vrot.slane %v9493_v24, 4  ;;  %v5283_v19 = vld [vmem:[#allocation2 + $0x58] sm:$0xf]  ;;  %v5411_v53 = vld [vmem:[#allocation2 + $0x6c] sm:$0xf] }
 0x1ec   : > { %v5650_v43 = vsel %vm1498_vm4, %v5647_v2, %v5649_v62  ;;  %v5776_v4 = vmax.f32 %v5536_v16, %v5649_v62  ;;  %v5824_v27 = vsel %vm1675_vm5, %v5822_v0, %v5823_v44  ;;  %v5984_v47 = vsel %vm1836_vm6, %v5982_v11, %v5983_v39  ;;  %4945 = vst.msk [vmem:[#allocation2 + $0xe8] sm:$0xf] %vm247_vm1, %v4851_v12  ;;  %v5413_v7 = vld [vmem:[#allocation2 + $0x74] sm:$0x1]  ;;  %v2931_v62 = vld [vmem:[#allocation2 + $0xd8] sm:$0x1] }
 0x1ed   : > { %v5775_v33 = vmax.f32 %v9493_v24, %v5650_v43  ;;  %v5986_v34 = vsel %vm1836_vm6, %v5983_v39, %v5985_v10  ;;  %v5918_v22 = vmax.f32 %v5774_v55, %v5822_v0  ;;  %v6159_v18 = vrot.slane %v5536_v16, 4  ;;  %v5285_v16 = vld [vmem:[#allocation2 + $0x60] sm:$0x1]  ;;  %v3121_v43 = vld [vmem:[#allocation2 + $0xf8] sm:$0xf] }
 0x1ee   : > { %v5920_v32 = vmax.f32 %v5776_v4, %v5823_v44  ;;  %v6161_v1 = vrot.slane %v5537_v37, 4  ;;  %v5092_v49 = vmax.bf16 %v5028_v61, %v4964_v35  ;;  %v5093_v15 = vmax.bf16 %v5029_v59, %v4965_v45  ;;  %v5410_v37 = vld [vmem:[#allocation2 + $0x68] sm:$0xf]  ;;  %v2995_v35 = vld [vmem:[#allocation2 + $0xec] sm:$0x1] }
 0x1ef   : > { %v5919_v41 = vmax.f32 %v5775_v33, %v5824_v27  ;;  %v6110_v51 = vmax.f32 %v5918_v22, %v5982_v11  ;;  %v6160_v5 = vsel %vm2013_vm7, %v6158_v36, %v6159_v18  ;;  %v5218_v57 = vmax.bf16 %v5154_v14, %v5090_v42  ;;  %v3122_v55 = vld [vmem:[#allocation2 + $0xfc] sm:$0xf] }
 0x1f0   : > { %v6112_v60 = vmax.f32 %v5920_v32, %v5986_v34  ;;  %v6162_v24 = vsel %vm2013_vm7, %v6159_v18, %v6161_v1  ;;  %v5219_v6 = vmax.bf16 %v5155_v20, %v5091_v23  ;;  %v5220_v29 = vmax.bf16 %v5156_v8, %v5092_v49  ;;  %v3120_v23 = vld [vmem:[#allocation2 + $0xf4] sm:$0xf] }
 0x1f1   : > { %v6111_v52 = vmax.f32 %v5919_v41, %v5984_v47  ;;  %v6286_v38 = vmax.f32 %v6110_v51, %v6158_v36  ;;  %v5221_v0 = vmax.bf16 %v5157_v58, %v5093_v15  ;;  %v5346_v11 = vmax.bf16 %v5282_v21, %v5218_v57  ;;  %v3123_v51 = vld [vmem:[#allocation2 + $0x100] sm:$0x1] }
 0x1f2   : > { %v6288_v2 = vmax.f32 %v6112_v60, %v6162_v24  ;;  %v5347_v42 = vmax.bf16 %v5283_v19, %v5219_v6  ;;  %v5348_v25 = vmax.bf16 %v5284_v17, %v5220_v29  ;;  %v3056_v61 = vmax.bf16 %v2992_v31, %v2928_v50  ;;  %v3248_v60 = vld [vmem:[#allocation2 + $0x108] sm:$0xf]  ;;  %v3249_v31 = vld [vmem:[#allocation2 + $0x10c] sm:$0xf] }
 0x1f3   : > { %v6287_v28 = vmax.f32 %v6111_v52, %v6160_v5  ;;  %v5349_v44 = vmax.bf16 %v5285_v16, %v5221_v0  ;;  %v5474_v63 = vmax.bf16 %v5410_v37, %v5346_v11  ;;  %v3057_v40 = vmax.bf16 %v9501_v54, %v9458_v3  ;;  %v3250_v52 = vld [vmem:[#allocation2 + $0x110] sm:$0xf]  ;;  %v3251_v37 = vld [vmem:[#allocation2 + $0x114] sm:$0x1] }
 0x1f4   : > { %v6335_v26 = vpack.c.bf16 %v6288_v2, %v6288_v2  ;;  %v5475_v10 = vmax.bf16 %v5411_v53, %v5347_v42  ;;  %v5476_v45 = vmax.bf16 %v5412_v13, %v5348_v25  ;;  %v3058_v12 = vmax.bf16 %v9511_v30, %v9467_v48  ;;  %v3376_v13 = vld [vmem:[#allocation2 + $0x11c] sm:$0xf]  ;;  %v9542_v42 = vld [vmem:[#allocation2 + $0xf4] sm:$0xf] }
 0x1f5   : > { %v6334_v39 = vpack.c.bf16 %v6287_v28, %v6286_v38  ;;  %v5477_v59 = vmax.bf16 %v5413_v7, %v5349_v44  ;;  %v5538_v33 = vunpack.c.l.bf16 %v5474_v63  ;;  %v3059_v27 = vmax.bf16 %v2995_v35, %v2931_v62  ;;  %v9540_v38 = vld [vmem:[#allocation2 + $0xe0] sm:$0xf] }
 0x1f6   : > { %v6431_v4 = vrot.slane %v6335_v26, 3  ;;  %v5539_v34 = vunpack.c.l.bf16 %v5475_v10  ;;  %v5540_v14 = vunpack.c.l.bf16 %v5476_v45  ;;  %v3184_v20 = vmax.bf16 %v3120_v23, %v3056_v61  ;;  %v3377_v28 = vld [vmem:[#allocation2 + $0x120] sm:$0xf]  ;;  %v3378_v61 = vld [vmem:[#allocation2 + $0x124] sm:$0xf] }
 0x1f7   : > { %v6430_v47 = vrot.slane %v6334_v39, 3  ;;  %v5541_v22 = vunpack.c.l.bf16 %v5477_v59  ;;  %v5651_v32 = vrot.slane %v5538_v33, 1  ;;  %v3185_v3 = vmax.bf16 %v3121_v43, %v3057_v40  ;;  %v3379_v26 = vld [vmem:[#allocation2 + $0x128] sm:$0x1]  ;;  %v2997_v39 = vld [vmem:[#allocation2 + $0xf8] sm:$0xf] }
 0x1f8   : > { %v3186_v54 = vmax.bf16 %v3122_v55, %v3058_v12  ;;  %v5652_v18 = vrot.slane %v5539_v34, 1  ;;  %v5654_v8 = vrot.slane %v5540_v14, 1  ;;  %v5825_v50 = vrot.slane %v5539_v34, 2  ;;  %v2998_v43 = vld [vmem:[#allocation2 + $0xfc] sm:$0xf] }
 0x1f9   : > { %v6432_v36 = vsel %vm1836_vm6, %v6430_v47, %v6431_v4  ;;  %v5826_v48 = vrot.slane %v5540_v14, 2  ;;  %v5987_v30 = vrot.slane %v5539_v34, 3  ;;  %v5988_v41 = vrot.slane %v5540_v14, 3 }
 0x1fa   : > { %7823 = vmatprep.mubr.msk.bf16.mxu1 %vm494_vm3, %v6432_v36  ;;  %v5990_v1 = vrot.slane %v5541_v22, 3  ;;  %v5653_v49 = vsel %vm1498_vm4, %v5651_v32, %v5652_v18  ;;  %v5655_v15 = vsel %vm1498_vm4, %v5652_v18, %v5654_v8  ;;  %v5779_v58 = vmax.f32 %v5540_v14, %v5654_v8 }
 0x1fb   : > { %v6163_v21 = vrot.slane %v5539_v34, 4  ;;  %v5777_v5 = vmax.f32 %v5538_v33, %v5653_v49  ;;  %v5778_v57 = vmax.f32 %v5539_v34, %v5655_v15  ;;  %v5827_v19 = vsel %vm1675_vm5, %v5825_v50, %v5826_v48 }
 0x1fc   : > { %v5989_v17 = vsel %vm1836_vm6, %v5987_v30, %v5988_v41  ;;  %v5923_v24 = vmax.f32 %v5779_v58, %v5826_v48  ;;  %v5991_v6 = vsel %vm1836_vm6, %v5988_v41, %v5990_v1  ;;  %v6164_v29 = vrot.slane %v5540_v14, 4 }
 0x1fd   : > { %v6166_v16 = vrot.slane %v5541_v22, 4  ;;  %v5921_v2 = vmax.f32 %v5777_v5, %v5825_v50  ;;  %v5922_v0 = vmax.f32 %v5778_v57, %v5827_v19  ;;  %v3187_v11 = vmax.bf16 %v3123_v51, %v3059_v27  ;;  %v2935_v51 = vld [vmem:[#allocation2 + $0xec] sm:$0x1]  ;;  %v2999_v57 = vld [vmem:[#allocation2 + $0x100] sm:$0x1] }
 0x1fe   : > { %v3312_v53 = vmax.bf16 %v3248_v60, %v3184_v20  ;;  %v6115_v25 = vmax.f32 %v5923_v24, %v5991_v6  ;;  %v6165_v7 = vsel %vm2013_vm7, %v6163_v21, %v6164_v29  ;;  %v3313_v35 = vmax.bf16 %v3249_v31, %v3185_v3  ;;  %v3124_v19 = vld [vmem:[#allocation2 + $0x108] sm:$0xf] }
 0x1ff   : > { %v6167_v62 = vsel %vm2013_vm7, %v6164_v29, %v6166_v16  ;;  %v6113_v44 = vmax.f32 %v5921_v2, %v5987_v30  ;;  %v6114_v63 = vmax.f32 %v5922_v0, %v5989_v17  ;;  %v3314_v40 = vmax.bf16 %v3250_v52, %v3186_v54  ;;  %v3125_v17 = vld [vmem:[#allocation2 + $0x10c] sm:$0xf]  ;;  %v3126_v29 = vld [vmem:[#allocation2 + $0x110] sm:$0xf]  ;;  %v3127_v0 = vld [vmem:[#allocation2 + $0x114] sm:$0x1] }
 0x200   : > { %v3315_v23 = vmax.bf16 %v3251_v37, %v3187_v11  ;;  %v6291_v10 = vmax.f32 %v6115_v25, %v6167_v62  ;;  %v3440_v45 = vmax.bf16 %v3376_v13, %v3312_v53  ;;  %v3441_v12 = vmax.bf16 %v3377_v28, %v3313_v35  ;;  %v3252_v11 = vld [vmem:[#allocation2 + $0x11c] sm:$0xf]  ;;  %v3253_v25 = vld [vmem:[#allocation2 + $0x120] sm:$0xf] }
 0x201   : > { %v3060_v55 = vmax.bf16 %v9542_v42, %v9540_v38  ;;  %v6289_v4 = vmax.f32 %v6113_v44, %v6163_v21  ;;  %v6290_v59 = vmax.f32 %v6114_v63, %v6165_v7  ;;  %v3442_v33 = vmax.bf16 %v3378_v61, %v3314_v40  ;;  %v9557_v7 = vld [vmem:[#allocation2 + $0x2c] sm:$0xf]  ;;  %v9559_v62 = vld [vmem:[#allocation2 + $0x40] sm:$0xf]  ;;  %v3254_v63 = vld [vmem:[#allocation2 + $0x124] sm:$0xf] }
 0x202   : > { %v3443_v27 = vmax.bf16 %v3379_v26, %v3315_v23  ;;  %v6337_v47 = vpack.c.bf16 %v6291_v10, %v6291_v10  ;;  %v3504_v34 = vunpack.c.l.bf16 %v3440_v45  ;;  %v3505_v14 = vunpack.c.l.bf16 %v3441_v12  ;;  %v3255_v40 = vld [vmem:[#allocation2 + $0x128] sm:$0x1]  ;;  %v3380_v23 = vld [vmem:[#allocation2 + $0x130] sm:$0xf] }
 0x203   : > { %v3061_v20 = vmax.bf16 %v2997_v39, %v9503_v46  ;;  %v6336_v22 = vpack.c.bf16 %v6290_v59, %v6289_v4  ;;  %v3506_v32 = vunpack.c.l.bf16 %v3442_v33  ;;  %v3062_v54 = vmax.bf16 %v2998_v43, %v9513_v56  ;;  %v3381_v43 = vld [vmem:[#allocation2 + $0x134] sm:$0xf]  ;;  %v9565_v4 = vld [vmem:[#allocation2 + $0x44] sm:$0xf] }
 0x204   : > { %v3507_v3 = vunpack.c.l.bf16 %v3443_v27  ;;  %v6434_v36 = vrot.slane %v6337_v47, 3  ;;  %v3626_v18 = vrot.slane %v3504_v34, 1  ;;  %v3627_v8 = vrot.slane %v3505_v14, 1  ;;  %v3382_v47 = vld [vmem:[#allocation2 + $0x138] sm:$0xf] }
 0x205   : > { %v3782_v50 = vrot.slane %v3505_v14, 2  ;;  %v6433_v48 = vrot.slane %v6336_v22, 3  ;;  %v3629_v30 = vrot.slane %v3506_v32, 1  ;;  %v3783_v41 = vrot.slane %v3506_v32, 2 }
 0x206   : > { %v3962_v1 = vrot.slane %v3505_v14, 3  ;;  %v3628_v49 = vsel %vm1498_vm4, %v3626_v18, %v3627_v8  ;;  %v3963_v15 = vrot.slane %v3506_v32, 3  ;;  %v3965_v58 = vrot.slane %v3507_v3, 3 }
 0x207   : > { %v4138_v21 = vrot.slane %v3505_v14, 4  ;;  %v6435_v46 = vsel %vm1836_vm6, %v6433_v48, %v6434_v36  ;;  %v3630_v60 = vsel %vm1498_vm4, %v3627_v8, %v3629_v30  ;;  %v3734_v5 = vmax.f32 %v3504_v34, %v3628_v49  ;;  %v3383_v34 = vld [vmem:[#allocation2 + $0x13c] sm:$0x1]  ;;  %v4968_v8 = vld [vmem:[#allocation2 + $0x34] sm:$0xf] }
 0x208   : > { %v3736_v56 = vmax.f32 %v3506_v32, %v3629_v30  ;;  %7824 = vmatmul.mubr.msk.bf16.vlgmr.msra.gmra.mxu1 %vm494_vm3, %v6435_v46  ;;  %v3735_v31 = vmax.f32 %v3505_v14, %v3630_v60  ;;  %v3784_v52 = vsel %vm1675_vm5, %v3782_v50, %v3783_v41  ;;  %v3964_v24 = vsel %vm1836_vm6, %v3962_v1, %v3963_v15  ;;  %v9571_v49 = vld [vmem:[#allocation2 + $0x38] sm:$0x1] }
 0x209   : > { %v3966_v6 = vsel %vm1836_vm6, %v3963_v15, %v3965_v58  ;;  %v3878_v16 = vmax.f32 %v3734_v5, %v3782_v50  ;;  %v4139_v38 = vrot.slane %v3506_v32, 4  ;;  %v4141_v2 = vrot.slane %v3507_v3, 4  ;;  %v5032_v15 = vld [vmem:[#allocation2 + $0x48] sm:$0xf]  ;;  %v9573_v58 = vld [vmem:[#allocation2 + $0x4c] sm:$0x1] }
 0x20a   : > { %v3880_v37 = vmax.f32 %v3736_v56, %v3783_v41  ;;  %v3879_v53 = vmax.f32 %v3735_v31, %v3784_v52  ;;  %v3063_v13 = vmax.bf16 %v2999_v57, %v2935_v51  ;;  %v3188_v28 = vmax.bf16 %v3124_v19, %v3060_v55  ;;  %v9563_v55 = vld [vmem:[#allocation2 + $0x30] sm:$0xf] }
 0x20b   : > { %v3189_v42 = vmax.bf16 %v3125_v17, %v3061_v20  ;;  %v4070_v35 = vmax.f32 %v3878_v16, %v3962_v1  ;;  %v4140_v26 = vsel %vm2013_vm7, %v4138_v21, %v4139_v38  ;;  %v4142_v44 = vsel %vm2013_vm7, %v4139_v38, %v4141_v2  ;;  %v9583_v38 = vld [vmem:[#allocation2 + $0xf8] sm:$0xf] }
 0x20c   : > { %v4072_v61 = vmax.f32 %v3880_v37, %v3966_v6  ;;  %v4071_v39 = vmax.f32 %v3879_v53, %v3964_v24  ;;  %v3190_v10 = vmax.bf16 %v3126_v29, %v3062_v54  ;;  %v3191_v45 = vmax.bf16 %v3127_v0, %v3063_v13 }
 0x20d   : > { %v3316_v12 = vmax.bf16 %v3252_v11, %v3188_v28  ;;  %v4246_v59 = vmax.f32 %v4070_v35, %v4138_v21  ;;  %v3317_v27 = vmax.bf16 %v3253_v25, %v3189_v42  ;;  %v5094_v14 = vmax.bf16 %v9559_v62, %v9557_v7  ;;  %v9592_v35 = vld [vmem:[#allocation2 + $0xfc] sm:$0xf] }
 0x20e   : > { %v4248_v33 = vmax.f32 %v4072_v61, %v4142_v44  ;;  %v4247_v20 = vmax.f32 %v4071_v39, %v4140_v26  ;;  %v3318_v22 = vmax.bf16 %v3254_v63, %v3190_v10  ;;  %v3319_v32 = vmax.bf16 %v3255_v40, %v3191_v45  ;;  %v5158_v40 = vld [vmem:[#allocation2 + $0x54] sm:$0xf]  ;;  %v5160_v39 = vld [vmem:[#allocation2 + $0x5c] sm:$0xf] }
 0x20f   : > { %v3444_v3 = vmax.bf16 %v3380_v23, %v3316_v12  ;;  %v7601_v36 = vpack.c.bf16 %v4246_v59, %v4246_v59  ;;  %v3445_v18 = vmax.bf16 %v3381_v43, %v3317_v27  ;;  %v5095_v50 = vmax.bf16 %v9565_v4, %v9563_v55  ;;  %v5159_v23 = vld [vmem:[#allocation2 + $0x58] sm:$0xf]  ;;  %v5161_v55 = vld [vmem:[#allocation2 + $0x60] sm:$0x1] }
 0x210   : > { %v4285_v54 = vpack.c.bf16 %v4248_v33, %v4248_v33  ;;  %v4284_v48 = vpack.c.bf16 %v4247_v20, %v4246_v59  ;;  %v7602_v30 = vpack.c.bf16 %v4247_v20, %v4247_v20  ;;  %v3446_v41 = vmax.bf16 %v3382_v47, %v3318_v22  ;;  %v5286_v47 = vld [vmem:[#allocation2 + $0x68] sm:$0xf] }
 0x211   : > { %v3447_v1 = vmax.bf16 %v3383_v34, %v3319_v32  ;;  %v7463_v51 = vrot.slane %v7601_v36, 11  ;;  %v3508_v60 = vunpack.c.l.bf16 %v3444_v3  ;;  %v9575_v57 = vunpack.c.l.bf16 %v3445_v18  ;;  %v5287_v34 = vld [vmem:[#allocation2 + $0x6c] sm:$0xf]  ;;  %v9604_v36 = vld [vmem:[#allocation2 + $0x40] sm:$0xf] }
 0x212   : > { %v4391_v21 = vrot.slane %v4285_v54, 3  ;;  %v4857_v46 = vrot.slane %v4285_v54, 7  ;;  %v4390_v5 = vrot.slane %v4284_v48, 3  ;;  %v4854_v56 = vrot.slane %v7602_v30, 7  ;;  %v5288_v54 = vld [vmem:[#allocation2 + $0x70] sm:$0xf] }
 0x213   : > { %v3510_v19 = vunpack.c.l.bf16 %v3446_v41  ;;  %v3511_v17 = vunpack.c.l.bf16 %v3447_v1  ;;  %v3631_v31 = vrot.slane %v3508_v60, 1  ;;  %v5096_v52 = vmax.bf16 %v5032_v15, %v4968_v8  ;;  %v9606_v18 = vld [vmem:[#allocation2 + $0x54] sm:$0xf]  ;;  %v5415_v15 = vld [vmem:[#allocation2 + $0x80] sm:$0xf] }
 0x214   : > { %v5097_v24 = vmax.bf16 %v9573_v58, %v9571_v49  ;;  %v4392_v6 = vsel %vm1836_vm6, %v4390_v5, %v4391_v21  ;;  %v4855_v29 = vsel %vm8470_vm9, %v7463_v51, %v4854_v56  ;;  %v4856_v16 = vrot.slane %v4854_v56, 4  ;;  %v5289_v1 = vld [vmem:[#allocation2 + $0x74] sm:$0x1]  ;;  %v5414_v49 = vld [vmem:[#allocation2 + $0x7c] sm:$0xf] }
 0x215   : > { %v3632_v37 = vrot.slane %v9575_v57, 1  ;;  %7809 = vmatprep.mubr.msk.bf16.mxu0 %vm494_vm3, %v4392_v6  ;;  %v3634_v2 = vrot.slane %v3510_v19, 1  ;;  %v3785_v0 = vrot.slane %v9575_v57, 2  ;;  %v3786_v11 = vrot.slane %v3510_v19, 2  ;;  %4946 = vst.msk [vmem:[#allocation2 + $0xf8] sm:$0xf] %vm247_vm1, %v4855_v29 }
 0x216   : > { %v3967_v53 = vrot.slane %v9575_v57, 3  ;;  %v4858_v13 = vsel %vm8470_vm9, %v4856_v16, %v4857_v46  ;;  %v3968_v42 = vrot.slane %v3510_v19, 3  ;;  %v3970_v25 = vrot.slane %v3511_v17, 3  ;;  %v9612_v51 = vld [vmem:[#allocation2 + $0x58] sm:$0xf] }
 0x217   : > { %v3633_v28 = vsel %vm1498_vm4, %v3631_v31, %v3632_v37  ;;  %v3635_v61 = vsel %vm1498_vm4, %v3632_v37, %v3634_v2  ;;  %v3739_v44 = vmax.f32 %v3510_v19, %v3634_v2  ;;  %v3787_v63 = vsel %vm1675_vm5, %v3785_v0, %v3786_v11  ;;  %4947 = vst.msk [vmem:[#allocation2 + $0xfc] sm:$0xf] %vm247_vm1, %v4858_v13  ;;  %v5417_v56 = vld [vmem:[#allocation2 + $0x88] sm:$0x1] }
 0x218   : > { %v3737_v26 = vmax.f32 %v3508_v60, %v3633_v28  ;;  %v3738_v10 = vmax.f32 %v9575_v57, %v3635_v61  ;;  %v3969_v45 = vsel %vm1836_vm6, %v3967_v53, %v3968_v42  ;;  %v3971_v12 = vsel %vm1836_vm6, %v3968_v42, %v3970_v25 }
 0x219   : > { %v4143_v43 = vrot.slane %v9575_v57, 4  ;;  %v3883_v59 = vmax.f32 %v3739_v44, %v3786_v11  ;;  %v4144_v33 = vrot.slane %v3510_v19, 4  ;;  %v4146_v27 = vrot.slane %v3511_v17, 4 }
 0x21a   : > { %v3881_v4 = vmax.f32 %v3737_v26, %v3785_v0  ;;  %v3882_v20 = vmax.f32 %v3738_v10, %v3787_v63  ;;  %v5222_v22 = vmax.bf16 %v5158_v40, %v5094_v14  ;;  %v5223_v32 = vmax.bf16 %v5159_v23, %v5095_v50  ;;  %v5416_v14 = vld [vmem:[#allocation2 + $0x84] sm:$0xf] }
 0x21b   : > { %v5224_v3 = vmax.bf16 %v5160_v39, %v5096_v52  ;;  %v4075_v48 = vmax.f32 %v3883_v59, %v3971_v12  ;;  %v4145_v30 = vsel %vm2013_vm7, %v4143_v43, %v4144_v33  ;;  %v4147_v41 = vsel %vm2013_vm7, %v4144_v33, %v4146_v27  ;;  %v9610_v50 = vld [vmem:[#allocation2 + $0x44] sm:$0xf]  ;;  %v9626_v59 = vld [vmem:[#allocation2 + $0x10c] sm:$0xf] }
 0x21c   : > { %v4073_v8 = vmax.f32 %v3881_v4, %v3967_v53  ;;  %v4074_v58 = vmax.f32 %v3882_v20, %v3969_v45  ;;  %v5225_v21 = vmax.bf16 %v5161_v55, %v5097_v24  ;;  %v5350_v7 = vmax.bf16 %v5286_v47, %v5222_v22  ;;  %v4972_v55 = vld [vmem:[#allocation2 + $0x48] sm:$0xf]  ;;  %v4973_v4 = vld [vmem:[#allocation2 + $0x4c] sm:$0x1]  ;;  %v5036_v22 = vld [vmem:[#allocation2 + $0x5c] sm:$0xf] }
 0x21d   : > { %v5351_v62 = vmax.bf16 %v5287_v34, %v5223_v32  ;;  %v4251_v60 = vmax.f32 %v4075_v48, %v4147_v41  ;;  %v5352_v5 = vmax.bf16 %v5288_v54, %v5224_v3  ;;  %v5098_v57 = vmax.bf16 %v9606_v18, %v9604_v36  ;;  %v9628_v33 = vld [vmem:[#allocation2 + $0x10c] sm:$0xf]  ;;  %v5037_v48 = vld [vmem:[#allocation2 + $0x60] sm:$0x1]  ;;  %v9638_v41 = vld [vmem:[#allocation2 + $0x110] sm:$0xf] }
 0x21e   : > { %v4249_v46 = vmax.f32 %v4073_v8, %v4143_v43  ;;  %v4250_v19 = vmax.f32 %v4074_v58, %v4145_v30  ;;  %v5353_v17 = vmax.bf16 %v5289_v1, %v5225_v21  ;;  %v5478_v31 = vmax.bf16 %v5414_v49, %v5350_v7  ;;  %v9636_v30 = vld [vmem:[#allocation2 + $0x110] sm:$0xf]  ;;  %v5162_v21 = vld [vmem:[#allocation2 + $0x68] sm:$0xf]  ;;  %v5163_v7 = vld [vmem:[#allocation2 + $0x6c] sm:$0xf] }
 0x21f   : > { %v5479_v52 = vmax.bf16 %v5415_v15, %v5351_v62  ;;  %v4287_v6 = vpack.c.bf16 %v4251_v60, %v4251_v60  ;;  %v5480_v29 = vmax.bf16 %v5416_v14, %v5352_v5  ;;  %v5099_v16 = vmax.bf16 %v9612_v51, %v9610_v50  ;;  %v5164_v5 = vld [vmem:[#allocation2 + $0x70] sm:$0xf]  ;;  %v5420_v36 = vld [vmem:[#allocation2 + $0x98] sm:$0xf] }
 0x220   : > { %v7604_v24 = vpack.c.bf16 %v4249_v46, %v4249_v46  ;;  %v4286_v37 = vpack.c.bf16 %v4250_v19, %v4249_v46  ;;  %v7605_v2 = vpack.c.bf16 %v4250_v19, %v4250_v19  ;;  %v5481_v0 = vmax.bf16 %v5417_v56, %v5353_v17  ;;  %v5290_v56 = vld [vmem:[#allocation2 + $0x7c] sm:$0xf] }
 0x221   : > { %v5542_v11 = vunpack.c.l.bf16 %v5478_v31  ;;  %v4394_v53 = vrot.slane %v4287_v6, 3  ;;  %v4864_v28 = vrot.slane %v4287_v6, 7  ;;  %v9618_v42 = vunpack.c.l.bf16 %v5479_v52  ;;  %v5165_v6 = vld [vmem:[#allocation2 + $0x74] sm:$0x1] }
 0x222   : > { %v7464_v13 = vrot.slane %v7604_v24, 11  ;;  %v4393_v25 = vrot.slane %v4286_v37, 3  ;;  %v4861_v61 = vrot.slane %v7605_v2, 7  ;;  %v5544_v26 = vunpack.c.l.bf16 %v5480_v29  ;;  %v5291_v24 = vld [vmem:[#allocation2 + $0x80] sm:$0xf] }
 0x223   : > { %v5545_v44 = vunpack.c.l.bf16 %v5481_v0  ;;  %v5656_v63 = vrot.slane %v5542_v11, 1  ;;  %v5657_v40 = vrot.slane %v9618_v42, 1  ;;  %v5828_v23 = vrot.slane %v9618_v42, 2 }
 0x224   : > { %v5992_v39 = vrot.slane %v9618_v42, 3  ;;  %v4395_v10 = vsel %vm1836_vm6, %v4393_v25, %v4394_v53  ;;  %v4862_v45 = vsel %vm8470_vm9, %v7464_v13, %v4861_v61  ;;  %v4863_v12 = vrot.slane %v4861_v61, 4  ;;  %v2936_v53 = vld [vmem:[#allocation2 + $0xf4] sm:$0xf]  ;;  %v3000_v13 = vld [vmem:[#allocation2 + $0x108] sm:$0xf] }
 0x225   : > { %v5659_v43 = vrot.slane %v5544_v26, 1  ;;  %7810 = vmatmul.mubr.msk.bf16.gmra.mxu0 %vm494_vm3, %v4395_v10  ;;  %v5658_v27 = vsel %vm1498_vm4, %v5656_v63, %v5657_v40  ;;  %v5829_v47 = vrot.slane %v5544_v26, 2  ;;  %v5993_v34 = vrot.slane %v5544_v26, 3  ;;  %4948 = vst.msk [vmem:[#allocation2 + $0x10c] sm:$0xf] %vm247_vm1, %v4862_v45 }
 0x226   : > { %v5995_v20 = vrot.slane %v5545_v44, 3  ;;  %v4865_v32 = vsel %vm8470_vm9, %v4863_v12, %v4864_v28  ;;  %v5780_v54 = vmax.f32 %v5542_v11, %v5658_v27  ;;  %v6168_v46 = vrot.slane %v9618_v42, 4  ;;  %v5292_v11 = vld [vmem:[#allocation2 + $0x84] sm:$0xf]  ;;  %v5419_v10 = vld [vmem:[#allocation2 + $0x94] sm:$0xf] }
 0x227   : > { %v5660_v3 = vsel %vm1498_vm4, %v5657_v40, %v5659_v43  ;;  %v5782_v8 = vmax.f32 %v5544_v26, %v5659_v43  ;;  %v5830_v49 = vsel %vm1675_vm5, %v5828_v23, %v5829_v47  ;;  %v5994_v15 = vsel %vm1836_vm6, %v5992_v39, %v5993_v34  ;;  %4949 = vst.msk [vmem:[#allocation2 + $0x110] sm:$0xf] %vm247_vm1, %v4865_v32  ;;  %v5421_v12 = vld [vmem:[#allocation2 + $0x9c] sm:$0x1]  ;;  %v2939_v43 = vld [vmem:[#allocation2 + $0x100] sm:$0x1] }
 0x228   : > { %v5781_v1 = vmax.f32 %v9618_v42, %v5660_v3  ;;  %v5996_v58 = vsel %vm1836_vm6, %v5993_v34, %v5995_v20  ;;  %v5924_v62 = vmax.f32 %v5780_v54, %v5828_v23  ;;  %v6169_v60 = vrot.slane %v5544_v26, 4  ;;  %v5293_v26 = vld [vmem:[#allocation2 + $0x88] sm:$0x1]  ;;  %v3129_v3 = vld [vmem:[#allocation2 + $0x120] sm:$0xf] }
 0x229   : > { %v5926_v14 = vmax.f32 %v5782_v8, %v5829_v47  ;;  %v6171_v17 = vrot.slane %v5545_v44, 4  ;;  %v5100_v31 = vmax.bf16 %v5036_v22, %v4972_v55  ;;  %v5101_v52 = vmax.bf16 %v5037_v48, %v4973_v4  ;;  %v5418_v44 = vld [vmem:[#allocation2 + $0x90] sm:$0xf]  ;;  %v3003_v55 = vld [vmem:[#allocation2 + $0x114] sm:$0x1] }
 0x22a   : > { %v5925_v19 = vmax.f32 %v5781_v1, %v5830_v49  ;;  %v6116_v29 = vmax.f32 %v5924_v62, %v5992_v39  ;;  %v6170_v2 = vsel %vm2013_vm7, %v6168_v46, %v6169_v60  ;;  %v5226_v0 = vmax.bf16 %v5162_v21, %v5098_v57  ;;  %v3130_v54 = vld [vmem:[#allocation2 + $0x124] sm:$0xf] }
 0x22b   : > { %v6118_v37 = vmax.f32 %v5926_v14, %v5996_v58  ;;  %v6172_v42 = vsel %vm2013_vm7, %v6169_v60, %v6171_v17  ;;  %v5227_v25 = vmax.bf16 %v5163_v7, %v5099_v16  ;;  %v5228_v61 = vmax.bf16 %v5164_v5, %v5100_v31  ;;  %v3128_v16 = vld [vmem:[#allocation2 + $0x11c] sm:$0xf] }
 0x22c   : > { %v6117_v28 = vmax.f32 %v5925_v19, %v5994_v15  ;;  %v6292_v63 = vmax.f32 %v6116_v29, %v6168_v46  ;;  %v5229_v23 = vmax.bf16 %v5165_v6, %v5101_v52  ;;  %v5354_v39 = vmax.bf16 %v5290_v56, %v5226_v0  ;;  %v3131_v29 = vld [vmem:[#allocation2 + $0x128] sm:$0x1] }
 0x22d   : > { %v6294_v40 = vmax.f32 %v6118_v37, %v6172_v42  ;;  %v5355_v57 = vmax.bf16 %v5291_v24, %v5227_v25  ;;  %v5356_v45 = vmax.bf16 %v5292_v11, %v5228_v61  ;;  %v3064_v4 = vmax.bf16 %v3000_v13, %v2936_v53  ;;  %v3256_v37 = vld [vmem:[#allocation2 + $0x130] sm:$0xf]  ;;  %v3257_v13 = vld [vmem:[#allocation2 + $0x134] sm:$0xf] }
 0x22e   : > { %v6293_v18 = vmax.f32 %v6117_v28, %v6170_v2  ;;  %v5357_v47 = vmax.bf16 %v5293_v26, %v5229_v23  ;;  %v5482_v50 = vmax.bf16 %v5418_v44, %v5354_v39  ;;  %v3065_v51 = vmax.bf16 %v9626_v59, %v9583_v38  ;;  %v3258_v28 = vld [vmem:[#allocation2 + $0x138] sm:$0xf]  ;;  %v3259_v44 = vld [vmem:[#allocation2 + $0x13c] sm:$0x1] }
 0x22f   : > { %v6339_v27 = vpack.c.bf16 %v6294_v40, %v6294_v40  ;;  %v5483_v20 = vmax.bf16 %v5419_v10, %v5355_v57  ;;  %v5484_v22 = vmax.bf16 %v5420_v36, %v5356_v45  ;;  %v3066_v32 = vmax.bf16 %v9636_v30, %v9592_v35  ;;  %v3384_v36 = vld [vmem:[#allocation2 + $0x144] sm:$0xf]  ;;  %v9667_v57 = vld [vmem:[#allocation2 + $0x11c] sm:$0xf] }
 0x230   : > { %v6338_v34 = vpack.c.bf16 %v6293_v18, %v6292_v63  ;;  %v5485_v48 = vmax.bf16 %v5421_v12, %v5357_v47  ;;  %v5546_v1 = vunpack.c.l.bf16 %v5482_v50  ;;  %v3067_v49 = vmax.bf16 %v3003_v55, %v2939_v43  ;;  %v9665_v63 = vld [vmem:[#allocation2 + $0x108] sm:$0xf] }
 0x231   : > { %v6437_v8 = vrot.slane %v6339_v27, 3  ;;  %v5547_v58 = vunpack.c.l.bf16 %v5483_v20  ;;  %v5548_v21 = vunpack.c.l.bf16 %v5484_v22  ;;  %v3192_v7 = vmax.bf16 %v3128_v16, %v3064_v4  ;;  %v3385_v18 = vld [vmem:[#allocation2 + $0x148] sm:$0xf]  ;;  %v3386_v4 = vld [vmem:[#allocation2 + $0x14c] sm:$0xf] }
 0x232   : > { %v6436_v15 = vrot.slane %v6338_v34, 3  ;;  %v5549_v62 = vunpack.c.l.bf16 %v5485_v48  ;;  %v5661_v14 = vrot.slane %v5546_v1, 1  ;;  %v3193_v38 = vmax.bf16 %v3129_v3, %v3065_v51  ;;  %v3387_v27 = vld [vmem:[#allocation2 + $0x150] sm:$0x1]  ;;  %v3005_v34 = vld [vmem:[#allocation2 + $0x120] sm:$0xf] }
 0x233   : > { %v3194_v59 = vmax.bf16 %v3130_v54, %v3066_v32  ;;  %v5662_v60 = vrot.slane %v5547_v58, 1  ;;  %v5664_v5 = vrot.slane %v5548_v21, 1  ;;  %v5831_v56 = vrot.slane %v5547_v58, 2  ;;  %v3006_v3 = vld [vmem:[#allocation2 + $0x124] sm:$0xf] }
 0x234   : > { %v6438_v46 = vsel %vm1836_vm6, %v6436_v15, %v6437_v8  ;;  %v5832_v35 = vrot.slane %v5548_v21, 2  ;;  %v5997_v30 = vrot.slane %v5547_v58, 3  ;;  %v5998_v19 = vrot.slane %v5548_v21, 3 }
 0x235   : > { %7827 = vmatprep.mubr.msk.bf16.mxu1 %vm494_vm3, %v6438_v46  ;;  %v6000_v17 = vrot.slane %v5549_v62, 3  ;;  %v5663_v31 = vsel %vm1498_vm4, %v5661_v14, %v5662_v60  ;;  %v5665_v52 = vsel %vm1498_vm4, %v5662_v60, %v5664_v5  ;;  %v5785_v6 = vmax.f32 %v5548_v21, %v5664_v5 }
 0x236   : > { %v6173_v24 = vrot.slane %v5547_v58, 4  ;;  %v5783_v2 = vmax.f32 %v5546_v1, %v5663_v31  ;;  %v5784_v0 = vmax.f32 %v5547_v58, %v5665_v52  ;;  %v5833_v11 = vsel %vm1675_vm5, %v5831_v56, %v5832_v35 }
 0x237   : > { %v5999_v53 = vsel %vm1836_vm6, %v5997_v30, %v5998_v19  ;;  %v5929_v42 = vmax.f32 %v5785_v6, %v5832_v35  ;;  %v6001_v25 = vsel %vm1836_vm6, %v5998_v19, %v6000_v17  ;;  %v6174_v61 = vrot.slane %v5548_v21, 4 }
 0x238   : > { %v6176_v26 = vrot.slane %v5549_v62, 4  ;;  %v5927_v40 = vmax.f32 %v5783_v2, %v5831_v56  ;;  %v5928_v23 = vmax.f32 %v5784_v0, %v5833_v11  ;;  %v3195_v39 = vmax.bf16 %v3131_v29, %v3067_v49  ;;  %v2943_v29 = vld [vmem:[#allocation2 + $0x114] sm:$0x1]  ;;  %v3007_v0 = vld [vmem:[#allocation2 + $0x128] sm:$0x1] }
 0x239   : > { %v3320_v10 = vmax.bf16 %v3256_v37, %v3192_v7  ;;  %v6121_v45 = vmax.f32 %v5929_v42, %v6001_v25  ;;  %v6175_v12 = vsel %vm2013_vm7, %v6173_v24, %v6174_v61  ;;  %v3321_v55 = vmax.bf16 %v3257_v13, %v3193_v38  ;;  %v3132_v11 = vld [vmem:[#allocation2 + $0x130] sm:$0xf] }
 0x23a   : > { %v6177_v43 = vsel %vm2013_vm7, %v6174_v61, %v6176_v26  ;;  %v6119_v47 = vmax.f32 %v5927_v40, %v5997_v30  ;;  %v6120_v50 = vmax.f32 %v5928_v23, %v5999_v53  ;;  %v3322_v51 = vmax.bf16 %v3258_v28, %v3194_v59  ;;  %v3133_v53 = vld [vmem:[#allocation2 + $0x134] sm:$0xf]  ;;  %v3134_v61 = vld [vmem:[#allocation2 + $0x138] sm:$0xf]  ;;  %v3135_v23 = vld [vmem:[#allocation2 + $0x13c] sm:$0x1] }
 0x23b   : > { %v3323_v16 = vmax.bf16 %v3259_v44, %v3195_v39  ;;  %v6297_v20 = vmax.f32 %v6121_v45, %v6177_v43  ;;  %v3448_v22 = vmax.bf16 %v3384_v36, %v3320_v10  ;;  %v3449_v32 = vmax.bf16 %v3385_v18, %v3321_v55  ;;  %v3260_v39 = vld [vmem:[#allocation2 + $0x144] sm:$0xf]  ;;  %v3261_v45 = vld [vmem:[#allocation2 + $0x148] sm:$0xf] }
 0x23c   : > { %v3068_v54 = vmax.bf16 %v9667_v57, %v9665_v63  ;;  %v6295_v8 = vmax.f32 %v6119_v47, %v6173_v24  ;;  %v6296_v48 = vmax.f32 %v6120_v50, %v6175_v12  ;;  %v3450_v1 = vmax.bf16 %v3386_v4, %v3322_v51  ;;  %v9682_v12 = vld [vmem:[#allocation2 + $0x54] sm:$0xf]  ;;  %v9684_v43 = vld [vmem:[#allocation2 + $0x68] sm:$0xf]  ;;  %v3262_v50 = vld [vmem:[#allocation2 + $0x14c] sm:$0xf] }
 0x23d   : > { %v3451_v49 = vmax.bf16 %v3387_v27, %v3323_v16  ;;  %v6341_v15 = vpack.c.bf16 %v6297_v20, %v6297_v20  ;;  %v3512_v58 = vunpack.c.l.bf16 %v3448_v22  ;;  %v3513_v21 = vunpack.c.l.bf16 %v3449_v32  ;;  %v3263_v51 = vld [vmem:[#allocation2 + $0x150] sm:$0x1]  ;;  %v3388_v16 = vld [vmem:[#allocation2 + $0x158] sm:$0xf] }
 0x23e   : > { %v3069_v7 = vmax.bf16 %v3005_v34, %v9628_v33  ;;  %v6340_v62 = vpack.c.bf16 %v6296_v48, %v6295_v8  ;;  %v3514_v14 = vunpack.c.l.bf16 %v3450_v1  ;;  %v3070_v59 = vmax.bf16 %v3006_v3, %v9638_v41  ;;  %v3389_v3 = vld [vmem:[#allocation2 + $0x15c] sm:$0xf]  ;;  %v9690_v8 = vld [vmem:[#allocation2 + $0x6c] sm:$0xf] }
 0x23f   : > { %v3515_v38 = vunpack.c.l.bf16 %v3451_v49  ;;  %v6440_v46 = vrot.slane %v6341_v15, 3  ;;  %v3636_v60 = vrot.slane %v3512_v58, 1  ;;  %v3637_v5 = vrot.slane %v3513_v21, 1  ;;  %v3390_v15 = vld [vmem:[#allocation2 + $0x160] sm:$0xf] }
 0x240   : > { %v3788_v56 = vrot.slane %v3513_v21, 2  ;;  %v6439_v35 = vrot.slane %v6340_v62, 3  ;;  %v3639_v30 = vrot.slane %v3514_v14, 1  ;;  %v3789_v19 = vrot.slane %v3514_v14, 2 }
 0x241   : > { %v3972_v17 = vrot.slane %v3513_v21, 3  ;;  %v3638_v31 = vsel %vm1498_vm4, %v3636_v60, %v3637_v5  ;;  %v3973_v52 = vrot.slane %v3514_v14, 3  ;;  %v3975_v6 = vrot.slane %v3515_v38, 3 }
 0x242   : > { %v4148_v24 = vrot.slane %v3513_v21, 4  ;;  %v6441_v33 = vsel %vm1836_vm6, %v6439_v35, %v6440_v46  ;;  %v3640_v37 = vsel %vm1498_vm4, %v3637_v5, %v3639_v30  ;;  %v3740_v2 = vmax.f32 %v3512_v58, %v3638_v31  ;;  %v3391_v58 = vld [vmem:[#allocation2 + $0x164] sm:$0x1]  ;;  %v4976_v5 = vld [vmem:[#allocation2 + $0x5c] sm:$0xf] }
 0x243   : > { %v3742_v41 = vmax.f32 %v3514_v14, %v3639_v30  ;;  %7828 = vmatmul.mubr.msk.bf16.gmra.mxu1 %vm494_vm3, %v6441_v33  ;;  %v3741_v13 = vmax.f32 %v3513_v21, %v3640_v37  ;;  %v3790_v28 = vsel %vm1675_vm5, %v3788_v56, %v3789_v19  ;;  %v3974_v42 = vsel %vm1836_vm6, %v3972_v17, %v3973_v52  ;;  %v9696_v31 = vld [vmem:[#allocation2 + $0x60] sm:$0x1] }
 0x244   : > { %v3976_v25 = vsel %vm1836_vm6, %v3973_v52, %v3975_v6  ;;  %v3884_v26 = vmax.f32 %v3740_v2, %v3788_v56  ;;  %v4149_v63 = vrot.slane %v3514_v14, 4  ;;  %v4151_v40 = vrot.slane %v3515_v38, 4  ;;  %v5040_v52 = vld [vmem:[#allocation2 + $0x70] sm:$0xf]  ;;  %v9698_v6 = vld [vmem:[#allocation2 + $0x74] sm:$0x1] }
 0x245   : > { %v3886_v44 = vmax.f32 %v3742_v41, %v3789_v19  ;;  %v3885_v10 = vmax.f32 %v3741_v13, %v3790_v28  ;;  %v3071_v36 = vmax.bf16 %v3007_v0, %v2943_v29  ;;  %v3196_v18 = vmax.bf16 %v3132_v11, %v3068_v54  ;;  %v9688_v54 = vld [vmem:[#allocation2 + $0x58] sm:$0xf] }
 0x246   : > { %v3197_v57 = vmax.bf16 %v3133_v53, %v3069_v7  ;;  %v4076_v55 = vmax.f32 %v3884_v26, %v3972_v17  ;;  %v4150_v27 = vsel %vm2013_vm7, %v4148_v24, %v4149_v63  ;;  %v4152_v47 = vsel %vm2013_vm7, %v4149_v63, %v4151_v40  ;;  %v9708_v63 = vld [vmem:[#allocation2 + $0x120] sm:$0xf] }
 0x247   : > { %v4078_v4 = vmax.f32 %v3886_v44, %v3976_v25  ;;  %v4077_v34 = vmax.f32 %v3885_v10, %v3974_v42  ;;  %v3198_v20 = vmax.bf16 %v3134_v61, %v3070_v59  ;;  %v3199_v22 = vmax.bf16 %v3135_v23, %v3071_v36 }
 0x248   : > { %v3324_v32 = vmax.bf16 %v3260_v39, %v3196_v18  ;;  %v4252_v48 = vmax.f32 %v4076_v55, %v4148_v24  ;;  %v3325_v49 = vmax.bf16 %v3261_v45, %v3197_v57  ;;  %v5102_v21 = vmax.bf16 %v9684_v43, %v9682_v12  ;;  %v9717_v55 = vld [vmem:[#allocation2 + $0x124] sm:$0xf] }
 0x249   : > { %v4254_v1 = vmax.f32 %v4078_v4, %v4152_v47  ;;  %v4253_v7 = vmax.f32 %v4077_v34, %v4150_v27  ;;  %v3326_v62 = vmax.bf16 %v3262_v50, %v3198_v20  ;;  %v3327_v14 = vmax.bf16 %v3263_v51, %v3199_v22  ;;  %v5166_v51 = vld [vmem:[#allocation2 + $0x7c] sm:$0xf]  ;;  %v5168_v34 = vld [vmem:[#allocation2 + $0x84] sm:$0xf] }
 0x24a   : > { %v3452_v38 = vmax.bf16 %v3388_v16, %v3324_v32  ;;  %v7607_v46 = vpack.c.bf16 %v4252_v48, %v4252_v48  ;;  %v3453_v60 = vmax.bf16 %v3389_v3, %v3325_v49  ;;  %v5103_v56 = vmax.bf16 %v9690_v8, %v9688_v54  ;;  %v5167_v16 = vld [vmem:[#allocation2 + $0x80] sm:$0xf]  ;;  %v5169_v54 = vld [vmem:[#allocation2 + $0x88] sm:$0x1] }
 0x24b   : > { %v4289_v59 = vpack.c.bf16 %v4254_v1, %v4254_v1  ;;  %v4288_v35 = vpack.c.bf16 %v4253_v7, %v4252_v48  ;;  %v7608_v30 = vpack.c.bf16 %v4253_v7, %v4253_v7  ;;  %v3454_v19 = vmax.bf16 %v3390_v15, %v3326_v62  ;;  %v5294_v15 = vld [vmem:[#allocation2 + $0x90] sm:$0xf] }
 0x24c   : > { %v3455_v17 = vmax.bf16 %v3391_v58, %v3327_v14  ;;  %v7465_v29 = vrot.slane %v7607_v46, 11  ;;  %v3516_v37 = vunpack.c.l.bf16 %v3452_v38  ;;  %v9700_v0 = vunpack.c.l.bf16 %v3453_v60  ;;  %v5295_v58 = vld [vmem:[#allocation2 + $0x94] sm:$0xf]  ;;  %v9729_v46 = vld [vmem:[#allocation2 + $0x68] sm:$0xf] }
 0x24d   : > { %v4397_v24 = vrot.slane %v4289_v59, 3  ;;  %v4871_v33 = vrot.slane %v4289_v59, 7  ;;  %v4396_v2 = vrot.slane %v4288_v35, 3  ;;  %v4868_v41 = vrot.slane %v7608_v30, 7  ;;  %v5296_v59 = vld [vmem:[#allocation2 + $0x98] sm:$0xf] }
 0x24e   : > { %v3518_v11 = vunpack.c.l.bf16 %v3454_v19  ;;  %v3519_v53 = vunpack.c.l.bf16 %v3455_v17  ;;  %v3641_v13 = vrot.slane %v3516_v37, 1  ;;  %v5104_v28 = vmax.bf16 %v5040_v52, %v4976_v5  ;;  %v9731_v60 = vld [vmem:[#allocation2 + $0x7c] sm:$0xf]  ;;  %v5423_v52 = vld [vmem:[#allocation2 + $0xa8] sm:$0xf] }
 0x24f   : > { %v5105_v42 = vmax.bf16 %v9698_v6, %v9696_v31  ;;  %v4398_v25 = vsel %vm1836_vm6, %v4396_v2, %v4397_v24  ;;  %v4869_v61 = vsel %vm8470_vm9, %v7465_v29, %v4868_v41  ;;  %v4870_v26 = vrot.slane %v4868_v41, 4  ;;  %v5297_v17 = vld [vmem:[#allocation2 + $0x9c] sm:$0x1]  ;;  %v5422_v31 = vld [vmem:[#allocation2 + $0xa4] sm:$0xf] }
 0x250   : > { %v3642_v44 = vrot.slane %v9700_v0, 1  ;;  %7813 = vmatprep.mubr.msk.bf16.mxu0 %vm494_vm3, %v4398_v25  ;;  %v3644_v40 = vrot.slane %v3518_v11, 1  ;;  %v3791_v23 = vrot.slane %v9700_v0, 2  ;;  %v3792_v39 = vrot.slane %v3518_v11, 2  ;;  %4950 = vst.msk [vmem:[#allocation2 + $0x120] sm:$0xf] %vm247_vm1, %v4869_v61 }
 0x251   : > { %v3977_v10 = vrot.slane %v9700_v0, 3  ;;  %v4872_v36 = vsel %vm8470_vm9, %v4870_v26, %v4871_v33  ;;  %v3978_v57 = vrot.slane %v3518_v11, 3  ;;  %v3980_v45 = vrot.slane %v3519_v53, 3  ;;  %v9737_v29 = vld [vmem:[#allocation2 + $0x80] sm:$0xf] }
 0x252   : > { %v3643_v18 = vsel %vm1498_vm4, %v3641_v13, %v3642_v44  ;;  %v3645_v4 = vsel %vm1498_vm4, %v3642_v44, %v3644_v40  ;;  %v3745_v47 = vmax.f32 %v3518_v11, %v3644_v40  ;;  %v3793_v50 = vsel %vm1675_vm5, %v3791_v23, %v3792_v39  ;;  %4951 = vst.msk [vmem:[#allocation2 + $0x124] sm:$0xf] %vm247_vm1, %v4872_v36  ;;  %v5425_v41 = vld [vmem:[#allocation2 + $0xb0] sm:$0x1] }
 0x253   : > { %v3743_v27 = vmax.f32 %v3516_v37, %v3643_v18  ;;  %v3744_v20 = vmax.f32 %v9700_v0, %v3645_v4  ;;  %v3979_v22 = vsel %vm1836_vm6, %v3977_v10, %v3978_v57  ;;  %v3981_v32 = vsel %vm1836_vm6, %v3978_v57, %v3980_v45 }
 0x254   : > { %v4153_v3 = vrot.slane %v9700_v0, 4  ;;  %v3889_v48 = vmax.f32 %v3745_v47, %v3792_v39  ;;  %v4154_v1 = vrot.slane %v3518_v11, 4  ;;  %v4156_v49 = vrot.slane %v3519_v53, 4 }
 0x255   : > { %v3887_v8 = vmax.f32 %v3743_v27, %v3791_v23  ;;  %v3888_v7 = vmax.f32 %v3744_v20, %v3793_v50  ;;  %v5230_v62 = vmax.bf16 %v5166_v51, %v5102_v21  ;;  %v5231_v14 = vmax.bf16 %v5167_v16, %v5103_v56  ;;  %v5424_v21 = vld [vmem:[#allocation2 + $0xac] sm:$0xf] }
 0x256   : > { %v5232_v38 = vmax.bf16 %v5168_v34, %v5104_v28  ;;  %v4081_v35 = vmax.f32 %v3889_v48, %v3981_v32  ;;  %v4155_v30 = vsel %vm2013_vm7, %v4153_v3, %v4154_v1  ;;  %v4157_v19 = vsel %vm2013_vm7, %v4154_v1, %v4156_v49  ;;  %v9735_v56 = vld [vmem:[#allocation2 + $0x6c] sm:$0xf]  ;;  %v9751_v48 = vld [vmem:[#allocation2 + $0x134] sm:$0xf] }
 0x257   : > { %v4079_v5 = vmax.f32 %v3887_v8, %v3977_v10  ;;  %v4080_v6 = vmax.f32 %v3888_v7, %v3979_v22  ;;  %v5233_v24 = vmax.bf16 %v5169_v54, %v5105_v42  ;;  %v5358_v12 = vmax.bf16 %v5294_v15, %v5230_v62  ;;  %v4980_v54 = vld [vmem:[#allocation2 + $0x70] sm:$0xf]  ;;  %v4981_v8 = vld [vmem:[#allocation2 + $0x74] sm:$0x1]  ;;  %v5044_v62 = vld [vmem:[#allocation2 + $0x84] sm:$0xf] }
 0x258   : > { %v5359_v43 = vmax.bf16 %v5295_v58, %v5231_v14  ;;  %v4257_v37 = vmax.f32 %v4081_v35, %v4157_v19  ;;  %v5360_v2 = vmax.bf16 %v5296_v59, %v5232_v38  ;;  %v5106_v0 = vmax.bf16 %v9731_v60, %v9729_v46  ;;  %v9753_v1 = vld [vmem:[#allocation2 + $0x134] sm:$0xf]  ;;  %v5045_v35 = vld [vmem:[#allocation2 + $0x88] sm:$0x1]  ;;  %v9763_v19 = vld [vmem:[#allocation2 + $0x138] sm:$0xf] }
 0x259   : > { %v4255_v33 = vmax.f32 %v4079_v5, %v4153_v3  ;;  %v4256_v11 = vmax.f32 %v4080_v6, %v4155_v30  ;;  %v5361_v53 = vmax.bf16 %v5297_v17, %v5233_v24  ;;  %v5486_v13 = vmax.bf16 %v5422_v31, %v5358_v12  ;;  %v9761_v30 = vld [vmem:[#allocation2 + $0x138] sm:$0xf]  ;;  %v5170_v24 = vld [vmem:[#allocation2 + $0x90] sm:$0xf]  ;;  %v5171_v12 = vld [vmem:[#allocation2 + $0x94] sm:$0xf] }
 0x25a   : > { %v5487_v28 = vmax.bf16 %v5423_v52, %v5359_v43  ;;  %v4291_v25 = vpack.c.bf16 %v4257_v37, %v4257_v37  ;;  %v5488_v61 = vmax.bf16 %v5424_v21, %v5360_v2  ;;  %v5107_v26 = vmax.bf16 %v9737_v29, %v9735_v56  ;;  %v5172_v2 = vld [vmem:[#allocation2 + $0x98] sm:$0xf]  ;;  %v5428_v46 = vld [vmem:[#allocation2 + $0xc0] sm:$0xf] }
 0x25b   : > { %v7610_v42 = vpack.c.bf16 %v4255_v33, %v4255_v33  ;;  %v4290_v44 = vpack.c.bf16 %v4256_v11, %v4255_v33  ;;  %v7611_v40 = vpack.c.bf16 %v4256_v11, %v4256_v11  ;;  %v5489_v23 = vmax.bf16 %v5425_v41, %v5361_v53  ;;  %v2944_v41 = vld [vmem:[#allocation2 + $0x11c] sm:$0xf] }
 0x25c   : > { %v5550_v39 = vunpack.c.l.bf16 %v5486_v13  ;;  %v4400_v10 = vrot.slane %v4291_v25, 3  ;;  %v4878_v18 = vrot.slane %v4291_v25, 7  ;;  %v9743_v57 = vunpack.c.l.bf16 %v5487_v28  ;;  %v5173_v25 = vld [vmem:[#allocation2 + $0x9c] sm:$0x1] }
 0x25d   : > { %v7466_v36 = vrot.slane %v7610_v42, 11  ;;  %v4399_v45 = vrot.slane %v4290_v44, 3  ;;  %v4875_v4 = vrot.slane %v7611_v40, 7  ;;  %v5552_v27 = vunpack.c.l.bf16 %v5488_v61  ;;  %v5298_v42 = vld [vmem:[#allocation2 + $0xa4] sm:$0xf] }
 0x25e   : > { %v5553_v47 = vunpack.c.l.bf16 %v5489_v23  ;;  %v5666_v50 = vrot.slane %v5550_v39, 1  ;;  %v5667_v51 = vrot.slane %v9743_v57, 1  ;;  %v5834_v16 = vrot.slane %v9743_v57, 2 }
 0x25f   : > { %v6002_v34 = vrot.slane %v9743_v57, 3  ;;  %v4401_v20 = vsel %vm1836_vm6, %v4399_v45, %v4400_v10  ;;  %v4876_v22 = vsel %vm8470_vm9, %v7466_v36, %v4875_v4  ;;  %v4877_v32 = vrot.slane %v4875_v4, 4  ;;  %v5300_v10 = vld [vmem:[#allocation2 + $0xac] sm:$0xf]  ;;  %v3008_v36 = vld [vmem:[#allocation2 + $0x130] sm:$0xf] }
 0x260   : > { %v5669_v3 = vrot.slane %v5552_v27, 1  ;;  %7814 = vmatmul.mubr.msk.bf16.gmra.mxu0 %vm494_vm3, %v4401_v20  ;;  %v5668_v49 = vsel %vm1498_vm4, %v5666_v50, %v5667_v51  ;;  %v5835_v15 = vrot.slane %v5552_v27, 2  ;;  %v6003_v58 = vrot.slane %v5552_v27, 3  ;;  %4952 = vst.msk [vmem:[#allocation2 + $0x134] sm:$0xf] %vm247_vm1, %v4876_v22 }
 0x261   : > { %v6005_v7 = vrot.slane %v5553_v47, 3  ;;  %v4879_v14 = vsel %vm8470_vm9, %v4877_v32, %v4878_v18  ;;  %v5786_v59 = vmax.f32 %v5550_v39, %v5668_v49  ;;  %v6178_v33 = vrot.slane %v9743_v57, 4  ;;  %v5299_v39 = vld [vmem:[#allocation2 + $0xa8] sm:$0xf]  ;;  %v5427_v20 = vld [vmem:[#allocation2 + $0xbc] sm:$0xf] }
 0x262   : > { %v5670_v38 = vsel %vm1498_vm4, %v5667_v51, %v5669_v3  ;;  %v5788_v5 = vmax.f32 %v5552_v27, %v5669_v3  ;;  %v5836_v31 = vsel %vm1675_vm5, %v5834_v16, %v5835_v15  ;;  %v6004_v52 = vsel %vm1836_vm6, %v6002_v34, %v6003_v58  ;;  %4953 = vst.msk [vmem:[#allocation2 + $0x138] sm:$0xf] %vm247_vm1, %v4879_v14  ;;  %v5429_v32 = vld [vmem:[#allocation2 + $0xc4] sm:$0x1]  ;;  %v2947_v3 = vld [vmem:[#allocation2 + $0x128] sm:$0x1] }
 0x263   : > { %v5787_v17 = vmax.f32 %v9743_v57, %v5670_v38  ;;  %v6006_v6 = vsel %vm1836_vm6, %v6003_v58, %v6005_v7  ;;  %v5930_v43 = vmax.f32 %v5786_v59, %v5834_v16  ;;  %v6179_v37 = vrot.slane %v5552_v27, 4  ;;  %v5301_v27 = vld [vmem:[#allocation2 + $0xb0] sm:$0x1]  ;;  %v3137_v38 = vld [vmem:[#allocation2 + $0x148] sm:$0xf] }
 0x264   : > { %v5932_v21 = vmax.f32 %v5788_v5, %v5835_v15  ;;  %v6181_v53 = vrot.slane %v5553_v47, 4  ;;  %v5108_v13 = vmax.bf16 %v5044_v62, %v4980_v54  ;;  %v5109_v28 = vmax.bf16 %v5045_v35, %v4981_v8  ;;  %v5426_v47 = vld [vmem:[#allocation2 + $0xb8] sm:$0xf]  ;;  %v3011_v54 = vld [vmem:[#allocation2 + $0x13c] sm:$0x1] }
 0x265   : > { %v5931_v11 = vmax.f32 %v5787_v17, %v5836_v31  ;;  %v6122_v61 = vmax.f32 %v5930_v43, %v6002_v34  ;;  %v6180_v40 = vsel %vm2013_vm7, %v6178_v33, %v6179_v37  ;;  %v5234_v23 = vmax.bf16 %v5170_v24, %v5106_v0  ;;  %v3138_v59 = vld [vmem:[#allocation2 + $0x14c] sm:$0xf] }
 0x266   : > { %v6124_v44 = vmax.f32 %v5932_v21, %v6006_v6  ;;  %v6182_v57 = vsel %vm2013_vm7, %v6179_v37, %v6181_v53  ;;  %v5235_v45 = vmax.bf16 %v5171_v12, %v5107_v26  ;;  %v5236_v4 = vmax.bf16 %v5172_v2, %v5108_v13  ;;  %v3136_v26 = vld [vmem:[#allocation2 + $0x144] sm:$0xf] }
 0x267   : > { %v6123_v18 = vmax.f32 %v5931_v11, %v6004_v52  ;;  %v6298_v50 = vmax.f32 %v6122_v61, %v6178_v33  ;;  %v5237_v16 = vmax.bf16 %v5173_v25, %v5109_v28  ;;  %v5362_v34 = vmax.bf16 %v5298_v42, %v5234_v23  ;;  %v3139_v61 = vld [vmem:[#allocation2 + $0x150] sm:$0x1] }
 0x268   : > { %v6300_v51 = vmax.f32 %v6124_v44, %v6182_v57  ;;  %v5363_v0 = vmax.bf16 %v5299_v39, %v5235_v45  ;;  %v5364_v22 = vmax.bf16 %v5300_v10, %v5236_v4  ;;  %v3072_v8 = vmax.bf16 %v3008_v36, %v2944_v41  ;;  %v3264_v44 = vld [vmem:[#allocation2 + $0x158] sm:$0xf]  ;;  %v3265_v36 = vld [vmem:[#allocation2 + $0x15c] sm:$0xf] }
 0x269   : > { %v6299_v60 = vmax.f32 %v6123_v18, %v6180_v40  ;;  %v5365_v15 = vmax.bf16 %v5301_v27, %v5237_v16  ;;  %v5490_v56 = vmax.bf16 %v5426_v47, %v5362_v34  ;;  %v3073_v29 = vmax.bf16 %v9751_v48, %v9708_v63  ;;  %v3266_v18 = vld [vmem:[#allocation2 + $0x160] sm:$0xf]  ;;  %v3267_v47 = vld [vmem:[#allocation2 + $0x164] sm:$0x1] }
 0x26a   : > { %v6343_v49 = vpack.c.bf16 %v6300_v51, %v6300_v51  ;;  %v5491_v7 = vmax.bf16 %v5427_v20, %v5363_v0  ;;  %v5492_v62 = vmax.bf16 %v5428_v46, %v5364_v22  ;;  %v3074_v14 = vmax.bf16 %v9761_v30, %v9717_v55  ;;  %v3392_v46 = vld [vmem:[#allocation2 + $0x16c] sm:$0xf]  ;;  %v9792_v0 = vld [vmem:[#allocation2 + $0x144] sm:$0xf] }
 0x26b   : > { %v6342_v58 = vpack.c.bf16 %v6299_v60, %v6298_v50  ;;  %v5493_v35 = vmax.bf16 %v5429_v32, %v5365_v15  ;;  %v5554_v17 = vunpack.c.l.bf16 %v5490_v56  ;;  %v3075_v31 = vmax.bf16 %v3011_v54, %v2947_v3  ;;  %v9790_v50 = vld [vmem:[#allocation2 + $0x130] sm:$0xf] }
 0x26c   : > { %v6443_v5 = vrot.slane %v6343_v49, 3  ;;  %v5555_v6 = vunpack.c.l.bf16 %v5491_v7  ;;  %v5556_v24 = vunpack.c.l.bf16 %v5492_v62  ;;  %v3200_v12 = vmax.bf16 %v3136_v26, %v3072_v8  ;;  %v3393_v60 = vld [vmem:[#allocation2 + $0x170] sm:$0xf]  ;;  %v3394_v8 = vld [vmem:[#allocation2 + $0x174] sm:$0xf] }
 0x26d   : > { %v6442_v52 = vrot.slane %v6342_v58, 3  ;;  %v5557_v43 = vunpack.c.l.bf16 %v5493_v35  ;;  %v5671_v21 = vrot.slane %v5554_v17, 1  ;;  %v3201_v63 = vmax.bf16 %v3137_v38, %v3073_v29  ;;  %v3395_v49 = vld [vmem:[#allocation2 + $0x178] sm:$0x1]  ;;  %v3013_v58 = vld [vmem:[#allocation2 + $0x148] sm:$0xf] }
 0x26e   : > { %v3202_v48 = vmax.bf16 %v3138_v59, %v3074_v14  ;;  %v5672_v37 = vrot.slane %v5555_v6, 1  ;;  %v5674_v2 = vrot.slane %v5556_v24, 1  ;;  %v5837_v41 = vrot.slane %v5555_v6, 2  ;;  %v3014_v38 = vld [vmem:[#allocation2 + $0x14c] sm:$0xf] }
 0x26f   : > { %v6444_v33 = vsel %vm1836_vm6, %v6442_v52, %v6443_v5  ;;  %v5838_v55 = vrot.slane %v5556_v24, 2  ;;  %v6007_v30 = vrot.slane %v5555_v6, 3  ;;  %v6008_v11 = vrot.slane %v5556_v24, 3 }
 0x270   : > { %7831 = vmatprep.mubr.msk.bf16.mxu1 %vm494_vm3, %v6444_v33  ;;  %v6010_v53 = vrot.slane %v5557_v43, 3  ;;  %v5673_v13 = vsel %vm1498_vm4, %v5671_v21, %v5672_v37  ;;  %v5675_v28 = vsel %vm1498_vm4, %v5672_v37, %v5674_v2  ;;  %v5791_v25 = vmax.f32 %v5556_v24, %v5674_v2 }
 0x271   : > { %v6183_v42 = vrot.slane %v5555_v6, 4  ;;  %v5789_v40 = vmax.f32 %v5554_v17, %v5673_v13  ;;  %v5790_v23 = vmax.f32 %v5555_v6, %v5675_v28  ;;  %v5839_v39 = vsel %vm1675_vm5, %v5837_v41, %v5838_v55 }
 0x272   : > { %v6009_v10 = vsel %vm1836_vm6, %v6007_v30, %v6008_v11  ;;  %v5935_v57 = vmax.f32 %v5791_v25, %v5838_v55  ;;  %v6011_v45 = vsel %vm1836_vm6, %v6008_v11, %v6010_v53  ;;  %v6184_v4 = vrot.slane %v5556_v24, 4 }
 0x273   : > { %v6186_v27 = vrot.slane %v5557_v43, 4  ;;  %v5933_v51 = vmax.f32 %v5789_v40, %v5837_v41  ;;  %v5934_v16 = vmax.f32 %v5790_v23, %v5839_v39  ;;  %v3203_v34 = vmax.bf16 %v3139_v61, %v3075_v31  ;;  %v2951_v61 = vld [vmem:[#allocation2 + $0x13c] sm:$0x1]  ;;  %v3015_v23 = vld [vmem:[#allocation2 + $0x150] sm:$0x1] }
 0x274   : > { %v3328_v20 = vmax.bf16 %v3264_v44, %v3200_v12  ;;  %v6127_v22 = vmax.f32 %v5935_v57, %v6011_v45  ;;  %v6185_v32 = vsel %vm2013_vm7, %v6183_v42, %v6184_v4  ;;  %v3329_v54 = vmax.bf16 %v3265_v36, %v3201_v63  ;;  %v3140_v39 = vld [vmem:[#allocation2 + $0x158] sm:$0xf] }
 0x275   : > { %v6187_v3 = vsel %vm2013_vm7, %v6184_v4, %v6186_v27  ;;  %v6125_v15 = vmax.f32 %v5933_v51, %v6007_v30  ;;  %v6126_v56 = vmax.f32 %v5934_v16, %v6009_v10  ;;  %v3330_v29 = vmax.bf16 %v3266_v18, %v3202_v48  ;;  %v3141_v10 = vld [vmem:[#allocation2 + $0x15c] sm:$0xf]  ;;  %v3142_v4 = vld [vmem:[#allocation2 + $0x160] sm:$0xf]  ;;  %v3143_v16 = vld [vmem:[#allocation2 + $0x164] sm:$0x1] }
 0x276   : > { %v3331_v26 = vmax.bf16 %v3267_v47, %v3203_v34  ;;  %v6303_v7 = vmax.f32 %v6127_v22, %v6187_v3  ;;  %v3456_v62 = vmax.bf16 %v3392_v46, %v3328_v20  ;;  %v3457_v14 = vmax.bf16 %v3393_v60, %v3329_v54  ;;  %v3268_v34 = vld [vmem:[#allocation2 + $0x16c] sm:$0xf]  ;;  %v3269_v22 = vld [vmem:[#allocation2 + $0x170] sm:$0xf] }
 0x277   : > { %v3076_v59 = vmax.bf16 %v9792_v0, %v9790_v50  ;;  %v6301_v5 = vmax.f32 %v6125_v15, %v6183_v42  ;;  %v6302_v35 = vmax.f32 %v6126_v56, %v6185_v32  ;;  %v3458_v17 = vmax.bf16 %v3394_v8, %v3330_v29  ;;  %v9807_v32 = vld [vmem:[#allocation2 + $0x7c] sm:$0xf]  ;;  %v9809_v3 = vld [vmem:[#allocation2 + $0x90] sm:$0xf]  ;;  %v3270_v56 = vld [vmem:[#allocation2 + $0x174] sm:$0xf] }
 0x278   : > { %v3459_v31 = vmax.bf16 %v3395_v49, %v3331_v26  ;;  %v6345_v52 = vpack.c.bf16 %v6303_v7, %v6303_v7  ;;  %v3520_v6 = vunpack.c.l.bf16 %v3456_v62  ;;  %v3521_v24 = vunpack.c.l.bf16 %v3457_v14  ;;  %v3271_v29 = vld [vmem:[#allocation2 + $0x178] sm:$0x1]  ;;  %v3396_v26 = vld [vmem:[#allocation2 + $0x180] sm:$0xf] }
 0x279   : > { %v3077_v12 = vmax.bf16 %v3013_v58, %v9753_v1  ;;  %v6344_v43 = vpack.c.bf16 %v6302_v35, %v6301_v5  ;;  %v3522_v21 = vunpack.c.l.bf16 %v3458_v17  ;;  %v3078_v48 = vmax.bf16 %v3014_v38, %v9763_v19  ;;  %v3397_v38 = vld [vmem:[#allocation2 + $0x184] sm:$0xf]  ;;  %v9815_v5 = vld [vmem:[#allocation2 + $0x94] sm:$0xf] }
 0x27a   : > { %v3523_v63 = vunpack.c.l.bf16 %v3459_v31  ;;  %v6446_v33 = vrot.slane %v6345_v52, 3  ;;  %v3646_v37 = vrot.slane %v3520_v6, 1  ;;  %v3647_v2 = vrot.slane %v3521_v24, 1  ;;  %v3398_v52 = vld [vmem:[#allocation2 + $0x188] sm:$0xf] }
 0x27b   : > { %v3794_v41 = vrot.slane %v3521_v24, 2  ;;  %v6445_v55 = vrot.slane %v6344_v43, 3  ;;  %v3649_v30 = vrot.slane %v3522_v21, 1  ;;  %v3795_v11 = vrot.slane %v3522_v21, 2 }
 0x27c   : > { %v3982_v53 = vrot.slane %v3521_v24, 3  ;;  %v3648_v13 = vsel %vm1498_vm4, %v3646_v37, %v3647_v2  ;;  %v3983_v28 = vrot.slane %v3522_v21, 3  ;;  %v3985_v25 = vrot.slane %v3523_v63, 3 }
 0x27d   : > { %v4158_v42 = vrot.slane %v3521_v24, 4  ;;  %v6447_v1 = vsel %vm1836_vm6, %v6445_v55, %v6446_v33  ;;  %v3650_v44 = vsel %vm1498_vm4, %v3647_v2, %v3649_v30  ;;  %v3746_v40 = vmax.f32 %v3520_v6, %v3648_v13  ;;  %v3399_v6 = vld [vmem:[#allocation2 + $0x18c] sm:$0x1]  ;;  %v4984_v2 = vld [vmem:[#allocation2 + $0x84] sm:$0xf] }
 0x27e   : > { %v3748_v19 = vmax.f32 %v3522_v21, %v3649_v30  ;;  %7832 = vmatmul.mubr.msk.bf16.gmra.mxu1 %vm494_vm3, %v6447_v1  ;;  %v3747_v36 = vmax.f32 %v3521_v24, %v3650_v44  ;;  %v3796_v18 = vsel %vm1675_vm5, %v3794_v41, %v3795_v11  ;;  %v3984_v57 = vsel %vm1836_vm6, %v3982_v53, %v3983_v28  ;;  %v9821_v13 = vld [vmem:[#allocation2 + $0x88] sm:$0x1] }
 0x27f   : > { %v3986_v45 = vsel %vm1836_vm6, %v3983_v28, %v3985_v25  ;;  %v3890_v27 = vmax.f32 %v3746_v40, %v3794_v41  ;;  %v4159_v50 = vrot.slane %v3522_v21, 4  ;;  %v4161_v51 = vrot.slane %v3523_v63, 4  ;;  %v5048_v28 = vld [vmem:[#allocation2 + $0x98] sm:$0xf]  ;;  %v5049_v25 = vld [vmem:[#allocation2 + $0x9c] sm:$0x1] }
 0x280   : > { %v3892_v47 = vmax.f32 %v3748_v19, %v3795_v11  ;;  %v3891_v20 = vmax.f32 %v3747_v36, %v3796_v18  ;;  %v3079_v46 = vmax.bf16 %v3015_v23, %v2951_v61  ;;  %v3204_v60 = vmax.bf16 %v3140_v39, %v3076_v59  ;;  %v9813_v59 = vld [vmem:[#allocation2 + $0x80] sm:$0xf] }
 0x281   : > { %v3205_v0 = vmax.bf16 %v3141_v10, %v3077_v12  ;;  %v4082_v54 = vmax.f32 %v3890_v27, %v3982_v53  ;;  %v4160_v49 = vsel %vm2013_vm7, %v4158_v42, %v4159_v50  ;;  %v4162_v15 = vsel %vm2013_vm7, %v4159_v50, %v4161_v51 }
 0x282   : > { %v4084_v8 = vmax.f32 %v3892_v47, %v3986_v45  ;;  %v4083_v58 = vmax.f32 %v3891_v20, %v3984_v57  ;;  %v3206_v7 = vmax.bf16 %v3142_v4, %v3078_v48  ;;  %v3207_v62 = vmax.bf16 %v3143_v16, %v3079_v46 }
 0x283   : > { %v3332_v14 = vmax.bf16 %v3268_v34, %v3204_v60  ;;  %v4258_v35 = vmax.f32 %v4082_v54, %v4158_v42  ;;  %v3333_v31 = vmax.bf16 %v3269_v22, %v3205_v0  ;;  %v5110_v24 = vmax.bf16 %v9809_v3, %v9807_v32 }
 0x284   : > { %v4260_v17 = vmax.f32 %v4084_v8, %v4162_v15  ;;  %v4259_v12 = vmax.f32 %v4083_v58, %v4160_v49  ;;  %v3334_v43 = vmax.bf16 %v3270_v56, %v3206_v7  ;;  %v3335_v21 = vmax.bf16 %v3271_v29, %v3207_v62  ;;  %v5174_v15 = vld [vmem:[#allocation2 + $0xa4] sm:$0xf]  ;;  %v5175_v56 = vld [vmem:[#allocation2 + $0xa8] sm:$0xf]  ;;  %v5176_v29 = vld [vmem:[#allocation2 + $0xac] sm:$0xf] }
 0x285   : > { %v3460_v63 = vmax.bf16 %v3396_v26, %v3332_v14  ;;  %v7613_v33 = vpack.c.bf16 %v4258_v35, %v4258_v35  ;;  %v3461_v37 = vmax.bf16 %v3397_v38, %v3333_v31  ;;  %v5111_v41 = vmax.bf16 %v9815_v5, %v9813_v59  ;;  %v5177_v14 = vld [vmem:[#allocation2 + $0xb0] sm:$0x1]  ;;  %v5303_v31 = vld [vmem:[#allocation2 + $0xbc] sm:$0xf] }
 0x286   : > { %v4293_v48 = vpack.c.bf16 %v4260_v17, %v4260_v17  ;;  %v4292_v55 = vpack.c.bf16 %v4259_v12, %v4258_v35  ;;  %v7614_v30 = vpack.c.bf16 %v4259_v12, %v4259_v12  ;;  %v3462_v11 = vmax.bf16 %v3398_v52, %v3334_v43  ;;  %v5302_v17 = vld [vmem:[#allocation2 + $0xb8] sm:$0xf] }
 0x287   : > { %v3463_v53 = vmax.bf16 %v3399_v6, %v3335_v21  ;;  %v7467_v61 = vrot.slane %v7613_v33, 11  ;;  %v3524_v44 = vunpack.c.l.bf16 %v3460_v63  ;;  %v3525_v23 = vunpack.c.l.bf16 %v3461_v37  ;;  %v5304_v21 = vld [vmem:[#allocation2 + $0xc0] sm:$0xf]  ;;  %v9840_v63 = vld [vmem:[#allocation2 + $0x90] sm:$0xf] }
 0x288   : > { %v4403_v42 = vrot.slane %v4293_v48, 3  ;;  %v4885_v1 = vrot.slane %v4293_v48, 7  ;;  %v4402_v40 = vrot.slane %v4292_v55, 3  ;;  %v4882_v19 = vrot.slane %v7614_v30, 7  ;;  %v9842_v48 = vld [vmem:[#allocation2 + $0xa4] sm:$0xf] }
 0x289   : > { %v3526_v39 = vunpack.c.l.bf16 %v3462_v11  ;;  %v3527_v10 = vunpack.c.l.bf16 %v3463_v53  ;;  %v3651_v36 = vrot.slane %v3524_v44, 1  ;;  %v5112_v18 = vmax.bf16 %v5048_v28, %v4984_v2  ;;  %v5305_v30 = vld [vmem:[#allocation2 + $0xc4] sm:$0x1]  ;;  %v5430_v11 = vld [vmem:[#allocation2 + $0xcc] sm:$0xf] }
 0x28a   : > { %v5113_v57 = vmax.bf16 %v5049_v25, %v9821_v13  ;;  %v4404_v45 = vsel %vm1836_vm6, %v4402_v40, %v4403_v42  ;;  %v4883_v4 = vsel %vm8470_vm9, %v7467_v61, %v4882_v19  ;;  %v4884_v27 = vrot.slane %v4882_v19, 4  ;;  %v5431_v53 = vld [vmem:[#allocation2 + $0xd0] sm:$0xf]  ;;  %v9848_v25 = vld [vmem:[#allocation2 + $0xa8] sm:$0xf] }
 0x28b   : > { %v3652_v47 = vrot.slane %v3525_v23, 1  ;;  %7817 = vmatprep.mubr.msk.bf16.mxu0 %vm494_vm3, %v4404_v45  ;;  %v3654_v50 = vrot.slane %v3526_v39, 1  ;;  %v3797_v51 = vrot.slane %v3525_v23, 2  ;;  %v3798_v16 = vrot.slane %v3526_v39, 2  ;;  %4954 = vst.msk [vmem:[#allocation2 + $0x148] sm:$0xf] %vm247_vm1, %v4883_v4 }
 0x28c   : > { %v3987_v34 = vrot.slane %v3525_v23, 3  ;;  %v4886_v20 = vsel %vm8470_vm9, %v4884_v27, %v4885_v1  ;;  %v3988_v60 = vrot.slane %v3526_v39, 3  ;;  %v3990_v0 = vrot.slane %v3527_v10, 3 }
 0x28d   : > { %v3653_v46 = vsel %vm1498_vm4, %v3651_v36, %v3652_v47  ;;  %v3655_v22 = vsel %vm1498_vm4, %v3652_v47, %v3654_v50  ;;  %v3751_v8 = vmax.f32 %v3526_v39, %v3654_v50  ;;  %v3799_v49 = vsel %vm1675_vm5, %v3797_v51, %v3798_v16  ;;  %4955 = vst.msk [vmem:[#allocation2 + $0x14c] sm:$0xf] %vm247_vm1, %v4886_v20 }
 0x28e   : > { %v3749_v54 = vmax.f32 %v3524_v44, %v3653_v46  ;;  %v3750_v26 = vmax.f32 %v3525_v23, %v3655_v22  ;;  %v3989_v58 = vsel %vm1836_vm6, %v3987_v34, %v3988_v60  ;;  %v3991_v7 = vsel %vm1836_vm6, %v3988_v60, %v3990_v0  ;;  %v5433_v44 = vld [vmem:[#allocation2 + $0xd8] sm:$0x1] }
 0x28f   : > { %v4163_v62 = vrot.slane %v3525_v23, 4  ;;  %v3895_v59 = vmax.f32 %v3751_v8, %v3798_v16  ;;  %v4164_v5 = vrot.slane %v3526_v39, 4  ;;  %v4166_v35 = vrot.slane %v3527_v10, 4 }
 0x290   : > { %v3893_v38 = vmax.f32 %v3749_v54, %v3797_v51  ;;  %v3894_v52 = vmax.f32 %v3750_v26, %v3799_v49  ;;  %v5238_v6 = vmax.bf16 %v5174_v15, %v5110_v24  ;;  %v5239_v12 = vmax.bf16 %v5175_v56, %v5111_v41  ;;  %v5432_v24 = vld [vmem:[#allocation2 + $0xd4] sm:$0xf] }
 0x291   : > { %v5240_v43 = vmax.bf16 %v5176_v29, %v5112_v18  ;;  %v4087_v37 = vmax.f32 %v3895_v59, %v3991_v7  ;;  %v4165_v2 = vsel %vm2013_vm7, %v4163_v62, %v4164_v5  ;;  %v4167_v55 = vsel %vm2013_vm7, %v4164_v5, %v4166_v35  ;;  %v9846_v41 = vld [vmem:[#allocation2 + $0x94] sm:$0xf]  ;;  %v4988_v7 = vld [vmem:[#allocation2 + $0x98] sm:$0xf]  ;;  %v4989_v5 = vld [vmem:[#allocation2 + $0x9c] sm:$0x1] }
 0x292   : > { %v4085_v33 = vmax.f32 %v3893_v38, %v3987_v34  ;;  %v4086_v13 = vmax.f32 %v3894_v52, %v3989_v58  ;;  %v5241_v28 = vmax.bf16 %v5177_v14, %v5113_v57  ;;  %v5366_v32 = vmax.bf16 %v5302_v17, %v5238_v6  ;;  %v5052_v6 = vld [vmem:[#allocation2 + $0xac] sm:$0xf] }
 0x293   : > { %v5367_v3 = vmax.bf16 %v5303_v31, %v5239_v12  ;;  %v4263_v61 = vmax.f32 %v4087_v37, %v4167_v55  ;;  %v5368_v1 = vmax.bf16 %v5304_v21, %v5240_v43  ;;  %v5114_v40 = vmax.bf16 %v9842_v48, %v9840_v63  ;;  %v5053_v12 = vld [vmem:[#allocation2 + $0xb0] sm:$0x1]  ;;  %v5178_v43 = vld [vmem:[#allocation2 + $0xb8] sm:$0xf]  ;;  %v5179_v55 = vld [vmem:[#allocation2 + $0xbc] sm:$0xf] }
 0x294   : > { %v4261_v42 = vmax.f32 %v4085_v33, %v4163_v62  ;;  %v4262_v19 = vmax.f32 %v4086_v13, %v4165_v2  ;;  %v5369_v23 = vmax.bf16 %v5305_v30, %v5241_v28  ;;  %v5494_v39 = vmax.bf16 %v5430_v11, %v5366_v32  ;;  %v5306_v30 = vld [vmem:[#allocation2 + $0xcc] sm:$0xf]  ;;  %v5307_v32 = vld [vmem:[#allocation2 + $0xd0] sm:$0xf]  ;;  %v5436_v63 = vld [vmem:[#allocation2 + $0xe8] sm:$0xf] }
 0x295   : > { %v5495_v10 = vmax.bf16 %v5431_v53, %v5367_v3  ;;  %v4295_v36 = vpack.c.bf16 %v4263_v61, %v4263_v61  ;;  %v5496_v57 = vmax.bf16 %v5432_v24, %v5368_v1  ;;  %v5115_v45 = vmax.bf16 %v9848_v25, %v9846_v41  ;;  %v5308_v3 = vld [vmem:[#allocation2 + $0xd4] sm:$0xf]  ;;  %v4992_v48 = vld [vmem:[#allocation2 + $0xac] sm:$0xf] }
 0x296   : > { %v7616_v18 = vpack.c.bf16 %v4261_v42, %v4261_v42  ;;  %v4294_v4 = vpack.c.bf16 %v4262_v19, %v4261_v42  ;;  %v7617_v27 = vpack.c.bf16 %v4262_v19, %v4262_v19  ;;  %v5497_v47 = vmax.bf16 %v5433_v44, %v5369_v23  ;;  %v5181_v44 = vld [vmem:[#allocation2 + $0xc4] sm:$0x1]  ;;  %v5434_v19 = vld [vmem:[#allocation2 + $0xe0] sm:$0xf] }
 0x297   : > { %v5558_v50 = vunpack.c.l.bf16 %v5494_v39  ;;  %v4406_v51 = vrot.slane %v4295_v36, 3  ;;  %v4892_v34 = vrot.slane %v4295_v36, 7  ;;  %v9854_v20 = vunpack.c.l.bf16 %v5495_v10 }
 0x298   : > { %v7468_v16 = vrot.slane %v7616_v18, 11  ;;  %v4405_v46 = vrot.slane %v4294_v4, 3  ;;  %v4889_v60 = vrot.slane %v7617_v27, 7  ;;  %v5560_v0 = vunpack.c.l.bf16 %v5496_v57  ;;  %v5435_v18 = vld [vmem:[#allocation2 + $0xe4] sm:$0xf] }
 0x299   : > { %v5561_v22 = vunpack.c.l.bf16 %v5497_v47  ;;  %v5676_v54 = vrot.slane %v5558_v50, 1  ;;  %v5677_v8 = vrot.slane %v9854_v20, 1  ;;  %v5840_v49 = vrot.slane %v9854_v20, 2  ;;  %v4990_v57 = vld [vmem:[#allocation2 + $0xa4] sm:$0xf] }
 0x29a   : > { %v6012_v15 = vrot.slane %v9854_v20, 3  ;;  %v4407_v56 = vsel %vm1836_vm6, %v4405_v46, %v4406_v51  ;;  %v4890_v29 = vsel %vm8470_vm9, %v7468_v16, %v4889_v60  ;;  %v4891_v26 = vrot.slane %v4889_v60, 4  ;;  %v5054_v4 = vld [vmem:[#allocation2 + $0xb8] sm:$0xf] }
 0x29b   : > { %v5679_v58 = vrot.slane %v5560_v0, 1  ;;  %7818 = vmatmul.mubr.msk.bf16.gmra.mxu0 %vm494_vm3, %v4407_v56  ;;  %4956 = vst.msk [vmem:[#allocation2 + $0x15c] sm:$0xf] %vm247_vm1, %v4890_v29  ;;  %v5678_v62 = vsel %vm1498_vm4, %v5676_v54, %v5677_v8  ;;  %v5841_v14 = vrot.slane %v5560_v0, 2  ;;  %v6013_v38 = vrot.slane %v5560_v0, 3 }
 0x29c   : > { %v6015_v59 = vrot.slane %v5561_v22, 3  ;;  %v4893_v35 = vsel %vm8470_vm9, %v4891_v26, %v4892_v34  ;;  %v5792_v31 = vmax.f32 %v5558_v50, %v5678_v62  ;;  %v6188_v13 = vrot.slane %v9854_v20, 4  ;;  %v5309_v16 = vld [vmem:[#allocation2 + $0xd8] sm:$0x1]  ;;  %v4991_v34 = vld [vmem:[#allocation2 + $0xa8] sm:$0xf] }
 0x29d   : > { %v5680_v17 = vsel %vm1498_vm4, %v5677_v8, %v5679_v58  ;;  %v5794_v52 = vmax.f32 %v5560_v0, %v5679_v58  ;;  %4957 = vst.msk [vmem:[#allocation2 + $0x160] sm:$0xf] %vm247_vm1, %v4893_v35  ;;  %v5842_v33 = vsel %vm1675_vm5, %v5840_v49, %v5841_v14  ;;  %v6014_v37 = vsel %vm1836_vm6, %v6012_v15, %v6013_v38  ;;  %v9882_v56 = vld [vmem:[#allocation2 + $0xb0] sm:$0x1]  ;;  %v9884_v29 = vld [vmem:[#allocation2 + $0xc4] sm:$0x1] }
 0x29e   : > { %v5793_v21 = vmax.f32 %v9854_v20, %v5680_v17  ;;  %v6016_v2 = vsel %vm1836_vm6, %v6013_v38, %v6015_v59  ;;  %v5936_v11 = vmax.f32 %v5792_v31, %v5840_v49  ;;  %v6189_v28 = vrot.slane %v5560_v0, 4  ;;  %v5055_v20 = vld [vmem:[#allocation2 + $0xbc] sm:$0xf]  ;;  %v5184_v35 = vld [vmem:[#allocation2 + $0xd4] sm:$0xf] }
 0x29f   : > { %v5938_v53 = vmax.f32 %v5794_v52, %v5841_v14  ;;  %v6191_v42 = vrot.slane %v5561_v22, 4  ;;  %v5116_v61 = vmax.bf16 %v5052_v6, %v4988_v7  ;;  %v5117_v1 = vmax.bf16 %v5053_v12, %v4989_v5  ;;  %v5182_v7 = vld [vmem:[#allocation2 + $0xcc] sm:$0xf]  ;;  %v5183_v5 = vld [vmem:[#allocation2 + $0xd0] sm:$0xf]  ;;  %v9888_v12 = vpop.f32.mrf.mxu0 }
 0x2a0   : > { %v5937_v24 = vmax.f32 %v5793_v21, %v5842_v33  ;;  %v6128_v23 = vmax.f32 %v5936_v11, %v6012_v15  ;;  %v6190_v10 = vsel %vm2013_vm7, %v6188_v13, %v6189_v28  ;;  %v5242_v36 = vmax.bf16 %v5178_v43, %v5114_v40  ;;  %v5056_v40 = vld [vmem:[#allocation2 + $0xc0] sm:$0xf]  ;;  %v5437_v15 = vld [vmem:[#allocation2 + $0xec] sm:$0x1]  ;;  %v9890_v43 = vpop.f32.mrf.mxu1 }
 0x2a1   : > { %v6130_v39 = vmax.f32 %v5938_v53, %v6016_v2  ;;  %v6192_v47 = vsel %vm2013_vm7, %v6189_v28, %v6191_v42  ;;  %v5243_v50 = vmax.bf16 %v5179_v55, %v5115_v45  ;;  %v5244_v51 = vmax.bf16 %v5180_v9, %v5116_v61  ;;  %10861 = vst [vmem:[#allocation5_spill] sm:$0xff] %v9890_v43  ;;  %v9896_v53 = vpop.f32.mrf.mxu0  ;;  %v5452_v43 = vld [vmem:[#allocation2 + $0x138] sm:$0xf] }
 0x2a2   : > { %v6129_v27 = vmax.f32 %v5937_v24, %v6014_v37  ;;  %v6304_v46 = vmax.f32 %v6128_v23, %v6188_v13  ;;  %v5245_v0 = vmax.bf16 %v5181_v44, %v5117_v1  ;;  %v5370_v22 = vmax.bf16 %v5306_v30, %v5242_v36  ;;  %v9898_v13 = vpop.f32.mrf.mxu1 }
 0x2a3   : > { %v6306_v60 = vmax.f32 %v6130_v39, %v6192_v47  ;;  %v5371_v8 = vmax.bf16 %v5307_v32, %v5243_v50  ;;  %v5372_v49 = vmax.bf16 %v5308_v3, %v5244_v51  ;;  %v5118_v41 = vmax.bf16 %v5054_v4, %v4990_v57  ;;  %10862 = vst [vmem:[#allocation4_spill] sm:$0xff] %v9898_v13  ;;  %v5185_v57 = vld [vmem:[#allocation2 + $0xd8] sm:$0x1]  ;;  %v5310_v4 = vld [vmem:[#allocation2 + $0xe0] sm:$0xf] }
 0x2a4   : > { %v6305_v54 = vmax.f32 %v6129_v27, %v6190_v10  ;;  %v5373_v45 = vmax.bf16 %v5309_v16, %v5245_v0  ;;  %v5498_v26 = vmax.bf16 %v5434_v19, %v5370_v22  ;;  %v5119_v58 = vmax.bf16 %v5055_v20, %v4991_v34  ;;  %v9905_v19 = vpop.f32.mrf.mxu0  ;;  %v9907_v23 = vpop.f32.mrf.mxu1  ;;  %v5311_v16 = vld [vmem:[#allocation2 + $0xe4] sm:$0xf]  ;;  %v5312_v34 = vld [vmem:[#allocation2 + $0xe8] sm:$0xf] }
 0x2a5   : > { %v6347_v25 = vpack.c.bf16 %v6306_v60, %v6306_v60  ;;  %v5499_v14 = vmax.bf16 %v5435_v18, %v5371_v8  ;;  %v5500_v38 = vmax.bf16 %v5436_v63, %v5372_v49  ;;  %v5120_v59 = vmax.bf16 %v5056_v40, %v4992_v48  ;;  %10863 = vst [vmem:[#allocation7_spill] sm:$0xff] %v9907_v23  ;;  %v5313_v48 = vld [vmem:[#allocation2 + $0xec] sm:$0x1]  ;;  %v9920_v40 = vld [vmem:[#allocation2 + $0xb8] sm:$0xf] }
 0x2a6   : > { %v6346_v62 = vpack.c.bf16 %v6305_v54, %v6304_v46  ;;  %v5501_v31 = vmax.bf16 %v5437_v15, %v5373_v45  ;;  %v5562_v52 = vunpack.c.l.bf16 %v5498_v26  ;;  %v5121_v6 = vmax.bf16 %v9884_v29, %v9882_v56  ;;  %v9915_v20 = vpop.f32.mrf.mxu0  ;;  %v9917_v46 = vpop.f32.mrf.mxu1  ;;  %v5438_v56 = vld [vmem:[#allocation2 + $0xf4] sm:$0xf]  ;;  %v5439_v29 = vld [vmem:[#allocation2 + $0xf8] sm:$0xf]  ;;  %v5070_v13 = vld [vmem:[#allocation2 + $0x108] sm:$0xf] }
 0x2a7   : > { %v6449_v17 = vrot.slane %v6347_v25, 3  ;;  %v9892_v33 = vunpack.c.l.bf16 %v5499_v14  ;;  %v5564_v37 = vunpack.c.l.bf16 %v5500_v38  ;;  %v5246_v2 = vmax.bf16 %v5182_v7, %v5118_v41  ;;  %10864 = vst [vmem:[#allocation6_spill] sm:$0xff] %v9917_v46  ;;  %v9922_v41 = vld [vmem:[#allocation2 + $0xcc] sm:$0xf]  ;;  %v5441_v14 = vld [vmem:[#allocation2 + $0x100] sm:$0x1] }
 0x2a8   : > { %v6448_v21 = vrot.slane %v6346_v62, 3  ;;  %v5565_v55 = vunpack.c.l.bf16 %v5501_v31  ;;  %v5681_v9 = vrot.slane %v5562_v52, 1  ;;  %v5247_v30 = vmax.bf16 %v5183_v5, %v5119_v58  ;;  %v9924_v25 = vpop.f32.mrf.mxu0  ;;  %v5440_v62 = vld [vmem:[#allocation2 + $0xfc] sm:$0xf]  ;;  %v9931_v31 = vld [vmem:[#allocation2 + $0xd0] sm:$0xf] }
 0x2a9   : > { %v9894_v11 = vmax.bf16 %v5184_v35, %v5120_v59  ;;  %v5682_v32 = vrot.slane %v9892_v33, 1  ;;  %v5684_v3 = vrot.slane %v5564_v37, 1  ;;  %v5843_v24 = vrot.slane %v9892_v33, 2 }
 0x2aa   : > { %v6450_v28 = vsel %vm1836_vm6, %v6448_v21, %v6449_v17  ;;  %v5844_v42 = vrot.slane %v5564_v37, 2  ;;  %v6017_v61 = vrot.slane %v9892_v33, 3  ;;  %v6018_v1 = vrot.slane %v5564_v37, 3  ;;  %v9929_v17 = vld [vmem:[#allocation2 + $0xbc] sm:$0xf] }
 0x2ab   : > { %7835 = vmatprep.mubr.msk.bf16.mxu1 %vm494_vm3, %v6450_v28  ;;  %v6020_v44 = vrot.slane %v5565_v55, 3  ;;  %v5683_v39 = vsel %vm1498_vm4, %v5681_v9, %v5682_v32  ;;  %v5685_v10 = vsel %vm1498_vm4, %v5682_v32, %v5684_v3  ;;  %v5797_v36 = vmax.f32 %v5564_v37, %v5684_v3 }
 0x2ac   : > { %v6193_v18 = vrot.slane %v9892_v33, 4  ;;  %v5795_v27 = vmax.f32 %v5562_v52, %v5683_v39  ;;  %v5796_v47 = vmax.f32 %v9892_v33, %v5685_v10  ;;  %v5845_v50 = vsel %vm1675_vm5, %v5843_v24, %v5844_v42  ;;  %v9933_v52 = vpop.f32.mrf.mxu0 }
 0x2ad   : > { %v6019_v51 = vsel %vm1836_vm6, %v6017_v61, %v6018_v1  ;;  %v5941_v60 = vmax.f32 %v5797_v36, %v5844_v42  ;;  %v6021_v0 = vsel %vm1836_vm6, %v6018_v1, %v6020_v44  ;;  %v6194_v22 = vrot.slane %v5564_v37, 4 }
 0x2ae   : > { %v6196_v63 = vrot.slane %v5565_v55, 4  ;;  %v5939_v54 = vmax.f32 %v5795_v27, %v5843_v24  ;;  %v5940_v8 = vmax.f32 %v5796_v47, %v5845_v50  ;;  %v5249_v49 = vmax.bf16 %v5185_v57, %v5121_v6  ;;  %v9935_v6 = vpop.f32.mrf.mxu1  ;;  %v9939_v55 = vld [vmem:[#allocation2 + $0xd4] sm:$0xf]  ;;  %v9943_v3 = vpop.f32.mrf.mxu0 }
 0x2af   : > { %v5374_v15 = vmax.bf16 %v5310_v4, %v5246_v2  ;;  %v6133_v45 = vmax.f32 %v5941_v60, %v6021_v0  ;;  %v6195_v26 = vsel %vm2013_vm7, %v6193_v18, %v6194_v22  ;;  %v5375_v7 = vmax.bf16 %v5311_v16, %v5247_v30  ;;  %10865 = vst [vmem:[#allocation8_spill] sm:$0xff] %v9935_v6  ;;  %v9937_v2 = vld [vmem:[#allocation2 + $0xc0] sm:$0xf] }
 0x2b0   : > { %v6197_v58 = vsel %vm2013_vm7, %v6194_v22, %v6196_v63  ;;  %v6131_v38 = vmax.f32 %v5939_v54, %v6017_v61  ;;  %v6132_v59 = vmax.f32 %v5940_v8, %v6019_v51  ;;  %v5376_v5 = vmax.bf16 %v5312_v34, %v9894_v11  ;;  %v9951_v57 = vpop.f32.mrf.mxu0  ;;  %v4997_v54 = vld [vmem:[#allocation2 + $0xc4] sm:$0x1] }
 0x2b1   : > { %v5377_v35 = vmax.bf16 %v5313_v48, %v5249_v49  ;;  %v6309_v21 = vmax.f32 %v6133_v45, %v6197_v58  ;;  %v5502_v33 = vmax.bf16 %v5438_v56, %v5374_v15  ;;  %v5503_v37 = vmax.bf16 %v5439_v29, %v5375_v7  ;;  %v5061_v29 = vld [vmem:[#allocation2 + $0xd8] sm:$0x1]  ;;  %v5187_v45 = vld [vmem:[#allocation2 + $0xe4] sm:$0xf] }
 0x2b2   : > { %v5122_v9 = vmax.bf16 %v9922_v41, %v9920_v40  ;;  %v6307_v30 = vmax.f32 %v6131_v38, %v6193_v18  ;;  %v6308_v11 = vmax.f32 %v6132_v59, %v6195_v26  ;;  %v5504_v28 = vmax.bf16 %v5440_v62, %v5376_v5  ;;  %v9953_v18 = vpop.f32.mrf.mxu1  ;;  %v9958_v0 = vpop.f32.mrf.mxu0  ;;  %v5186_v41 = vld [vmem:[#allocation2 + $0xe0] sm:$0xf]  ;;  %v5188_v59 = vld [vmem:[#allocation2 + $0xe8] sm:$0xf]  ;;  %v5189_v5 = vld [vmem:[#allocation2 + $0xec] sm:$0x1] }
 0x2b3   : > { %v5505_v32 = vmax.bf16 %v5441_v14, %v5377_v35  ;;  %v6349_v24 = vpack.c.bf16 %v6309_v21, %v6309_v21  ;;  %v5566_v42 = vunpack.c.l.bf16 %v5502_v33  ;;  %v9945_v61 = vunpack.c.l.bf16 %v5503_v37  ;;  %10866 = vst [vmem:[#allocation9_spill] sm:$0xff] %v9953_v18  ;;  %v5314_v35 = vld [vmem:[#allocation2 + $0xf4] sm:$0xf]  ;;  %v5315_v37 = vld [vmem:[#allocation2 + $0xf8] sm:$0xf] }
 0x2b4   : > { %v5123_v1 = vmax.bf16 %v9931_v31, %v9929_v17  ;;  %v6348_v44 = vpack.c.bf16 %v6308_v11, %v6307_v30  ;;  %v5568_v39 = vunpack.c.l.bf16 %v5504_v28  ;;  %v5124_v36 = vmax.bf16 %v9939_v55, %v9937_v2  ;;  %v9964_v26 = vpop.f32.mrf.mxu0  ;;  %v9966_v58 = vpop.f32.mrf.mxu1  ;;  %v5316_v2 = vld [vmem:[#allocation2 + $0xfc] sm:$0xf]  ;;  %v5450_v18 = vld [vmem:[#allocation2 + $0x130] sm:$0xf] }
 0x2b5   : > { %v5569_v10 = vunpack.c.l.bf16 %v5505_v32  ;;  %v6452_v4 = vrot.slane %v6349_v24, 3  ;;  %v5686_v27 = vrot.slane %v5566_v42, 1  ;;  %v5687_v47 = vrot.slane %v9945_v61, 1  ;;  %10867 = vst [vmem:[#allocation10_spill] sm:$0xff] %v9966_v58  ;;  %v5442_v24 = vld [vmem:[#allocation2 + $0x108] sm:$0xf] }
 0x2b6   : > { %v5846_v50 = vrot.slane %v9945_v61, 2  ;;  %v6451_v51 = vrot.slane %v6348_v44, 3  ;;  %v5689_v16 = vrot.slane %v5568_v39, 1  ;;  %v5847_v34 = vrot.slane %v5568_v39, 2  ;;  %v9973_v55 = vpop.f32.mrf.mxu0 }
 0x2b7   : > { %v6022_v60 = vrot.slane %v9945_v61, 3  ;;  %v5688_v22 = vsel %vm1498_vm4, %v5686_v27, %v5687_v47  ;;  %v6023_v63 = vrot.slane %v5568_v39, 3  ;;  %v6025_v48 = vrot.slane %v5569_v10, 3 }
 0x2b8   : > { %v6198_v40 = vrot.slane %v9945_v61, 4  ;;  %v6453_v8 = vsel %vm1836_vm6, %v6451_v51, %v6452_v4  ;;  %v5690_v49 = vsel %vm1498_vm4, %v5687_v47, %v5689_v16  ;;  %v5798_v15 = vmax.f32 %v5566_v42, %v5688_v22  ;;  %v4998_v42 = vld [vmem:[#allocation2 + $0xcc] sm:$0xf]  ;;  %v9979_v51 = vpop.f32.mrf.mxu0 }
 0x2b9   : > { %v5800_v56 = vmax.f32 %v5568_v39, %v5689_v16  ;;  %7836 = vmatmul.mubr.msk.bf16.gmra.mxu1 %vm494_vm3, %v6453_v8  ;;  %v5799_v7 = vmax.f32 %v9945_v61, %v5690_v49  ;;  %v5848_v62 = vsel %vm1675_vm5, %v5846_v50, %v5847_v34  ;;  %v6024_v14 = vsel %vm1836_vm6, %v6022_v60, %v6023_v63  ;;  %v5062_v61 = vld [vmem:[#allocation2 + $0xe0] sm:$0xf]  ;;  %v9981_v16 = vpop.f32.mrf.mxu1 }
 0x2ba   : > { %v6026_v38 = vsel %vm1836_vm6, %v6023_v63, %v6025_v48  ;;  %v5942_v17 = vmax.f32 %v5798_v15, %v5846_v50  ;;  %v6199_v21 = vrot.slane %v5568_v39, 4  ;;  %v6201_v33 = vrot.slane %v5569_v10, 4  ;;  %v5317_v50 = vld [vmem:[#allocation2 + $0x100] sm:$0x1]  ;;  %v5443_v39 = vld [vmem:[#allocation2 + $0x10c] sm:$0xf] }
 0x2bb   : > { %v5944_v31 = vmax.f32 %v5800_v56, %v5847_v34  ;;  %v5943_v30 = vmax.f32 %v5799_v7, %v5848_v62  ;;  %v5125_v11 = vmax.bf16 %v5061_v29, %v4997_v54  ;;  %v5250_v28 = vmax.bf16 %v5186_v41, %v5122_v9  ;;  %v9977_v10 = vld [vmem:[#allocation2 + $0xd0] sm:$0xf]  ;;  %10868 = vst [vmem:[#allocation11_spill] sm:$0xff] %v9981_v16  ;;  %v9983_v63 = vld [vmem:[#allocation2 + $0xd4] sm:$0xf]  ;;  %v9989_v41 = vpop.f32.mrf.mxu0 }
 0x2bc   : > { %v5251_v32 = vmax.bf16 %v5187_v45, %v5123_v1  ;;  %v6134_v44 = vmax.f32 %v5942_v17, %v6022_v60  ;;  %v6200_v27 = vsel %vm2013_vm7, %v6198_v40, %v6199_v21  ;;  %v6202_v47 = vsel %vm2013_vm7, %v6199_v21, %v6201_v33  ;;  %v9985_v60 = vld [vmem:[#allocation2 + $0xe4] sm:$0xf]  ;;  %v9987_v48 = vld [vmem:[#allocation2 + $0xe8] sm:$0xf]  ;;  %v5444_v15 = vld [vmem:[#allocation2 + $0x110] sm:$0xf]  ;;  %v10001_v21 = vpop.f32.mrf.mxu1 }
 0x2bd   : > { %v6136_v4 = vmax.f32 %v5944_v31, %v6026_v38  ;;  %v6135_v34 = vmax.f32 %v5943_v30, %v6024_v14  ;;  %v5252_v9 = vmax.bf16 %v5188_v59, %v5124_v36  ;;  %v5253_v1 = vmax.bf16 %v5189_v5, %v5125_v11  ;;  %v5445_v56 = vld [vmem:[#allocation2 + $0x114] sm:$0x1]  ;;  %v9991_v14 = vld [vmem:[#allocation2 + $0xd8] sm:$0x1]  ;;  %v9993_v38 = vld [vmem:[#allocation2 + $0xec] sm:$0x1]  ;;  %v9999_v31 = vpop.f32.mrf.mxu0 }
 0x2be   : > { %v5378_v22 = vmax.bf16 %v5314_v35, %v5250_v28  ;;  %v6310_v54 = vmax.f32 %v6134_v44, %v6198_v40  ;;  %v5379_v49 = vmax.bf16 %v5315_v37, %v5251_v32  ;;  %v5126_v29 = vmax.bf16 %v5062_v61, %v4998_v42  ;;  %v5190_v59 = vld [vmem:[#allocation2 + $0xf4] sm:$0xf]  ;;  %10869 = vst [vmem:[#allocation12_spill] sm:$0xff] %v10001_v21  ;;  %v10040_v21 = vld [vmem:[#allocation2 + $0xe4] sm:$0xf] }
 0x2bf   : > { %v6312_v8 = vmax.f32 %v6136_v4, %v6202_v47  ;;  %v6311_v45 = vmax.f32 %v6135_v34, %v6200_v27  ;;  %v5380_v7 = vmax.bf16 %v5316_v2, %v5252_v9  ;;  %v5381_v62 = vmax.bf16 %v5317_v50, %v5253_v1  ;;  %v10009_v42 = vpop.f32.mrf.mxu0  ;;  %v10017_v9 = vpop.f32.mrf.mxu1  ;;  %v10042_v16 = vld [vmem:[#allocation2 + $0xf8] sm:$0xf] }
 0x2c0   : > { %v5506_v36 = vmax.bf16 %v5442_v24, %v5378_v22  ;;  %v5507_v35 = vmax.bf16 %v5443_v39, %v5379_v49  ;;  %v5127_v40 = vmax.bf16 %v9985_v60, %v9977_v10  ;;  %v5128_v17 = vmax.bf16 %v9987_v48, %v9983_v63  ;;  %10870 = vst [vmem:[#allocation13_spill] sm:$0xff] %v10017_v9  ;;  %v5447_v9 = vld [vmem:[#allocation2 + $0x120] sm:$0xf] }
 0x2c1   : > { %v6351_v5 = vpack.c.bf16 %v6312_v8, %v6312_v8  ;;  %v6350_v33 = vpack.c.bf16 %v6311_v45, %v6310_v54  ;;  %v5508_v37 = vmax.bf16 %v5444_v15, %v5380_v7  ;;  %v5509_v2 = vmax.bf16 %v5445_v56, %v5381_v62  ;;  %v10015_v34 = vpop.f32.mrf.mxu0  ;;  %v5191_v15 = vld [vmem:[#allocation2 + $0xf8] sm:$0xf] }
 0x2c2   : > { %v5570_v30 = vunpack.c.l.bf16 %v5506_v36  ;;  %v10003_v28 = vunpack.c.l.bf16 %v5507_v35  ;;  %v5129_v32 = vmax.bf16 %v9993_v38, %v9991_v14  ;;  %v10007_v24 = vmax.bf16 %v5190_v59, %v5126_v29  ;;  %v5192_v36 = vld [vmem:[#allocation2 + $0xfc] sm:$0xf]  ;;  %v5193_v14 = vld [vmem:[#allocation2 + $0x100] sm:$0x1]  ;;  %v5318_v38 = vld [vmem:[#allocation2 + $0x108] sm:$0xf] }
 0x2c3   : > { %v6455_v11 = vrot.slane %v6351_v5, 3  ;;  %v6454_v61 = vrot.slane %v6350_v33, 3  ;;  %v5572_v44 = vunpack.c.l.bf16 %v5508_v37  ;;  %v5573_v4 = vunpack.c.l.bf16 %v5509_v2  ;;  %v10022_v56 = vpop.f32.mrf.mxu0  ;;  %v5319_v37 = vld [vmem:[#allocation2 + $0x10c] sm:$0xf]  ;;  %v10030_v2 = vld [vmem:[#allocation2 + $0xe0] sm:$0xf] }
 0x2c4   : > { %v5691_v27 = vrot.slane %v5570_v30, 1  ;;  %v5692_v47 = vrot.slane %v10003_v28, 1  ;;  %v5849_v50 = vrot.slane %v10003_v28, 2  ;;  %v6027_v39 = vrot.slane %v10003_v28, 3 }
 0x2c5   : > { %v6203_v10 = vrot.slane %v10003_v28, 4  ;;  %v6456_v1 = vsel %vm1836_vm6, %v6454_v61, %v6455_v11  ;;  %v5694_v22 = vrot.slane %v5572_v44, 1  ;;  %v5850_v63 = vrot.slane %v5572_v44, 2  ;;  %v10032_v11 = vld [vmem:[#allocation2 + $0xf4] sm:$0xf]  ;;  %v10036_v61 = vpop.f32.mrf.mxu1 }
 0x2c6   : > { %v6028_v60 = vrot.slane %v5572_v44, 3  ;;  %7839 = vmatprep.mubr.msk.bf16.mxu1 %vm494_vm3, %v6456_v1  ;;  %v5693_v48 = vsel %vm1498_vm4, %v5691_v27, %v5692_v47  ;;  %v6030_v54 = vrot.slane %v5573_v4, 3  ;;  %v6204_v8 = vrot.slane %v5572_v44, 4  ;;  %10871 = vst [vmem:[#allocation14_spill] sm:$0xff] %v10036_v61  ;;  %v5321_v1 = vld [vmem:[#allocation2 + $0x114] sm:$0x1] }
 0x2c7   : > { %v6206_v49 = vrot.slane %v5573_v4, 4  ;;  %v5695_v29 = vsel %vm1498_vm4, %v5692_v47, %v5694_v22  ;;  %v5801_v45 = vmax.f32 %v5570_v30, %v5693_v48  ;;  %v5803_v7 = vmax.f32 %v5572_v44, %v5694_v22  ;;  %v10034_v30 = vpop.f32.mrf.mxu0  ;;  %v5320_v47 = vld [vmem:[#allocation2 + $0x110] sm:$0xf]  ;;  %v5446_v22 = vld [vmem:[#allocation2 + $0x11c] sm:$0xf] }
 0x2c8   : > { %v5851_v62 = vsel %vm1675_vm5, %v5849_v50, %v5850_v63  ;;  %v5802_v59 = vmax.f32 %v10003_v28, %v5695_v29  ;;  %v6029_v5 = vsel %vm1836_vm6, %v6027_v39, %v6028_v60  ;;  %v6031_v35 = vsel %vm1836_vm6, %v6028_v60, %v6030_v54 }
 0x2c9   : > { %v6205_v33 = vsel %vm2013_vm7, %v6203_v10, %v6204_v8  ;;  %v5945_v44 = vmax.f32 %v5801_v45, %v5849_v50  ;;  %v5947_v4 = vmax.f32 %v5803_v7, %v5850_v63  ;;  %v6207_v27 = vsel %vm2013_vm7, %v6204_v8, %v6206_v49  ;;  %v10044_v58 = vpop.f32.mrf.mxu0  ;;  %v5448_v8 = vld [vmem:[#allocation2 + $0x124] sm:$0xf]  ;;  %v10046_v49 = vld [vmem:[#allocation2 + $0xe8] sm:$0xf] }
 0x2ca   : > { %v5255_v28 = vmax.bf16 %v5191_v15, %v5127_v40  ;;  %v5946_v60 = vmax.f32 %v5802_v59, %v5851_v62  ;;  %v5256_v48 = vmax.bf16 %v5192_v36, %v5128_v17  ;;  %v5257_v54 = vmax.bf16 %v5193_v14, %v5129_v32  ;;  %v5449_v40 = vld [vmem:[#allocation2 + $0x128] sm:$0x1]  ;;  %v10050_v62 = vld [vmem:[#allocation2 + $0xec] sm:$0x1]  ;;  %v10052_v36 = vld [vmem:[#allocation2 + $0xfc] sm:$0xf] }
 0x2cb   : > { %v5382_v29 = vmax.bf16 %v5318_v38, %v10007_v24  ;;  %v6137_v50 = vmax.f32 %v5945_v44, %v6027_v39  ;;  %v6139_v63 = vmax.f32 %v5947_v4, %v6031_v35  ;;  %v10054_v14 = vld [vmem:[#allocation2 + $0x100] sm:$0x1]  ;;  %v10056_v39 = vpop.f32.mrf.mxu0  ;;  %v10058_v38 = vpop.f32.mrf.mxu1  ;;  %v5131_v44 = vmax.bf16 %v10042_v16, %v10040_v21 }
 0x2cc   : > { %v5383_v45 = vmax.bf16 %v5319_v37, %v5255_v28  ;;  %v6138_v32 = vmax.f32 %v5946_v60, %v6029_v5  ;;  %v5384_v15 = vmax.bf16 %v5320_v47, %v5256_v48  ;;  %v5385_v24 = vmax.bf16 %v5321_v1, %v5257_v54  ;;  %10872 = vst [vmem:[#allocation15_spill] sm:$0xff] %v10058_v38 }
 0x2cd   : > { %v5510_v7 = vmax.bf16 %v5446_v22, %v5382_v29  ;;  %v6313_v59 = vmax.f32 %v6137_v50, %v6203_v10  ;;  %v6315_v35 = vmax.f32 %v6139_v63, %v6207_v27  ;;  %v10062_v1 = vpop.f32.mrf.mxu0  ;;  %v5132_v48 = vmax.bf16 %v10052_v36, %v10046_v49  ;;  %v10072_v21 = vpop.f32.mrf.mxu1 }
 0x2ce   : > { %v5511_v37 = vmax.bf16 %v5447_v9, %v5383_v45  ;;  %v6314_v5 = vmax.f32 %v6138_v32, %v6205_v33  ;;  %v5512_v4 = vmax.bf16 %v5448_v8, %v5384_v15  ;;  %v5513_v28 = vmax.bf16 %v5449_v40, %v5385_v24  ;;  %10873 = vst [vmem:[#allocation16_spill] sm:$0xff] %v10072_v21 }
 0x2cf   : > { %v5574_v47 = vunpack.c.l.bf16 %v5510_v7  ;;  %v6353_v22 = vpack.c.bf16 %v6315_v35, %v6315_v35  ;;  %v5133_v10 = vmax.bf16 %v10054_v14, %v10050_v62  ;;  %v10070_v16 = vpop.f32.mrf.mxu0  ;;  %v5194_v14 = vld [vmem:[#allocation2 + $0x108] sm:$0xf]  ;;  %v10085_v17 = vpop.f32.mrf.mxu1 }
 0x2d0   : > { %v10064_v60 = vunpack.c.l.bf16 %v5511_v37  ;;  %v6352_v27 = vpack.c.bf16 %v6314_v5, %v6313_v59  ;;  %v5576_v9 = vunpack.c.l.bf16 %v5512_v4  ;;  %v5577_v54 = vunpack.c.l.bf16 %v5513_v28  ;;  %v5195_v4 = vld [vmem:[#allocation2 + $0x10c] sm:$0xf]  ;;  %v5196_v28 = vld [vmem:[#allocation2 + $0x110] sm:$0xf]  ;;  %10875 = vst [vmem:[#allocation18_spill] sm:$0xff] %v10085_v17 }
 0x2d1   : > { %v5696_v29 = vrot.slane %v5574_v47, 1  ;;  %v6458_v33 = vrot.slane %v6353_v22, 3  ;;  %v10077_v15 = vpop.f32.mrf.mxu0  ;;  %v5197_v22 = vld [vmem:[#allocation2 + $0x114] sm:$0x1]  ;;  %v5259_v46 = vmax.bf16 %v5195_v4, %v5131_v44  ;;  %v5260_v23 = vmax.bf16 %v5196_v28, %v5132_v48  ;;  %v10107_v4 = vld [vmem:[#allocation2 + $0x10c] sm:$0xf] }
 0x2d2   : > { %v5697_v50 = vrot.slane %v10064_v60, 1  ;;  %v5852_v63 = vrot.slane %v10064_v60, 2  ;;  %v6032_v45 = vrot.slane %v10064_v60, 3  ;;  %v6457_v8 = vrot.slane %v6352_v27, 3  ;;  %v5006_v17 = vld [vmem:[#allocation2 + $0xf4] sm:$0xf] }
 0x2d3   : > { %v5699_v40 = vrot.slane %v5576_v9, 1  ;;  %v5853_v49 = vrot.slane %v5576_v9, 2  ;;  %v6033_v32 = vrot.slane %v5576_v9, 3  ;;  %v6035_v7 = vrot.slane %v5577_v54, 3  ;;  %v10083_v27 = vpop.f32.mrf.mxu0 }
 0x2d4   : > { %v5698_v24 = vsel %vm1498_vm4, %v5696_v29, %v5697_v50  ;;  %v6208_v62 = vrot.slane %v10064_v60, 4  ;;  %v6209_v36 = vrot.slane %v5576_v9, 4  ;;  %v6459_v59 = vsel %vm1836_vm6, %v6457_v8, %v6458_v33  ;;  %10874 = vst [vmem:[#allocation17_spill] sm:$0xff] %v10083_v27  ;;  %v10101_v27 = vld [vmem:[#allocation2 + $0xfc] sm:$0xf] }
 0x2d5   : > { %v5700_v35 = vsel %vm1498_vm4, %v5697_v50, %v5699_v40  ;;  %v5804_v37 = vmax.f32 %v5574_v47, %v5698_v24  ;;  %v5806_v5 = vmax.f32 %v5576_v9, %v5699_v40  ;;  %7840 = vmatmul.mubr.msk.bf16.gmra.mxu1 %vm494_vm3, %v6459_v59  ;;  %v5854_v21 = vsel %vm1675_vm5, %v5852_v63, %v5853_v49  ;;  %v5322_v50 = vld [vmem:[#allocation2 + $0x11c] sm:$0xf]  ;;  %v5323_v47 = vld [vmem:[#allocation2 + $0x120] sm:$0xf]  ;;  %v5324_v9 = vld [vmem:[#allocation2 + $0x124] sm:$0xf]  ;;  %v10093_v6 = vpop.f32.mrf.mxu0 }
 0x2d6   : > { %v5805_v29 = vmax.f32 %v10064_v60, %v5700_v35  ;;  %v6034_v38 = vsel %vm1836_vm6, %v6032_v45, %v6033_v32  ;;  %v6036_v33 = vsel %vm1836_vm6, %v6033_v32, %v6035_v7  ;;  %v6210_v24 = vsel %vm2013_vm7, %v6208_v62, %v6209_v36  ;;  %v5325_v32 = vld [vmem:[#allocation2 + $0x128] sm:$0x1]  ;;  %v10098_v7 = vld [vmem:[#allocation2 + $0xf8] sm:$0xf] }
 0x2d7   : > { %v5948_v8 = vmax.f32 %v5804_v37, %v5852_v63  ;;  %v5950_v40 = vmax.f32 %v5806_v5, %v5853_v49  ;;  %v6211_v61 = vrot.slane %v5577_v54, 4  ;;  %v10876_v60 = vmax.bf16 %v10032_v11, %v10030_v2  ;;  %v5451_v5 = vld [vmem:[#allocation2 + $0x134] sm:$0xf] }
 0x2d8   : > { %v5949_v59 = vmax.f32 %v5805_v29, %v5854_v21  ;;  %v5261_v54 = vmax.bf16 %v5197_v22, %v5133_v10  ;;  %v10103_v21 = vpop.f32.mrf.mxu0  ;;  %v10105_v29 = vpop.f32.mrf.mxu1  ;;  %v5387_v44 = vmax.bf16 %v5323_v47, %v5259_v46  ;;  %v5388_v48 = vmax.bf16 %v5324_v9, %v5260_v23 }
 0x2d9   : > { %v5258_v35 = vmax.bf16 %v5194_v14, %v10876_v60  ;;  %v6140_v63 = vmax.f32 %v5948_v8, %v6032_v45  ;;  %v6142_v49 = vmax.f32 %v5950_v40, %v6036_v33  ;;  %v6212_v37 = vsel %vm2013_vm7, %v6209_v36, %v6211_v61  ;;  %10877 = vst [vmem:[#allocation19_spill] sm:$0xff] %v10105_v29  ;;  %v5453_v14 = vld [vmem:[#allocation2 + $0x13c] sm:$0x1]  ;;  %v10109_v45 = vld [vmem:[#allocation2 + $0x110] sm:$0xf] }
 0x2da   : > { %v6141_v2 = vmax.f32 %v5949_v59, %v6034_v38  ;;  %v5389_v10 = vmax.bf16 %v5325_v32, %v5261_v54  ;;  %v5134_v36 = vmax.bf16 %v5070_v13, %v5006_v17  ;;  %v10111_v22 = vpop.f32.mrf.mxu0  ;;  %v5515_v40 = vmax.bf16 %v5451_v5, %v5387_v44  ;;  %v5009_v29 = vld [vmem:[#allocation2 + $0x100] sm:$0x1]  ;;  %v5073_v38 = vld [vmem:[#allocation2 + $0x114] sm:$0x1]  ;;  %v10119_v13 = vpop.f32.mrf.mxu1 }
 0x2db   : > { %v5386_v11 = vmax.bf16 %v5322_v50, %v5258_v35  ;;  %v6316_v28 = vmax.f32 %v6140_v63, %v6208_v62  ;;  %v6318_v61 = vmax.f32 %v6142_v49, %v6212_v37  ;;  %v5516_v60 = vmax.bf16 %v5452_v43, %v5388_v48  ;;  %v5198_v50 = vld [vmem:[#allocation2 + $0x11c] sm:$0xf]  ;;  %10879 = vst [vmem:[#allocation21_spill] sm:$0xff] %v10119_v13 }
 0x2dc   : > { %v6317_v33 = vmax.f32 %v6141_v2, %v6210_v24  ;;  %v5517_v23 = vmax.bf16 %v5453_v14, %v5389_v10  ;;  %v5135_v47 = vmax.bf16 %v10107_v4, %v10098_v7  ;;  %v5136_v62 = vmax.bf16 %v10109_v45, %v10101_v27  ;;  %v10117_v9 = vpop.f32.mrf.mxu0  ;;  %v10132_v14 = vpop.f32.mrf.mxu1 }
 0x2dd   : > { %v5514_v8 = vmax.bf16 %v5450_v18, %v5386_v11  ;;  %v6355_v46 = vpack.c.bf16 %v6318_v61, %v6318_v61  ;;  %10878 = vst [vmem:[#allocation20_spill] sm:$0xff] %v10117_v9  ;;  %v10121_v18 = vunpack.c.l.bf16 %v5515_v40  ;;  %v5580_v43 = vunpack.c.l.bf16 %v5516_v60  ;;  %10882 = vst [vmem:[#allocation24_spill] sm:$0xff] %v10132_v14  ;;  %v5199_v61 = vld [vmem:[#allocation2 + $0x120] sm:$0xf]  ;;  %v5200_v40 = vld [vmem:[#allocation2 + $0x124] sm:$0xf] }
 0x2de   : > { %v6354_v17 = vpack.c.bf16 %v6317_v33, %v6316_v28  ;;  %v5581_v35 = vunpack.c.l.bf16 %v5517_v23  ;;  %v5137_v32 = vmax.bf16 %v5073_v38, %v5009_v29  ;;  %v10123_v63 = vmax.bf16 %v5198_v50, %v5134_v36  ;;  %v10125_v49 = vpop.f32.mrf.mxu0  ;;  %v5201_v60 = vld [vmem:[#allocation2 + $0x128] sm:$0x1]  ;;  %v5326_v38 = vld [vmem:[#allocation2 + $0x130] sm:$0xf]  ;;  %v10146_v13 = vpop.f32.mrf.mxu1 }
 0x2df   : > { %v5578_v24 = vunpack.c.l.bf16 %v5514_v8  ;;  %v6461_v59 = vrot.slane %v6355_v46, 3  ;;  %10880 = vst [vmem:[#allocation22_spill] sm:$0xff] %v10125_v49  ;;  %v5702_v27 = vrot.slane %v10121_v18, 1  ;;  %v5704_v54 = vrot.slane %v5580_v43, 1  ;;  %10885 = vst [vmem:[#allocation27_spill] sm:$0xff] %v10146_v13 }
 0x2e0   : > { %v6460_v7 = vrot.slane %v6354_v17, 3  ;;  %v5855_v5 = vrot.slane %v10121_v18, 2  ;;  %v5856_v2 = vrot.slane %v5580_v43, 2  ;;  %v6037_v11 = vrot.slane %v10121_v18, 3  ;;  %v10130_v48 = vpop.f32.mrf.mxu0  ;;  %v5074_v49 = vld [vmem:[#allocation2 + $0x11c] sm:$0xf] }
 0x2e1   : > { %v5701_v37 = vrot.slane %v5578_v24, 1  ;;  %v6038_v44 = vrot.slane %v5580_v43, 3  ;;  %10881 = vst [vmem:[#allocation23_spill] sm:$0xff] %v10130_v48  ;;  %v5705_v45 = vsel %vm1498_vm4, %v5702_v27, %v5704_v54  ;;  %v5809_v28 = vmax.f32 %v5580_v43, %v5704_v54  ;;  %v5017_v9 = vld [vmem:[#allocation2 + $0x128] sm:$0x1] }
 0x2e2   : > { %v6462_v29 = vsel %vm1836_vm6, %v6460_v7, %v6461_v59  ;;  %v5808_v36 = vmax.f32 %v10121_v18, %v5705_v45  ;;  %v5857_v33 = vsel %vm1675_vm5, %v5855_v5, %v5856_v2  ;;  %v10141_v50 = vpop.f32.mrf.mxu0  ;;  %v6040_v23 = vrot.slane %v5581_v35, 3  ;;  %v5327_v7 = vld [vmem:[#allocation2 + $0x134] sm:$0xf]  ;;  %v5329_v45 = vld [vmem:[#allocation2 + $0x13c] sm:$0x1] }
 0x2e3   : > { %v5703_v4 = vsel %vm1498_vm4, %v5701_v37, %v5702_v27  ;;  %7843 = vmatprep.mubr.msk.bf16.mxu1 %vm494_vm3, %v6462_v29  ;;  %v6039_v8 = vsel %vm1836_vm6, %v6037_v11, %v6038_v44  ;;  %10883 = vst [vmem:[#allocation25_spill] sm:$0xff] %v10141_v50  ;;  %v5953_v46 = vmax.f32 %v5809_v28, %v5856_v2  ;;  %v6213_v17 = vrot.slane %v10121_v18, 4  ;;  %v5010_v37 = vld [vmem:[#allocation2 + $0x108] sm:$0xf]  ;;  %v5454_v18 = vld [vmem:[#allocation2 + $0x144] sm:$0xf] }
 0x2e4   : > { %v5807_v10 = vmax.f32 %v5578_v24, %v5703_v4  ;;  %v6214_v59 = vrot.slane %v5580_v43, 4  ;;  %v5952_v24 = vmax.f32 %v5808_v36, %v5857_v33  ;;  %v6216_v54 = vrot.slane %v5581_v35, 4  ;;  %v5328_v4 = vld [vmem:[#allocation2 + $0x138] sm:$0xf]  ;;  %v10144_v14 = vpop.f32.mrf.mxu0  ;;  %v10150_v43 = vld [vmem:[#allocation2 + $0x10c] sm:$0xf] }
 0x2e5   : > { %v5263_v29 = vmax.bf16 %v5199_v61, %v5135_v47  ;;  %10884 = vst [vmem:[#allocation26_spill] sm:$0xff] %v10144_v14  ;;  %v6041_v48 = vsel %vm1836_vm6, %v6038_v44, %v6040_v23  ;;  %v5264_v28 = vmax.bf16 %v5200_v40, %v5136_v62  ;;  %v5265_v50 = vmax.bf16 %v5201_v60, %v5137_v32  ;;  %v5455_v61 = vld [vmem:[#allocation2 + $0x148] sm:$0xf]  ;;  %v5456_v36 = vld [vmem:[#allocation2 + $0x14c] sm:$0xf] }
 0x2e6   : > { %v5951_v27 = vmax.f32 %v5807_v10, %v5855_v5  ;;  %v6215_v2 = vsel %vm2013_vm7, %v6213_v17, %v6214_v59  ;;  %v6144_v10 = vmax.f32 %v5952_v24, %v6039_v8  ;;  %v6145_v35 = vmax.f32 %v5953_v46, %v6041_v48  ;;  %v5457_v33 = vld [vmem:[#allocation2 + $0x150] sm:$0x1]  ;;  %v10153_v14 = vpop.f32.mrf.mxu0  ;;  %v10158_v40 = vld [vmem:[#allocation2 + $0x120] sm:$0xf]  ;;  %v10160_v60 = vld [vmem:[#allocation2 + $0x124] sm:$0xf] }
 0x2e7   : > { %v6217_v47 = vsel %vm2013_vm7, %v6214_v59, %v6216_v54  ;;  %10886 = vst [vmem:[#allocation28_spill] sm:$0xff] %v10153_v14  ;;  %v5390_v44 = vmax.bf16 %v5326_v38, %v10123_v63  ;;  %v5391_v23 = vmax.bf16 %v5327_v7, %v5263_v29  ;;  %v5392_v13 = vmax.bf16 %v5328_v4, %v5264_v28  ;;  %v10156_v32 = vld [vmem:[#allocation2 + $0x110] sm:$0xf]  ;;  %v10162_v59 = vpop.f32.mrf.mxu1  ;;  %v5013_v7 = vld [vmem:[#allocation2 + $0x114] sm:$0x1] }
 0x2e8   : > { %v6143_v5 = vmax.f32 %v5951_v27, %v6037_v11  ;;  %v5393_v62 = vmax.bf16 %v5329_v45, %v5265_v50  ;;  %v6320_v48 = vmax.f32 %v6144_v10, %v6215_v2  ;;  %v6321_v8 = vmax.f32 %v6145_v35, %v6217_v47  ;;  %10887 = vst [vmem:[#allocation29_spill] sm:$0xff] %v10162_v59  ;;  %v10164_v27 = vpop.f32.mrf.mxu0  ;;  %v5077_v50 = vld [vmem:[#allocation2 + $0x128] sm:$0x1]  ;;  %v5202_v29 = vld [vmem:[#allocation2 + $0x130] sm:$0xf] }
 0x2e9   : > { %v5138_v46 = vmax.bf16 %v5074_v49, %v5010_v37  ;;  %10888 = vst [vmem:[#allocation30_spill] sm:$0xff] %v10164_v27  ;;  %v5518_v24 = vmax.bf16 %v5454_v18, %v5390_v44  ;;  %v5519_v54 = vmax.bf16 %v5455_v61, %v5391_v23  ;;  %v5520_v63 = vmax.bf16 %v5456_v36, %v5392_v13  ;;  %v10176_v61 = vpop.f32.mrf.mxu1  ;;  %v5331_v27 = vld [vmem:[#allocation2 + $0x148] sm:$0xf]  ;;  %v5332_v14 = vld [vmem:[#allocation2 + $0x14c] sm:$0xf] }
 0x2ea   : > { %v6319_v11 = vmax.f32 %v6143_v5, %v6213_v17  ;;  %v5521_v38 = vmax.bf16 %v5457_v33, %v5393_v62  ;;  %v6357_v45 = vpack.c.bf16 %v6321_v8, %v6321_v8  ;;  %v5139_v28 = vmax.bf16 %v10158_v40, %v10150_v43  ;;  %v10170_v49 = vpop.f32.mrf.mxu0  ;;  %10890 = vst [vmem:[#allocation32_spill] sm:$0xff] %v10176_v61 }
 0x2eb   : > { %v5140_v17 = vmax.bf16 %v10160_v60, %v10156_v32  ;;  %10889 = vst [vmem:[#allocation31_spill] sm:$0xff] %v10170_v49  ;;  %v5582_v37 = vunpack.c.l.bf16 %v5518_v24  ;;  %v10172_v2 = vunpack.c.l.bf16 %v5519_v54  ;;  %v5584_v18 = vunpack.c.l.bf16 %v5520_v63  ;;  %v5203_v54 = vld [vmem:[#allocation2 + $0x134] sm:$0xf] }
 0x2ec   : > { %v6356_v4 = vpack.c.bf16 %v6320_v48, %v6319_v11  ;;  %v5585_v5 = vunpack.c.l.bf16 %v5521_v38  ;;  %v6464_v10 = vrot.slane %v6357_v45, 3  ;;  %v5141_v35 = vmax.bf16 %v5077_v50, %v5013_v7  ;;  %v10178_v36 = vpop.f32.mrf.mxu0  ;;  %v5330_v45 = vld [vmem:[#allocation2 + $0x144] sm:$0xf] }
 0x2ed   : > { %v10174_v47 = vmax.bf16 %v5202_v29, %v5138_v46  ;;  %10891 = vst [vmem:[#allocation33_spill] sm:$0xff] %v10178_v36  ;;  %v5706_v43 = vrot.slane %v5582_v37, 1  ;;  %v5707_v33 = vrot.slane %v10172_v2, 1  ;;  %v5709_v44 = vrot.slane %v5584_v18, 1  ;;  %v5204_v29 = vld [vmem:[#allocation2 + $0x138] sm:$0xf] }
 0x2ee   : > { %v6463_v13 = vrot.slane %v6356_v4, 3  ;;  %v5858_v23 = vrot.slane %v10172_v2, 2  ;;  %v5859_v32 = vrot.slane %v5584_v18, 2  ;;  %v6042_v40 = vrot.slane %v10172_v2, 3  ;;  %v10184_v11 = vpop.f32.mrf.mxu0  ;;  %v5205_v4 = vld [vmem:[#allocation2 + $0x13c] sm:$0x1] }
 0x2ef   : > { %v6043_v60 = vrot.slane %v5584_v18, 3  ;;  %10892 = vst [vmem:[#allocation34_spill] sm:$0xff] %v10184_v11  ;;  %v5708_v48 = vsel %vm1498_vm4, %v5706_v43, %v5707_v33  ;;  %v5710_v8 = vsel %vm1498_vm4, %v5707_v33, %v5709_v44  ;;  %v5812_v46 = vmax.f32 %v5584_v18, %v5709_v44 }
 0x2f0   : > { %v6465_v62 = vsel %vm1836_vm6, %v6463_v13, %v6464_v10  ;;  %v6045_v24 = vrot.slane %v5585_v5, 3  ;;  %v5810_v63 = vmax.f32 %v5582_v37, %v5708_v48  ;;  %v5811_v38 = vmax.f32 %v10172_v2, %v5710_v8  ;;  %v10192_v13 = vpop.f32.mrf.mxu1  ;;  %v10194_v10 = vpop.f32.mrf.mxu0  ;;  %v5333_v37 = vld [vmem:[#allocation2 + $0x150] sm:$0x1]  ;;  %v5458_v48 = vld [vmem:[#allocation2 + $0x158] sm:$0xf] }
 0x2f1   : > { %7844 = vmatmul.mubr.msk.bf16.gmra.mxu1 %vm494_vm3, %v6465_v62  ;;  %v5860_v7 = vsel %vm1675_vm5, %v5858_v23, %v5859_v32  ;;  %v6044_v50 = vsel %vm1836_vm6, %v6042_v40, %v6043_v60  ;;  %10893 = vst [vmem:[#allocation35_spill] sm:$0xff] %v10192_v13  ;;  %10894 = vst [vmem:[#allocation36_spill] sm:$0xff] %v10194_v10  ;;  %v5956_v43 = vmax.f32 %v5812_v46, %v5859_v32  ;;  %v5014_v46 = vld [vmem:[#allocation2 + $0x11c] sm:$0xf] }
 0x2f2   : > { %v6046_v33 = vsel %vm1836_vm6, %v6043_v60, %v6045_v24  ;;  %v6218_v44 = vrot.slane %v10172_v2, 4  ;;  %v6219_v62 = vrot.slane %v5584_v18, 4  ;;  %v5954_v8 = vmax.f32 %v5810_v63, %v5858_v23  ;;  %v10198_v61 = vpop.f32.mrf.mxu0  ;;  %v10201_v60 = vld [vmem:[#allocation2 + $0x120] sm:$0xf]  ;;  %v5078_v2 = vld [vmem:[#allocation2 + $0x130] sm:$0xf] }
 0x2f3   : > { %v5955_v11 = vmax.f32 %v5811_v38, %v5860_v7  ;;  %v6221_v36 = vrot.slane %v5585_v5, 4  ;;  %v5267_v49 = vmax.bf16 %v5203_v54, %v5139_v28  ;;  %10895 = vst [vmem:[#allocation37_spill] sm:$0xff] %v10198_v61  ;;  %v6148_v59 = vmax.f32 %v5956_v43, %v6046_v33  ;;  %v5459_v28 = vld [vmem:[#allocation2 + $0x15c] sm:$0xf]  ;;  %v5460_v54 = vld [vmem:[#allocation2 + $0x160] sm:$0xf]  ;;  %v10205_v38 = vpop.f32.mrf.mxu1 }
 0x2f4   : > { %v6220_v13 = vsel %vm2013_vm7, %v6218_v44, %v6219_v62  ;;  %v5268_v10 = vmax.bf16 %v5204_v29, %v5140_v17  ;;  %v5269_v32 = vmax.bf16 %v5205_v4, %v5141_v35  ;;  %v6146_v18 = vmax.f32 %v5954_v8, %v6042_v40  ;;  %v5461_v63 = vld [vmem:[#allocation2 + $0x164] sm:$0x1]  ;;  %10896 = vst [vmem:[#allocation38_spill] sm:$0xff] %v10205_v38  ;;  %v10207_v7 = vpop.f32.mrf.mxu0  ;;  %v5079_v33 = vld [vmem:[#allocation2 + $0x134] sm:$0xf] }
 0x2f5   : > { %v6147_v24 = vmax.f32 %v5955_v11, %v6044_v50  ;;  %v6222_v23 = vsel %vm2013_vm7, %v6219_v62, %v6221_v36  ;;  %v5394_v5 = vmax.bf16 %v5330_v45, %v10174_v47  ;;  %10897 = vst [vmem:[#allocation39_spill] sm:$0xff] %v10207_v7  ;;  %v5395_v17 = vmax.bf16 %v5331_v27, %v5267_v49  ;;  %v10209_v4 = vld [vmem:[#allocation2 + $0x124] sm:$0xf]  ;;  %v5080_v40 = vld [vmem:[#allocation2 + $0x138] sm:$0xf] }
 0x2f6   : > { %v6324_v43 = vmax.f32 %v6148_v59, %v6222_v23  ;;  %v5396_v35 = vmax.bf16 %v5332_v14, %v5268_v10  ;;  %v5397_v29 = vmax.bf16 %v5333_v37, %v5269_v32  ;;  %v6322_v11 = vmax.f32 %v6146_v18, %v6218_v44  ;;  %v10211_v47 = vpop.f32.mrf.mxu0  ;;  %v5081_v7 = vld [vmem:[#allocation2 + $0x13c] sm:$0x1]  ;;  %v5206_v59 = vld [vmem:[#allocation2 + $0x144] sm:$0xf]  ;;  %v10215_v37 = vpop.f32.mrf.mxu1 }
 0x2f7   : > { %v6323_v50 = vmax.f32 %v6147_v24, %v6220_v13  ;;  %v5522_v36 = vmax.bf16 %v5458_v48, %v5394_v5  ;;  %v5142_v62 = vmax.bf16 %v5078_v2, %v5014_v46  ;;  %10898 = vst [vmem:[#allocation40_spill] sm:$0xff] %v10211_v47  ;;  %v5523_v8 = vmax.bf16 %v5459_v28, %v5395_v17  ;;  %v10245_v47 = vld [vmem:[#allocation2 + $0x144] sm:$0xf] }
 0x2f8   : > { %v6359_v45 = vpack.c.bf16 %v6324_v43, %v6324_v43  ;;  %v5524_v61 = vmax.bf16 %v5460_v54, %v5396_v35  ;;  %v5525_v38 = vmax.bf16 %v5461_v63, %v5397_v29  ;;  %v5143_v49 = vmax.bf16 %v5079_v33, %v10201_v60  ;;  %10899 = vst [vmem:[#allocation41_spill] sm:$0xff] %v10215_v37  ;;  %v10217_v13 = vpop.f32.mrf.mxu0 }
 0x2f9   : > { %v6358_v27 = vpack.c.bf16 %v6323_v50, %v6322_v11  ;;  %v5586_v14 = vunpack.c.l.bf16 %v5522_v36  ;;  %v5144_v10 = vmax.bf16 %v5080_v40, %v10209_v4  ;;  %10900 = vst [vmem:[#allocation42_spill] sm:$0xff] %v10217_v13  ;;  %v10219_v48 = vunpack.c.l.bf16 %v5523_v8  ;;  %v5207_v40 = vld [vmem:[#allocation2 + $0x148] sm:$0xf]  ;;  %v5208_v11 = vld [vmem:[#allocation2 + $0x14c] sm:$0xf] }
 0x2fa   : > { %v6467_v44 = vrot.slane %v6359_v45, 3  ;;  %v5588_v32 = vunpack.c.l.bf16 %v5524_v61  ;;  %v5589_v46 = vunpack.c.l.bf16 %v5525_v38  ;;  %v5145_v24 = vmax.bf16 %v5081_v7, %v5017_v9  ;;  %v10223_v5 = vpop.f32.mrf.mxu0  ;;  %v10229_v38 = vpop.f32.mrf.mxu1  ;;  %v5209_v8 = vld [vmem:[#allocation2 + $0x150] sm:$0x1]  ;;  %v5337_v13 = vld [vmem:[#allocation2 + $0x164] sm:$0x1] }
 0x2fb   : > { %v6466_v2 = vrot.slane %v6358_v27, 3  ;;  %v5711_v18 = vrot.slane %v5586_v14, 1  ;;  %v10221_v23 = vmax.bf16 %v5206_v59, %v5142_v62  ;;  %10901 = vst [vmem:[#allocation43_spill] sm:$0xff] %v10223_v5  ;;  %v5712_v60 = vrot.slane %v10219_v48, 1  ;;  %10902 = vst [vmem:[#allocation44_spill] sm:$0xff] %v10229_v38 }
 0x2fc   : > { %v5714_v28 = vrot.slane %v5588_v32, 1  ;;  %v5861_v54 = vrot.slane %v10219_v48, 2  ;;  %v5862_v63 = vrot.slane %v5588_v32, 2  ;;  %v6047_v17 = vrot.slane %v10219_v48, 3  ;;  %v10231_v29 = vpop.f32.mrf.mxu0  ;;  %v5334_v59 = vld [vmem:[#allocation2 + $0x158] sm:$0xf] }
 0x2fd   : > { %v6468_v43 = vsel %vm1836_vm6, %v6466_v2, %v6467_v44  ;;  %v6048_v35 = vrot.slane %v5588_v32, 3  ;;  %v6050_v61 = vrot.slane %v5589_v46, 3  ;;  %10903 = vst [vmem:[#allocation45_spill] sm:$0xff] %v10231_v29  ;;  %v5713_v9 = vsel %vm1498_vm4, %v5711_v18, %v5712_v60  ;;  %v10240_v27 = vld [vmem:[#allocation2 + $0x130] sm:$0xf] }
 0x2fe   : > { %7847 = vmatprep.mubr.msk.bf16.mxu1 %vm494_vm3, %v6468_v43  ;;  %v5715_v7 = vsel %vm1498_vm4, %v5712_v60, %v5714_v28  ;;  %v5815_v4 = vmax.f32 %v5588_v32, %v5714_v28  ;;  %v5863_v33 = vsel %vm1675_vm5, %v5861_v54, %v5862_v63  ;;  %v5813_v50 = vmax.f32 %v5586_v14, %v5713_v9  ;;  %v10242_v44 = vpop.f32.mrf.mxu0  ;;  %v5335_v43 = vld [vmem:[#allocation2 + $0x15c] sm:$0xf]  ;;  %v5336_v5 = vld [vmem:[#allocation2 + $0x160] sm:$0xf] }
 0x2ff   : > { %v5814_v36 = vmax.f32 %v10219_v48, %v5715_v7  ;;  %v6049_v62 = vsel %vm1836_vm6, %v6047_v17, %v6048_v35  ;;  %v6051_v45 = vsel %vm1836_vm6, %v6048_v35, %v6050_v61  ;;  %10904 = vst [vmem:[#allocation46_spill] sm:$0xff] %v10242_v44  ;;  %v6223_v18 = vrot.slane %v10219_v48, 4  ;;  %v10247_v35 = vpop.f32.mrf.mxu1  ;;  %v5462_v48 = vld [vmem:[#allocation2 + $0x16c] sm:$0xf] }
 0x300   : > { %v5959_v2 = vmax.f32 %v5815_v4, %v5862_v63  ;;  %v6224_v60 = vrot.slane %v5588_v32, 4  ;;  %v6226_v28 = vrot.slane %v5589_v46, 4  ;;  %v5957_v29 = vmax.f32 %v5813_v50, %v5861_v54  ;;  %10905 = vst [vmem:[#allocation47_spill] sm:$0xff] %v10247_v35  ;;  %v5463_v32 = vld [vmem:[#allocation2 + $0x170] sm:$0xf] }
 0x301   : > { %v5958_v14 = vmax.f32 %v5814_v36, %v5863_v33  ;;  %v5271_v9 = vmax.bf16 %v5207_v40, %v5143_v49  ;;  %v5272_v7 = vmax.bf16 %v5208_v11, %v5144_v10  ;;  %v5273_v4 = vmax.bf16 %v5209_v8, %v5145_v24  ;;  %v10251_v46 = vld [vmem:[#allocation2 + $0x134] sm:$0xf]  ;;  %v5465_v11 = vld [vmem:[#allocation2 + $0x178] sm:$0x1]  ;;  %v10254_v50 = vld [vmem:[#allocation2 + $0x148] sm:$0xf]  ;;  %v10256_v36 = vpop.f32.mrf.mxu0 }
 0x302   : > { %v6151_v61 = vmax.f32 %v5959_v2, %v6051_v45  ;;  %v6225_v38 = vsel %vm2013_vm7, %v6223_v18, %v6224_v60  ;;  %v6227_v63 = vsel %vm2013_vm7, %v6224_v60, %v6226_v28  ;;  %v6149_v54 = vmax.f32 %v5957_v29, %v6047_v17  ;;  %v5464_v40 = vld [vmem:[#allocation2 + $0x174] sm:$0xf]  ;;  %10906 = vst [vmem:[#allocation48_spill] sm:$0xff] %v10256_v36  ;;  %v5020_v60 = vld [vmem:[#allocation2 + $0x138] sm:$0xf] }
 0x303   : > { %v6150_v33 = vmax.f32 %v5958_v14, %v6049_v62  ;;  %v5398_v49 = vmax.bf16 %v5334_v59, %v10221_v23  ;;  %v5399_v10 = vmax.bf16 %v5335_v43, %v5271_v9  ;;  %v5400_v2 = vmax.bf16 %v5336_v5, %v5272_v7  ;;  %v5084_v24 = vld [vmem:[#allocation2 + $0x14c] sm:$0xf]  ;;  %v5021_v23 = vld [vmem:[#allocation2 + $0x13c] sm:$0x1]  ;;  %v5085_v59 = vld [vmem:[#allocation2 + $0x150] sm:$0x1]  ;;  %v10260_v43 = vpop.f32.mrf.mxu1 }
 0x304   : > { %v6327_v45 = vmax.f32 %v6151_v61, %v6227_v63  ;;  %v5401_v44 = vmax.bf16 %v5337_v13, %v5273_v4  ;;  %v5146_v8 = vmax.bf16 %v10245_v47, %v10240_v27  ;;  %v6325_v28 = vmax.f32 %v6149_v54, %v6223_v18  ;;  %10907 = vst [vmem:[#allocation49_spill] sm:$0xff] %v10260_v43  ;;  %v10264_v4 = vpop.f32.mrf.mxu0 }
 0x305   : > { %v6326_v17 = vmax.f32 %v6150_v33, %v6225_v38  ;;  %v5526_v29 = vmax.bf16 %v5462_v48, %v5398_v49  ;;  %v5527_v62 = vmax.bf16 %v5463_v32, %v5399_v10  ;;  %v5528_v9 = vmax.bf16 %v5464_v40, %v5400_v2  ;;  %10908 = vst [vmem:[#allocation50_spill] sm:$0xff] %v10264_v4  ;;  %v10266_v49 = vpop.f32.mrf.mxu1 }
 0x306   : > { %v6361_v14 = vpack.c.bf16 %v6327_v45, %v6327_v45  ;;  %v5529_v35 = vmax.bf16 %v5465_v11, %v5401_v44  ;;  %v5147_v5 = vmax.bf16 %v10254_v50, %v10251_v46  ;;  %v5148_v63 = vmax.bf16 %v5084_v24, %v5020_v60  ;;  %10909 = vst [vmem:[#allocation51_spill] sm:$0xff] %v10266_v49  ;;  %v5210_v60 = vld [vmem:[#allocation2 + $0x158] sm:$0xf]  ;;  %v10270_v24 = vpop.f32.mrf.mxu0 }
 0x307   : > { %v6360_v13 = vpack.c.bf16 %v6326_v17, %v6325_v28  ;;  %v5590_v7 = vunpack.c.l.bf16 %v5526_v29  ;;  %v5591_v61 = vunpack.c.l.bf16 %v5527_v62  ;;  %v5592_v38 = vunpack.c.l.bf16 %v5528_v9  ;;  %10910 = vst [vmem:[#allocation52_spill] sm:$0xff] %v10270_v24  ;;  %v5211_v62 = vld [vmem:[#allocation2 + $0x15c] sm:$0xf] }
 0x308   : > { %v6470_v47 = vrot.slane %v6361_v14, 3  ;;  %v5593_v27 = vunpack.c.l.bf16 %v5529_v35  ;;  %v5149_v18 = vmax.bf16 %v5085_v59, %v5021_v23  ;;  %v5212_v23 = vld [vmem:[#allocation2 + $0x160] sm:$0xf]  ;;  %v5275_v49 = vmax.bf16 %v5211_v62, %v5147_v5  ;;  %v10280_v43 = vpop.f32.mrf.mxu0 }
 0x309   : > { %v6469_v48 = vrot.slane %v6360_v13, 3  ;;  %v5716_v32 = vrot.slane %v5590_v7, 1  ;;  %v5717_v54 = vrot.slane %v5591_v61, 1  ;;  %v5864_v33 = vrot.slane %v5591_v61, 2 }
 0x30a   : > { %v5719_v44 = vrot.slane %v5592_v38, 1  ;;  %v5865_v10 = vrot.slane %v5592_v38, 2  ;;  %v6052_v40 = vrot.slane %v5591_v61, 3  ;;  %v6053_v46 = vrot.slane %v5592_v38, 3 }
 0x30b   : > { %v6471_v11 = vsel %vm1836_vm6, %v6469_v48, %v6470_v47  ;;  %v5718_v50 = vsel %vm1498_vm4, %v5716_v32, %v5717_v54  ;;  %v6055_v45 = vrot.slane %v5593_v27, 3  ;;  %v6228_v2 = vrot.slane %v5591_v61, 4  ;;  %v5213_v47 = vld [vmem:[#allocation2 + $0x164] sm:$0x1]  ;;  %v5338_v48 = vld [vmem:[#allocation2 + $0x16c] sm:$0xf]  ;;  %v10277_v32 = vpop.f32.mrf.mxu1 }
 0x30c   : > { %7848 = vmatmul.mubr.msk.bf16.gmra.mxu1 %vm494_vm3, %v6471_v11  ;;  %v5720_v35 = vsel %vm1498_vm4, %v5717_v54, %v5719_v44  ;;  %v5816_v28 = vmax.f32 %v5590_v7, %v5718_v50  ;;  %v5818_v17 = vmax.f32 %v5592_v38, %v5719_v44  ;;  %v5866_v29 = vsel %vm1675_vm5, %v5864_v33, %v5865_v10  ;;  %v5339_v7 = vld [vmem:[#allocation2 + $0x170] sm:$0xf]  ;;  %v5340_v44 = vld [vmem:[#allocation2 + $0x174] sm:$0xf] }
 0x30d   : > { %v5817_v59 = vmax.f32 %v5591_v61, %v5720_v35  ;;  %v6054_v14 = vsel %vm1836_vm6, %v6052_v40, %v6053_v46  ;;  %v6056_v9 = vsel %vm1836_vm6, %v6053_v46, %v6055_v45  ;;  %v6229_v13 = vrot.slane %v5592_v38, 4  ;;  %10911 = vst [vmem:[#allocation53_spill] sm:$0xff] %v10277_v32  ;;  %v5341_v35 = vld [vmem:[#allocation2 + $0x178] sm:$0x1]  ;;  %v5466_v32 = vld [vmem:[#allocation2 + $0x180] sm:$0xf] }
 0x30e   : > { %v5960_v24 = vmax.f32 %v5816_v28, %v5864_v33  ;;  %v5962_v11 = vmax.f32 %v5818_v17, %v5865_v10  ;;  %v6231_v4 = vrot.slane %v5593_v27, 4  ;;  %v5274_v54 = vmax.bf16 %v5210_v60, %v5146_v8  ;;  %v5467_v33 = vld [vmem:[#allocation2 + $0x184] sm:$0xf]  ;;  %v5468_v10 = vld [vmem:[#allocation2 + $0x188] sm:$0xf] }
 0x30f   : > { %v5961_v50 = vmax.f32 %v5817_v59, %v5866_v29  ;;  %v6230_v36 = vsel %vm2013_vm7, %v6228_v2, %v6229_v13  ;;  %v5276_v61 = vmax.bf16 %v5212_v23, %v5148_v63  ;;  %v5277_v37 = vmax.bf16 %v5213_v47, %v5149_v18  ;;  %v5469_v17 = vld [vmem:[#allocation2 + $0x18c] sm:$0x1]  ;;  %v10283_v29 = vpop.f32.mrf.mxu1 }
 0x310   : > { %v6152_v46 = vmax.f32 %v5960_v24, %v6052_v40  ;;  %v6154_v38 = vmax.f32 %v5962_v11, %v6056_v9  ;;  %v6232_v45 = vsel %vm2013_vm7, %v6229_v13, %v6231_v4  ;;  %v5402_v8 = vmax.bf16 %v5338_v48, %v5274_v54  ;;  %v10285_v4 = vpop.f32.mrf.mxu0 }
 0x311   : > { %v6153_v27 = vmax.f32 %v5961_v50, %v6054_v14  ;;  %v5403_v60 = vmax.bf16 %v5339_v7, %v5275_v49  ;;  %v5404_v28 = vmax.bf16 %v5340_v44, %v5276_v61  ;;  %v5405_v62 = vmax.bf16 %v5341_v35, %v5277_v37  ;;  %v10325_v37 = vpop.f32.mrf.mxu1 }
 0x312   : > { %v6328_v5 = vmax.f32 %v6152_v46, %v6228_v2  ;;  %v6330_v63 = vmax.f32 %v6154_v38, %v6232_v45  ;;  %v5530_v40 = vmax.bf16 %v5466_v32, %v5402_v8  ;;  %v8054_v48 = vmov 0.0   ;;  %v10330_v44 = vpop.f32.mrf.mxu0 }
 0x313   : > { %v6329_v23 = vmax.f32 %v6153_v27, %v6230_v36  ;;  %v5531_v24 = vmax.bf16 %v5467_v33, %v5403_v60  ;;  %v5532_v59 = vmax.bf16 %v5468_v10, %v5404_v28  ;;  %v10287_v9 = vmax.bf16 %v5469_v17, %v5405_v62  ;;  %217 = vst.msk [vmem:[#allocation3 + $0x10] sm:$0xff] %vm214_vm10, %v8054_v48  ;;  %v10340_v27 = vpop.f32.mrf.mxu1 }
 0x314   : > { %v6363_v18 = vpack.c.bf16 %v6330_v63, %v6330_v63  ;;  %v5594_v13 = vunpack.c.l.bf16 %v5530_v40  ;;  %215 = vst.msk [vmem:[#allocation3] sm:$0xff] %vm214_vm10, %v8054_v48  ;;  %216 = vst.msk [vmem:[#allocation3 + $0x8] sm:$0xff] %vm214_vm10, %v8054_v48  ;;  %v10348_v40 = vpop.f32.mrf.mxu0 }
 0x315   : > { %v6362_v14 = vpack.c.bf16 %v6329_v23, %v6328_v5  ;;  %v10289_v49 = vunpack.c.l.bf16 %v5531_v24  ;;  %v10291_v47 = vunpack.c.l.bf16 %v5532_v59  ;;  %218 = vst.msk [vmem:[#allocation3 + $0x18] sm:$0xff] %vm214_vm10, %v8054_v48  ;;  %219 = vst.msk [vmem:[#allocation3 + $0x20] sm:$0xff] %vm214_vm10, %v8054_v48  ;;  %v5597_v2 = vunpack.c.l.bf16 %v10287_v9 }
 0x316   : > { %220 = vst.msk [vmem:[#allocation3 + $0x28] sm:$0xff] %vm214_vm10, %v8054_v48  ;;  %221 = vst.msk [vmem:[#allocation3 + $0x30] sm:$0xff] %vm214_vm10, %v8054_v48  ;;  %v6473_v36 = vrot.slane %v6363_v18, 3  ;;  %v5721_v11 = vrot.slane %v5594_v13, 1 }
 0x317   : > { %222 = vst.msk [vmem:[#allocation3 + $0x38] sm:$0xff] %vm214_vm10, %v8054_v48  ;;  %223 = vst.msk [vmem:[#allocation3 + $0x40] sm:$0xff] %vm214_vm10, %v8054_v48  ;;  %v6472_v32 = vrot.slane %v6362_v14, 3  ;;  %v5722_v54 = vrot.slane %v10289_v49, 1  ;;  %v5724_v7 = vrot.slane %v10291_v47, 1  ;;  %v5867_v50 = vrot.slane %v10289_v49, 2 }
 0x318   : > { %224 = vst.msk [vmem:[#allocation3 + $0x48] sm:$0xff] %vm214_vm10, %v8054_v48  ;;  %225 = vst.msk [vmem:[#allocation3 + $0x50] sm:$0xff] %vm214_vm10, %v8054_v48  ;;  %v5868_v61 = vrot.slane %v10291_v47, 2  ;;  %v6057_v35 = vrot.slane %v10289_v49, 3  ;;  %v6058_v46 = vrot.slane %v10291_v47, 3  ;;  %v6060_v63 = vrot.slane %v5597_v2, 3 }
 0x319   : > { %226 = vst.msk [vmem:[#allocation3 + $0x58] sm:$0xff] %vm214_vm10, %v8054_v48  ;;  %227 = vst.msk [vmem:[#allocation3 + $0x60] sm:$0xff] %vm214_vm10, %v8054_v48  ;;  %v6474_v38 = vsel %vm1836_vm6, %v6472_v32, %v6473_v36  ;;  %v5723_v45 = vsel %vm1498_vm4, %v5721_v11, %v5722_v54  ;;  %v5725_v33 = vsel %vm1498_vm4, %v5722_v54, %v5724_v7  ;;  %v6233_v62 = vrot.slane %v10289_v49, 4 }
 0x31a   : > { %228 = vst.msk [vmem:[#allocation3 + $0x68] sm:$0xff] %vm214_vm10, %v8054_v48  ;;  %229 = vst.msk [vmem:[#allocation3 + $0x70] sm:$0xff] %vm214_vm10, %v8054_v48  ;;  %v5821_v10 = vmax.f32 %v10291_v47, %v5724_v7  ;;  %7851 = vmatprep.mubr.msk.bf16.mxu1 %vm494_vm3, %v6474_v38  ;;  %v5819_v8 = vmax.f32 %v5594_v13, %v5723_v45  ;;  %v5820_v60 = vmax.f32 %v10289_v49, %v5725_v33  ;;  %v383_v9 = vld [vmem:[#allocation3 + $0x10] sm:$0xff] }
 0x31b   : > { %230 = vst.msk [vmem:[#allocation3 + $0x78] sm:$0xff] %vm214_vm10, %v8054_v48  ;;  %231 = vst.msk [vmem:[#allocation3 + $0x80] sm:$0xff] %vm214_vm10, %v8054_v48  ;;  %v5869_v28 = vsel %vm1675_vm5, %v5867_v50, %v5868_v61  ;;  %v6059_v17 = vsel %vm1836_vm6, %v6057_v35, %v6058_v46  ;;  %v6234_v23 = vrot.slane %v10291_v47, 4  ;;  %v6236_v18 = vrot.slane %v5597_v2, 4  ;;  %v381_v14 = vld [vmem:[#allocation3] sm:$0xff]  ;;  %v382_v54 = vld [vmem:[#allocation3 + $0x8] sm:$0xff]  ;;  %v10354_v47 = vpop.f32.mrf.mxu1 }
 0x31c   : > { %232 = vst.msk [vmem:[#allocation3 + $0x88] sm:$0xff] %vm214_vm10, %v8054_v48  ;;  %233 = vst.msk [vmem:[#allocation3 + $0x90] sm:$0xff] %vm214_vm10, %v8054_v48  ;;  %v5965_v5 = vmax.f32 %v5821_v10, %v5868_v61  ;;  %v5963_v24 = vmax.f32 %v5819_v8, %v5867_v50  ;;  %v5964_v59 = vmax.f32 %v5820_v60, %v5869_v28  ;;  %v384_v13 = vld [vmem:[#allocation3 + $0x18] sm:$0xff]  ;;  %v385_v7 = vld [vmem:[#allocation3 + $0x20] sm:$0xff] }
 0x31d   : > { %234 = vst.msk [vmem:[#allocation3 + $0x98] sm:$0xff] %vm214_vm10, %v8054_v48  ;;  %235 = vst.msk [vmem:[#allocation3 + $0xa0] sm:$0xff] %vm214_vm10, %v8054_v48  ;;  %v6235_v36 = vsel %vm2013_vm7, %v6233_v62, %v6234_v23  ;;  %v710_v32 = vadd.f32 %v9888_v12, %v383_v9  ;;  %v708_v11 = vadd.f32 %v9896_v53, %v381_v14  ;;  %v387_v49 = vld [vmem:[#allocation3 + $0x30] sm:$0xff]  ;;  %v386_v33 = vld [vmem:[#allocation3 + $0x28] sm:$0xff] }
 0x31e   : > { %236 = vst.msk [vmem:[#allocation3 + $0xa8] sm:$0xff] %vm214_vm10, %v8054_v48  ;;  %237 = vst.msk [vmem:[#allocation3 + $0xb0] sm:$0xff] %vm214_vm10, %v8054_v48  ;;  %v6155_v61 = vmax.f32 %v5963_v24, %v6057_v35  ;;  %v6156_v50 = vmax.f32 %v5964_v59, %v6059_v17  ;;  %v6237_v2 = vsel %vm2013_vm7, %v6234_v23, %v6236_v18  ;;  %v388_v45 = vld [vmem:[#allocation3 + $0x38] sm:$0xff]  ;;  %v389_v35 = vld [vmem:[#allocation3 + $0x40] sm:$0xff]  ;;  %v10363_v17 = vpop.f32.mrf.mxu1 }
 0x31f   : > { %238 = vst.msk [vmem:[#allocation3 + $0xb8] sm:$0xff] %vm214_vm10, %v8054_v48  ;;  %239 = vst.msk [vmem:[#allocation3 + $0xc0] sm:$0xff] %vm214_vm10, %v8054_v48  ;;  %v391_v10 = vld [vmem:[#allocation3 + $0x50] sm:$0xff]  ;;  %v711_v12 = vadd.f32 %v9905_v19, %v384_v13  ;;  %v709_v53 = vadd.f32 %v9915_v20, %v382_v54  ;;  %v712_v8 = vadd.f32 %v9933_v52, %v385_v7  ;;  %v390_v28 = vld [vmem:[#allocation3 + $0x48] sm:$0xff] }
 0x320   : > { %240 = vst.msk [vmem:[#allocation3 + $0xc8] sm:$0xff] %vm214_vm10, %v8054_v48  ;;  %241 = vst.msk [vmem:[#allocation3 + $0xd0] sm:$0xff] %vm214_vm10, %v8054_v48  ;;  %v392_v60 = vld [vmem:[#allocation3 + $0x58] sm:$0xff]  ;;  %v6332_v23 = vmax.f32 %v6156_v50, %v6235_v36  ;;  %v715_v59 = vadd.f32 %v9943_v3, %v388_v45  ;;  %v393_v19 = vld [vmem:[#allocation3 + $0x60] sm:$0xff]  ;;  %v713_v20 = vadd.f32 %v9951_v57, %v386_v33  ;;  %v10387_v50 = vpop.f32.mrf.mxu1 }
 0x321   : > { %242 = vst.msk [vmem:[#allocation3 + $0xd8] sm:$0xff] %vm214_vm10, %v8054_v48  ;;  %243 = vst.msk [vmem:[#allocation3 + $0xe0] sm:$0xff] %vm214_vm10, %v8054_v48  ;;  %v395_v18 = vld [vmem:[#allocation3 + $0x70] sm:$0xff]  ;;  %v716_v52 = vadd.f32 %v9964_v26, %v389_v35  ;;  %v394_v3 = vld [vmem:[#allocation3 + $0x68] sm:$0xff] }
 0x322   : > { %244 = vst.msk [vmem:[#allocation3 + $0xe8] sm:$0xff] %vm214_vm10, %v8054_v48  ;;  %245 = vst.msk [vmem:[#allocation3 + $0xf0] sm:$0xff] %vm214_vm10, %v8054_v48  ;;  %v396_v9 = vld [vmem:[#allocation3 + $0x78] sm:$0xff]  ;;  %v397_v13 = vld [vmem:[#allocation3 + $0x80] sm:$0xff] }
 0x323   : > { %246 = vst.msk [vmem:[#allocation3 + $0xf8] sm:$0xff] %vm214_vm10, %v8054_v48  ;;  %v6061_v48 = vsel %vm1836_vm6, %v6058_v46, %v6060_v63  ;;  %743 = vst.msk [vmem:[#allocation3 + $0x10] sm:$0xff] %vm214_vm10, %v710_v32  ;;  %v714_v46 = vadd.f32 %v9924_v25, %v387_v49  ;;  %v6331_v63 = vmax.f32 %v6155_v61, %v6233_v62  ;;  %v399_v14 = vld [vmem:[#allocation3 + $0x90] sm:$0xff]  ;;  %v398_v49 = vld [vmem:[#allocation3 + $0x88] sm:$0xff] }
 0x324   : > { %v6157_v38 = vmax.f32 %v5965_v5, %v6061_v48  ;;  %741 = vst.msk [vmem:[#allocation3] sm:$0xff] %vm214_vm10, %v708_v11  ;;  %v10365_v5 = vpop.f32.mrf.mxu0  ;;  %744 = vst.msk [vmem:[#allocation3 + $0x18] sm:$0xff] %vm214_vm10, %v711_v12  ;;  %v718_v25 = vadd.f32 %v9958_v0, %v391_v10  ;;  %v719_v62 = vadd.f32 %v9973_v55, %v392_v60  ;;  %v400_v54 = vld [vmem:[#allocation3 + $0x98] sm:$0xff] }
 0x325   : > { %742 = vst.msk [vmem:[#allocation3 + $0x8] sm:$0xff] %vm214_vm10, %v709_v53  ;;  %747 = vst.msk [vmem:[#allocation3 + $0x30] sm:$0xff] %vm214_vm10, %v714_v46  ;;  %v6364_v48 = vpack.c.bf16 %v6332_v23, %v6331_v63  ;;  %v717_v32 = vadd.f32 %v9979_v51, %v390_v28  ;;  %v722_v11 = vadd.f32 %v9989_v41, %v395_v18  ;;  %v403_v57 = vld [vmem:[#allocation3 + $0xb0] sm:$0xff]  ;;  %v401_v41 = vld [vmem:[#allocation3 + $0xa0] sm:$0xff] }
 0x326   : > { %v6333_v24 = vmax.f32 %v6157_v38, %v6237_v2  ;;  %745 = vst.msk [vmem:[#allocation3 + $0x20] sm:$0xff] %vm214_vm10, %v712_v8  ;;  %748 = vst.msk [vmem:[#allocation3 + $0x38] sm:$0xff] %vm214_vm10, %v715_v59  ;;  %v720_v0 = vadd.f32 %v9999_v31, %v393_v19  ;;  %v723_v26 = vadd.f32 %v10009_v42, %v396_v9  ;;  %v404_v7 = vld [vmem:[#allocation3 + $0xb8] sm:$0xff]  ;;  %v402_v61 = vld [vmem:[#allocation3 + $0xa8] sm:$0xff]  ;;  %v10389_v38 = vpop.f32.mrf.mxu0 }
 0x327   : > { %746 = vst.msk [vmem:[#allocation3 + $0x28] sm:$0xff] %vm214_vm10, %v713_v20  ;;  %751 = vst.msk [vmem:[#allocation3 + $0x50] sm:$0xff] %vm214_vm10, %v718_v25  ;;  %v721_v55 = vadd.f32 %v10015_v34, %v394_v3  ;;  %v726_v51 = vadd.f32 %v10022_v56, %v399_v14  ;;  %v6475_v2 = vrot.slane %v6364_v48, 3  ;;  %v724_v31 = vadd.f32 %v10034_v30, %v397_v13  ;;  %v407_v34 = vld [vmem:[#allocation3 + $0xd0] sm:$0xff]  ;;  %v405_v33 = vld [vmem:[#allocation3 + $0xc0] sm:$0xff]  ;;  %v10418_v20 = vpop.f32.mrf.mxu1 }
 0x328   : > { %v6365_v36 = vpack.c.bf16 %v6333_v24, %v6333_v24  ;;  %749 = vst.msk [vmem:[#allocation3 + $0x40] sm:$0xff] %vm214_vm10, %v716_v52  ;;  %752 = vst.msk [vmem:[#allocation3 + $0x58] sm:$0xff] %vm214_vm10, %v719_v62  ;;  %v727_v42 = vadd.f32 %v10044_v58, %v400_v54  ;;  %v408_v56 = vld [vmem:[#allocation3 + $0xd8] sm:$0xff]  ;;  %v725_v10 = vadd.f32 %v10056_v39, %v398_v49  ;;  %v406_v58 = vld [vmem:[#allocation3 + $0xc8] sm:$0xff]  ;;  %v10420_v25 = vpop.f32.mrf.mxu0 }
 0x329   : > { %750 = vst.msk [vmem:[#allocation3 + $0x48] sm:$0xff] %vm214_vm10, %v717_v32  ;;  %755 = vst.msk [vmem:[#allocation3 + $0x70] sm:$0xff] %vm214_vm10, %v722_v11  ;;  %v730_v12 = vadd.f32 %v10062_v1, %v403_v57  ;;  %v728_v53 = vadd.f32 %v10070_v16, %v401_v41  ;;  %v731_v30 = vadd.f32 %v10077_v15, %v404_v7  ;;  %v411_v46 = vld [vmem:[#allocation3 + $0xf0] sm:$0xff]  ;;  %v409_v8 = vld [vmem:[#allocation3 + $0xe0] sm:$0xff] }
 0x32a   : > { %v6476_v45 = vrot.slane %v6365_v36, 3  ;;  %753 = vst.msk [vmem:[#allocation3 + $0x60] sm:$0xff] %vm214_vm10, %v720_v0  ;;  %756 = vst.msk [vmem:[#allocation3 + $0x78] sm:$0xff] %vm214_vm10, %v723_v26  ;;  %v2224_v60 = vld [vmem:[#allocation3 + $0x10] sm:$0xff]  ;;  %v10912_v63 = vld [vmem:[#allocation17_spill] sm:$0xff]  ;;  %v734_v39 = vadd.f32 %v10093_v6, %v407_v34  ;;  %v732_v1 = vadd.f32 %v10103_v21, %v405_v33  ;;  %v735_v19 = vadd.f32 %v10111_v22, %v408_v56 }
 0x32b   : > { %754 = vst.msk [vmem:[#allocation3 + $0x68] sm:$0xff] %vm214_vm10, %v721_v55  ;;  %759 = vst.msk [vmem:[#allocation3 + $0x90] sm:$0xff] %vm214_vm10, %v726_v51  ;;  %v2222_v28 = vld [vmem:[#allocation3] sm:$0xff]  ;;  %v729_v23 = vadd.f32 %v10912_v63, %v402_v61  ;;  %v412_v16 = vld [vmem:[#allocation3 + $0xf8] sm:$0xff] }
 0x32c   : > { %v6477_v35 = vsel %vm1836_vm6, %v6475_v2, %v6476_v45  ;;  %757 = vst.msk [vmem:[#allocation3 + $0x80] sm:$0xff] %vm214_vm10, %v724_v31  ;;  %760 = vst.msk [vmem:[#allocation3 + $0x98] sm:$0xff] %vm214_vm10, %v727_v42  ;;  %v10913_v15 = vld [vmem:[#allocation5_spill] sm:$0xff]  ;;  %v10914_v59 = vld [vmem:[#allocation4_spill] sm:$0xff] }
 0x32d   : > { %7852 = vmatmul.mubr.msk.bf16.gmra.mxu1 %vm494_vm3, %v6477_v35  ;;  %v2551_v24 = vadd.f32 %v10913_v15, %v2224_v60  ;;  %v2549_v18 = vadd.f32 %v10914_v59, %v2222_v28  ;;  %758 = vst.msk [vmem:[#allocation3 + $0x88] sm:$0xff] %vm214_vm10, %v725_v10  ;;  %763 = vst.msk [vmem:[#allocation3 + $0xb0] sm:$0xff] %vm214_vm10, %v730_v12  ;;  %v10915_v6 = vld [vmem:[#allocation20_spill] sm:$0xff]  ;;  %v410_v21 = vld [vmem:[#allocation3 + $0xe8] sm:$0xff]  ;;  %v10448_v60 = vpop.f32.mrf.mxu1  ;;  %v10450_v28 = vpop.f32.mrf.mxu0 }
 0x32e   : > { %761 = vst.msk [vmem:[#allocation3 + $0xa0] sm:$0xff] %vm214_vm10, %v728_v53  ;;  %764 = vst.msk [vmem:[#allocation3 + $0xb8] sm:$0xff] %vm214_vm10, %v731_v30  ;;  %v733_v9 = vadd.f32 %v10915_v6, %v406_v58  ;;  %v2225_v52 = vld [vmem:[#allocation3 + $0x18] sm:$0xff]  ;;  %v2223_v62 = vld [vmem:[#allocation3 + $0x8] sm:$0xff] }
 0x32f   : > { %v2228_v3 = vld [vmem:[#allocation3 + $0x30] sm:$0xff]  ;;  %762 = vst.msk [vmem:[#allocation3 + $0xa8] sm:$0xff] %vm214_vm10, %v729_v23  ;;  %767 = vst.msk [vmem:[#allocation3 + $0xd0] sm:$0xff] %vm214_vm10, %v734_v39  ;;  %v10917_v48 = vld [vmem:[#allocation23_spill] sm:$0xff] }
 0x330   : > { %765 = vst.msk [vmem:[#allocation3 + $0xc0] sm:$0xff] %vm214_vm10, %v732_v1  ;;  %v10916_v14 = vld [vmem:[#allocation22_spill] sm:$0xff]  ;;  %v736_v22 = vadd.f32 %v10917_v48, %v409_v8  ;;  %v10918_v36 = vld [vmem:[#allocation25_spill] sm:$0xff]  ;;  %2583 = vst.msk [vmem:[#allocation3 + $0x10] sm:$0xff] %vm214_vm10, %v2551_v24 }
 0x331   : > { %v738_v13 = vadd.f32 %v10916_v14, %v411_v46  ;;  %v739_v32 = vadd.f32 %v10918_v36, %v412_v16  ;;  %v10919_v11 = vld [vmem:[#allocation26_spill] sm:$0xff]  ;;  %2581 = vst.msk [vmem:[#allocation3] sm:$0xff] %vm214_vm10, %v2549_v18  ;;  %v10920_v49 = vld [vmem:[#allocation7_spill] sm:$0xff]  ;;  %v10922_v55 = vld [vmem:[#allocation8_spill] sm:$0xff] }
 0x332   : > { %v737_v54 = vadd.f32 %v10919_v11, %v410_v21  ;;  %v2552_v57 = vadd.f32 %v10920_v49, %v2225_v52  ;;  %v10921_v0 = vld [vmem:[#allocation6_spill] sm:$0xff]  ;;  %v2555_v51 = vadd.f32 %v10922_v55, %v2228_v3  ;;  %v2226_v41 = vld [vmem:[#allocation3 + $0x20] sm:$0xff]  ;;  %v2229_v7 = vld [vmem:[#allocation3 + $0x38] sm:$0xff]  ;;  %768 = vst.msk [vmem:[#allocation3 + $0xd8] sm:$0xff] %vm214_vm10, %v735_v19 }
 0x333   : > { %v2550_v26 = vadd.f32 %v10921_v0, %v2223_v62  ;;  %766 = vst.msk [vmem:[#allocation3 + $0xc8] sm:$0xff] %vm214_vm10, %v733_v9  ;;  %v10923_v61 = vld [vmem:[#allocation9_spill] sm:$0xff]  ;;  %v10924_v45 = vld [vmem:[#allocation10_spill] sm:$0xff]  ;;  %v2230_v33 = vld [vmem:[#allocation3 + $0x40] sm:$0xff] }
 0x334   : > { %v2553_v2 = vadd.f32 %v10923_v61, %v2226_v41  ;;  %v2556_v31 = vadd.f32 %v10924_v45, %v2229_v7  ;;  %v2227_v42 = vld [vmem:[#allocation3 + $0x28] sm:$0xff]  ;;  %v2232_v34 = vld [vmem:[#allocation3 + $0x50] sm:$0xff]  ;;  %771 = vst.msk [vmem:[#allocation3 + $0xf0] sm:$0xff] %vm214_vm10, %v738_v13  ;;  %769 = vst.msk [vmem:[#allocation3 + $0xe0] sm:$0xff] %vm214_vm10, %v736_v22 }
 0x335   : > { %772 = vst.msk [vmem:[#allocation3 + $0xf8] sm:$0xff] %vm214_vm10, %v739_v32  ;;  %770 = vst.msk [vmem:[#allocation3 + $0xe8] sm:$0xff] %vm214_vm10, %v737_v54  ;;  %v10925_v56 = vld [vmem:[#allocation11_spill] sm:$0xff]  ;;  %v10926_v12 = vld [vmem:[#allocation12_spill] sm:$0xff] }
 0x336   : > { %2584 = vst.msk [vmem:[#allocation3 + $0x18] sm:$0xff] %vm214_vm10, %v2552_v57  ;;  %2582 = vst.msk [vmem:[#allocation3 + $0x8] sm:$0xff] %vm214_vm10, %v2550_v26  ;;  %v2554_v10 = vadd.f32 %v10925_v56, %v2227_v42  ;;  %v2559_v53 = vadd.f32 %v10926_v12, %v2232_v34  ;;  %v10927_v30 = vld [vmem:[#allocation13_spill] sm:$0xff]  ;;  %v2233_v46 = vld [vmem:[#allocation3 + $0x58] sm:$0xff]  ;;  %v10475_v42 = vpop.f32.mrf.mxu1  ;;  %v10477_v34 = vpop.f32.mrf.mxu0 }
 0x337   : > { %2587 = vst.msk [vmem:[#allocation3 + $0x30] sm:$0xff] %vm214_vm10, %v2555_v51  ;;  %v2557_v58 = vadd.f32 %v10927_v30, %v2230_v33  ;;  %v2231_v8 = vld [vmem:[#allocation3 + $0x48] sm:$0xff]  ;;  %v2236_v35 = vld [vmem:[#allocation3 + $0x70] sm:$0xff]  ;;  %2585 = vst.msk [vmem:[#allocation3 + $0x20] sm:$0xff] %vm214_vm10, %v2553_v2 }
 0x338   : > { %2588 = vst.msk [vmem:[#allocation3 + $0x38] sm:$0xff] %vm214_vm10, %v2556_v31  ;;  %v10928_v63 = vld [vmem:[#allocation14_spill] sm:$0xff]  ;;  %v10929_v39 = vld [vmem:[#allocation15_spill] sm:$0xff]  ;;  %v10930_v16 = vld [vmem:[#allocation16_spill] sm:$0xff] }
 0x339   : > { %v2560_v23 = vadd.f32 %v10928_v63, %v2233_v46  ;;  %v2558_v1 = vadd.f32 %v10929_v39, %v2231_v8  ;;  %v2563_v15 = vadd.f32 %v10930_v16, %v2236_v35  ;;  %v2234_v24 = vld [vmem:[#allocation3 + $0x60] sm:$0xff]  ;;  %v2237_v59 = vld [vmem:[#allocation3 + $0x78] sm:$0xff]  ;;  %v2235_v18 = vld [vmem:[#allocation3 + $0x68] sm:$0xff]  ;;  %2586 = vst.msk [vmem:[#allocation3 + $0x28] sm:$0xff] %vm214_vm10, %v2554_v10 }
 0x33a   : > { %2591 = vst.msk [vmem:[#allocation3 + $0x50] sm:$0xff] %vm214_vm10, %v2559_v53  ;;  %2589 = vst.msk [vmem:[#allocation3 + $0x40] sm:$0xff] %vm214_vm10, %v2557_v58  ;;  %v10931_v19 = vld [vmem:[#allocation18_spill] sm:$0xff]  ;;  %v10932_v9 = vld [vmem:[#allocation19_spill] sm:$0xff] }
 0x33b   : > { %v2561_v6 = vadd.f32 %v10931_v19, %v2234_v24  ;;  %v2564_v21 = vadd.f32 %v10932_v9, %v2237_v59  ;;  %v10933_v52 = vld [vmem:[#allocation21_spill] sm:$0xff]  ;;  %v2240_v3 = vld [vmem:[#allocation3 + $0x90] sm:$0xff]  ;;  %v2238_v14 = vld [vmem:[#allocation3 + $0x80] sm:$0xff]  ;;  %2592 = vst.msk [vmem:[#allocation3 + $0x58] sm:$0xff] %vm214_vm10, %v2560_v23 }
 0x33c   : > { %v2562_v62 = vadd.f32 %v10933_v52, %v2235_v18  ;;  %v2241_v13 = vld [vmem:[#allocation3 + $0x98] sm:$0xff]  ;;  %2590 = vst.msk [vmem:[#allocation3 + $0x48] sm:$0xff] %vm214_vm10, %v2558_v1  ;;  %2595 = vst.msk [vmem:[#allocation3 + $0x70] sm:$0xff] %vm214_vm10, %v2563_v15  ;;  %v10934_v48 = vld [vmem:[#allocation24_spill] sm:$0xff] }
 0x33d   : > { %v2567_v22 = vadd.f32 %v10934_v48, %v2240_v3  ;;  %v10935_v36 = vld [vmem:[#allocation27_spill] sm:$0xff]  ;;  %v10936_v11 = vld [vmem:[#allocation29_spill] sm:$0xff]  ;;  %v2244_v57 = vld [vmem:[#allocation3 + $0xb0] sm:$0xff]  ;;  %2593 = vst.msk [vmem:[#allocation3 + $0x60] sm:$0xff] %vm214_vm10, %v2561_v6 }
 0x33e   : > { %v2565_v32 = vadd.f32 %v10935_v36, %v2238_v14  ;;  %v2568_v54 = vadd.f32 %v10936_v11, %v2241_v13  ;;  %v2239_v49 = vld [vmem:[#allocation3 + $0x88] sm:$0xff]  ;;  %v2242_v0 = vld [vmem:[#allocation3 + $0xa0] sm:$0xff]  ;;  %2596 = vst.msk [vmem:[#allocation3 + $0x78] sm:$0xff] %vm214_vm10, %v2564_v21  ;;  %2594 = vst.msk [vmem:[#allocation3 + $0x68] sm:$0xff] %vm214_vm10, %v2562_v62 }
 0x33f   : > { %v10937_v26 = vld [vmem:[#allocation32_spill] sm:$0xff]  ;;  %v10938_v51 = vld [vmem:[#allocation35_spill] sm:$0xff]  ;;  %v10939_v7 = vld [vmem:[#allocation38_spill] sm:$0xff]  ;;  %2599 = vst.msk [vmem:[#allocation3 + $0x90] sm:$0xff] %vm214_vm10, %v2567_v22 }
 0x340   : > { %v2566_v55 = vadd.f32 %v10937_v26, %v2239_v49  ;;  %v2571_v41 = vadd.f32 %v10938_v51, %v2244_v57  ;;  %v2569_v61 = vadd.f32 %v10939_v7, %v2242_v0  ;;  %v2245_v2 = vld [vmem:[#allocation3 + $0xb8] sm:$0xff]  ;;  %v2243_v45 = vld [vmem:[#allocation3 + $0xa8] sm:$0xff]  ;;  %v2248_v31 = vld [vmem:[#allocation3 + $0xd0] sm:$0xff]  ;;  %2597 = vst.msk [vmem:[#allocation3 + $0x80] sm:$0xff] %vm214_vm10, %v2565_v32  ;;  %v10503_v57 = vpop.f32.mrf.mxu1  ;;  %v10505_v0 = vpop.f32.mrf.mxu0 }
 0x341   : > { %v4298_v33 = vld [vmem:[#allocation3 + $0x10] sm:$0xff]  ;;  %2600 = vst.msk [vmem:[#allocation3 + $0x98] sm:$0xff] %vm214_vm10, %v2568_v54  ;;  %v4296_v56 = vld [vmem:[#allocation3] sm:$0xff]  ;;  %v10940_v10 = vld [vmem:[#allocation41_spill] sm:$0xff] }
 0x342   : > { %v2572_v12 = vadd.f32 %v10940_v10, %v2245_v2  ;;  %v10941_v53 = vld [vmem:[#allocation44_spill] sm:$0xff]  ;;  %v10942_v58 = vld [vmem:[#allocation47_spill] sm:$0xff]  ;;  %v10944_v23 = vld [vmem:[#allocation30_spill] sm:$0xff]  ;;  %2598 = vst.msk [vmem:[#allocation3 + $0x88] sm:$0xff] %vm214_vm10, %v2566_v55 }
 0x343   : > { %v2570_v30 = vadd.f32 %v10941_v53, %v2243_v45  ;;  %v2575_v46 = vadd.f32 %v10942_v58, %v2248_v31  ;;  %v2246_v8 = vld [vmem:[#allocation3 + $0xc0] sm:$0xff]  ;;  %v4622_v39 = vadd.f32 %v10944_v23, %v4296_v56  ;;  %2603 = vst.msk [vmem:[#allocation3 + $0xb0] sm:$0xff] %vm214_vm10, %v2571_v41  ;;  %2601 = vst.msk [vmem:[#allocation3 + $0xa0] sm:$0xff] %vm214_vm10, %v2569_v61  ;;  %v10945_v1 = vld [vmem:[#allocation49_spill] sm:$0xff] }
 0x344   : > { %v10943_v35 = vld [vmem:[#allocation28_spill] sm:$0xff]  ;;  %v2573_v16 = vadd.f32 %v10945_v1, %v2246_v8  ;;  %v2249_v15 = vld [vmem:[#allocation3 + $0xd8] sm:$0xff]  ;;  %v2247_v24 = vld [vmem:[#allocation3 + $0xc8] sm:$0xff]  ;;  %2604 = vst.msk [vmem:[#allocation3 + $0xb8] sm:$0xff] %vm214_vm10, %v2572_v12 }
 0x345   : > { %v4624_v63 = vadd.f32 %v10943_v35, %v4298_v33  ;;  %v2252_v59 = vld [vmem:[#allocation3 + $0xf0] sm:$0xff]  ;;  %v4299_v18 = vld [vmem:[#allocation3 + $0x18] sm:$0xff]  ;;  %v4297_v19 = vld [vmem:[#allocation3 + $0x8] sm:$0xff]  ;;  %2602 = vst.msk [vmem:[#allocation3 + $0xa8] sm:$0xff] %vm214_vm10, %v2570_v30 }
 0x346   : > { %v4302_v6 = vld [vmem:[#allocation3 + $0x30] sm:$0xff]  ;;  %2607 = vst.msk [vmem:[#allocation3 + $0xd0] sm:$0xff] %vm214_vm10, %v2575_v46  ;;  %v10946_v9 = vld [vmem:[#allocation51_spill] sm:$0xff]  ;;  %v10947_v52 = vld [vmem:[#allocation53_spill] sm:$0xff]  ;;  %v2579_v3 = vadd.f32 %v10283_v29, %v2252_v59 }
 0x347   : > { %v2576_v21 = vadd.f32 %v10946_v9, %v2249_v15  ;;  %v2574_v62 = vadd.f32 %v10947_v52, %v2247_v24  ;;  %4656 = vst.msk [vmem:[#allocation3 + $0x10] sm:$0xff] %vm214_vm10, %v4624_v63  ;;  %4654 = vst.msk [vmem:[#allocation3] sm:$0xff] %vm214_vm10, %v4622_v39  ;;  %v10948_v14 = vld [vmem:[#allocation31_spill] sm:$0xff]  ;;  %v10949_v48 = vld [vmem:[#allocation33_spill] sm:$0xff]  ;;  %v7816_v52 = vpop.f32.mrf.mxu0 }
 0x348   : > { %v4625_v13 = vadd.f32 %v10948_v14, %v4299_v18  ;;  %v4623_v22 = vadd.f32 %v10949_v48, %v4297_v19  ;;  %v10950_v36 = vld [vmem:[#allocation34_spill] sm:$0xff]  ;;  %v4300_v11 = vld [vmem:[#allocation3 + $0x20] sm:$0xff]  ;;  %v4303_v54 = vld [vmem:[#allocation3 + $0x38] sm:$0xff]  ;;  %2605 = vst.msk [vmem:[#allocation3 + $0xc0] sm:$0xff] %vm214_vm10, %v2573_v16 }
 0x349   : > { %v4628_v32 = vadd.f32 %v10950_v36, %v4302_v6  ;;  %v2250_v49 = vld [vmem:[#allocation3 + $0xe0] sm:$0xff]  ;;  %v10952_v55 = vld [vmem:[#allocation37_spill] sm:$0xff]  ;;  %v4306_v7 = vld [vmem:[#allocation3 + $0x50] sm:$0xff]  ;;  %2608 = vst.msk [vmem:[#allocation3 + $0xd8] sm:$0xff] %vm214_vm10, %v2576_v21  ;;  %v7830_v21 = vpop.f32.mrf.mxu1 }
 0x34a   : > { %v10951_v29 = vld [vmem:[#allocation36_spill] sm:$0xff]  ;;  %v4629_v51 = vadd.f32 %v10952_v55, %v4303_v54  ;;  %v4301_v41 = vld [vmem:[#allocation3 + $0x28] sm:$0xff]  ;;  %2606 = vst.msk [vmem:[#allocation3 + $0xc8] sm:$0xff] %vm214_vm10, %v2574_v62  ;;  %2611 = vst.msk [vmem:[#allocation3 + $0xf0] sm:$0xff] %vm214_vm10, %v2579_v3  ;;  %v2577_v2 = vadd.f32 %v10325_v37, %v2250_v49 }
 0x34b   : > { %v4626_v26 = vadd.f32 %v10951_v29, %v4300_v11  ;;  %v4304_v61 = vld [vmem:[#allocation3 + $0x40] sm:$0xff]  ;;  %4657 = vst.msk [vmem:[#allocation3 + $0x18] sm:$0xff] %vm214_vm10, %v4625_v13  ;;  %4655 = vst.msk [vmem:[#allocation3 + $0x8] sm:$0xff] %vm214_vm10, %v4623_v22  ;;  %v10953_v45 = vld [vmem:[#allocation39_spill] sm:$0xff] }
 0x34c   : > { %4660 = vst.msk [vmem:[#allocation3 + $0x30] sm:$0xff] %vm214_vm10, %v4628_v32  ;;  %v4627_v31 = vadd.f32 %v10953_v45, %v4301_v41  ;;  %v10954_v33 = vld [vmem:[#allocation40_spill] sm:$0xff]  ;;  %v10955_v10 = vld [vmem:[#allocation42_spill] sm:$0xff]  ;;  %v4307_v53 = vld [vmem:[#allocation3 + $0x58] sm:$0xff] }
 0x34d   : > { %v4632_v56 = vadd.f32 %v10954_v33, %v4306_v7  ;;  %v4630_v12 = vadd.f32 %v10955_v10, %v4304_v61  ;;  %v4305_v30 = vld [vmem:[#allocation3 + $0x48] sm:$0xff]  ;;  %v4310_v58 = vld [vmem:[#allocation3 + $0x70] sm:$0xff]  ;;  %4658 = vst.msk [vmem:[#allocation3 + $0x20] sm:$0xff] %vm214_vm10, %v4626_v26  ;;  %4661 = vst.msk [vmem:[#allocation3 + $0x38] sm:$0xff] %vm214_vm10, %v4629_v51 }
 0x34e   : > { %v10956_v37 = vld [vmem:[#allocation43_spill] sm:$0xff]  ;;  %v10957_v8 = vld [vmem:[#allocation45_spill] sm:$0xff]  ;;  %2609 = vst.msk [vmem:[#allocation3 + $0xe0] sm:$0xff] %vm214_vm10, %v2577_v2  ;;  %v10958_v63 = vld [vmem:[#allocation46_spill] sm:$0xff]  ;;  %v6584_v2 = vpop.f32.mrf.mxu1 }
 0x34f   : > { %v4633_v46 = vadd.f32 %v10956_v37, %v4307_v53  ;;  %v4631_v35 = vadd.f32 %v10957_v8, %v4305_v30  ;;  %v4636_v23 = vadd.f32 %v10958_v63, %v4310_v58  ;;  %v2253_v39 = vld [vmem:[#allocation3 + $0xf8] sm:$0xff]  ;;  %v4308_v1 = vld [vmem:[#allocation3 + $0x60] sm:$0xff]  ;;  %v2251_v16 = vld [vmem:[#allocation3 + $0xe8] sm:$0xff]  ;;  %4659 = vst.msk [vmem:[#allocation3 + $0x28] sm:$0xff] %vm214_vm10, %v4627_v31 }
 0x350   : > { %4664 = vst.msk [vmem:[#allocation3 + $0x50] sm:$0xff] %vm214_vm10, %v4632_v56  ;;  %4662 = vst.msk [vmem:[#allocation3 + $0x40] sm:$0xff] %vm214_vm10, %v4630_v12  ;;  %v2580_v15 = vadd.f32 %v10340_v27, %v2253_v39  ;;  %v10959_v24 = vld [vmem:[#allocation48_spill] sm:$0xff]  ;;  %v2578_v18 = vadd.f32 %v10354_v47, %v2251_v16  ;;  %v4311_v19 = vld [vmem:[#allocation3 + $0x78] sm:$0xff] }
 0x351   : > { %v4634_v59 = vadd.f32 %v10959_v24, %v4308_v1  ;;  %v4309_v6 = vld [vmem:[#allocation3 + $0x68] sm:$0xff]  ;;  %v4314_v9 = vld [vmem:[#allocation3 + $0x90] sm:$0xff]  ;;  %4665 = vst.msk [vmem:[#allocation3 + $0x58] sm:$0xff] %vm214_vm10, %v4633_v46  ;;  %4663 = vst.msk [vmem:[#allocation3 + $0x48] sm:$0xff] %vm214_vm10, %v4631_v35  ;;  %v7833_v46 = vpop.f32.mrf.mxu1 }
 0x352   : > { %4668 = vst.msk [vmem:[#allocation3 + $0x70] sm:$0xff] %vm214_vm10, %v4636_v23  ;;  %v10960_v62 = vld [vmem:[#allocation50_spill] sm:$0xff]  ;;  %v10961_v14 = vld [vmem:[#allocation52_spill] sm:$0xff]  ;;  %v4640_v27 = vadd.f32 %v10280_v43, %v4314_v9  ;;  %v4315_v22 = vld [vmem:[#allocation3 + $0x98] sm:$0xff] }
 0x353   : > { %v4637_v3 = vadd.f32 %v10960_v62, %v4311_v19  ;;  %v4635_v13 = vadd.f32 %v10961_v14, %v4309_v6  ;;  %v4312_v48 = vld [vmem:[#allocation3 + $0x80] sm:$0xff]  ;;  %v4313_v47 = vld [vmem:[#allocation3 + $0x88] sm:$0xff]  ;;  %2612 = vst.msk [vmem:[#allocation3 + $0xf8] sm:$0xff] %vm214_vm10, %v2580_v15  ;;  %4666 = vst.msk [vmem:[#allocation3 + $0x60] sm:$0xff] %vm214_vm10, %v4634_v59  ;;  %v4641_v32 = vadd.f32 %v10330_v44, %v4315_v22  ;;  %v6597_v35 = vpop.f32.mrf.mxu1 }
 0x354   : > { %2610 = vst.msk [vmem:[#allocation3 + $0xe8] sm:$0xff] %vm214_vm10, %v2578_v18  ;;  %v4638_v36 = vadd.f32 %v10285_v4, %v4312_v48  ;;  %v4639_v11 = vadd.f32 %v10348_v40, %v4313_v47  ;;  %v4318_v54 = vld [vmem:[#allocation3 + $0xb0] sm:$0xff]  ;;  %v4316_v49 = vld [vmem:[#allocation3 + $0xa0] sm:$0xff]  ;;  %v4319_v29 = vld [vmem:[#allocation3 + $0xb8] sm:$0xff] }
 0x355   : > { %4669 = vst.msk [vmem:[#allocation3 + $0x78] sm:$0xff] %vm214_vm10, %v4637_v3  ;;  %4667 = vst.msk [vmem:[#allocation3 + $0x68] sm:$0xff] %vm214_vm10, %v4635_v13  ;;  %v6368_v43 = vld [vmem:[#allocation3 + $0x10] sm:$0xff]  ;;  %v6366_v26 = vld [vmem:[#allocation3] sm:$0xff]  ;;  %v4644_v55 = vadd.f32 %v10365_v5, %v4318_v54  ;;  %v4642_v51 = vadd.f32 %v10389_v38, %v4316_v49  ;;  %v4645_v4 = vadd.f32 %v10420_v25, %v4319_v29  ;;  %v4594_v38 = vpop.f32.mrf.mxu0  ;;  %v7834_v1 = vpop.f32.mrf.mxu1 }
 0x356   : > { %4672 = vst.msk [vmem:[#allocation3 + $0x90] sm:$0xff] %vm214_vm10, %v4640_v27  ;;  %v4317_v44 = vld [vmem:[#allocation3 + $0xa8] sm:$0xff]  ;;  %4670 = vst.msk [vmem:[#allocation3 + $0x80] sm:$0xff] %vm214_vm10, %v4638_v36  ;;  %v6694_v40 = vadd.f32 %v10363_v17, %v6368_v43  ;;  %v6692_v41 = vadd.f32 %v10387_v50, %v6366_v26  ;;  %v4322_v61 = vld [vmem:[#allocation3 + $0xd0] sm:$0xff] }
 0x357   : > { %4673 = vst.msk [vmem:[#allocation3 + $0x98] sm:$0xff] %vm214_vm10, %v4641_v32  ;;  %4671 = vst.msk [vmem:[#allocation3 + $0x88] sm:$0xff] %vm214_vm10, %v4639_v11  ;;  %v4643_v7 = vadd.f32 %v10450_v28, %v4317_v44  ;;  %v4320_v5 = vld [vmem:[#allocation3 + $0xc0] sm:$0xff]  ;;  %v4323_v45 = vld [vmem:[#allocation3 + $0xd8] sm:$0xff]  ;;  %v4648_v50 = vadd.f32 %v10477_v34, %v4322_v61  ;;  %v6600_v6 = vpop.f32.mrf.mxu1 }
 0x358   : > { %v6369_v31 = vld [vmem:[#allocation3 + $0x18] sm:$0xff]  ;;  %4676 = vst.msk [vmem:[#allocation3 + $0xb0] sm:$0xff] %vm214_vm10, %v4644_v55  ;;  %v6367_v25 = vld [vmem:[#allocation3 + $0x8] sm:$0xff]  ;;  %4674 = vst.msk [vmem:[#allocation3 + $0xa0] sm:$0xff] %vm214_vm10, %v4642_v51  ;;  %v4646_v33 = vadd.f32 %v10505_v0, %v4320_v5  ;;  %v4649_v56 = vadd.f32 %v7816_v52, %v4323_v45 }
 0x359   : > { %v6372_v17 = vld [vmem:[#allocation3 + $0x30] sm:$0xff]  ;;  %4677 = vst.msk [vmem:[#allocation3 + $0xb8] sm:$0xff] %vm214_vm10, %v4645_v4  ;;  %6726 = vst.msk [vmem:[#allocation3 + $0x10] sm:$0xff] %vm214_vm10, %v6694_v40  ;;  %v6695_v28 = vadd.f32 %v10418_v20, %v6369_v31  ;;  %v6693_v10 = vadd.f32 %v10448_v60, %v6367_v25  ;;  %v6370_v53 = vld [vmem:[#allocation3 + $0x20] sm:$0xff] }
 0x35a   : > { %6724 = vst.msk [vmem:[#allocation3] sm:$0xff] %vm214_vm10, %v6692_v41  ;;  %v6698_v12 = vadd.f32 %v10475_v42, %v6372_v17  ;;  %4675 = vst.msk [vmem:[#allocation3 + $0xa8] sm:$0xff] %vm214_vm10, %v4643_v7  ;;  %v6373_v30 = vld [vmem:[#allocation3 + $0x38] sm:$0xff]  ;;  %v4321_v58 = vld [vmem:[#allocation3 + $0xc8] sm:$0xff]  ;;  %v6696_v34 = vadd.f32 %v10503_v57, %v6370_v53 }
 0x35b   : > { %v6699_v37 = vadd.f32 %v7830_v21, %v6373_v30  ;;  %4680 = vst.msk [vmem:[#allocation3 + $0xd0] sm:$0xff] %vm214_vm10, %v4648_v50  ;;  %v6371_v0 = vld [vmem:[#allocation3 + $0x28] sm:$0xff]  ;;  %4678 = vst.msk [vmem:[#allocation3 + $0xc0] sm:$0xff] %vm214_vm10, %v4646_v33  ;;  %v4647_v20 = vadd.f32 %v4594_v38, %v4321_v58  ;;  %v6376_v42 = vld [vmem:[#allocation3 + $0x50] sm:$0xff] }
 0x35c   : > { %4681 = vst.msk [vmem:[#allocation3 + $0xd8] sm:$0xff] %vm214_vm10, %v4649_v56  ;;  %6727 = vst.msk [vmem:[#allocation3 + $0x18] sm:$0xff] %vm214_vm10, %v6695_v28  ;;  %v6697_v60 = vadd.f32 %v6584_v2, %v6371_v0  ;;  %v6702_v57 = vadd.f32 %v7833_v46, %v6376_v42  ;;  %v6374_v8 = vld [vmem:[#allocation3 + $0x40] sm:$0xff]  ;;  %v10580_v63 = vld [vmem:[%s10832_s2] ss:$0 sm:$0xff] }
 0x35d   : > { %6725 = vst.msk [vmem:[#allocation3 + $0x8] sm:$0xff] %vm214_vm10, %v6693_v10  ;;  %6730 = vst.msk [vmem:[#allocation3 + $0x30] sm:$0xff] %vm214_vm10, %v6698_v12  ;;  %v6700_v23 = vadd.f32 %v6597_v35, %v6374_v8  ;;  %v6377_v39 = vld [vmem:[#allocation3 + $0x58] sm:$0xff]  ;;  %v6375_v19 = vld [vmem:[#allocation3 + $0x48] sm:$0xff] }
 0x35e   : > { %6728 = vst.msk [vmem:[#allocation3 + $0x20] sm:$0xff] %vm214_vm10, %v6696_v34  ;;  %6731 = vst.msk [vmem:[#allocation3 + $0x38] sm:$0xff] %vm214_vm10, %v6699_v37  ;;  %v6703_v24 = vadd.f32 %v7834_v1, %v6377_v39  ;;  %v6701_v62 = vadd.f32 %v6600_v6, %v6375_v19  ;;  %v4326_v39 = vld [vmem:[#allocation3 + $0xf0] sm:$0xff]  ;;  %v7819_v1 = vpop.f32.mrf.mxu0 }
 0x35f   : > { %4679 = vst.msk [vmem:[#allocation3 + $0xc8] sm:$0xff] %vm214_vm10, %v4647_v20  ;;  %6729 = vst.msk [vmem:[#allocation3 + $0x28] sm:$0xff] %vm214_vm10, %v6697_v60 }
 0x360   : > { %6734 = vst.msk [vmem:[#allocation3 + $0x50] sm:$0xff] %vm214_vm10, %v6702_v57  ;;  %v6761_v16 = vld [vmem:[#allocation3 + $0x10] sm:$0xff]  ;;  %6732 = vst.msk [vmem:[#allocation3 + $0x40] sm:$0xff] %vm214_vm10, %v6700_v23 }
 0x361   : > { %v6759_v15 = vld [vmem:[#allocation3] sm:$0xff]  ;;  %v10585_v59 = vadd.f32 %v10580_v63, %v6761_v16  ;;  %6735 = vst.msk [vmem:[#allocation3 + $0x58] sm:$0xff] %vm214_vm10, %v6703_v24  ;;  %6733 = vst.msk [vmem:[#allocation3 + $0x48] sm:$0xff] %vm214_vm10, %v6701_v62  ;;  %v4652_v24 = vadd.f32 %v7819_v1, %v4326_v39 }
 0x362   : > { %v10588_v18 = vadd.f32 %v10580_v63, %v6759_v15 }
 0x363   : > { %v6762_v9 = vld [vmem:[#allocation3 + $0x18] sm:$0xff]  ;;  %v6832_v3 = vsub.f32 0.0, %v10585_v59  ;;  %4684 = vst.msk [vmem:[#allocation3 + $0xf0] sm:$0xff] %vm214_vm10, %v4652_v24 }
 0x364   : > { %v6760_v21 = vld [vmem:[#allocation3 + $0x8] sm:$0xff]  ;;  %v6765_v52 = vld [vmem:[#allocation3 + $0x30] sm:$0xff]  ;;  %v6830_v14 = vsub.f32 0.0, %v10588_v18  ;;  %v10594_v13 = vadd.f32 %v10580_v63, %v6762_v9  ;;  %v4324_v9 = vld [vmem:[#allocation3 + $0xe0] sm:$0xff] }
 0x365   : > { %v10597_v27 = vadd.f32 %v10580_v63, %v6760_v21  ;;  %v6763_v48 = vld [vmem:[#allocation3 + $0x20] sm:$0xff]  ;;  %v6766_v22 = vld [vmem:[#allocation3 + $0x38] sm:$0xff]  ;;  %v10600_v47 = vadd.f32 %v10580_v63, %v6765_v52  ;;  %v6866_v54 = vmul.f32 1.442695, %v6832_v3  ;;  %v4607_v21 = vpop.f32.mrf.mxu0 }
 0x366   : > { %v10603_v36 = vadd.f32 %v10580_v63, %v6763_v48  ;;  %v10606_v32 = vadd.f32 %v10580_v63, %v6766_v22  ;;  %v6764_v11 = vld [vmem:[#allocation3 + $0x28] sm:$0xff]  ;;  %v6862_v49 = vmul.f32 1.442695, %v6830_v14  ;;  %v6833_v29 = vsub.f32 0.0, %v10594_v13  ;;  %v4327_v22 = vld [vmem:[#allocation3 + $0xf8] sm:$0xff] }
 0x367   : > { %v6831_v43 = vsub.f32 0.0, %v10597_v27  ;;  %v6836_v26 = vsub.f32 0.0, %v10600_v47  ;;  %v10615_v4 = vadd.f32 %v10580_v63, %v6764_v11  ;;  %v6769_v44 = vld [vmem:[#allocation3 + $0x50] sm:$0xff]  ;;  %7901 = vpow2.f32 %v6866_v54  ;;  %v6767_v61 = vld [vmem:[#allocation3 + $0x40] sm:$0xff]  ;;  %v7820_v11 = vpop.f32.mrf.mxu0 }
 0x368   : > { %v6834_v55 = vsub.f32 0.0, %v10603_v36  ;;  %v6837_v51 = vsub.f32 0.0, %v10606_v32  ;;  %v6868_v40 = vmul.f32 1.442695, %v6833_v29  ;;  %v10618_v7 = vadd.f32 %v10580_v63, %v6769_v44  ;;  %v6770_v17 = vld [vmem:[#allocation3 + $0x58] sm:$0xff]  ;;  %v6768_v10 = vld [vmem:[#allocation3 + $0x48] sm:$0xff] }
 0x369   : > { %v6864_v41 = vmul.f32 1.442695, %v6831_v43  ;;  %7903 = vpow2.f32 %v6862_v49  ;;  %v6874_v2 = vmul.f32 1.442695, %v6836_v26  ;;  %v6835_v38 = vsub.f32 0.0, %v10615_v4 }
 0x36a   : > { %v6870_v5 = vmul.f32 1.442695, %v6834_v55  ;;  %v6876_v45 = vmul.f32 1.442695, %v6837_v51  ;;  %7905 = vpow2.f32 %v6868_v40  ;;  %v6840_v31 = vsub.f32 0.0, %v10618_v7  ;;  %v4325_v55 = vld [vmem:[#allocation3 + $0xe8] sm:$0xff]  ;;  %v4610_v51 = vpop.f32.mrf.mxu0 }
 0x36b   : > { %v10623_v25 = vadd.f32 %v10580_v63, %v6767_v61  ;;  %7907 = vpow2.f32 %v6864_v41  ;;  %v10626_v50 = vadd.f32 %v10580_v63, %v6770_v17  ;;  %v6872_v33 = vmul.f32 1.442695, %v6835_v38 }
 0x36c   : > { %7909 = vpow2.f32 %v6874_v2  ;;  %v6882_v56 = vmul.f32 1.442695, %v6840_v31  ;;  %v10631_v53 = vadd.f32 %v10580_v63, %v6768_v10  ;;  %v4650_v3 = vadd.f32 %v4607_v21, %v4324_v9  ;;  %v6381_v9 = vld [vmem:[#allocation3 + $0x78] sm:$0xff] }
 0x36d   : > { %v6838_v28 = vsub.f32 0.0, %v10623_v25  ;;  %7911 = vpow2.f32 %v6870_v5  ;;  %v6841_v12 = vsub.f32 0.0, %v10626_v50  ;;  %v4653_v29 = vadd.f32 %v7820_v11, %v4327_v22 }
 0x36e   : > { %7913 = vpow2.f32 %v6876_v45  ;;  %v6839_v34 = vsub.f32 0.0, %v10631_v53  ;;  %4682 = vst.msk [vmem:[#allocation3 + $0xe0] sm:$0xff] %vm214_vm10, %v4650_v3  ;;  %v4651_v41 = vadd.f32 %v4610_v51, %v4325_v55 }
 0x36f   : > { %v6878_v30 = vmul.f32 1.442695, %v6838_v28  ;;  %7915 = vpow2.f32 %v6872_v33  ;;  %v6884_v58 = vmul.f32 1.442695, %v6841_v12  ;;  %4685 = vst.msk [vmem:[#allocation3 + $0xf8] sm:$0xff] %vm214_vm10, %v4653_v29 }
 0x370   : > { %7917 = vpow2.f32 %v6882_v56  ;;  %v6880_v37 = vmul.f32 1.442695, %v6839_v34  ;;  %4683 = vst.msk [vmem:[#allocation3 + $0xe8] sm:$0xff] %vm214_vm10, %v4651_v41 }
 0x371   : > { %7919 = vpow2.f32 %v6878_v30 }
 0x372   : > { %7921 = vpow2.f32 %v6884_v58 }
 0x373   : > { %7923 = vpow2.f32 %v6880_v37 }
 0x374   : > { %v7902_v0 = vpop.eup %7901 }
 0x375   : > { %v6928_v60 = vadd.f32 1.0, %v7902_v0 }
 0x376   : > { %v7904_v20 = vpop.eup %7903 }
 0x377   : > { %v7906_v42 = vpop.eup %7905  ;;  %v6926_v46 = vadd.f32 1.0, %v7904_v20  ;;  %7925 = vrcp.f32 %v6928_v60 }
 0x378   : > { %v7908_v57 = vpop.eup %7907  ;;  %v6929_v8 = vadd.f32 1.0, %v7906_v42 }
 0x379   : > { %v7910_v35 = vpop.eup %7909  ;;  %7927 = vrcp.f32 %v6926_v46  ;;  %v6927_v23 = vadd.f32 1.0, %v7908_v57 }
 0x37a   : > { %v7912_v16 = vpop.eup %7911  ;;  %7929 = vrcp.f32 %v6929_v8  ;;  %v6932_v15 = vadd.f32 1.0, %v7910_v35 }
 0x37b   : > { %v7914_v19 = vpop.eup %7913  ;;  %7931 = vrcp.f32 %v6927_v23  ;;  %v6930_v6 = vadd.f32 1.0, %v7912_v16 }
 0x37c   : > { %v7916_v52 = vpop.eup %7915  ;;  %7933 = vrcp.f32 %v6932_v15  ;;  %v6933_v62 = vadd.f32 1.0, %v7914_v19  ;;  %v7837_v15 = vpop.f32.mrf.mxu1  ;;  %v6378_v19 = vld [vmem:[#allocation3 + $0x60] sm:$0xff] }
 0x37d   : > { %v7918_v14 = vpop.eup %7917  ;;  %7935 = vrcp.f32 %v6930_v6  ;;  %v6931_v48 = vadd.f32 1.0, %v7916_v52  ;;  %v6379_v52 = vld [vmem:[#allocation3 + $0x68] sm:$0xff] }
 0x37e   : > { %v7920_v54 = vpop.eup %7919  ;;  %7937 = vrcp.f32 %v6933_v62  ;;  %v6936_v49 = vadd.f32 1.0, %v7918_v14 }
 0x37f   : > { %v7922_v43 = vpop.eup %7921  ;;  %7939 = vrcp.f32 %v6931_v48  ;;  %v6934_v26 = vadd.f32 1.0, %v7920_v54 }
 0x380   : > { %v7924_v44 = vpop.eup %7923  ;;  %7941 = vrcp.f32 %v6936_v49  ;;  %v6937_v40 = vadd.f32 1.0, %v7922_v43 }
 0x381   : > { %7943 = vrcp.f32 %v6934_v26  ;;  %v6935_v61 = vadd.f32 1.0, %v7924_v44 }
 0x382   : > { %7945 = vrcp.f32 %v6937_v40 }
 0x383   : > { %7947 = vrcp.f32 %v6935_v61 }
 0x384   : > { %v7926_v2 = vpop.eup %7925 }
 0x385   : > { %v6992_v45 = vmul.f32 %v7926_v2, %v10585_v59 }
 0x386   : > { %v7928_v5 = vpop.eup %7927 }
 0x387   : > { %v7930_v38 = vpop.eup %7929  ;;  %v6990_v31 = vmul.f32 %v7928_v5, %v10588_v18  ;;  %v7621_v33 = vpack.c.bf16 %v6992_v45, %v6992_v45  ;;  %v6384_v5 = vld [vmem:[#allocation3 + $0x90] sm:$0xff] }
 0x388   : > { %v7932_v17 = vpop.eup %7931  ;;  %v6993_v56 = vmul.f32 %v7930_v38, %v10594_v13 }
 0x389   : > { %v7934_v28 = vpop.eup %7933  ;;  %v7619_v59 = vpack.c.bf16 %v6990_v31, %v6990_v31  ;;  %v6991_v10 = vmul.f32 %v7932_v17, %v10597_v27  ;;  %7153 = vst.msk [vmem:[%s10644_s5 + $0x8] sm:$0xf] %vm7150_vm11, %v7621_v33  ;;  %v6382_v17 = vld [vmem:[#allocation3 + $0x80] sm:$0xff] }
 0x38a   : > { %v7936_v12 = vpop.eup %7935  ;;  %v7622_v30 = vpack.c.bf16 %v6993_v56, %v6993_v56  ;;  %v6996_v58 = vmul.f32 %v7934_v28, %v10600_v47 }
 0x38b   : > { %v7938_v34 = vpop.eup %7937  ;;  %7151 = vst.msk [vmem:[%s10644_s5] sm:$0xf] %vm7150_vm11, %v7619_v59  ;;  %v7620_v18 = vpack.c.bf16 %v6991_v10, %v6991_v10  ;;  %v6994_v37 = vmul.f32 %v7936_v12, %v10603_v36  ;;  %v6385_v10 = vld [vmem:[#allocation3 + $0x98] sm:$0xff] }
 0x38c   : > { %v7940_v13 = vpop.eup %7939  ;;  %7154 = vst.msk [vmem:[%s10644_s5 + $0xc] sm:$0xf] %vm7150_vm11, %v7622_v30  ;;  %v7625_v0 = vpack.c.bf16 %v6996_v58, %v6996_v58  ;;  %v6997_v27 = vmul.f32 %v7938_v34, %v10606_v32 }
 0x38d   : > { %v7942_v20 = vpop.eup %7941  ;;  %7152 = vst.msk [vmem:[%s10644_s5 + $0x4] sm:$0xf] %vm7150_vm11, %v7620_v18  ;;  %v7623_v60 = vpack.c.bf16 %v6994_v37, %v6994_v37  ;;  %v6995_v47 = vmul.f32 %v7940_v13, %v10615_v4  ;;  %v6383_v18 = vld [vmem:[#allocation3 + $0x88] sm:$0xff] }
 0x38e   : > { %v7944_v42 = vpop.eup %7943  ;;  %7157 = vst.msk [vmem:[%s10644_s5 + $0x18] sm:$0xf] %vm7150_vm11, %v7625_v0  ;;  %v7626_v36 = vpack.c.bf16 %v6997_v27, %v6997_v27  ;;  %v7000_v46 = vmul.f32 %v7942_v20, %v10618_v7 }
 0x38f   : > { %v7946_v57 = vpop.eup %7945  ;;  %7155 = vst.msk [vmem:[%s10644_s5 + $0x10] sm:$0xf] %vm7150_vm11, %v7623_v60  ;;  %v7624_v32 = vpack.c.bf16 %v6995_v47, %v6995_v47  ;;  %v6998_v8 = vmul.f32 %v7944_v42, %v10623_v25  ;;  %v6380_v25 = vld [vmem:[#allocation3 + $0x70] sm:$0xff] }
 0x390   : > { %v7948_v35 = vpop.eup %7947  ;;  %7158 = vst.msk [vmem:[%s10644_s5 + $0x1c] sm:$0xf] %vm7150_vm11, %v7626_v36  ;;  %v7629_v4 = vpack.c.bf16 %v7000_v46, %v7000_v46  ;;  %v7001_v23 = vmul.f32 %v7946_v57, %v10626_v50  ;;  %v6706_v24 = vadd.f32 %v7837_v15, %v6380_v25  ;;  %v6613_v50 = vpop.f32.mrf.mxu1 }
 0x391   : > { %7156 = vst.msk [vmem:[%s10644_s5 + $0x14] sm:$0xf] %vm7150_vm11, %v7624_v32  ;;  %v7627_v39 = vpack.c.bf16 %v6998_v8, %v6998_v8  ;;  %v6999_v1 = vmul.f32 %v7948_v35, %v10631_v53  ;;  %v6704_v6 = vadd.f32 %v6613_v50, %v6378_v19 }
 0x392   : > { %7161 = vst.msk [vmem:[%s10644_s5 + $0x28] sm:$0xf] %vm7150_vm11, %v7629_v4  ;;  %v7630_v7 = vpack.c.bf16 %v7001_v23, %v7001_v23  ;;  %v7838_v53 = vpop.f32.mrf.mxu1 }
 0x393   : > { %7159 = vst.msk [vmem:[%s10644_s5 + $0x20] sm:$0xf] %vm7150_vm11, %v7627_v39  ;;  %v7628_v16 = vpack.c.bf16 %v6999_v1, %v6999_v1  ;;  %v6707_v21 = vadd.f32 %v7838_v53, %v6381_v9 }
 0x394   : > { %7162 = vst.msk [vmem:[%s10644_s5 + $0x2c] sm:$0xf] %vm7150_vm11, %v7630_v7  ;;  %v6616_v62 = vpop.f32.mrf.mxu1 }
 0x395   : > { %7160 = vst.msk [vmem:[%s10644_s5 + $0x24] sm:$0xf] %vm7150_vm11, %v7628_v16  ;;  %v6705_v3 = vadd.f32 %v6616_v62, %v6379_v52 }
 0x396   : > { %6738 = vst.msk [vmem:[#allocation3 + $0x70] sm:$0xff] %vm214_vm10, %v6706_v24  ;;  %6736 = vst.msk [vmem:[#allocation3 + $0x60] sm:$0xff] %vm214_vm10, %v6704_v6  ;;  %v7841_v45 = vpop.f32.mrf.mxu1 }
 0x397   : > { %6739 = vst.msk [vmem:[#allocation3 + $0x78] sm:$0xff] %vm214_vm10, %v6707_v21  ;;  %6737 = vst.msk [vmem:[#allocation3 + $0x68] sm:$0xff] %vm214_vm10, %v6705_v3  ;;  %v6710_v38 = vadd.f32 %v7841_v45, %v6384_v5 }
 0x398   : > { %v6629_v33 = vpop.f32.mrf.mxu1 }
 0x399   : > { %6742 = vst.msk [vmem:[#allocation3 + $0x90] sm:$0xff] %vm214_vm10, %v6710_v38  ;;  %v6708_v28 = vadd.f32 %v6629_v33, %v6382_v17 }
 0x39a   : > { %v7842_v12 = vpop.f32.mrf.mxu1 }
 0x39b   : > { %6740 = vst.msk [vmem:[#allocation3 + $0x80] sm:$0xff] %vm214_vm10, %v6708_v28  ;;  %v6711_v58 = vadd.f32 %v7842_v12, %v6385_v10 }
 0x39c   : > { %v6632_v37 = vpop.f32.mrf.mxu1 }
 0x39d   : > { %v6773_v14 = vld [vmem:[#allocation3 + $0x70] sm:$0xff]  ;;  %v6771_v22 = vld [vmem:[#allocation3 + $0x60] sm:$0xff]  ;;  %6743 = vst.msk [vmem:[#allocation3 + $0x98] sm:$0xff] %vm214_vm10, %v6711_v58  ;;  %v6709_v0 = vadd.f32 %v6632_v37, %v6383_v18 }
 0x39e   : > { %v6812_v48 = vadd.f32 %v10580_v63, %v6773_v14  ;;  %v10687_v54 = vadd.f32 %v10580_v63, %v6771_v22  ;;  %v6774_v49 = vld [vmem:[#allocation3 + $0x78] sm:$0xff]  ;;  %v6772_v55 = vld [vmem:[#allocation3 + $0x68] sm:$0xff]  ;;  %v6388_v14 = vld [vmem:[#allocation3 + $0xb0] sm:$0xff] }
 0x39f   : > { %v10691_v26 = vadd.f32 %v10580_v63, %v6774_v49  ;;  %v10695_v40 = vadd.f32 %v10580_v63, %v6772_v55  ;;  %6741 = vst.msk [vmem:[#allocation3 + $0x88] sm:$0xff] %vm214_vm10, %v6709_v0 }
 0x3a0   : > { %v6844_v11 = vsub.f32 0.0, %v6812_v48  ;;  %v6842_v43 = vsub.f32 0.0, %v10687_v54  ;;  %v6777_v60 = vld [vmem:[#allocation3 + $0x90] sm:$0xff] }
 0x3a1   : > { %v6845_v44 = vsub.f32 0.0, %v10691_v26  ;;  %v6843_v61 = vsub.f32 0.0, %v10695_v40  ;;  %v10703_v47 = vadd.f32 %v10580_v63, %v6777_v60 }
 0x3a2   : > { %v6890_v29 = vmul.f32 1.442695, %v6844_v11  ;;  %v6886_v51 = vmul.f32 1.442695, %v6842_v43  ;;  %v6775_v42 = vld [vmem:[#allocation3 + $0x80] sm:$0xff] }
 0x3a3   : > { %v6892_v41 = vmul.f32 1.442695, %v6845_v44  ;;  %v6888_v2 = vmul.f32 1.442695, %v6843_v61  ;;  %v6848_v36 = vsub.f32 0.0, %v10703_v47  ;;  %v10707_v46 = vadd.f32 %v10580_v63, %v6775_v42 }
 0x3a4   : > { %7949 = vpow2.f32 %v6890_v29  ;;  %v6778_v57 = vld [vmem:[#allocation3 + $0x98] sm:$0xff] }
 0x3a5   : > { %7951 = vpow2.f32 %v6886_v51  ;;  %v6898_v32 = vmul.f32 1.442695, %v6848_v36  ;;  %v6846_v8 = vsub.f32 0.0, %v10707_v46  ;;  %v10711_v35 = vadd.f32 %v10580_v63, %v6778_v57 }
 0x3a6   : > { %7953 = vpow2.f32 %v6892_v41  ;;  %v6776_v4 = vld [vmem:[#allocation3 + $0x88] sm:$0xff] }
 0x3a7   : > { %7955 = vpow2.f32 %v6888_v2  ;;  %v6894_v23 = vmul.f32 1.442695, %v6846_v8  ;;  %v6849_v39 = vsub.f32 0.0, %v10711_v35  ;;  %v10715_v1 = vadd.f32 %v10580_v63, %v6776_v4  ;;  %v6387_v41 = vld [vmem:[#allocation3 + $0xa8] sm:$0xff] }
 0x3a9   : > { %v6900_v25 = vmul.f32 1.442695, %v6849_v39  ;;  %v6847_v15 = vsub.f32 0.0, %v10715_v1 }
 0x3ab   : > { %v6896_v6 = vmul.f32 1.442695, %v6847_v15 }
 0x3b1   : > { %v7950_v31 = vpop.eup %7949 }
 0x3b2   : > { %v6940_v56 = vadd.f32 1.0, %v7950_v31  ;;  %v7952_v59 = vpop.eup %7951 }
 0x3b3   : > { %v6938_v30 = vadd.f32 1.0, %v7952_v59  ;;  %v7954_v34 = vpop.eup %7953 }
 0x3b4   : > { %7957 = vrcp.f32 %v6940_v56  ;;  %v6941_v13 = vadd.f32 1.0, %v7954_v34  ;;  %v7956_v27 = vpop.eup %7955 }
 0x3b5   : > { %7959 = vrcp.f32 %v6938_v30  ;;  %v6939_v20 = vadd.f32 1.0, %v7956_v27 }
 0x3b6   : > { %7961 = vrcp.f32 %v6941_v13 }
 0x3b7   : > { %7963 = vrcp.f32 %v6939_v20 }
 0x3b8   : > { %7965 = vpow2.f32 %v6898_v32 }
 0x3b9   : > { %7967 = vpow2.f32 %v6894_v23 }
 0x3ba   : > { %7969 = vpow2.f32 %v6900_v25  ;;  %v6392_v25 = vld [vmem:[#allocation3 + $0xd0] sm:$0xff] }
 0x3bb   : > { %7971 = vpow2.f32 %v6896_v6 }
 0x3c1   : > { %v7958_v7 = vpop.eup %7957 }
 0x3c2   : > { %v7004_v16 = vmul.f32 %v7958_v7, %v6812_v48  ;;  %v7960_v24 = vpop.eup %7959  ;;  %v7845_v48 = vpop.f32.mrf.mxu1 }
 0x3c3   : > { %v7002_v50 = vmul.f32 %v7960_v24, %v10687_v54  ;;  %v7962_v9 = vpop.eup %7961  ;;  %v6714_v11 = vadd.f32 %v7845_v48, %v6388_v14  ;;  %v6386_v54 = vld [vmem:[#allocation3 + $0xa0] sm:$0xff]  ;;  %v6391_v14 = vld [vmem:[#allocation3 + $0xc8] sm:$0xff] }
 0x3c4   : > { %v7633_v19 = vpack.c.bf16 %v7004_v16, %v7004_v16  ;;  %v7005_v21 = vmul.f32 %v7962_v9, %v10691_v26  ;;  %v7964_v52 = vpop.eup %7963  ;;  %v6645_v49 = vpop.f32.mrf.mxu1  ;;  %v6389_v26 = vld [vmem:[#allocation3 + $0xb8] sm:$0xff] }
 0x3c5   : > { %v7631_v53 = vpack.c.bf16 %v7002_v50, %v7002_v50  ;;  %v7003_v3 = vmul.f32 %v7964_v52, %v10695_v40  ;;  %6746 = vst.msk [vmem:[#allocation3 + $0xb0] sm:$0xff] %vm214_vm10, %v6714_v11  ;;  %v6712_v29 = vadd.f32 %v6645_v49, %v6386_v54  ;;  %v7966_v43 = vpop.eup %7965  ;;  %v6390_v50 = vld [vmem:[#allocation3 + $0xc0] sm:$0xff] }
 0x3c6   : > { %7165 = vst.msk [vmem:[%s10644_s5 + $0x38] sm:$0xf] %vm7150_vm11, %v7633_v19  ;;  %v7634_v62 = vpack.c.bf16 %v7005_v21, %v7005_v21  ;;  %v7846_v55 = vpop.f32.mrf.mxu1  ;;  %v6944_v51 = vadd.f32 1.0, %v7966_v43  ;;  %v7968_v40 = vpop.eup %7967  ;;  %v6393_v21 = vld [vmem:[#allocation3 + $0xd8] sm:$0xff] }
 0x3c7   : > { %7163 = vst.msk [vmem:[%s10644_s5 + $0x30] sm:$0xf] %vm7150_vm11, %v7631_v53  ;;  %v7632_v22 = vpack.c.bf16 %v7003_v3, %v7003_v3  ;;  %v6715_v44 = vadd.f32 %v7846_v55, %v6389_v26  ;;  %v6942_v2 = vadd.f32 1.0, %v7968_v40  ;;  %v7970_v45 = vpop.eup %7969 }
 0x3c8   : > { %7166 = vst.msk [vmem:[%s10644_s5 + $0x3c] sm:$0xf] %vm7150_vm11, %v7634_v62  ;;  %v6648_v61 = vpop.f32.mrf.mxu1  ;;  %7973 = vrcp.f32 %v6944_v51  ;;  %v6945_v38 = vadd.f32 1.0, %v7970_v45  ;;  %v7972_v31 = vpop.eup %7971 }
 0x3c9   : > { %7164 = vst.msk [vmem:[%s10644_s5 + $0x34] sm:$0xf] %vm7150_vm11, %v7632_v22  ;;  %v6713_v5 = vadd.f32 %v6648_v61, %v6387_v41  ;;  %7975 = vrcp.f32 %v6942_v2  ;;  %v6943_v33 = vadd.f32 1.0, %v7972_v31 }
 0x3ca   : > { %6744 = vst.msk [vmem:[#allocation3 + $0xa0] sm:$0xff] %vm214_vm10, %v6712_v29  ;;  %6747 = vst.msk [vmem:[#allocation3 + $0xb8] sm:$0xff] %vm214_vm10, %v6715_v44  ;;  %7977 = vrcp.f32 %v6945_v38 }
 0x3cb   : > { %6745 = vst.msk [vmem:[#allocation3 + $0xa8] sm:$0xff] %vm214_vm10, %v6713_v5  ;;  %7979 = vrcp.f32 %v6943_v33 }
 0x3cc   : > { %v6781_v17 = vld [vmem:[#allocation3 + $0xb0] sm:$0xff]  ;;  %v7849_v15 = vpop.f32.mrf.mxu1 }
 0x3cd   : > { %v10734_v56 = vadd.f32 %v10580_v63, %v6781_v17 }
 0x3ce   : > { %v6661_v6 = vpop.f32.mrf.mxu1 }
 0x3cf   : > { %v6852_v59 = vsub.f32 0.0, %v10734_v56 }
 0x3d0   : > { %v7850_v52 = vpop.f32.mrf.mxu1 }
 0x3d1   : > { %v6779_v28 = vld [vmem:[#allocation3 + $0xa0] sm:$0xff]  ;;  %v6782_v12 = vld [vmem:[#allocation3 + $0xb8] sm:$0xff]  ;;  %v6906_v30 = vmul.f32 1.442695, %v6852_v59  ;;  %v6719_v62 = vadd.f32 %v7850_v52, %v6393_v21 }
 0x3d2   : > { %v10738_v10 = vadd.f32 %v10580_v63, %v6779_v28  ;;  %v10742_v34 = vadd.f32 %v10580_v63, %v6782_v12  ;;  %v6780_v18 = vld [vmem:[#allocation3 + $0xa8] sm:$0xff]  ;;  %v6664_v48 = vpop.f32.mrf.mxu1 }
 0x3d3   : > { %7981 = vpow2.f32 %v6906_v30  ;;  %v10746_v0 = vadd.f32 %v10580_v63, %v6780_v18  ;;  %6751 = vst.msk [vmem:[#allocation3 + $0xd8] sm:$0xff] %vm214_vm10, %v6719_v62  ;;  %v6717_v11 = vadd.f32 %v6664_v48, %v6391_v14 }
 0x3d4   : > { %v6850_v58 = vsub.f32 0.0, %v10738_v10  ;;  %v6853_v13 = vsub.f32 0.0, %v10742_v34 }
 0x3d5   : > { %v6851_v20 = vsub.f32 0.0, %v10746_v0  ;;  %v7974_v60 = vpop.eup %7973  ;;  %6749 = vst.msk [vmem:[#allocation3 + $0xc8] sm:$0xff] %vm214_vm10, %v6717_v11 }
 0x3d6   : > { %v6902_v37 = vmul.f32 1.442695, %v6850_v58  ;;  %v6908_v27 = vmul.f32 1.442695, %v6853_v13  ;;  %v7008_v42 = vmul.f32 %v7974_v60, %v10703_v47  ;;  %v7976_v57 = vpop.eup %7975 }
 0x3d7   : > { %v6904_v36 = vmul.f32 1.442695, %v6851_v20  ;;  %v7006_v8 = vmul.f32 %v7976_v57, %v10707_v46  ;;  %v7978_v4 = vpop.eup %7977  ;;  %v6718_v46 = vadd.f32 %v7849_v15, %v6392_v25  ;;  %v6394_v57 = vld [vmem:[#allocation3 + $0xe0] sm:$0xff] }
 0x3d8   : > { %7983 = vpow2.f32 %v6902_v37  ;;  %v7637_v32 = vpack.c.bf16 %v7008_v42, %v7008_v42  ;;  %v7009_v39 = vmul.f32 %v7978_v4, %v10711_v35  ;;  %v7980_v7 = vpop.eup %7979  ;;  %v6716_v35 = vadd.f32 %v6661_v6, %v6390_v50 }
 0x3d9   : > { %7985 = vpow2.f32 %v6908_v27  ;;  %v7635_v23 = vpack.c.bf16 %v7006_v8, %v7006_v8  ;;  %v7007_v47 = vmul.f32 %v7980_v7, %v10715_v1  ;;  %6750 = vst.msk [vmem:[#allocation3 + $0xd0] sm:$0xff] %vm214_vm10, %v6718_v46 }
 0x3da   : > { %7987 = vpow2.f32 %v6904_v36  ;;  %7169 = vst.msk [vmem:[%s10644_s5 + $0x48] sm:$0xf] %vm7150_vm11, %v7637_v32  ;;  %v7638_v16 = vpack.c.bf16 %v7009_v39, %v7009_v39  ;;  %v6786_v44 = vld [vmem:[#allocation3 + $0xd8] sm:$0xff] }
 0x3db   : > { %7167 = vst.msk [vmem:[%s10644_s5 + $0x40] sm:$0xf] %vm7150_vm11, %v7635_v23  ;;  %v7636_v24 = vpack.c.bf16 %v7007_v47, %v7007_v47  ;;  %v10774_v61 = vadd.f32 %v10580_v63, %v6786_v44  ;;  %v6397_v23 = vld [vmem:[#allocation3 + $0xf8] sm:$0xff]  ;;  %v6395_v47 = vld [vmem:[#allocation3 + $0xe8] sm:$0xff] }
 0x3dc   : > { %7170 = vst.msk [vmem:[%s10644_s5 + $0x4c] sm:$0xf] %vm7150_vm11, %v7638_v16  ;;  %v6784_v2 = vld [vmem:[#allocation3 + $0xc8] sm:$0xff] }
 0x3dd   : > { %7168 = vst.msk [vmem:[%s10644_s5 + $0x44] sm:$0xf] %vm7150_vm11, %v7636_v24  ;;  %v6857_v45 = vsub.f32 0.0, %v10774_v61  ;;  %v10778_v38 = vadd.f32 %v10580_v63, %v6784_v2 }
 0x3de   : > { %6748 = vst.msk [vmem:[#allocation3 + $0xc0] sm:$0xff] %vm214_vm10, %v6716_v35 }
 0x3df   : > { %v6916_v33 = vmul.f32 1.442695, %v6857_v45  ;;  %v6855_v28 = vsub.f32 0.0, %v10778_v38 }
 0x3e0   : > { %v7982_v19 = vpop.eup %7981  ;;  %v6785_v29 = vld [vmem:[#allocation3 + $0xd0] sm:$0xff] }
 0x3e1   : > { %v6948_v9 = vadd.f32 1.0, %v7982_v19  ;;  %v10766_v43 = vadd.f32 %v10580_v63, %v6785_v29  ;;  %v6912_v58 = vmul.f32 1.442695, %v6855_v28 }
 0x3e3   : > { %7989 = vrcp.f32 %v6948_v9  ;;  %v6856_v55 = vsub.f32 0.0, %v10766_v43 }
 0x3e5   : > { %v7984_v53 = vpop.eup %7983  ;;  %v6783_v26 = vld [vmem:[#allocation3 + $0xc0] sm:$0xff]  ;;  %v6914_v40 = vmul.f32 1.442695, %v6856_v55 }
 0x3e6   : > { %v6946_v1 = vadd.f32 1.0, %v7984_v53  ;;  %v7986_v3 = vpop.eup %7985  ;;  %v10770_v51 = vadd.f32 %v10580_v63, %v6783_v26 }
 0x3e7   : > { %v6949_v22 = vadd.f32 1.0, %v7986_v3  ;;  %v7988_v54 = vpop.eup %7987 }
 0x3e8   : > { %7991 = vrcp.f32 %v6946_v1  ;;  %v6947_v49 = vadd.f32 1.0, %v7988_v54  ;;  %v6854_v41 = vsub.f32 0.0, %v10770_v51 }
 0x3e9   : > { %7993 = vrcp.f32 %v6949_v22 }
 0x3ea   : > { %7995 = vrcp.f32 %v6947_v49  ;;  %v6910_v5 = vmul.f32 1.442695, %v6854_v41 }
 0x3eb   : > { %7997 = vpow2.f32 %v6914_v40 }
 0x3ec   : > { %7999 = vpow2.f32 %v6910_v5 }
 0x3ed   : > { %8001 = vpow2.f32 %v6916_v33  ;;  %v7853_v42 = vpop.f32.mrf.mxu1 }
 0x3ee   : > { %8003 = vpow2.f32 %v6912_v58 }
 0x3ef   : > { %v6677_v32 = vpop.f32.mrf.mxu1 }
 0x3f0   : > { %v7990_v31 = vpop.eup %7989 }
 0x3f1   : > { %v7012_v17 = vmul.f32 %v7990_v31, %v10734_v56  ;;  %v7854_v39 = vpop.f32.mrf.mxu1 }
 0x3f3   : > { %v7641_v12 = vpack.c.bf16 %v7012_v17, %v7012_v17  ;;  %v6680_v25 = vpop.f32.mrf.mxu1 }
 0x3f4   : > { %v6721_v24 = vadd.f32 %v6680_v25, %v6395_v47 }
 0x3f5   : > { %v7992_v59 = vpop.eup %7991  ;;  %7173 = vst.msk [vmem:[%s10644_s5 + $0x58] sm:$0xf] %vm7150_vm11, %v7641_v12 }
 0x3f6   : > { %v7010_v30 = vmul.f32 %v7992_v59, %v10738_v10  ;;  %v7994_v18 = vpop.eup %7993  ;;  %v6396_v10 = vld [vmem:[#allocation3 + $0xf0] sm:$0xff]  ;;  %6753 = vst.msk [vmem:[#allocation3 + $0xe8] sm:$0xff] %vm214_vm10, %v6721_v24 }
 0x3f7   : > { %v7013_v13 = vmul.f32 %v7994_v18, %v10742_v34  ;;  %v7996_v56 = vpop.eup %7995  ;;  %v6722_v36 = vadd.f32 %v7853_v42, %v6396_v10  ;;  %v6720_v34 = vadd.f32 %v6677_v32, %v6394_v57 }
 0x3f8   : > { %v7639_v37 = vpack.c.bf16 %v7010_v30, %v7010_v30  ;;  %v7011_v20 = vmul.f32 %v7996_v56, %v10746_v0  ;;  %v7998_v8 = vpop.eup %7997  ;;  %v6723_v0 = vadd.f32 %v7854_v39, %v6397_v23 }
 0x3f9   : > { %v7642_v27 = vpack.c.bf16 %v7013_v13, %v7013_v13  ;;  %6754 = vst.msk [vmem:[#allocation3 + $0xf0] sm:$0xff] %vm214_vm10, %v6722_v36  ;;  %v6952_v4 = vadd.f32 1.0, %v7998_v8  ;;  %v8000_v7 = vpop.eup %7999  ;;  %6752 = vst.msk [vmem:[#allocation3 + $0xe0] sm:$0xff] %vm214_vm10, %v6720_v34 }
 0x3fa   : > { %7171 = vst.msk [vmem:[%s10644_s5 + $0x50] sm:$0xf] %vm7150_vm11, %v7639_v37  ;;  %v7640_v60 = vpack.c.bf16 %v7011_v20, %v7011_v20  ;;  %v6950_v16 = vadd.f32 1.0, %v8000_v7  ;;  %v8002_v15 = vpop.eup %8001 }
 0x3fb   : > { %7174 = vst.msk [vmem:[%s10644_s5 + $0x5c] sm:$0xf] %vm7150_vm11, %v7642_v27  ;;  %8005 = vrcp.f32 %v6952_v4  ;;  %v6953_v46 = vadd.f32 1.0, %v8002_v15  ;;  %v8004_v19 = vpop.eup %8003 }
 0x3fc   : > { %7172 = vst.msk [vmem:[%s10644_s5 + $0x54] sm:$0xf] %vm7150_vm11, %v7640_v60  ;;  %8007 = vrcp.f32 %v6950_v16  ;;  %v6951_v50 = vadd.f32 1.0, %v8004_v19 }
 0x3fd   : > { %6755 = vst.msk [vmem:[#allocation3 + $0xf8] sm:$0xff] %vm214_vm10, %v6723_v0  ;;  %8009 = vrcp.f32 %v6953_v46  ;;  %v6788_v14 = vld [vmem:[#allocation3 + $0xe8] sm:$0xff] }
 0x3fe   : > { %8011 = vrcp.f32 %v6951_v50  ;;  %v6827_v11 = vadd.f32 %v10580_v63, %v6788_v14 }
 0x400   : > { %v6789_v6 = vld [vmem:[#allocation3 + $0xf0] sm:$0xff]  ;;  %v6787_v35 = vld [vmem:[#allocation3 + $0xe0] sm:$0xff]  ;;  %v6859_v29 = vsub.f32 0.0, %v6827_v11 }
 0x401   : > { %v6828_v9 = vadd.f32 %v10580_v63, %v6789_v6  ;;  %v6826_v21 = vadd.f32 %v10580_v63, %v6787_v35 }
 0x402   : > { %v6920_v44 = vmul.f32 1.442695, %v6859_v29 }
 0x403   : > { %v6860_v53 = vsub.f32 0.0, %v6828_v9  ;;  %v6858_v62 = vsub.f32 0.0, %v6826_v21 }
 0x404   : > { %v6790_v52 = vld [vmem:[#allocation3 + $0xf8] sm:$0xff] }
 0x405   : > { %v6922_v1 = vmul.f32 1.442695, %v6860_v53  ;;  %v6829_v3 = vadd.f32 %v10580_v63, %v6790_v52  ;;  %v6918_v48 = vmul.f32 1.442695, %v6858_v62 }
 0x407   : > { %8013 = vpow2.f32 %v6922_v1  ;;  %v6861_v22 = vsub.f32 0.0, %v6829_v3 }
 0x408   : > { %v8006_v54 = vpop.eup %8005  ;;  %8015 = vpow2.f32 %v6918_v48 }
 0x409   : > { %v6924_v49 = vmul.f32 1.442695, %v6861_v22  ;;  %v7016_v26 = vmul.f32 %v8006_v54, %v10766_v43  ;;  %v8008_v55 = vpop.eup %8007 }
 0x40a   : > { %v7014_v41 = vmul.f32 %v8008_v55, %v10770_v51  ;;  %v8010_v2 = vpop.eup %8009 }
 0x40b   : > { %8017 = vpow2.f32 %v6924_v49  ;;  %v7645_v40 = vpack.c.bf16 %v7016_v26, %v7016_v26  ;;  %v7017_v5 = vmul.f32 %v8010_v2, %v10774_v61  ;;  %v8012_v45 = vpop.eup %8011 }
 0x40c   : > { %8019 = vpow2.f32 %v6920_v44  ;;  %v7643_v63 = vpack.c.bf16 %v7014_v41, %v7014_v41  ;;  %v7015_v43 = vmul.f32 %v8012_v45, %v10778_v38 }
 0x40d   : > { %7177 = vst.msk [vmem:[%s10644_s5 + $0x68] sm:$0xf] %vm7150_vm11, %v7645_v40  ;;  %v7646_v31 = vpack.c.bf16 %v7017_v5, %v7017_v5 }
 0x40e   : > { %7175 = vst.msk [vmem:[%s10644_s5 + $0x60] sm:$0xf] %vm7150_vm11, %v7643_v63  ;;  %v7644_v17 = vpack.c.bf16 %v7015_v43, %v7015_v43 }
 0x40f   : > { %7178 = vst.msk [vmem:[%s10644_s5 + $0x6c] sm:$0xf] %vm7150_vm11, %v7646_v31 }
 0x410   : > { %7176 = vst.msk [vmem:[%s10644_s5 + $0x64] sm:$0xf] %vm7150_vm11, %v7644_v17 }
 0x414   : > { %v8014_v33 = vpop.eup %8013 }
 0x415   : > { %v6956_v51 = vadd.f32 1.0, %v8014_v33  ;;  %v8016_v28 = vpop.eup %8015 }
 0x416   : > { %v6954_v59 = vadd.f32 1.0, %v8016_v28 }
 0x417   : > { %8021 = vrcp.f32 %v6956_v51 }
 0x418   : > { %v8018_v12 = vpop.eup %8017  ;;  %8023 = vrcp.f32 %v6954_v59 }
 0x419   : > { %v6957_v61 = vadd.f32 1.0, %v8018_v12  ;;  %v8020_v30 = vpop.eup %8019 }
 0x41a   : > { %v6955_v58 = vadd.f32 1.0, %v8020_v30 }
 0x41b   : > { %8025 = vrcp.f32 %v6957_v61 }
 0x41c   : > { %8027 = vrcp.f32 %v6955_v58 }
 0x424   : > { %v8022_v38 = vpop.eup %8021 }
 0x425   : > { %v7020_v18 = vmul.f32 %v8022_v38, %v6828_v9  ;;  %v8024_v37 = vpop.eup %8023 }
 0x426   : > { %v7018_v56 = vmul.f32 %v8024_v37, %v6826_v21 }
 0x427   : > { %v7649_v13 = vpack.c.bf16 %v7020_v18, %v7020_v18 }
 0x428   : > { %v8026_v27 = vpop.eup %8025  ;;  %v7647_v20 = vpack.c.bf16 %v7018_v56, %v7018_v56 }
 0x429   : > { %7181 = vst.msk [vmem:[%s10644_s5 + $0x78] sm:$0xf] %vm7150_vm11, %v7649_v13  ;;  %v7021_v60 = vmul.f32 %v8026_v27, %v6829_v3  ;;  %v8028_v10 = vpop.eup %8027 }
 0x42a   : > { %7179 = vst.msk [vmem:[%s10644_s5 + $0x70] sm:$0xf] %vm7150_vm11, %v7647_v20  ;;  %v7019_v36 = vmul.f32 %v8028_v10, %v6827_v11 }
 0x42b   : > { %v7650_v42 = vpack.c.bf16 %v7021_v60, %v7021_v60 }
 0x42c   : > { %v7648_v57 = vpack.c.bf16 %v7019_v36, %v7019_v36 }
 0x42d   : > { %7182 = vst.msk [vmem:[%s10644_s5 + $0x7c] sm:$0xf] %vm7150_vm11, %v7650_v42 }
 0x42e   : > { %7180 = vst.msk [vmem:[%s10644_s5 + $0x74] sm:$0xf] %vm7150_vm11, %v7648_v57 }
 0x42f PF: > { %s13_s14 = sadd.s32 1, %s8051_s14   ;;  %s10962_s12 = smov %s8047_s13 }
 0x430   : > { %p10_p5 = scmp.ge.s32.totalorder %s13_s14, 4   ;;  %s10963_s13 = smov %s10965_s15 }
 0x432   :  { %12 = sbr.rel (!%p10_p5) target bundleno = 2 (0x2), region = 80 }

</bundles_post_ra>
